<compile_context>
chip_gen: v5e
topology: v5e:2x2
jax: 0.10.0
libtpu: 0.0.40
codegen_flags: <defaults>
</compile_context>

<pallas_src>
import jax
import jax.numpy as jnp
from jax import lax
from jax.experimental import pallas as pl
from jax.experimental.pallas import tpu as pltpu


_C = 1.0            # Poincare-ball curvature
_MIN_NORM = 1e-5    # hyptorch clamp_min
_PROJ_EPS = 1e-3    # hyptorch projection epsilon (float32)


# ---------------------------------------------------------------------------
# Hyperbolic math helpers (shared by the kernel body and the JAX reference).
# ---------------------------------------------------------------------------
def _norm_last(x):
    return jnp.sqrt(jnp.sum(x * x, axis=-1, keepdims=True))


def _artanh(x):
    x = jnp.clip(x, -1.0 + 1e-5, 1.0 - 1e-5)
    return 0.5 * (jnp.log(1.0 + x) - jnp.log(1.0 - x))


def _project(x, c):
    sqrt_c = jnp.sqrt(c)
    norm = jnp.maximum(_norm_last(x), _MIN_NORM)
    maxnorm = (1.0 - _PROJ_EPS) / sqrt_c
    clipped = x / norm * maxnorm
    return jnp.where(norm > maxnorm, clipped, x)


def _expmap0(u, c):
    sqrt_c = jnp.sqrt(c)
    u_norm = jnp.maximum(_norm_last(u), _MIN_NORM)
    return jnp.tanh(sqrt_c * u_norm) * u / (sqrt_c * u_norm)


def _mobius_add(x, y, c):
    x2 = jnp.sum(x * x, axis=-1, keepdims=True)
    y2 = jnp.sum(y * y, axis=-1, keepdims=True)
    xy = jnp.sum(x * y, axis=-1, keepdims=True)
    num = (1.0 + 2.0 * c * xy + c * y2) * x + (1.0 - c * x2) * y
    denom = 1.0 + 2.0 * c * xy + (c * c) * x2 * y2
    return num / (denom + _MIN_NORM)


def _mobius_matvec(w, x, c):
    """x: (R, Din), w: (Dout, Din) -> (R, Dout)  (Mobius matrix-vector product)."""
    sqrt_c = jnp.sqrt(c)
    x_norm = jnp.maximum(_norm_last(x), _MIN_NORM)
    # Contract x's feature dim with w's input dim directly (no w.T materialized).
    mx = lax.dot_general(x, w, (((1,), (1,)), ((), ())),
                         preferred_element_type=jnp.float32)
    mx_norm = jnp.maximum(_norm_last(mx), _MIN_NORM)
    res_c = (jnp.tanh(mx_norm / x_norm * _artanh(sqrt_c * x_norm))
             * mx / (mx_norm * sqrt_c))
    all_zero = jnp.sum(jnp.abs(mx), axis=-1, keepdims=True) == 0.0
    res = jnp.where(all_zero, jnp.zeros_like(res_c), res_c)
    return _project(res, c)


def _hyp_linear(x, w, b, c):
    """hyptorch HypLinear: project(mobius_add(mobius_matvec(w, x), expmap0(b)))."""
    mv = _mobius_matvec(w, x, c)
    bias = _expmap0(b, c)                      # b: (1, Dout) -> hyperbolic bias
    return _project(_mobius_add(mv, bias, c), c)


def _gelu_tanh(x):
    # TODO(synk): nn.GELU() defaults to the exact erf-based GELU; the tanh
    # approximation is used here (erf has no guaranteed Mosaic lowering).
    return 0.5 * x * (1.0 + jnp.tanh(0.7978845608028654
                                     * (x + 0.044715 * x * x * x)))


def _hyp_mlp_forward(x, w1, b1, w2, b2, w3, b3):
    """Shared math for kernel body and the pure-JAX reference.  x: (R, Din)."""
    h = _project(_expmap0(x, _C), _C)          # ToPoincare(c=1)
    h = _hyp_linear(h, w1, b1, _C)             # hypfc1
    h = _gelu_tanh(h)
    # TODO(synk): nn.Dropout(p=0.05) treated as identity (eval mode).
    h = _hyp_linear(h, w2, b2, _C)             # hypfc2
    h = _gelu_tanh(h)
    h = _hyp_linear(h, w3, b3, _C)             # hypfc3
    return h


# ---------------------------------------------------------------------------
# Pallas kernel + wrapper
# ---------------------------------------------------------------------------
def _hyp_mlp_kernel(x_ref, w1_ref, b1_ref, w2_ref, b2_ref, w3_ref, b3_ref,
                    o_ref):
    o_ref[...] = _hyp_mlp_forward(
        x_ref[...],
        w1_ref[...], b1_ref[...],
        w2_ref[...], b2_ref[...],
        w3_ref[...], b3_ref[...])


def hyp_mlp(x, params, *, row_tile=128):
    """x: (..., input_dim) float32.

    params = (w1, b1, w2, b2, w3, b3) with w*: (out, in), b*: (1, out).
    """
    w1, b1, w2, b2, w3, b3 = params
    din = w1.shape[1]
    dout = w3.shape[0]

    lead = x.shape[:-1]
    rows = 1
    for d in lead:
        rows *= d
    x2 = x.reshape(rows, din)

    # Pick a row tile: a divisor of the row count that is a multiple of 8
    # (sublane) unless it covers all rows.
    rt = min(row_tile, rows)
    while rows % rt != 0 or (rt % 8 != 0 and rt != rows):
        rt -= 1
    grid = (rows // rt,)

    full = lambda a: pl.BlockSpec(a.shape, lambda i: tuple(0 for _ in a.shape))

    out = pl.pallas_call(
        _hyp_mlp_kernel,
        out_shape=jax.ShapeDtypeStruct((rows, dout), jnp.float32),
        grid_spec=pltpu.PrefetchScalarGridSpec(
            num_scalar_prefetch=0,
            grid=grid,
            in_specs=[
                pl.BlockSpec((rt, din), lambda i: (i, 0)),   # row tile of tokens
                full(w1), full(b1),                          # resident weights
                full(w2), full(b2),
                full(w3), full(b3),
            ],
            out_specs=pl.BlockSpec((rt, dout), lambda i: (i, 0)),
        ),
        compiler_params=pltpu.CompilerParams(
            dimension_semantics=("parallel",)),  # independent row tiles
    )(x2, w1, b1, w2, b2, w3, b3)

    return out.reshape(*lead, dout)


def reference_forward(x, params):
    """Pure-JAX reference mirroring the PyTorch HypMlp forward (eval mode)."""
    w1, b1, w2, b2, w3, b3 = params
    lead = x.shape[:-1]
    x2 = x.reshape(-1, x.shape[-1])
    out = _hyp_mlp_forward(x2, w1, b1, w2, b2, w3, b3)
    return out.reshape(*lead, w3.shape[0])


if __name__ == "__main__":
    # Small config: input_dim = 32, output_dim = 16, batch = 2, seq = 64.
    B, N = 2, 64
    DIN, DOUT = 32, 16

    key = jax.random.PRNGKey(0)
    ks = jax.random.split(key, 7)

    x = jax.random.normal(ks[0], (B, N, DIN), dtype=jnp.float32)

    s = 0.1
    w1 = s * jax.random.normal(ks[1], (DIN, DIN), dtype=jnp.float32)
    b1 = s * jax.random.normal(ks[2], (1, DIN), dtype=jnp.float32)
    w2 = s * jax.random.normal(ks[3], (DIN, DIN), dtype=jnp.float32)
    b2 = s * jax.random.normal(ks[4], (1, DIN), dtype=jnp.float32)
    w3 = s * jax.random.normal(ks[5], (DOUT, DIN), dtype=jnp.float32)
    b3 = s * jax.random.normal(ks[6], (1, DOUT), dtype=jnp.float32)

    params = (w1, b1, w2, b2, w3, b3)

    out = jax.block_until_ready(hyp_mlp(x, params, row_tile=64))
    ref = jax.block_until_ready(reference_forward(x, params))

    assert out.shape == (B, N, DOUT), out.shape
    max_err = float(jnp.max(jnp.abs(out - ref)))
    assert jnp.allclose(out, ref, rtol=1e-4, atol=1e-4), max_err

    print("KERNEL_OK")
</pallas_src>

<mosaic_0001>
module attributes {stable_mosaic.version = 11 : i64} {
  func.func @_hyp_mlp_kernel(%arg0: i32, %arg1: memref<64x32xf32, #tpu.memory_space<vmem>>, %arg2: memref<32x32xf32, #tpu.memory_space<vmem>>, %arg3: memref<1x32xf32, #tpu.memory_space<vmem>>, %arg4: memref<32x32xf32, #tpu.memory_space<vmem>>, %arg5: memref<1x32xf32, #tpu.memory_space<vmem>>, %arg6: memref<16x32xf32, #tpu.memory_space<vmem>>, %arg7: memref<1x16xf32, #tpu.memory_space<vmem>>, %arg8: memref<64x16xf32, #tpu.memory_space<vmem>>) attributes {dimension_semantics = [#tpu.dimension_semantics<parallel>], iteration_bounds = array<i64: 2>, scalar_prefetch = 0 : i64, scratch_operands = 0 : i64, tpu.core_type = #tpu.core_type<tc>, window_params = [{transform_indices = @transform_0, window_bounds = array<i64: 64, 32>}, {pipeline_mode = #tpu.pipeline_mode<synchronous>, transform_indices = @transform_1, window_bounds = array<i64: 32, 32>}, {pipeline_mode = #tpu.pipeline_mode<synchronous>, transform_indices = @transform_2, window_bounds = array<i64: 1, 32>}, {pipeline_mode = #tpu.pipeline_mode<synchronous>, transform_indices = @transform_3, window_bounds = array<i64: 32, 32>}, {pipeline_mode = #tpu.pipeline_mode<synchronous>, transform_indices = @transform_4, window_bounds = array<i64: 1, 32>}, {pipeline_mode = #tpu.pipeline_mode<synchronous>, transform_indices = @transform_5, window_bounds = array<i64: 16, 32>}, {pipeline_mode = #tpu.pipeline_mode<synchronous>, transform_indices = @transform_6, window_bounds = array<i64: 1, 16>}, {transform_indices = @transform_7, window_bounds = array<i64: 64, 16>}]} {
    %c0 = arith.constant 0 : index
    %c0_0 = arith.constant 0 : index
    %0 = vector.load %arg1[%c0, %c0_0] : memref<64x32xf32, #tpu.memory_space<vmem>>, vector<64x32xf32>
    %c0_1 = arith.constant 0 : index
    %c0_2 = arith.constant 0 : index
    %1 = vector.load %arg2[%c0_1, %c0_2] : memref<32x32xf32, #tpu.memory_space<vmem>>, vector<32x32xf32>
    %c0_3 = arith.constant 0 : index
    %c0_4 = arith.constant 0 : index
    %2 = vector.load %arg3[%c0_3, %c0_4] : memref<1x32xf32, #tpu.memory_space<vmem>>, vector<1x32xf32>
    %c0_5 = arith.constant 0 : index
    %c0_6 = arith.constant 0 : index
    %3 = vector.load %arg4[%c0_5, %c0_6] : memref<32x32xf32, #tpu.memory_space<vmem>>, vector<32x32xf32>
    %c0_7 = arith.constant 0 : index
    %c0_8 = arith.constant 0 : index
    %4 = vector.load %arg5[%c0_7, %c0_8] : memref<1x32xf32, #tpu.memory_space<vmem>>, vector<1x32xf32>
    %c0_9 = arith.constant 0 : index
    %c0_10 = arith.constant 0 : index
    %5 = vector.load %arg6[%c0_9, %c0_10] : memref<16x32xf32, #tpu.memory_space<vmem>>, vector<16x32xf32>
    %c0_11 = arith.constant 0 : index
    %c0_12 = arith.constant 0 : index
    %6 = vector.load %arg7[%c0_11, %c0_12] : memref<1x16xf32, #tpu.memory_space<vmem>>, vector<1x16xf32>
    %cst = arith.constant 1.000000e+00 : f32
    %7 = math.sqrt %cst : f32
    %8 = arith.mulf %0, %0 : vector<64x32xf32>
    %cst_13 = arith.constant dense<0.000000e+00> : vector<64xf32>
    %9 = vector.multi_reduction <add>, %8, %cst_13 [1] : vector<64x32xf32> to vector<64xf32>
    %10 = vector.shape_cast %9 : vector<64xf32> to vector<64x1xf32>
    %11 = math.sqrt %10 : vector<64x1xf32>
    %cst_14 = arith.constant 9.99999974E-6 : f32
    %12 = vector.broadcast %cst_14 : f32 to vector<64x1xf32>
    %13 = arith.maximumf %11, %12 : vector<64x1xf32>
    %14 = vector.broadcast %7 : f32 to vector<64x1xf32>
    %15 = arith.mulf %14, %13 : vector<64x1xf32>
    %16 = math.tanh %15 : vector<64x1xf32>
    %17 = vector.broadcast %16 : vector<64x1xf32> to vector<64x32xf32>
    %18 = arith.mulf %17, %0 : vector<64x32xf32>
    %19 = vector.broadcast %7 : f32 to vector<64x1xf32>
    %20 = arith.mulf %19, %13 : vector<64x1xf32>
    %21 = vector.broadcast %20 : vector<64x1xf32> to vector<64x32xf32>
    %22 = arith.divf %18, %21 : vector<64x32xf32>
    %cst_15 = arith.constant 1.000000e+00 : f32
    %23 = math.sqrt %cst_15 : f32
    %24 = arith.mulf %22, %22 : vector<64x32xf32>
    %cst_16 = arith.constant dense<0.000000e+00> : vector<64xf32>
    %25 = vector.multi_reduction <add>, %24, %cst_16 [1] : vector<64x32xf32> to vector<64xf32>
    %26 = vector.shape_cast %25 : vector<64xf32> to vector<64x1xf32>
    %27 = math.sqrt %26 : vector<64x1xf32>
    %cst_17 = arith.constant 9.99999974E-6 : f32
    %28 = vector.broadcast %cst_17 : f32 to vector<64x1xf32>
    %29 = arith.maximumf %27, %28 : vector<64x1xf32>
    %cst_18 = arith.constant 9.990000e-01 : f32
    %30 = arith.divf %cst_18, %23 : f32
    %31 = vector.broadcast %29 : vector<64x1xf32> to vector<64x32xf32>
    %32 = arith.divf %22, %31 : vector<64x32xf32>
    %33 = vector.broadcast %30 : f32 to vector<64x32xf32>
    %34 = arith.mulf %32, %33 : vector<64x32xf32>
    %35 = vector.broadcast %30 : f32 to vector<64x1xf32>
    %36 = arith.cmpf ogt, %29, %35 : vector<64x1xf32>
    %37 = vector.shape_cast %36 : vector<64x1xi1> to vector<64x1xi1>
    %38 = vector.broadcast %37 : vector<64x1xi1> to vector<64x32xi1>
    %39 = arith.select %38, %34, %22 : vector<64x32xi1>, vector<64x32xf32>
    %cst_19 = arith.constant 1.000000e+00 : f32
    %40 = math.sqrt %cst_19 : f32
    %41 = arith.mulf %39, %39 : vector<64x32xf32>
    %cst_20 = arith.constant dense<0.000000e+00> : vector<64xf32>
    %42 = vector.multi_reduction <add>, %41, %cst_20 [1] : vector<64x32xf32> to vector<64xf32>
    %43 = vector.shape_cast %42 : vector<64xf32> to vector<64x1xf32>
    %44 = math.sqrt %43 : vector<64x1xf32>
    %cst_21 = arith.constant 9.99999974E-6 : f32
    %45 = vector.broadcast %cst_21 : f32 to vector<64x1xf32>
    %46 = arith.maximumf %44, %45 : vector<64x1xf32>
    %cst_22 = arith.constant dense<0.000000e+00> : vector<64x32xf32>
    %47 = tpu.matmul %39, %1, %cst_22 {dimension_numbers = #tpu.dot_dimension_numbers<[1], [1], [0], [0], [0, 0, 1, 0], [], []>} : vector<64x32xf32>, vector<32x32xf32>, vector<64x32xf32> -> vector<64x32xf32>
    %48 = arith.mulf %47, %47 : vector<64x32xf32>
    %cst_23 = arith.constant dense<0.000000e+00> : vector<64xf32>
    %49 = vector.multi_reduction <add>, %48, %cst_23 [1] : vector<64x32xf32> to vector<64xf32>
    %50 = vector.shape_cast %49 : vector<64xf32> to vector<64x1xf32>
    %51 = math.sqrt %50 : vector<64x1xf32>
    %cst_24 = arith.constant 9.99999974E-6 : f32
    %52 = vector.broadcast %cst_24 : f32 to vector<64x1xf32>
    %53 = arith.maximumf %51, %52 : vector<64x1xf32>
    %54 = arith.divf %53, %46 : vector<64x1xf32>
    %55 = vector.broadcast %40 : f32 to vector<64x1xf32>
    %56 = arith.mulf %55, %46 : vector<64x1xf32>
    %cst_25 = arith.constant -0.999989986 : f32
    %cst_26 = arith.constant 0.999989986 : f32
    %57 = vector.broadcast %cst_25 : f32 to vector<64x1xf32>
    %58 = arith.maximumf %57, %56 : vector<64x1xf32>
    %59 = vector.broadcast %cst_26 : f32 to vector<64x1xf32>
    %60 = arith.minimumf %59, %58 : vector<64x1xf32>
    %cst_27 = arith.constant 1.000000e+00 : f32
    %61 = vector.broadcast %cst_27 : f32 to vector<64x1xf32>
    %62 = arith.addf %61, %60 : vector<64x1xf32>
    %63 = math.log %62 : vector<64x1xf32>
    %cst_28 = arith.constant 1.000000e+00 : f32
    %64 = vector.broadcast %cst_28 : f32 to vector<64x1xf32>
    %65 = arith.subf %64, %60 : vector<64x1xf32>
    %66 = math.log %65 : vector<64x1xf32>
    %67 = arith.subf %63, %66 : vector<64x1xf32>
    %cst_29 = arith.constant 5.000000e-01 : f32
    %68 = vector.broadcast %cst_29 : f32 to vector<64x1xf32>
    %69 = arith.mulf %68, %67 : vector<64x1xf32>
    %70 = arith.mulf %54, %69 : vector<64x1xf32>
    %71 = math.tanh %70 : vector<64x1xf32>
    %72 = vector.broadcast %71 : vector<64x1xf32> to vector<64x32xf32>
    %73 = arith.mulf %72, %47 : vector<64x32xf32>
    %74 = vector.broadcast %40 : f32 to vector<64x1xf32>
    %75 = arith.mulf %53, %74 : vector<64x1xf32>
    %76 = vector.broadcast %75 : vector<64x1xf32> to vector<64x32xf32>
    %77 = arith.divf %73, %76 : vector<64x32xf32>
    %78 = math.absf %47 : vector<64x32xf32>
    %cst_30 = arith.constant dense<0.000000e+00> : vector<64xf32>
    %79 = vector.multi_reduction <add>, %78, %cst_30 [1] : vector<64x32xf32> to vector<64xf32>
    %80 = vector.shape_cast %79 : vector<64xf32> to vector<64x1xf32>
    %cst_31 = arith.constant 0.000000e+00 : f32
    %81 = vector.broadcast %cst_31 : f32 to vector<64x1xf32>
    %82 = arith.cmpf oeq, %80, %81 : vector<64x1xf32>
    %cst_32 = arith.constant 0.000000e+00 : f32
    %83 = vector.broadcast %cst_32 : f32 to vector<64x32xf32>
    %84 = vector.shape_cast %82 : vector<64x1xi1> to vector<64x1xi1>
    %85 = vector.broadcast %84 : vector<64x1xi1> to vector<64x32xi1>
    %86 = arith.select %85, %83, %77 : vector<64x32xi1>, vector<64x32xf32>
    %cst_33 = arith.constant 1.000000e+00 : f32
    %87 = math.sqrt %cst_33 : f32
    %88 = arith.mulf %86, %86 : vector<64x32xf32>
    %cst_34 = arith.constant dense<0.000000e+00> : vector<64xf32>
    %89 = vector.multi_reduction <add>, %88, %cst_34 [1] : vector<64x32xf32> to vector<64xf32>
    %90 = vector.shape_cast %89 : vector<64xf32> to vector<64x1xf32>
    %91 = math.sqrt %90 : vector<64x1xf32>
    %cst_35 = arith.constant 9.99999974E-6 : f32
    %92 = vector.broadcast %cst_35 : f32 to vector<64x1xf32>
    %93 = arith.maximumf %91, %92 : vector<64x1xf32>
    %cst_36 = arith.constant 9.990000e-01 : f32
    %94 = arith.divf %cst_36, %87 : f32
    %95 = vector.broadcast %93 : vector<64x1xf32> to vector<64x32xf32>
    %96 = arith.divf %86, %95 : vector<64x32xf32>
    %97 = vector.broadcast %94 : f32 to vector<64x32xf32>
    %98 = arith.mulf %96, %97 : vector<64x32xf32>
    %99 = vector.broadcast %94 : f32 to vector<64x1xf32>
    %100 = arith.cmpf ogt, %93, %99 : vector<64x1xf32>
    %101 = vector.shape_cast %100 : vector<64x1xi1> to vector<64x1xi1>
    %102 = vector.broadcast %101 : vector<64x1xi1> to vector<64x32xi1>
    %103 = arith.select %102, %98, %86 : vector<64x32xi1>, vector<64x32xf32>
    %cst_37 = arith.constant 1.000000e+00 : f32
    %104 = math.sqrt %cst_37 : f32
    %105 = arith.mulf %2, %2 : vector<1x32xf32>
    %cst_38 = arith.constant dense<0.000000e+00> : vector<1xf32>
    %106 = vector.multi_reduction <add>, %105, %cst_38 [1] : vector<1x32xf32> to vector<1xf32>
    %107 = vector.shape_cast %106 : vector<1xf32> to vector<1x1xf32>
    %108 = math.sqrt %107 : vector<1x1xf32>
    %cst_39 = arith.constant 9.99999974E-6 : f32
    %109 = vector.broadcast %cst_39 : f32 to vector<1x1xf32>
    %110 = arith.maximumf %108, %109 : vector<1x1xf32>
    %111 = vector.broadcast %104 : f32 to vector<1x1xf32>
    %112 = arith.mulf %111, %110 : vector<1x1xf32>
    %113 = math.tanh %112 : vector<1x1xf32>
    %114 = vector.broadcast %113 : vector<1x1xf32> to vector<1x32xf32>
    %115 = arith.mulf %114, %2 : vector<1x32xf32>
    %116 = vector.broadcast %104 : f32 to vector<1x1xf32>
    %117 = arith.mulf %116, %110 : vector<1x1xf32>
    %118 = vector.broadcast %117 : vector<1x1xf32> to vector<1x32xf32>
    %119 = arith.divf %115, %118 : vector<1x32xf32>
    %120 = arith.mulf %103, %103 : vector<64x32xf32>
    %cst_40 = arith.constant dense<0.000000e+00> : vector<64xf32>
    %121 = vector.multi_reduction <add>, %120, %cst_40 [1] : vector<64x32xf32> to vector<64xf32>
    %122 = vector.shape_cast %121 : vector<64xf32> to vector<64x1xf32>
    %123 = arith.mulf %119, %119 : vector<1x32xf32>
    %cst_41 = arith.constant dense<0.000000e+00> : vector<1xf32>
    %124 = vector.multi_reduction <add>, %123, %cst_41 [1] : vector<1x32xf32> to vector<1xf32>
    %125 = vector.shape_cast %124 : vector<1xf32> to vector<1x1xf32>
    %126 = vector.broadcast %119 : vector<1x32xf32> to vector<64x32xf32>
    %127 = arith.mulf %103, %126 : vector<64x32xf32>
    %cst_42 = arith.constant dense<0.000000e+00> : vector<64xf32>
    %128 = vector.multi_reduction <add>, %127, %cst_42 [1] : vector<64x32xf32> to vector<64xf32>
    %129 = vector.shape_cast %128 : vector<64xf32> to vector<64x1xf32>
    %cst_43 = arith.constant 2.000000e+00 : f32
    %130 = vector.broadcast %cst_43 : f32 to vector<64x1xf32>
    %131 = arith.mulf %130, %129 : vector<64x1xf32>
    %cst_44 = arith.constant 1.000000e+00 : f32
    %132 = vector.broadcast %cst_44 : f32 to vector<64x1xf32>
    %133 = arith.addf %132, %131 : vector<64x1xf32>
    %cst_45 = arith.constant 1.000000e+00 : f32
    %134 = vector.broadcast %cst_45 : f32 to vector<1x1xf32>
    %135 = arith.mulf %134, %125 : vector<1x1xf32>
    %136 = vector.broadcast %135 : vector<1x1xf32> to vector<64x1xf32>
    %137 = arith.addf %133, %136 : vector<64x1xf32>
    %138 = vector.broadcast %137 : vector<64x1xf32> to vector<64x32xf32>
    %139 = arith.mulf %138, %103 : vector<64x32xf32>
    %cst_46 = arith.constant 1.000000e+00 : f32
    %140 = vector.broadcast %cst_46 : f32 to vector<64x1xf32>
    %141 = arith.mulf %140, %122 : vector<64x1xf32>
    %cst_47 = arith.constant 1.000000e+00 : f32
    %142 = vector.broadcast %cst_47 : f32 to vector<64x1xf32>
    %143 = arith.subf %142, %141 : vector<64x1xf32>
    %144 = vector.broadcast %143 : vector<64x1xf32> to vector<64x32xf32>
    %145 = vector.broadcast %119 : vector<1x32xf32> to vector<64x32xf32>
    %146 = arith.mulf %144, %145 : vector<64x32xf32>
    %147 = arith.addf %139, %146 : vector<64x32xf32>
    %cst_48 = arith.constant 2.000000e+00 : f32
    %148 = vector.broadcast %cst_48 : f32 to vector<64x1xf32>
    %149 = arith.mulf %148, %129 : vector<64x1xf32>
    %cst_49 = arith.constant 1.000000e+00 : f32
    %150 = vector.broadcast %cst_49 : f32 to vector<64x1xf32>
    %151 = arith.addf %150, %149 : vector<64x1xf32>
    %cst_50 = arith.constant 1.000000e+00 : f32
    %152 = vector.broadcast %cst_50 : f32 to vector<64x1xf32>
    %153 = arith.mulf %152, %122 : vector<64x1xf32>
    %154 = vector.broadcast %125 : vector<1x1xf32> to vector<64x1xf32>
    %155 = arith.mulf %153, %154 : vector<64x1xf32>
    %156 = arith.addf %151, %155 : vector<64x1xf32>
    %cst_51 = arith.constant 9.99999974E-6 : f32
    %157 = vector.broadcast %cst_51 : f32 to vector<64x1xf32>
    %158 = arith.addf %156, %157 : vector<64x1xf32>
    %159 = vector.broadcast %158 : vector<64x1xf32> to vector<64x32xf32>
    %160 = arith.divf %147, %159 : vector<64x32xf32>
    %cst_52 = arith.constant 1.000000e+00 : f32
    %161 = math.sqrt %cst_52 : f32
    %162 = arith.mulf %160, %160 : vector<64x32xf32>
    %cst_53 = arith.constant dense<0.000000e+00> : vector<64xf32>
    %163 = vector.multi_reduction <add>, %162, %cst_53 [1] : vector<64x32xf32> to vector<64xf32>
    %164 = vector.shape_cast %163 : vector<64xf32> to vector<64x1xf32>
    %165 = math.sqrt %164 : vector<64x1xf32>
    %cst_54 = arith.constant 9.99999974E-6 : f32
    %166 = vector.broadcast %cst_54 : f32 to vector<64x1xf32>
    %167 = arith.maximumf %165, %166 : vector<64x1xf32>
    %cst_55 = arith.constant 9.990000e-01 : f32
    %168 = arith.divf %cst_55, %161 : f32
    %169 = vector.broadcast %167 : vector<64x1xf32> to vector<64x32xf32>
    %170 = arith.divf %160, %169 : vector<64x32xf32>
    %171 = vector.broadcast %168 : f32 to vector<64x32xf32>
    %172 = arith.mulf %170, %171 : vector<64x32xf32>
    %173 = vector.broadcast %168 : f32 to vector<64x1xf32>
    %174 = arith.cmpf ogt, %167, %173 : vector<64x1xf32>
    %175 = vector.shape_cast %174 : vector<64x1xi1> to vector<64x1xi1>
    %176 = vector.broadcast %175 : vector<64x1xi1> to vector<64x32xi1>
    %177 = arith.select %176, %172, %160 : vector<64x32xi1>, vector<64x32xf32>
    %cst_56 = arith.constant 5.000000e-01 : f32
    %178 = vector.broadcast %cst_56 : f32 to vector<64x32xf32>
    %179 = arith.mulf %178, %177 : vector<64x32xf32>
    %cst_57 = arith.constant 4.471500e-02 : f32
    %180 = vector.broadcast %cst_57 : f32 to vector<64x32xf32>
    %181 = arith.mulf %180, %177 : vector<64x32xf32>
    %182 = arith.mulf %181, %177 : vector<64x32xf32>
    %183 = arith.mulf %182, %177 : vector<64x32xf32>
    %184 = arith.addf %177, %183 : vector<64x32xf32>
    %cst_58 = arith.constant 0.797884583 : f32
    %185 = vector.broadcast %cst_58 : f32 to vector<64x32xf32>
    %186 = arith.mulf %185, %184 : vector<64x32xf32>
    %187 = math.tanh %186 : vector<64x32xf32>
    %cst_59 = arith.constant 1.000000e+00 : f32
    %188 = vector.broadcast %cst_59 : f32 to vector<64x32xf32>
    %189 = arith.addf %188, %187 : vector<64x32xf32>
    %190 = arith.mulf %179, %189 : vector<64x32xf32>
    %cst_60 = arith.constant 1.000000e+00 : f32
    %191 = math.sqrt %cst_60 : f32
    %192 = arith.mulf %190, %190 : vector<64x32xf32>
    %cst_61 = arith.constant dense<0.000000e+00> : vector<64xf32>
    %193 = vector.multi_reduction <add>, %192, %cst_61 [1] : vector<64x32xf32> to vector<64xf32>
    %194 = vector.shape_cast %193 : vector<64xf32> to vector<64x1xf32>
    %195 = math.sqrt %194 : vector<64x1xf32>
    %cst_62 = arith.constant 9.99999974E-6 : f32
    %196 = vector.broadcast %cst_62 : f32 to vector<64x1xf32>
    %197 = arith.maximumf %195, %196 : vector<64x1xf32>
    %cst_63 = arith.constant dense<0.000000e+00> : vector<64x32xf32>
    %198 = tpu.matmul %190, %3, %cst_63 {dimension_numbers = #tpu.dot_dimension_numbers<[1], [1], [0], [0], [0, 0, 1, 0], [], []>} : vector<64x32xf32>, vector<32x32xf32>, vector<64x32xf32> -> vector<64x32xf32>
    %199 = arith.mulf %198, %198 : vector<64x32xf32>
    %cst_64 = arith.constant dense<0.000000e+00> : vector<64xf32>
    %200 = vector.multi_reduction <add>, %199, %cst_64 [1] : vector<64x32xf32> to vector<64xf32>
    %201 = vector.shape_cast %200 : vector<64xf32> to vector<64x1xf32>
    %202 = math.sqrt %201 : vector<64x1xf32>
    %cst_65 = arith.constant 9.99999974E-6 : f32
    %203 = vector.broadcast %cst_65 : f32 to vector<64x1xf32>
    %204 = arith.maximumf %202, %203 : vector<64x1xf32>
    %205 = arith.divf %204, %197 : vector<64x1xf32>
    %206 = vector.broadcast %191 : f32 to vector<64x1xf32>
    %207 = arith.mulf %206, %197 : vector<64x1xf32>
    %cst_66 = arith.constant -0.999989986 : f32
    %cst_67 = arith.constant 0.999989986 : f32
    %208 = vector.broadcast %cst_66 : f32 to vector<64x1xf32>
    %209 = arith.maximumf %208, %207 : vector<64x1xf32>
    %210 = vector.broadcast %cst_67 : f32 to vector<64x1xf32>
    %211 = arith.minimumf %210, %209 : vector<64x1xf32>
    %cst_68 = arith.constant 1.000000e+00 : f32
    %212 = vector.broadcast %cst_68 : f32 to vector<64x1xf32>
    %213 = arith.addf %212, %211 : vector<64x1xf32>
    %214 = math.log %213 : vector<64x1xf32>
    %cst_69 = arith.constant 1.000000e+00 : f32
    %215 = vector.broadcast %cst_69 : f32 to vector<64x1xf32>
    %216 = arith.subf %215, %211 : vector<64x1xf32>
    %217 = math.log %216 : vector<64x1xf32>
    %218 = arith.subf %214, %217 : vector<64x1xf32>
    %cst_70 = arith.constant 5.000000e-01 : f32
    %219 = vector.broadcast %cst_70 : f32 to vector<64x1xf32>
    %220 = arith.mulf %219, %218 : vector<64x1xf32>
    %221 = arith.mulf %205, %220 : vector<64x1xf32>
    %222 = math.tanh %221 : vector<64x1xf32>
    %223 = vector.broadcast %222 : vector<64x1xf32> to vector<64x32xf32>
    %224 = arith.mulf %223, %198 : vector<64x32xf32>
    %225 = vector.broadcast %191 : f32 to vector<64x1xf32>
    %226 = arith.mulf %204, %225 : vector<64x1xf32>
    %227 = vector.broadcast %226 : vector<64x1xf32> to vector<64x32xf32>
    %228 = arith.divf %224, %227 : vector<64x32xf32>
    %229 = math.absf %198 : vector<64x32xf32>
    %cst_71 = arith.constant dense<0.000000e+00> : vector<64xf32>
    %230 = vector.multi_reduction <add>, %229, %cst_71 [1] : vector<64x32xf32> to vector<64xf32>
    %231 = vector.shape_cast %230 : vector<64xf32> to vector<64x1xf32>
    %cst_72 = arith.constant 0.000000e+00 : f32
    %232 = vector.broadcast %cst_72 : f32 to vector<64x1xf32>
    %233 = arith.cmpf oeq, %231, %232 : vector<64x1xf32>
    %cst_73 = arith.constant 0.000000e+00 : f32
    %234 = vector.broadcast %cst_73 : f32 to vector<64x32xf32>
    %235 = vector.shape_cast %233 : vector<64x1xi1> to vector<64x1xi1>
    %236 = vector.broadcast %235 : vector<64x1xi1> to vector<64x32xi1>
    %237 = arith.select %236, %234, %228 : vector<64x32xi1>, vector<64x32xf32>
    %cst_74 = arith.constant 1.000000e+00 : f32
    %238 = math.sqrt %cst_74 : f32
    %239 = arith.mulf %237, %237 : vector<64x32xf32>
    %cst_75 = arith.constant dense<0.000000e+00> : vector<64xf32>
    %240 = vector.multi_reduction <add>, %239, %cst_75 [1] : vector<64x32xf32> to vector<64xf32>
    %241 = vector.shape_cast %240 : vector<64xf32> to vector<64x1xf32>
    %242 = math.sqrt %241 : vector<64x1xf32>
    %cst_76 = arith.constant 9.99999974E-6 : f32
    %243 = vector.broadcast %cst_76 : f32 to vector<64x1xf32>
    %244 = arith.maximumf %242, %243 : vector<64x1xf32>
    %cst_77 = arith.constant 9.990000e-01 : f32
    %245 = arith.divf %cst_77, %238 : f32
    %246 = vector.broadcast %244 : vector<64x1xf32> to vector<64x32xf32>
    %247 = arith.divf %237, %246 : vector<64x32xf32>
    %248 = vector.broadcast %245 : f32 to vector<64x32xf32>
    %249 = arith.mulf %247, %248 : vector<64x32xf32>
    %250 = vector.broadcast %245 : f32 to vector<64x1xf32>
    %251 = arith.cmpf ogt, %244, %250 : vector<64x1xf32>
    %252 = vector.shape_cast %251 : vector<64x1xi1> to vector<64x1xi1>
    %253 = vector.broadcast %252 : vector<64x1xi1> to vector<64x32xi1>
    %254 = arith.select %253, %249, %237 : vector<64x32xi1>, vector<64x32xf32>
    %cst_78 = arith.constant 1.000000e+00 : f32
    %255 = math.sqrt %cst_78 : f32
    %256 = arith.mulf %4, %4 : vector<1x32xf32>
    %cst_79 = arith.constant dense<0.000000e+00> : vector<1xf32>
    %257 = vector.multi_reduction <add>, %256, %cst_79 [1] : vector<1x32xf32> to vector<1xf32>
    %258 = vector.shape_cast %257 : vector<1xf32> to vector<1x1xf32>
    %259 = math.sqrt %258 : vector<1x1xf32>
    %cst_80 = arith.constant 9.99999974E-6 : f32
    %260 = vector.broadcast %cst_80 : f32 to vector<1x1xf32>
    %261 = arith.maximumf %259, %260 : vector<1x1xf32>
    %262 = vector.broadcast %255 : f32 to vector<1x1xf32>
    %263 = arith.mulf %262, %261 : vector<1x1xf32>
    %264 = math.tanh %263 : vector<1x1xf32>
    %265 = vector.broadcast %264 : vector<1x1xf32> to vector<1x32xf32>
    %266 = arith.mulf %265, %4 : vector<1x32xf32>
    %267 = vector.broadcast %255 : f32 to vector<1x1xf32>
    %268 = arith.mulf %267, %261 : vector<1x1xf32>
    %269 = vector.broadcast %268 : vector<1x1xf32> to vector<1x32xf32>
    %270 = arith.divf %266, %269 : vector<1x32xf32>
    %271 = arith.mulf %254, %254 : vector<64x32xf32>
    %cst_81 = arith.constant dense<0.000000e+00> : vector<64xf32>
    %272 = vector.multi_reduction <add>, %271, %cst_81 [1] : vector<64x32xf32> to vector<64xf32>
    %273 = vector.shape_cast %272 : vector<64xf32> to vector<64x1xf32>
    %274 = arith.mulf %270, %270 : vector<1x32xf32>
    %cst_82 = arith.constant dense<0.000000e+00> : vector<1xf32>
    %275 = vector.multi_reduction <add>, %274, %cst_82 [1] : vector<1x32xf32> to vector<1xf32>
    %276 = vector.shape_cast %275 : vector<1xf32> to vector<1x1xf32>
    %277 = vector.broadcast %270 : vector<1x32xf32> to vector<64x32xf32>
    %278 = arith.mulf %254, %277 : vector<64x32xf32>
    %cst_83 = arith.constant dense<0.000000e+00> : vector<64xf32>
    %279 = vector.multi_reduction <add>, %278, %cst_83 [1] : vector<64x32xf32> to vector<64xf32>
    %280 = vector.shape_cast %279 : vector<64xf32> to vector<64x1xf32>
    %cst_84 = arith.constant 2.000000e+00 : f32
    %281 = vector.broadcast %cst_84 : f32 to vector<64x1xf32>
    %282 = arith.mulf %281, %280 : vector<64x1xf32>
    %cst_85 = arith.constant 1.000000e+00 : f32
    %283 = vector.broadcast %cst_85 : f32 to vector<64x1xf32>
    %284 = arith.addf %283, %282 : vector<64x1xf32>
    %cst_86 = arith.constant 1.000000e+00 : f32
    %285 = vector.broadcast %cst_86 : f32 to vector<1x1xf32>
    %286 = arith.mulf %285, %276 : vector<1x1xf32>
    %287 = vector.broadcast %286 : vector<1x1xf32> to vector<64x1xf32>
    %288 = arith.addf %284, %287 : vector<64x1xf32>
    %289 = vector.broadcast %288 : vector<64x1xf32> to vector<64x32xf32>
    %290 = arith.mulf %289, %254 : vector<64x32xf32>
    %cst_87 = arith.constant 1.000000e+00 : f32
    %291 = vector.broadcast %cst_87 : f32 to vector<64x1xf32>
    %292 = arith.mulf %291, %273 : vector<64x1xf32>
    %cst_88 = arith.constant 1.000000e+00 : f32
    %293 = vector.broadcast %cst_88 : f32 to vector<64x1xf32>
    %294 = arith.subf %293, %292 : vector<64x1xf32>
    %295 = vector.broadcast %294 : vector<64x1xf32> to vector<64x32xf32>
    %296 = vector.broadcast %270 : vector<1x32xf32> to vector<64x32xf32>
    %297 = arith.mulf %295, %296 : vector<64x32xf32>
    %298 = arith.addf %290, %297 : vector<64x32xf32>
    %cst_89 = arith.constant 2.000000e+00 : f32
    %299 = vector.broadcast %cst_89 : f32 to vector<64x1xf32>
    %300 = arith.mulf %299, %280 : vector<64x1xf32>
    %cst_90 = arith.constant 1.000000e+00 : f32
    %301 = vector.broadcast %cst_90 : f32 to vector<64x1xf32>
    %302 = arith.addf %301, %300 : vector<64x1xf32>
    %cst_91 = arith.constant 1.000000e+00 : f32
    %303 = vector.broadcast %cst_91 : f32 to vector<64x1xf32>
    %304 = arith.mulf %303, %273 : vector<64x1xf32>
    %305 = vector.broadcast %276 : vector<1x1xf32> to vector<64x1xf32>
    %306 = arith.mulf %304, %305 : vector<64x1xf32>
    %307 = arith.addf %302, %306 : vector<64x1xf32>
    %cst_92 = arith.constant 9.99999974E-6 : f32
    %308 = vector.broadcast %cst_92 : f32 to vector<64x1xf32>
    %309 = arith.addf %307, %308 : vector<64x1xf32>
    %310 = vector.broadcast %309 : vector<64x1xf32> to vector<64x32xf32>
    %311 = arith.divf %298, %310 : vector<64x32xf32>
    %cst_93 = arith.constant 1.000000e+00 : f32
    %312 = math.sqrt %cst_93 : f32
    %313 = arith.mulf %311, %311 : vector<64x32xf32>
    %cst_94 = arith.constant dense<0.000000e+00> : vector<64xf32>
    %314 = vector.multi_reduction <add>, %313, %cst_94 [1] : vector<64x32xf32> to vector<64xf32>
    %315 = vector.shape_cast %314 : vector<64xf32> to vector<64x1xf32>
    %316 = math.sqrt %315 : vector<64x1xf32>
    %cst_95 = arith.constant 9.99999974E-6 : f32
    %317 = vector.broadcast %cst_95 : f32 to vector<64x1xf32>
    %318 = arith.maximumf %316, %317 : vector<64x1xf32>
    %cst_96 = arith.constant 9.990000e-01 : f32
    %319 = arith.divf %cst_96, %312 : f32
    %320 = vector.broadcast %318 : vector<64x1xf32> to vector<64x32xf32>
    %321 = arith.divf %311, %320 : vector<64x32xf32>
    %322 = vector.broadcast %319 : f32 to vector<64x32xf32>
    %323 = arith.mulf %321, %322 : vector<64x32xf32>
    %324 = vector.broadcast %319 : f32 to vector<64x1xf32>
    %325 = arith.cmpf ogt, %318, %324 : vector<64x1xf32>
    %326 = vector.shape_cast %325 : vector<64x1xi1> to vector<64x1xi1>
    %327 = vector.broadcast %326 : vector<64x1xi1> to vector<64x32xi1>
    %328 = arith.select %327, %323, %311 : vector<64x32xi1>, vector<64x32xf32>
    %cst_97 = arith.constant 5.000000e-01 : f32
    %329 = vector.broadcast %cst_97 : f32 to vector<64x32xf32>
    %330 = arith.mulf %329, %328 : vector<64x32xf32>
    %cst_98 = arith.constant 4.471500e-02 : f32
    %331 = vector.broadcast %cst_98 : f32 to vector<64x32xf32>
    %332 = arith.mulf %331, %328 : vector<64x32xf32>
    %333 = arith.mulf %332, %328 : vector<64x32xf32>
    %334 = arith.mulf %333, %328 : vector<64x32xf32>
    %335 = arith.addf %328, %334 : vector<64x32xf32>
    %cst_99 = arith.constant 0.797884583 : f32
    %336 = vector.broadcast %cst_99 : f32 to vector<64x32xf32>
    %337 = arith.mulf %336, %335 : vector<64x32xf32>
    %338 = math.tanh %337 : vector<64x32xf32>
    %cst_100 = arith.constant 1.000000e+00 : f32
    %339 = vector.broadcast %cst_100 : f32 to vector<64x32xf32>
    %340 = arith.addf %339, %338 : vector<64x32xf32>
    %341 = arith.mulf %330, %340 : vector<64x32xf32>
    %cst_101 = arith.constant 1.000000e+00 : f32
    %342 = math.sqrt %cst_101 : f32
    %343 = arith.mulf %341, %341 : vector<64x32xf32>
    %cst_102 = arith.constant dense<0.000000e+00> : vector<64xf32>
    %344 = vector.multi_reduction <add>, %343, %cst_102 [1] : vector<64x32xf32> to vector<64xf32>
    %345 = vector.shape_cast %344 : vector<64xf32> to vector<64x1xf32>
    %346 = math.sqrt %345 : vector<64x1xf32>
    %cst_103 = arith.constant 9.99999974E-6 : f32
    %347 = vector.broadcast %cst_103 : f32 to vector<64x1xf32>
    %348 = arith.maximumf %346, %347 : vector<64x1xf32>
    %cst_104 = arith.constant dense<0.000000e+00> : vector<64x16xf32>
    %349 = tpu.matmul %341, %5, %cst_104 {dimension_numbers = #tpu.dot_dimension_numbers<[1], [1], [0], [0], [0, 0, 1, 0], [], []>} : vector<64x32xf32>, vector<16x32xf32>, vector<64x16xf32> -> vector<64x16xf32>
    %350 = arith.mulf %349, %349 : vector<64x16xf32>
    %cst_105 = arith.constant dense<0.000000e+00> : vector<64xf32>
    %351 = vector.multi_reduction <add>, %350, %cst_105 [1] : vector<64x16xf32> to vector<64xf32>
    %352 = vector.shape_cast %351 : vector<64xf32> to vector<64x1xf32>
    %353 = math.sqrt %352 : vector<64x1xf32>
    %cst_106 = arith.constant 9.99999974E-6 : f32
    %354 = vector.broadcast %cst_106 : f32 to vector<64x1xf32>
    %355 = arith.maximumf %353, %354 : vector<64x1xf32>
    %356 = arith.divf %355, %348 : vector<64x1xf32>
    %357 = vector.broadcast %342 : f32 to vector<64x1xf32>
    %358 = arith.mulf %357, %348 : vector<64x1xf32>
    %cst_107 = arith.constant -0.999989986 : f32
    %cst_108 = arith.constant 0.999989986 : f32
    %359 = vector.broadcast %cst_107 : f32 to vector<64x1xf32>
    %360 = arith.maximumf %359, %358 : vector<64x1xf32>
    %361 = vector.broadcast %cst_108 : f32 to vector<64x1xf32>
    %362 = arith.minimumf %361, %360 : vector<64x1xf32>
    %cst_109 = arith.constant 1.000000e+00 : f32
    %363 = vector.broadcast %cst_109 : f32 to vector<64x1xf32>
    %364 = arith.addf %363, %362 : vector<64x1xf32>
    %365 = math.log %364 : vector<64x1xf32>
    %cst_110 = arith.constant 1.000000e+00 : f32
    %366 = vector.broadcast %cst_110 : f32 to vector<64x1xf32>
    %367 = arith.subf %366, %362 : vector<64x1xf32>
    %368 = math.log %367 : vector<64x1xf32>
    %369 = arith.subf %365, %368 : vector<64x1xf32>
    %cst_111 = arith.constant 5.000000e-01 : f32
    %370 = vector.broadcast %cst_111 : f32 to vector<64x1xf32>
    %371 = arith.mulf %370, %369 : vector<64x1xf32>
    %372 = arith.mulf %356, %371 : vector<64x1xf32>
    %373 = math.tanh %372 : vector<64x1xf32>
    %374 = vector.broadcast %373 : vector<64x1xf32> to vector<64x16xf32>
    %375 = arith.mulf %374, %349 : vector<64x16xf32>
    %376 = vector.broadcast %342 : f32 to vector<64x1xf32>
    %377 = arith.mulf %355, %376 : vector<64x1xf32>
    %378 = vector.broadcast %377 : vector<64x1xf32> to vector<64x16xf32>
    %379 = arith.divf %375, %378 : vector<64x16xf32>
    %380 = math.absf %349 : vector<64x16xf32>
    %cst_112 = arith.constant dense<0.000000e+00> : vector<64xf32>
    %381 = vector.multi_reduction <add>, %380, %cst_112 [1] : vector<64x16xf32> to vector<64xf32>
    %382 = vector.shape_cast %381 : vector<64xf32> to vector<64x1xf32>
    %cst_113 = arith.constant 0.000000e+00 : f32
    %383 = vector.broadcast %cst_113 : f32 to vector<64x1xf32>
    %384 = arith.cmpf oeq, %382, %383 : vector<64x1xf32>
    %cst_114 = arith.constant 0.000000e+00 : f32
    %385 = vector.broadcast %cst_114 : f32 to vector<64x16xf32>
    %386 = vector.shape_cast %384 : vector<64x1xi1> to vector<64x1xi1>
    %387 = vector.broadcast %386 : vector<64x1xi1> to vector<64x16xi1>
    %388 = arith.select %387, %385, %379 : vector<64x16xi1>, vector<64x16xf32>
    %cst_115 = arith.constant 1.000000e+00 : f32
    %389 = math.sqrt %cst_115 : f32
    %390 = arith.mulf %388, %388 : vector<64x16xf32>
    %cst_116 = arith.constant dense<0.000000e+00> : vector<64xf32>
    %391 = vector.multi_reduction <add>, %390, %cst_116 [1] : vector<64x16xf32> to vector<64xf32>
    %392 = vector.shape_cast %391 : vector<64xf32> to vector<64x1xf32>
    %393 = math.sqrt %392 : vector<64x1xf32>
    %cst_117 = arith.constant 9.99999974E-6 : f32
    %394 = vector.broadcast %cst_117 : f32 to vector<64x1xf32>
    %395 = arith.maximumf %393, %394 : vector<64x1xf32>
    %cst_118 = arith.constant 9.990000e-01 : f32
    %396 = arith.divf %cst_118, %389 : f32
    %397 = vector.broadcast %395 : vector<64x1xf32> to vector<64x16xf32>
    %398 = arith.divf %388, %397 : vector<64x16xf32>
    %399 = vector.broadcast %396 : f32 to vector<64x16xf32>
    %400 = arith.mulf %398, %399 : vector<64x16xf32>
    %401 = vector.broadcast %396 : f32 to vector<64x1xf32>
    %402 = arith.cmpf ogt, %395, %401 : vector<64x1xf32>
    %403 = vector.shape_cast %402 : vector<64x1xi1> to vector<64x1xi1>
    %404 = vector.broadcast %403 : vector<64x1xi1> to vector<64x16xi1>
    %405 = arith.select %404, %400, %388 : vector<64x16xi1>, vector<64x16xf32>
    %cst_119 = arith.constant 1.000000e+00 : f32
    %406 = math.sqrt %cst_119 : f32
    %407 = arith.mulf %6, %6 : vector<1x16xf32>
    %cst_120 = arith.constant dense<0.000000e+00> : vector<1xf32>
    %408 = vector.multi_reduction <add>, %407, %cst_120 [1] : vector<1x16xf32> to vector<1xf32>
    %409 = vector.shape_cast %408 : vector<1xf32> to vector<1x1xf32>
    %410 = math.sqrt %409 : vector<1x1xf32>
    %cst_121 = arith.constant 9.99999974E-6 : f32
    %411 = vector.broadcast %cst_121 : f32 to vector<1x1xf32>
    %412 = arith.maximumf %410, %411 : vector<1x1xf32>
    %413 = vector.broadcast %406 : f32 to vector<1x1xf32>
    %414 = arith.mulf %413, %412 : vector<1x1xf32>
    %415 = math.tanh %414 : vector<1x1xf32>
    %416 = vector.broadcast %415 : vector<1x1xf32> to vector<1x16xf32>
    %417 = arith.mulf %416, %6 : vector<1x16xf32>
    %418 = vector.broadcast %406 : f32 to vector<1x1xf32>
    %419 = arith.mulf %418, %412 : vector<1x1xf32>
    %420 = vector.broadcast %419 : vector<1x1xf32> to vector<1x16xf32>
    %421 = arith.divf %417, %420 : vector<1x16xf32>
    %422 = arith.mulf %405, %405 : vector<64x16xf32>
    %cst_122 = arith.constant dense<0.000000e+00> : vector<64xf32>
    %423 = vector.multi_reduction <add>, %422, %cst_122 [1] : vector<64x16xf32> to vector<64xf32>
    %424 = vector.shape_cast %423 : vector<64xf32> to vector<64x1xf32>
    %425 = arith.mulf %421, %421 : vector<1x16xf32>
    %cst_123 = arith.constant dense<0.000000e+00> : vector<1xf32>
    %426 = vector.multi_reduction <add>, %425, %cst_123 [1] : vector<1x16xf32> to vector<1xf32>
    %427 = vector.shape_cast %426 : vector<1xf32> to vector<1x1xf32>
    %428 = vector.broadcast %421 : vector<1x16xf32> to vector<64x16xf32>
    %429 = arith.mulf %405, %428 : vector<64x16xf32>
    %cst_124 = arith.constant dense<0.000000e+00> : vector<64xf32>
    %430 = vector.multi_reduction <add>, %429, %cst_124 [1] : vector<64x16xf32> to vector<64xf32>
    %431 = vector.shape_cast %430 : vector<64xf32> to vector<64x1xf32>
    %cst_125 = arith.constant 2.000000e+00 : f32
    %432 = vector.broadcast %cst_125 : f32 to vector<64x1xf32>
    %433 = arith.mulf %432, %431 : vector<64x1xf32>
    %cst_126 = arith.constant 1.000000e+00 : f32
    %434 = vector.broadcast %cst_126 : f32 to vector<64x1xf32>
    %435 = arith.addf %434, %433 : vector<64x1xf32>
    %cst_127 = arith.constant 1.000000e+00 : f32
    %436 = vector.broadcast %cst_127 : f32 to vector<1x1xf32>
    %437 = arith.mulf %436, %427 : vector<1x1xf32>
    %438 = vector.broadcast %437 : vector<1x1xf32> to vector<64x1xf32>
    %439 = arith.addf %435, %438 : vector<64x1xf32>
    %440 = vector.broadcast %439 : vector<64x1xf32> to vector<64x16xf32>
    %441 = arith.mulf %440, %405 : vector<64x16xf32>
    %cst_128 = arith.constant 1.000000e+00 : f32
    %442 = vector.broadcast %cst_128 : f32 to vector<64x1xf32>
    %443 = arith.mulf %442, %424 : vector<64x1xf32>
    %cst_129 = arith.constant 1.000000e+00 : f32
    %444 = vector.broadcast %cst_129 : f32 to vector<64x1xf32>
    %445 = arith.subf %444, %443 : vector<64x1xf32>
    %446 = vector.broadcast %445 : vector<64x1xf32> to vector<64x16xf32>
    %447 = vector.broadcast %421 : vector<1x16xf32> to vector<64x16xf32>
    %448 = arith.mulf %446, %447 : vector<64x16xf32>
    %449 = arith.addf %441, %448 : vector<64x16xf32>
    %cst_130 = arith.constant 2.000000e+00 : f32
    %450 = vector.broadcast %cst_130 : f32 to vector<64x1xf32>
    %451 = arith.mulf %450, %431 : vector<64x1xf32>
    %cst_131 = arith.constant 1.000000e+00 : f32
    %452 = vector.broadcast %cst_131 : f32 to vector<64x1xf32>
    %453 = arith.addf %452, %451 : vector<64x1xf32>
    %cst_132 = arith.constant 1.000000e+00 : f32
    %454 = vector.broadcast %cst_132 : f32 to vector<64x1xf32>
    %455 = arith.mulf %454, %424 : vector<64x1xf32>
    %456 = vector.broadcast %427 : vector<1x1xf32> to vector<64x1xf32>
    %457 = arith.mulf %455, %456 : vector<64x1xf32>
    %458 = arith.addf %453, %457 : vector<64x1xf32>
    %cst_133 = arith.constant 9.99999974E-6 : f32
    %459 = vector.broadcast %cst_133 : f32 to vector<64x1xf32>
    %460 = arith.addf %458, %459 : vector<64x1xf32>
    %461 = vector.broadcast %460 : vector<64x1xf32> to vector<64x16xf32>
    %462 = arith.divf %449, %461 : vector<64x16xf32>
    %cst_134 = arith.constant 1.000000e+00 : f32
    %463 = math.sqrt %cst_134 : f32
    %464 = arith.mulf %462, %462 : vector<64x16xf32>
    %cst_135 = arith.constant dense<0.000000e+00> : vector<64xf32>
    %465 = vector.multi_reduction <add>, %464, %cst_135 [1] : vector<64x16xf32> to vector<64xf32>
    %466 = vector.shape_cast %465 : vector<64xf32> to vector<64x1xf32>
    %467 = math.sqrt %466 : vector<64x1xf32>
    %cst_136 = arith.constant 9.99999974E-6 : f32
    %468 = vector.broadcast %cst_136 : f32 to vector<64x1xf32>
    %469 = arith.maximumf %467, %468 : vector<64x1xf32>
    %cst_137 = arith.constant 9.990000e-01 : f32
    %470 = arith.divf %cst_137, %463 : f32
    %471 = vector.broadcast %469 : vector<64x1xf32> to vector<64x16xf32>
    %472 = arith.divf %462, %471 : vector<64x16xf32>
    %473 = vector.broadcast %470 : f32 to vector<64x16xf32>
    %474 = arith.mulf %472, %473 : vector<64x16xf32>
    %475 = vector.broadcast %470 : f32 to vector<64x1xf32>
    %476 = arith.cmpf ogt, %469, %475 : vector<64x1xf32>
    %477 = vector.shape_cast %476 : vector<64x1xi1> to vector<64x1xi1>
    %478 = vector.broadcast %477 : vector<64x1xi1> to vector<64x16xi1>
    %479 = arith.select %478, %474, %462 : vector<64x16xi1>, vector<64x16xf32>
    %c0_138 = arith.constant 0 : index
    %c0_139 = arith.constant 0 : index
    %480 = vector.load %arg8[%c0_138, %c0_139] : memref<64x16xf32, #tpu.memory_space<vmem>>, vector<64x16xf32>
    tpu.vector_store %arg8[%c0_138, %c0_139], %479 {strides = array<i32>} : memref<64x16xf32, #tpu.memory_space<vmem>>, vector<64x16xf32>,
    return
  }
  func.func @transform_0(%arg0: i32) -> (i32, i32) {
    %c0_i32 = arith.constant 0 : i32
    %c0_i32_0 = arith.constant 0 : i32
    return %arg0, %c0_i32 : i32, i32
  }
  func.func @transform_1(%arg0: i32) -> (i32, i32) {
    %c0_i32 = arith.constant 0 : i32
    %c0_i32_0 = arith.constant 0 : i32
    %c0_i32_1 = arith.constant 0 : i32
    return %c0_i32, %c0_i32_0 : i32, i32
  }
  func.func @transform_2(%arg0: i32) -> (i32, i32) {
    %c0_i32 = arith.constant 0 : i32
    %c0_i32_0 = arith.constant 0 : i32
    %c0_i32_1 = arith.constant 0 : i32
    return %c0_i32, %c0_i32_0 : i32, i32
  }
  func.func @transform_3(%arg0: i32) -> (i32, i32) {
    %c0_i32 = arith.constant 0 : i32
    %c0_i32_0 = arith.constant 0 : i32
    %c0_i32_1 = arith.constant 0 : i32
    return %c0_i32, %c0_i32_0 : i32, i32
  }
  func.func @transform_4(%arg0: i32) -> (i32, i32) {
    %c0_i32 = arith.constant 0 : i32
    %c0_i32_0 = arith.constant 0 : i32
    %c0_i32_1 = arith.constant 0 : i32
    return %c0_i32, %c0_i32_0 : i32, i32
  }
  func.func @transform_5(%arg0: i32) -> (i32, i32) {
    %c0_i32 = arith.constant 0 : i32
    %c0_i32_0 = arith.constant 0 : i32
    %c0_i32_1 = arith.constant 0 : i32
    return %c0_i32, %c0_i32_0 : i32, i32
  }
  func.func @transform_6(%arg0: i32) -> (i32, i32) {
    %c0_i32 = arith.constant 0 : i32
    %c0_i32_0 = arith.constant 0 : i32
    %c0_i32_1 = arith.constant 0 : i32
    return %c0_i32, %c0_i32_0 : i32, i32
  }
  func.func @transform_7(%arg0: i32) -> (i32, i32) {
    %c0_i32 = arith.constant 0 : i32
    %c0_i32_0 = arith.constant 0 : i32
    return %arg0, %c0_i32 : i32, i32
  }
}

</mosaic_0001>

<bundles_post_ra>
// kernel: tpu_custom_call.1
= control target key start
LH: loop header
LB: loop body
LE: loop exit
PB: predicated region body
PF: predicated region fallthrough
CT: control target
= control target key end

     0   :  { %s6879_s24 = smov 0   ;;  %s11184_s0 = inlined_call_operand.vmem [shape: f32[128,32], index: 0, kind: input, shape index: {}]   ;;  %s11185_s1 = inlined_call_operand.vmem [shape: f32[32,32], index: 1, kind: input, shape index: {}]   ;;  %s11186_s2 = inlined_call_operand.vmem [shape: f32[1,32], index: 2, kind: input, shape index: {}]   ;;  %s11187_s3 = inlined_call_operand.vmem [shape: f32[32,32], index: 3, kind: input, shape index: {}]   ;;  %s11188_s4 = inlined_call_operand.vmem [shape: f32[1,32], index: 4, kind: input, shape index: {}]   ;;  %s11189_s5 = inlined_call_operand.vmem [shape: f32[16,32], index: 5, kind: input, shape index: {}]   ;;  %s11190_s6 = inlined_call_operand.vmem [shape: f32[1,16], index: 6, kind: input, shape index: {}]   ;;  %s11191_s7 = inlined_call_operand.vmem [shape: f32[128,16], index: 7, kind: output, shape index: {}]  }
   0x1 LB: > { %s6036_s25 = sadd.s32 4294967295, %s6837_s24   ;;  %p6040_p0 = scmp.ge.s32.totalorder %s6837_s24, 1  ;;  %s6837_s24 = sphi %s6879_s24, %s17_s24  }
   0x2   : > { %p238_p1 = scmp.lt.s32.totalorder %s6837_s24, 3 }
   0x4   : > { %p239_p2 = pnand %p6040_p0, %p238_p1 }
   0x5   : > { %s6041_s26 = sshll.u32 (!%p239_p2), %s6036_s25, 3 }
   0x6   : > { %242 = sbr.rel (%p239_p2) target bundleno = 2904 (0xb58), region = 48  ;;  %p271_p3 = scmp.lt.s32.totalorder (!%p239_p2), %s6041_s26, 15 }
   0xb   : > { %s11349_s26 = smov (!%p271_p3, %s6041_s26), 15  ;;  %vm311_vm0 = vcmask 261120  }
   0xc   : > { %s6042_s27 = sshll.u32 %s11349_s26, 3 }
   0xd   : > { %s274_s30 = scalar_lea.vmem %s11184_s0, %s6042_s27  ;;  %s11066_s20 = scalar_lea.vmem %s11191_s7, %s6042_s27 }
   0xe   : > { %v6895_v0 = vld [vmem:[%s274_s30 + $0x30] sm:$0xff]  ;;  %v6899_v2 = vld [vmem:[%s274_s30] sm:$0xff]  ;;  %v6909_v7 = vld [vmem:[%s274_s30 + $0x18] sm:$0xff] }
   0xf   : > { %v6897_v1 = vld [vmem:[%s274_s30 + $0x10] sm:$0xff]  ;;  %v309_v3 = vmul.f32 %v6895_v0, %v6895_v0  ;;  %v303_v5 = vmul.f32 %v6899_v2, %v6899_v2  ;;  %v6907_v6 = vld [vmem:[%s274_s30 + $0x20] sm:$0xff]  ;;  %v6914_v11 = vld [vmem:[%s274_s30 + $0x8] sm:$0xff]  ;;  %v306_v13 = vmul.f32 %v6909_v7, %v6909_v7 }
  0x10   : > { %v305_v4 = vmul.f32 %v6897_v1, %v6897_v1  ;;  %v307_v12 = vmul.f32 %v6907_v6, %v6907_v6  ;;  %v304_v14 = vmul.f32 %v6914_v11, %v6914_v11  ;;  %v6925_v18 = vld [vmem:[%s274_s30 + $0x28] sm:$0xff]  ;;  %v6927_v19 = vld [vmem:[%s274_s30 + $0x38] sm:$0xff] }
  0x11   : > { %v330_v8 = vsel %vm311_vm0, %v309_v3, 0.0  ;;  %v312_v10 = vsel %vm311_vm0, %v303_v5, 0.0  ;;  %v321_v16 = vsel %vm311_vm0, %v306_v13, 0.0  ;;  %v308_v20 = vmul.f32 %v6925_v18, %v6925_v18 }
  0x12   : > { %v318_v9 = vsel %vm311_vm0, %v305_v4, 0.0  ;;  %331 = vadd.xlane.f32.xlu2 %v330_v8  ;;  %313 = vadd.xlane.f32.xlu0 %v312_v10  ;;  %v324_v15 = vsel %vm311_vm0, %v307_v12, 0.0  ;;  %v315_v17 = vsel %vm311_vm0, %v304_v14, 0.0  ;;  %v310_v21 = vmul.f32 %v6927_v19, %v6927_v19 }
  0x13   : > { %319 = vadd.xlane.f32.xlu1 %v318_v9  ;;  %v327_v22 = vsel %vm311_vm0, %v308_v20, 0.0 }
  0x14   : > { %v333_v23 = vsel %vm311_vm0, %v310_v21, 0.0 }
  0x1a   : > { %325 = vadd.xlane.f32.xlu2 %v324_v15  ;;  %316 = vadd.xlane.f32.xlu0 %v315_v17 }
  0x1b   : > { %322 = vadd.xlane.f32.xlu1 %v321_v16 }
  0x22   : > { %334 = vadd.xlane.f32.xlu0 %v333_v23 }
  0x23   : > { %328 = vadd.xlane.f32.xlu1 %v327_v22 }
  0x85   : > { %v6935_v24 = vpop.xlane.xlu2 %331  ;;  %v6940_v26 = vpop.xlane.xlu0 %313 }
  0x86   : > { %v6937_v25 = vpop.xlane.xlu1 %319  ;;  %6123 = vrsqrt.f32 %v6935_v24  ;;  %vm415_vm1 = vcmp.eq.f32.partialorder %v6935_v24, inf  ;;  %vm417_vm2 = vcmp.eq.f32.partialorder %v6935_v24, 0.0  ;;  %v418_v40 = vand.u32 2147483648, %v6935_v24 }
  0x87   : > { %6125 = vrsqrt.f32 %v6937_v25  ;;  %vm367_vm3 = vcmp.eq.f32.partialorder %v6937_v25, inf  ;;  %vm369_vm4 = vcmp.eq.f32.partialorder %v6937_v25, 0.0  ;;  %v370_v46 = vand.u32 2147483648, %v6937_v25 }
  0x88   : > { %6127 = vrsqrt.f32 %v6940_v26  ;;  %vm343_vm5 = vcmp.eq.f32.partialorder %v6940_v26, inf  ;;  %vm345_vm6 = vcmp.eq.f32.partialorder %v6940_v26, 0.0  ;;  %v346_v50 = vand.u32 2147483648, %v6940_v26 }
  0x8c   : > { %v6124_v27 = vpop.eup %6123 }
  0x8d   : > { %v6126_v28 = vpop.eup %6125  ;;  %v409_v29 = vmul.f32 %v6124_v27, %v6935_v24  ;;  %v6945_v30 = vpop.xlane.xlu2 %325 }
  0x8e   : > { %v6947_v31 = vpop.xlane.xlu1 %322  ;;  %v6128_v32 = vpop.eup %6127  ;;  %v361_v33 = vmul.f32 %v6126_v28, %v6937_v25  ;;  %6129 = vrsqrt.f32 %v6945_v30  ;;  %vm391_vm7 = vcmp.eq.f32.partialorder %v6945_v30, inf  ;;  %v394_v54 = vand.u32 2147483648, %v6945_v30 }
  0x8f   : > { %v6951_v34 = vpop.xlane.xlu0 %316  ;;  %v410_v35 = vmul.f32 %v6124_v27, %v409_v29  ;;  %v337_v36 = vmul.f32 %v6128_v32, %v6940_v26  ;;  %6131 = vrsqrt.f32 %v6947_v31  ;;  %vm393_vm8 = vcmp.eq.f32.partialorder %v6945_v30, 0.0 }
  0x90   : > { %v362_v37 = vmul.f32 %v6126_v28, %v361_v33  ;;  %6133 = vrsqrt.f32 %v6951_v34  ;;  %vm379_vm9 = vcmp.eq.f32.partialorder %v6947_v31, inf  ;;  %v382_v63 = vand.u32 2147483648, %v6947_v31 }
  0x91   : > { %v411_v38 = vmul.f32 0.5, %v410_v35  ;;  %v338_v39 = vmul.f32 %v6128_v32, %v337_v36  ;;  %vm381_vm10 = vcmp.eq.f32.partialorder %v6947_v31, 0.0  ;;  %vm355_vm11 = vcmp.eq.f32.partialorder %v6951_v34, inf }
  0x92   : > { %v363_v41 = vmul.f32 0.5, %v362_v37  ;;  %vm357_vm12 = vcmp.eq.f32.partialorder %v6951_v34, 0.0 }
  0x93   : > { %v412_v42 = vsub.f32 1.5, %v411_v38  ;;  %v339_v43 = vmul.f32 0.5, %v338_v39 }
  0x94   : > { %v6130_v44 = vpop.eup %6129  ;;  %v364_v45 = vsub.f32 1.5, %v363_v41 }
  0x95   : > { %v6132_v47 = vpop.eup %6131  ;;  %v413_v48 = vmul.f32 %v6124_v27, %v412_v42  ;;  %v340_v49 = vsub.f32 1.5, %v339_v43  ;;  %v385_v51 = vmul.f32 %v6130_v44, %v6945_v30 }
  0x96   : > { %v6966_v52 = vpop.xlane.xlu1 %328  ;;  %v365_v53 = vmul.f32 %v6126_v28, %v364_v45  ;;  %v373_v55 = vmul.f32 %v6132_v47, %v6947_v31  ;;  %v6134_v57 = vpop.eup %6133  ;;  %v358_v28 = vand.u32 2147483648, %v6951_v34 }
  0x97   : > { %6135 = vrsqrt.f32 %v6966_v52  ;;  %v6972_v56 = vpop.xlane.xlu0 %334  ;;  %v414_v58 = vmul.f32 %v413_v48, %v6935_v24  ;;  %v341_v59 = vmul.f32 %v6128_v32, %v340_v49  ;;  %v386_v60 = vmul.f32 %v6130_v44, %v385_v51 }
  0x98   : > { %v366_v61 = vmul.f32 %v365_v53, %v6937_v25  ;;  %v374_v62 = vmul.f32 %v6132_v47, %v373_v55  ;;  %v349_v3 = vmul.f32 %v6134_v57, %v6951_v34  ;;  %6137 = vrsqrt.f32 %v6972_v56 }
  0x99   : > { %v416_v4 = vsel %vm415_vm1, %v6935_v24, %v414_v58  ;;  %v342_v5 = vmul.f32 %v341_v59, %v6940_v26  ;;  %v387_v8 = vmul.f32 0.5, %v386_v60  ;;  %vm403_vm13 = vcmp.eq.f32.partialorder %v6966_v52, inf }
  0x9a   : > { %v419_v9 = vsel %vm417_vm2, %v418_v40, %v416_v4  ;;  %v368_v10 = vsel %vm367_vm3, %v6937_v25, %v366_v61  ;;  %v375_v12 = vmul.f32 0.5, %v374_v62  ;;  %v350_v13 = vmul.f32 %v6134_v57, %v349_v3 }
  0x9b   : > { %v6991_v14 = vmax.f32 %v419_v9, 1e-05  ;;  %v371_v15 = vsel %vm369_vm4, %v370_v46, %v368_v10  ;;  %v344_v16 = vsel %vm343_vm5, %v6940_v26, %v342_v5  ;;  %v388_v17 = vsub.f32 1.5, %v387_v8 }
  0x9c   : > { %v6999_v21 = vmax.f32 %v371_v15, 1e-05  ;;  %v347_v22 = vsel %vm345_vm6, %v346_v50, %v344_v16  ;;  %v376_v23 = vsub.f32 1.5, %v375_v12  ;;  %v351_v24 = vmul.f32 0.5, %v350_v13 }
  0x9d   : > { %v6136_v20 = vpop.eup %6135  ;;  %v7004_v27 = vmax.f32 %v347_v22, 1e-05  ;;  %v389_v25 = vmul.f32 %v6130_v44, %v388_v17  ;;  %vm405_vm14 = vcmp.eq.f32.partialorder %v6966_v52, 0.0  ;;  %v406_v37 = vand.u32 2147483648, %v6966_v52 }
  0x9e   : > { %v397_v29 = vmul.f32 %v6136_v20, %v6966_v52  ;;  %6139 = vrcp.f32 %v6999_v21  ;;  %v377_v32 = vmul.f32 %v6132_v47, %v376_v23  ;;  %v352_v33 = vsub.f32 1.5, %v351_v24  ;;  %v6138_v35 = vpop.eup %6137 }
  0x9f   : > { %6141 = vrcp.f32 %v7004_v27  ;;  %v390_v26 = vmul.f32 %v389_v25, %v6945_v30  ;;  %v421_v40 = vmul.f32 %v6138_v35, %v6972_v56  ;;  %vm427_vm15 = vcmp.eq.f32.partialorder %v6972_v56, inf }
  0xa0   : > { %v398_v36 = vmul.f32 %v6136_v20, %v397_v29  ;;  %6143 = vrcp.f32 %v6991_v14  ;;  %v378_v38 = vmul.f32 %v377_v32, %v6947_v31  ;;  %v353_v39 = vmul.f32 %v6134_v57, %v352_v33 }
  0xa1   : > { %v392_v41 = vsel %vm391_vm7, %v6945_v30, %v390_v26  ;;  %v430_v43 = vand.u32 2147483648, %v6972_v56  ;;  %6145 = vtanh.f32 %v6999_v21  ;;  %v422_v47 = vmul.f32 %v6138_v35, %v421_v40 }
  0xa2   : > { %v399_v42 = vmul.f32 0.5, %v398_v36  ;;  %v395_v44 = vsel %vm393_vm8, %v394_v54, %v392_v41  ;;  %v380_v45 = vsel %vm379_vm9, %v6947_v31, %v378_v38  ;;  %v354_v46 = vmul.f32 %v353_v39, %v6951_v34 }
  0xa3   : > { %vm429_vm1 = vcmp.eq.f32.partialorder %v6972_v56, 0.0  ;;  %v7030_v48 = vmax.f32 %v395_v44, 1e-05  ;;  %v383_v49 = vsel %vm381_vm10, %v382_v63, %v380_v45  ;;  %vm491_vm2 = vweird.f32 %v6999_v21 }
  0xa4   : > { %v400_v50 = vsub.f32 1.5, %v399_v42  ;;  %v495_v30 = vand.u32 2147483647, %v6999_v21  ;;  %v6140_v51 = vpop.eup %6139  ;;  %v7036_v53 = vmax.f32 %v383_v49, 1e-05  ;;  %v356_v54 = vsel %vm355_vm11, %v6951_v34, %v354_v46 }
  0xa5   : > { %v423_v55 = vmul.f32 0.5, %v422_v47  ;;  %v497_v57 = vand.u32 2147483648, %v6999_v21  ;;  %v6142_v58 = vpop.eup %6141  ;;  %6147 = vrcp.f32 %v7030_v48  ;;  %v359_v31 = vsel %vm357_vm12, %v358_v28, %v356_v54 }
  0xa6   : > { %v401_v59 = vmul.f32 %v6136_v20, %v400_v50  ;;  %v487_v60 = vmul.f32 %v6140_v51, %v6999_v21  ;;  %v7046_v61 = vpop.eup %6143  ;;  %6149 = vrcp.f32 %v7036_v53  ;;  %v7049_v62 = vmax.f32 %v359_v31, 1e-05 }
  0xa7   : > { %v424_v63 = vsub.f32 1.5, %v423_v55  ;;  %vm492_vm3 = vweird.f32 %v6140_v51  ;;  %v6146_v3 = vpop.eup %6145  ;;  %vm7052_vm4 = vcmp.eq.f32.partialorder %v495_v30, 8.507059e+37  ;;  %v498_v34 = vor.u32 1.1754944e-38, %v497_v57 }
  0xa8   : > { %v402_v4 = vmul.f32 %v401_v59, %v6966_v52  ;;  %v488_v5 = vsub.f32 1.0, %v487_v60  ;;  %6151 = vrcp.f32 %v7049_v62  ;;  %v450_v10 = vmul.f32 %v6146_v3, %v6897_v1  ;;  %vm493_vm7 = vmor %vm491_vm2, %vm492_vm3 }
  0xa9   : > { %v425_v9 = vmul.f32 %v6138_v35, %v424_v63  ;;  %v457_v12 = vmul.f32 %v6142_v58, %v7004_v27  ;;  %6153 = vtanh.f32 %v7004_v27  ;;  %vm461_vm5 = vweird.f32 %v7004_v27 }
  0xaa   : > { %v404_v13 = vsel %vm403_vm13, %v6966_v52, %v402_v4  ;;  %v489_v15 = vmul.f32 %v6140_v51, %v488_v5  ;;  %vm462_vm6 = vweird.f32 %v6142_v58  ;;  %v465_v24 = vand.u32 2147483647, %v7004_v27 }
  0xab   : > { %v407_v16 = vsel %vm405_vm14, %v406_v37, %v404_v13  ;;  %v426_v17 = vmul.f32 %v425_v9, %v6972_v56  ;;  %v458_v20 = vsub.f32 1.0, %v457_v12  ;;  %v6148_v22 = vpop.eup %6147  ;;  %v467_v25 = vand.u32 2147483648, %v7004_v27  ;;  %vm463_vm9 = vmor %vm461_vm5, %vm462_vm6 }
  0xac   : > { %v7067_v1 = vmax.f32 %v407_v16, 1e-05  ;;  %v490_v23 = vadd.f32 %v6140_v51, %v489_v15  ;;  %v7071_v28 = vpop.eup %6149  ;;  %6155 = vtanh.f32 %v7030_v48  ;;  %v517_v32 = vmul.f32 %v6148_v22, %v7030_v48 }
  0xad   : > { %v428_v29 = vsel %vm427_vm15, %v6972_v56, %v426_v17  ;;  %v459_v52 = vmul.f32 %v6142_v58, %v458_v20  ;;  %vm7084_vm8 = vcmp.eq.f32.partialorder %v465_v24, 8.507059e+37  ;;  %v468_v39 = vor.u32 1.1754944e-38, %v467_v25 }
  0xae   : > { %6157 = vrcp.f32 %v7067_v1  ;;  %v431_v33 = vsel %vm429_vm1, %v430_v43, %v428_v29  ;;  %v494_v35 = vsel %vm493_vm7, %v6140_v51, %v490_v23  ;;  %v7088_v36 = vpop.eup %6151  ;;  %v518_v56 = vsub.f32 1.0, %v517_v32 }
  0xaf   : > { %v7090_v37 = vmax.f32 %v431_v33, 1e-05  ;;  %v499_v21 = vsel %vm7052_vm4, %v498_v34, %v494_v35  ;;  %v460_v38 = vadd.f32 %v6142_v58, %v459_v52  ;;  %v6154_v40 = vpop.eup %6153  ;;  %vm521_vm10 = vweird.f32 %v7030_v48 }
  0xb0   : > { %v7094_v41 = vmul.f32 %v499_v21, %v450_v10  ;;  %vm522_vm11 = vweird.f32 %v6148_v22  ;;  %v448_v42 = vmul.f32 %v6154_v40, %v6899_v2  ;;  %v525_v44 = vand.u32 2147483647, %v7030_v48 }
  0xb1   : > { %6159 = vrcp.f32 %v7090_v37  ;;  %v464_v43 = vsel %vm463_vm9, %v6142_v58, %v460_v38  ;;  %v519_v47 = vmul.f32 %v6148_v22, %v518_v56  ;;  %v527_v27 = vand.u32 2147483648, %v7030_v48  ;;  %vm523_vm13 = vmor %vm521_vm10, %vm522_vm11 }
  0xb2   : > { %v578_v45 = vmul.f32 %v7094_v41, %v7094_v41  ;;  %v469_v46 = vsel %vm7084_vm8, %v468_v39, %v464_v43  ;;  %v6156_v49 = vpop.eup %6155  ;;  %vm7110_vm12 = vcmp.eq.f32.partialorder %v525_v44, 8.507059e+37  ;;  %6161 = vtanh.f32 %v7036_v53 }
  0xb3   : > { %v7108_v50 = vmul.f32 %v469_v46, %v448_v42  ;;  %v502_v2 = vmul.f32 %v7071_v28, %v7036_v53  ;;  %v452_v55 = vmul.f32 %v6156_v49, %v6907_v6  ;;  %v520_v57 = vadd.f32 %v6148_v22, %v519_v47 }
  0xb4   : > { %v7117_v51 = vpop.eup %6157  ;;  %v590_v54 = vsel %vm311_vm0, %v578_v45, 0.0  ;;  %v528_v58 = vor.u32 1.1754944e-38, %v527_v27  ;;  %vm506_vm14 = vweird.f32 %v7036_v53  ;;  %vm507_vm15 = vweird.f32 %v7071_v28 }
  0xb5   : > { %591 = vadd.xlane.f32.xlu1 %v590_v54  ;;  %v576_v31 = vmul.f32 %v7108_v50, %v7108_v50  ;;  %v503_v59 = vsub.f32 1.0, %v502_v2  ;;  %v524_v60 = vsel %vm523_vm13, %v6148_v22, %v520_v57  ;;  %v510_v63 = vand.u32 2147483647, %v7036_v53  ;;  %vm508_vm4 = vmor %vm506_vm14, %vm507_vm15 }
  0xb6   : > { %v512_v6 = vand.u32 2147483648, %v7036_v53  ;;  %6163 = vtanh.f32 %v7049_v62  ;;  %v529_v48 = vsel %vm7110_vm12, %v528_v58, %v524_v60  ;;  %v472_v8 = vmul.f32 %v7088_v36, %v7049_v62 }
  0xb7   : > { %v7131_v3 = vpop.eup %6159  ;;  %v584_v4 = vsel %vm311_vm0, %v576_v31, 0.0  ;;  %v504_v5 = vmul.f32 %v7071_v28, %v503_v59  ;;  %v7139_v34 = vmul.f32 %v529_v48, %v452_v55  ;;  %vm7141_vm1 = vcmp.eq.f32.partialorder %v510_v63, 8.507059e+37 }
  0xb8   : > { %585 = vadd.xlane.f32.xlu2 %v584_v4  ;;  %v513_v10 = vor.u32 1.1754944e-38, %v512_v6  ;;  %vm476_vm2 = vweird.f32 %v7049_v62  ;;  %v6162_v12 = vpop.eup %6161  ;;  %v473_v15 = vsub.f32 1.0, %v472_v8  ;;  %vm477_vm3 = vweird.f32 %v7088_v36 }
  0xb9   : > { %v505_v13 = vadd.f32 %v7071_v28, %v504_v5  ;;  %v480_v16 = vand.u32 2147483647, %v7049_v62  ;;  %v580_v17 = vmul.f32 %v7139_v34, %v7139_v34  ;;  %v451_v20 = vmul.f32 %v6162_v12, %v6909_v7  ;;  %vm478_vm7 = vmor %vm476_vm2, %vm477_vm3 }
  0xba   : > { %v482_v22 = vand.u32 2147483648, %v7049_v62  ;;  %6165 = vtanh.f32 %v6991_v14  ;;  %v474_v24 = vmul.f32 %v7088_v36, %v473_v15  ;;  %v547_v7 = vmul.f32 %v7046_v61, %v6991_v14 }
  0xbb   : > { %v509_v23 = vsel %vm508_vm4, %v7071_v28, %v505_v13  ;;  %vm7160_vm5 = vcmp.eq.f32.partialorder %v480_v16, 8.507059e+37  ;;  %v596_v52 = vsel %vm311_vm0, %v580_v17, 0.0  ;;  %vm551_vm6 = vweird.f32 %v6991_v14 }
  0xbc   : > { %v6164_v29 = vpop.eup %6163  ;;  %v514_v53 = vsel %vm7141_vm1, %v513_v10, %v509_v23  ;;  %v483_v32 = vor.u32 1.1754944e-38, %v482_v22  ;;  %v475_v35 = vadd.f32 %v7088_v36, %v474_v24  ;;  %v548_v26 = vsub.f32 1.0, %v547_v7 }
  0xbd   : > { %597 = vadd.xlane.f32.xlu1 %v596_v52  ;;  %v7170_v28 = vmul.f32 %v514_v53, %v451_v20  ;;  %v449_v33 = vmul.f32 %v6164_v29, %v6914_v11  ;;  %vm552_vm8 = vweird.f32 %v7046_v61  ;;  %v555_v21 = vand.u32 2147483647, %v6991_v14 }
  0xbe   : > { %v557_v38 = vand.u32 2147483648, %v6991_v14  ;;  %6167 = vtanh.f32 %v7090_v37  ;;  %v479_v11 = vsel %vm478_vm7, %v7088_v36, %v475_v35  ;;  %v549_v40 = vmul.f32 %v7046_v61, %v548_v26  ;;  %vm553_vm11 = vmor %vm551_vm6, %vm552_vm8 }
  0xbf   : > { %v579_v39 = vmul.f32 %v7170_v28, %v7170_v28  ;;  %v562_v56 = vmul.f32 %v7131_v3, %v7090_v37  ;;  %v484_v42 = vsel %vm7160_vm5, %v483_v32, %v479_v11  ;;  %vm7190_vm9 = vcmp.eq.f32.partialorder %v555_v21, 8.507059e+37 }
  0xc0   : > { %v6166_v62 = vpop.eup %6165  ;;  %v558_v44 = vor.u32 1.1754944e-38, %v557_v38  ;;  %vm566_vm10 = vweird.f32 %v7090_v37  ;;  %v7196_v46 = vmul.f32 %v484_v42, %v449_v33  ;;  %v550_v47 = vadd.f32 %v7046_v61, %v549_v40 }
  0xc1   : > { %v593_v45 = vsel %vm311_vm0, %v579_v39, 0.0  ;;  %v454_v36 = vmul.f32 %v6166_v62, %v6895_v0  ;;  %v563_v27 = vsub.f32 1.0, %v562_v56  ;;  %vm567_vm12 = vweird.f32 %v7131_v3 }
  0xc2   : > { %594 = vadd.xlane.f32.xlu2 %v593_v45  ;;  %v570_v49 = vand.u32 2147483647, %v7090_v37  ;;  %v572_v30 = vand.u32 2147483648, %v7090_v37  ;;  %v577_v2 = vmul.f32 %v7196_v46, %v7196_v46  ;;  %v554_v0 = vsel %vm553_vm11, %v7046_v61, %v550_v47  ;;  %vm7221_vm13 = vmor %vm566_vm10, %vm567_vm12 }
  0xc3   : > { %6169 = vtanh.f32 %v7067_v1  ;;  %v532_v54 = vmul.f32 %v7117_v51, %v7067_v1  ;;  %v559_v14 = vsel %vm7190_vm9, %v558_v44, %v554_v0  ;;  %v564_v57 = vmul.f32 %v7131_v3, %v563_v27 }
  0xc4   : > { %v6168_v55 = vpop.eup %6167  ;;  %v587_v58 = vsel %vm311_vm0, %v577_v2, 0.0  ;;  %v7217_v31 = vmul.f32 %v559_v14, %v454_v36  ;;  %v573_v61 = vor.u32 1.1754944e-38, %v572_v30  ;;  %vm571_vm14 = vcmp.eq.f32.partialorder %v570_v49, 8.507059e+37 }
  0xc5   : > { %v533_v60 = vsub.f32 1.0, %v532_v54  ;;  %588 = vadd.xlane.f32.xlu0 %v587_v58  ;;  %v455_v63 = vmul.f32 %v6168_v55, %v6927_v19  ;;  %v565_v6 = vadd.f32 %v7131_v3, %v564_v57  ;;  %vm536_vm15 = vweird.f32 %v7067_v1  ;;  %v293_v55 = vld [vmem:[%s11185_s1 + $0x18] sm:$0xff] }
  0xc6   : > { %vm537_vm1 = vweird.f32 %v7117_v51  ;;  %v540_v37 = vand.u32 2147483647, %v7067_v1  ;;  %v542_v48 = vand.u32 2147483648, %v7067_v1  ;;  %v582_v19 = vmul.f32 %v7217_v31, %v7217_v31  ;;  %6045 = vmatpush.xpose.msk.msra.mxu0 %vm311_vm0, %v293_v55  ;;  %6105 = vmatpush.xpose.msk.msra.mxu3 %vm311_vm0, %v293_v55 }
  0xc7   : > { %v534_v4 = vmul.f32 %v7117_v51, %v533_v60  ;;  %v569_v5 = vsel %vm7221_vm13, %v7131_v3, %v565_v6  ;;  %vm538_vm2 = vmor %vm536_vm15, %vm537_vm1 }
  0xc8   : > { %v574_v9 = vsel %vm571_vm14, %v573_v61, %v569_v5  ;;  %v543_v15 = vor.u32 1.1754944e-38, %v542_v48  ;;  %vm541_vm3 = vcmp.eq.f32.partialorder %v540_v37, 8.507059e+37  ;;  %v602_v17 = vsel %vm311_vm0, %v582_v19, 0.0  ;;  %v292_v61 = vld [vmem:[%s11185_s1 + $0x10] sm:$0xff]  ;;  %v291_v19 = vld [vmem:[%s11185_s1 + $0x8] sm:$0xff] }
  0xc9   : > { %v6170_v8 = vpop.eup %6169  ;;  %v535_v10 = vadd.f32 %v7117_v51, %v534_v4  ;;  %v7238_v12 = vmul.f32 %v574_v9, %v455_v63 }
  0xca   : > { %v453_v13 = vmul.f32 %v6170_v8, %v6925_v18  ;;  %6046 = vmatpush.xpose.msk.msra.mxu0 %vm311_vm0, %v292_v61  ;;  %6106 = vmatpush.xpose.msk.msra.mxu3 %vm311_vm0, %v292_v61 }
  0xcb   : > { %v539_v16 = vsel %vm538_vm2, %v7117_v51, %v535_v10  ;;  %v583_v1 = vmul.f32 %v7238_v12, %v7238_v12 }
  0xcc   : > { %v544_v3 = vsel %vm541_vm3, %v543_v15, %v539_v16 }
  0xcd   : > { %v7245_v20 = vmul.f32 %v544_v3, %v453_v13  ;;  %603 = vadd.xlane.f32.xlu0 %v602_v17  ;;  %v605_v22 = vsel %vm311_vm0, %v583_v1, 0.0 }
  0xce   : > { %606 = vadd.xlane.f32.xlu2 %v605_v22  ;;  %6047 = vmatpush.xpose.msk.msra.mxu0 %vm311_vm0, %v291_v19 }
  0xcf   : > { %v581_v18 = vmul.f32 %v7245_v20, %v7245_v20  ;;  %6107 = vmatpush.xpose.msk.msra.mxu3 %vm311_vm0, %v291_v19 }
  0xd1   : > { %v599_v23 = vsel %vm311_vm0, %v581_v18, 0.0 }
  0xd5   : > { %600 = vadd.xlane.f32.xlu0 %v599_v23 }
 0x128   : > { %v592_v51 = vpop.xlane.xlu1 %591 }
 0x129   : > { %6171 = vrsqrt.f32 %v592_v51  ;;  %vm639_vm4 = vcmp.eq.f32.partialorder %v592_v51, inf  ;;  %v642_v44 = vand.u32 2147483648, %v592_v51  ;;  %vm641_vm5 = vcmp.eq.f32.partialorder %v592_v51, 0.0 }
 0x12b   : > { %v586_v24 = vpop.xlane.xlu2 %585 }
 0x12c   : > { %6173 = vrsqrt.f32 %v586_v24  ;;  %vm615_vm6 = vcmp.eq.f32.partialorder %v586_v24, inf  ;;  %v618_v0 = vand.u32 2147483648, %v586_v24  ;;  %vm617_vm7 = vcmp.eq.f32.partialorder %v586_v24, 0.0 }
 0x12f   : > { %v6172_v25 = vpop.eup %6171 }
 0x130   : > { %v633_v7 = vmul.f32 %v6172_v25, %v592_v51  ;;  %v7251_v29 = vpop.xlane.xlu1 %597 }
 0x131   : > { %6175 = vrsqrt.f32 %v7251_v29  ;;  %v666_v16 = vand.u32 2147483648, %v7251_v29  ;;  %vm663_vm13 = vcmp.eq.f32.partialorder %v7251_v29, inf }
 0x132   : > { %v6174_v52 = vpop.eup %6173  ;;  %v634_v53 = vmul.f32 %v6172_v25, %v633_v7 }
 0x133   : > { %v609_v32 = vmul.f32 %v6174_v52, %v586_v24 }
 0x134   : > { %v635_v33 = vmul.f32 0.5, %v634_v53 }
 0x135   : > { %v610_v35 = vmul.f32 %v6174_v52, %v609_v32  ;;  %v7254_v26 = vpop.xlane.xlu2 %594 }
 0x136   : > { %v636_v21 = vsub.f32 1.5, %v635_v33  ;;  %6177 = vrsqrt.f32 %v7254_v26  ;;  %vm651_vm8 = vcmp.eq.f32.partialorder %v7254_v26, inf  ;;  %vm653_vm9 = vcmp.eq.f32.partialorder %v7254_v26, 0.0 }
 0x137   : > { %v6176_v38 = vpop.eup %6175  ;;  %v611_v39 = vmul.f32 0.5, %v610_v35  ;;  %v654_v1 = vand.u32 2147483648, %v7254_v26 }
 0x138   : > { %v637_v11 = vmul.f32 %v6172_v25, %v636_v21  ;;  %v657_v40 = vmul.f32 %v6176_v38, %v7251_v29  ;;  %v7258_v62 = vpop.xlane.xlu0 %588 }
 0x139   : > { %v612_v56 = vsub.f32 1.5, %v611_v39  ;;  %6179 = vrsqrt.f32 %v7258_v62  ;;  %vm627_vm10 = vcmp.eq.f32.partialorder %v7258_v62, inf  ;;  %vm629_vm11 = vcmp.eq.f32.partialorder %v7258_v62, 0.0 }
 0x13a   : > { %v638_v42 = vmul.f32 %v637_v11, %v592_v51  ;;  %v658_v43 = vmul.f32 %v6176_v38, %v657_v40  ;;  %v630_v23 = vand.u32 2147483648, %v7258_v62 }
 0x13b   : > { %v613_v45 = vmul.f32 %v6174_v52, %v612_v56 }
 0x13c   : > { %v6178_v36 = vpop.eup %6177  ;;  %v640_v47 = vsel %vm639_vm4, %v592_v51, %v638_v42  ;;  %v659_v54 = vmul.f32 0.5, %v658_v43  ;;  %v290_v51 = vld [vmem:[%s11185_s1] sm:$0xff] }
 0x13d   : > { %v643_v27 = vsel %vm641_vm5, %v642_v44, %v640_v47  ;;  %v614_v49 = vmul.f32 %v613_v45, %v586_v24  ;;  %v645_v30 = vmul.f32 %v6178_v36, %v7254_v26  ;;  %6048 = vmatpush.xpose.msk.msra.mxu0 %vm311_vm0, %v290_v51  ;;  %6108 = vmatpush.xpose.msk.msra.mxu3 %vm311_vm0, %v290_v51 }
 0x13e   : > { %v7262_v2 = vmax.f32 %v643_v27, 1e-05  ;;  %v660_v37 = vsub.f32 1.5, %v659_v54 }
 0x13f   : > { %v616_v14 = vsel %vm615_vm6, %v586_v24, %v614_v49  ;;  %v646_v57 = vmul.f32 %v6178_v36, %v645_v30  ;;  %v6180_v58 = vpop.eup %6179 }
 0x140   : > { %6181 = vrcp.f32 %v7262_v2  ;;  %v619_v59 = vsel %vm617_vm7, %v618_v0, %v616_v14  ;;  %v621_v63 = vmul.f32 %v6180_v58, %v7258_v62  ;;  %v7274_v6 = vpop.xlane.xlu0 %603  ;;  %v661_v15 = vmul.f32 %v6176_v38, %v660_v37 }
 0x141   : > { %v647_v60 = vmul.f32 0.5, %v646_v57  ;;  %v7276_v4 = vmax.f32 %v619_v59, 1e-05  ;;  %v7278_v48 = vpop.xlane.xlu2 %606  ;;  %6183 = vrsqrt.f32 %v7274_v6  ;;  %vm747_vm12 = vweird.f32 %v7262_v2 }
 0x142   : > { %v622_v8 = vmul.f32 %v6180_v58, %v621_v63  ;;  %6185 = vrsqrt.f32 %v7278_v48  ;;  %v662_v32 = vmul.f32 %v661_v15, %v7251_v29  ;;  %v751_v35 = vand.u32 2147483647, %v7262_v2 }
 0x143   : > { %v648_v5 = vsub.f32 1.5, %v647_v60  ;;  %6187 = vrcp.f32 %v7276_v4  ;;  %vm717_vm14 = vweird.f32 %v7276_v4  ;;  %vm687_vm1 = vcmp.eq.f32.partialorder %v7274_v6, inf }
 0x144   : > { %v623_v10 = vmul.f32 0.5, %v622_v8  ;;  %vm689_vm2 = vcmp.eq.f32.partialorder %v7274_v6, 0.0  ;;  %v721_v45 = vand.u32 2147483647, %v7276_v4  ;;  %v723_v55 = vand.u32 2147483648, %v7276_v4 }
 0x145   : > { %v649_v9 = vmul.f32 %v6178_v36, %v648_v5  ;;  %v753_v36 = vand.u32 2147483648, %v7262_v2  ;;  %vm752_vm5 = vcmp.eq.f32.partialorder %v751_v35, 8.507059e+37 }
 0x146   : > { %v7288_v13 = vpop.eup %6181  ;;  %v624_v3 = vsub.f32 1.5, %v623_v10  ;;  %v724_v10 = vor.u32 1.1754944e-38, %v723_v55  ;;  %vm722_vm7 = vcmp.eq.f32.partialorder %v721_v45, 8.507059e+37 }
 0x147   : > { %v743_v17 = vmul.f32 %v7288_v13, %v7262_v2  ;;  %v6184_v22 = vpop.eup %6183  ;;  %v650_v18 = vmul.f32 %v649_v9, %v7254_v26  ;;  %vm748_vm15 = vweird.f32 %v7288_v13  ;;  %v754_v63 = vor.u32 1.1754944e-38, %v753_v36 }
 0x148   : > { %v6186_v24 = vpop.eup %6185  ;;  %v625_v25 = vmul.f32 %v6180_v58, %v624_v3  ;;  %v681_v7 = vmul.f32 %v6184_v22, %v7274_v6  ;;  %v7306_v52 = vpop.xlane.xlu0 %600  ;;  %vm7343_vm3 = vmor %vm747_vm12, %vm748_vm15 }
 0x149   : > { %v744_v53 = vsub.f32 1.0, %v743_v17  ;;  %v693_v33 = vmul.f32 %v6186_v24, %v7278_v48  ;;  %6189 = vrsqrt.f32 %v7306_v52  ;;  %v6188_v21 = vpop.eup %6187  ;;  %v652_v11 = vsel %vm651_vm8, %v7254_v26, %v650_v18 }
 0x14a   : > { %v626_v38 = vmul.f32 %v625_v25, %v7258_v62  ;;  %v682_v39 = vmul.f32 %v6184_v22, %v681_v7  ;;  %v713_v56 = vmul.f32 %v6188_v21, %v7276_v4  ;;  %v655_v0 = vsel %vm653_vm9, %v654_v1, %v652_v11 }
 0x14b   : > { %v694_v40 = vmul.f32 %v6186_v24, %v693_v33  ;;  %v745_v42 = vmul.f32 %v7288_v13, %v744_v53  ;;  %vm718_vm4 = vweird.f32 %v6188_v21  ;;  %v7352_v8 = vmax.f32 %v655_v0, 1e-05 }
 0x14c   : > { %v628_v43 = vsel %vm627_vm10, %v7258_v62, %v626_v38  ;;  %v683_v44 = vmul.f32 0.5, %v682_v39  ;;  %v714_v49 = vsub.f32 1.0, %v713_v56  ;;  %vm719_vm6 = vmor %vm717_vm14, %vm718_vm4  ;;  %v690_v1 = vand.u32 2147483648, %v7274_v6 }
 0x14d   : > { %v631_v47 = vsel %vm629_vm11, %v630_v23, %v628_v43  ;;  %v695_v27 = vmul.f32 0.5, %v694_v40  ;;  %v746_v30 = vadd.f32 %v7288_v13, %v745_v42  ;;  %vm665_vm8 = vcmp.eq.f32.partialorder %v7251_v29, 0.0 }
 0x14e   : > { %v684_v54 = vsub.f32 1.5, %v683_v44  ;;  %v7337_v14 = vmax.f32 %v631_v47, 1e-05  ;;  %v715_v59 = vmul.f32 %v6188_v21, %v714_v49  ;;  %vm699_vm9 = vcmp.eq.f32.partialorder %v7278_v48, inf }
 0x14f   : > { %v6190_v62 = vpop.eup %6189  ;;  %v696_v58 = vsub.f32 1.5, %v695_v27  ;;  %v750_v26 = vsel %vm7343_vm3, %v7288_v13, %v746_v30  ;;  %v664_v13 = vsel %vm663_vm13, %v7251_v29, %v662_v32  ;;  %vm701_vm10 = vcmp.eq.f32.partialorder %v7278_v48, 0.0 }
 0x150   : > { %v685_v61 = vmul.f32 %v6184_v22, %v684_v54  ;;  %v669_v60 = vmul.f32 %v6190_v62, %v7306_v52  ;;  %6191 = vrcp.f32 %v7337_v14  ;;  %v716_v5 = vadd.f32 %v6188_v21, %v715_v59 }
 0x151   : > { %v697_v37 = vmul.f32 %v6186_v24, %v696_v58  ;;  %v755_v15 = vsel %vm752_vm5, %v754_v63, %v750_v26  ;;  %6193 = vrcp.f32 %v7352_v8  ;;  %v667_v33 = vsel %vm665_vm8, %v666_v16, %v664_v13 }
 0x152   : > { %v686_v19 = vmul.f32 %v685_v61, %v7274_v6  ;;  %v670_v9 = vmul.f32 %v6190_v62, %v669_v60  ;;  %v720_v3 = vsel %vm719_vm6, %v6188_v21, %v716_v5  ;;  %v756_v25 = vmul.f32 %v755_v15, %v7094_v41 }
 0x153   : > { %v698_v17 = vmul.f32 %v697_v37, %v7278_v48  ;;  %v725_v23 = vsel %vm722_vm7, %v724_v10, %v720_v3  ;;  %vm840_vm11 = vcmp.gt.f32.partialorder %v7276_v4, 0.999  ;;  %v702_v38 = vand.u32 2147483648, %v7278_v48 }
 0x154   : > { %v688_v22 = vsel %vm687_vm1, %v7274_v6, %v686_v19  ;;  %v671_v18 = vmul.f32 0.5, %v670_v9  ;;  %v726_v24 = vmul.f32 %v725_v23, %v7108_v50  ;;  %v834_v29 = vmul.f32 0.999, %v756_v25 }
 0x155   : > { %v691_v51 = vsel %vm689_vm2, %v690_v1, %v688_v22  ;;  %v700_v21 = vsel %vm699_vm9, %v7278_v48, %v698_v17  ;;  %v738_v56 = vand.u32 2147483648, %v7337_v14  ;;  %v7385_v42 = vmax.f32 %v667_v33, 1e-05 }
 0x156   : > { %v6192_v7 = vpop.eup %6191  ;;  %v672_v53 = vsub.f32 1.5, %v671_v18  ;;  %v7371_v32 = vmax.f32 %v691_v51, 1e-05  ;;  %v832_v35 = vmul.f32 0.999, %v726_v24  ;;  %v703_v44 = vsel %vm701_vm10, %v702_v38, %v700_v21 }
 0x157   : > { %v728_v6 = vmul.f32 %v6192_v7, %v7337_v14  ;;  %v7387_v43 = vpop.eup %6193  ;;  %vm733_vm12 = vweird.f32 %v6192_v7  ;;  %v736_v45 = vand.u32 2147483647, %v7337_v14  ;;  %vm675_vm13 = vcmp.eq.f32.partialorder %v7306_v52, inf }
 0x158   : > { %6195 = vrcp.f32 %v7371_v32  ;;  %v864_v39 = vsel %vm840_vm11, %v832_v35, %v7108_v50  ;;  %v673_v16 = vmul.f32 %v6190_v62, %v672_v53  ;;  %vm842_vm14 = vcmp.gt.f32.partialorder %v7262_v2, 0.999 }
 0x159   : > { %v729_v11 = vsub.f32 1.0, %v728_v6  ;;  %6049 = vmatmul.msk.f32.vlgmr.msra.gmra.mxu0 %vm311_vm0, %v864_v39  ;;  %v872_v40 = vmul.f32 %v864_v39, %v864_v39  ;;  %v758_v48 = vmul.f32 %v7387_v43, %v7352_v8  ;;  %vm677_vm15 = vcmp.eq.f32.partialorder %v7306_v52, 0.0 }
 0x15a   : > { %v678_v36 = vand.u32 2147483648, %v7306_v52  ;;  %vm732_vm1 = vweird.f32 %v7337_v14  ;;  %v7399_v27 = vsel %vm842_vm14, %v834_v29, %v7094_v41  ;;  %v674_v30 = vmul.f32 %v673_v16, %v7306_v52 }
 0x15b   : > { %v730_v4 = vmul.f32 %v6192_v7, %v729_v11  ;;  %v880_v50 = vsel %vm311_vm0, %v872_v40, 0.0  ;;  %vm734_vm2 = vmor %vm732_vm1, %vm733_vm12  ;;  %v739_v0 = vor.u32 1.1754944e-38, %v738_v56  ;;  %v759_v2 = vsub.f32 1.0, %v758_v48 }
 0x15c   : > { %881 = vadd.xlane.f32.xlu1 %v880_v50  ;;  %v7402_v54 = vmax.f32 %v703_v44, 1e-05  ;;  %vm737_vm3 = vcmp.eq.f32.partialorder %v736_v45, 8.507059e+37  ;;  %6197 = vrcp.f32 %v7385_v42  ;;  %v874_v58 = vmul.f32 %v7399_v27, %v7399_v27 }
 0x15d   : > { %v731_v47 = vadd.f32 %v6192_v7, %v730_v4  ;;  %v760_v41 = vmul.f32 %v7387_v43, %v759_v2  ;;  %vm841_vm4 = vcmp.gt.f32.partialorder %v7337_v14, 0.999  ;;  %v811_v61 = vand.u32 2147483647, %v7371_v32 }
 0x15e   : > { %v6196_v49 = vpop.eup %6195  ;;  %6199 = vrcp.f32 %v7402_v54  ;;  %v676_v60 = vsel %vm675_vm13, %v7306_v52, %v674_v30  ;;  %v813_v63 = vand.u32 2147483648, %v7371_v32  ;;  %vm763_vm5 = vweird.f32 %v7387_v43 }
 0x15f   : > { %v735_v55 = vsel %vm734_vm2, %v6192_v7, %v731_v47  ;;  %v803_v57 = vmul.f32 %v6196_v49, %v7371_v32  ;;  %v766_v37 = vand.u32 2147483647, %v7352_v8  ;;  %vm808_vm6 = vweird.f32 %v6196_v49 }
 0x160   : > { %v740_v62 = vsel %vm737_vm3, %v739_v0, %v735_v55  ;;  %v761_v9 = vadd.f32 %v7387_v43, %v760_v41  ;;  %v886_v10 = vsel %vm311_vm0, %v874_v58, 0.0  ;;  %vm807_vm7 = vweird.f32 %v7371_v32 }
 0x161   : > { %v741_v59 = vmul.f32 %v740_v62, %v7196_v46  ;;  %v804_v26 = vsub.f32 1.0, %v803_v57  ;;  %vm762_vm8 = vweird.f32 %v7352_v8  ;;  %v768_v15 = vand.u32 2147483648, %v7352_v8  ;;  %vm809_vm12 = vmor %vm807_vm7, %vm808_vm6 }
 0x162   : > { %v6198_v13 = vpop.eup %6197  ;;  %vm812_vm9 = vcmp.eq.f32.partialorder %v811_v61, 8.507059e+37  ;;  %vm846_vm10 = vcmp.gt.f32.partialorder %v7371_v32, 0.999  ;;  %vm7430_vm11 = vmor %vm762_vm8, %vm763_vm5  ;;  %v679_v18 = vsel %vm677_vm15, %v678_v36, %v676_v60  ;;  %vm767_vm13 = vcmp.eq.f32.partialorder %v766_v37, 8.507059e+37 }
 0x163   : > { %v833_v5 = vmul.f32 0.999, %v741_v59  ;;  %v805_v19 = vmul.f32 %v6196_v49, %v804_v26  ;;  %v773_v14 = vmul.f32 %v6198_v13, %v7385_v42  ;;  %v765_v24 = vsel %vm7430_vm11, %v7387_v43, %v761_v9 }
 0x164   : > { %887 = vadd.xlane.f32.xlu1 %v886_v10  ;;  %v6200_v22 = vpop.eup %6199  ;;  %v769_v53 = vor.u32 1.1754944e-38, %v768_v15  ;;  %v826_v21 = vand.u32 2147483647, %v7402_v54  ;;  %v709_v38 = vmax.f32 %v679_v18, 1e-05  ;;  %v828_v11 = vand.u32 2147483648, %v7402_v54 }
 0x165   : > { %v865_v1 = vsel %vm841_vm4, %v833_v5, %v7196_v46  ;;  %v806_v3 = vadd.f32 %v6196_v49, %v805_v19  ;;  %v814_v46 = vor.u32 1.1754944e-38, %v813_v63  ;;  %v818_v25 = vmul.f32 %v6200_v22, %v7402_v54 }
 0x166   : > { %6050 = vmatmul.msk.f32.gmra.mxu0 %vm311_vm0, %v865_v1  ;;  %v873_v23 = vmul.f32 %v865_v1, %v865_v1  ;;  %v774_v33 = vsub.f32 1.0, %v773_v14  ;;  %v770_v39 = vsel %vm767_vm13, %v769_v53, %v765_v24  ;;  %vm778_vm14 = vweird.f32 %v6198_v13 }
 0x167   : > { %v810_v51 = vsel %vm809_vm12, %v6196_v49, %v806_v3  ;;  %v819_v6 = vsub.f32 1.0, %v818_v25  ;;  %vm823_vm15 = vweird.f32 %v6200_v22  ;;  %6201 = vrcp.f32 %v709_v38 }
 0x168   : > { %v883_v7 = vsel %vm311_vm0, %v873_v23, 0.0  ;;  %v815_v52 = vsel %vm812_vm9, %v814_v46, %v810_v51  ;;  %v775_v29 = vmul.f32 %v6198_v13, %v774_v33  ;;  %vm822_vm1 = vweird.f32 %v7402_v54 }
 0x169   : > { %884 = vadd.xlane.f32.xlu2 %v883_v7  ;;  %v816_v35 = vmul.f32 %v815_v52, %v7217_v31  ;;  %v820_v40 = vmul.f32 %v6200_v22, %v819_v6  ;;  %vm777_vm2 = vweird.f32 %v7385_v42  ;;  %v783_v43 = vand.u32 2147483648, %v7385_v42  ;;  %vm824_vm4 = vmor %vm822_vm1, %vm823_vm15 }
 0x16a   : > { %v776_v56 = vadd.f32 %v6198_v13, %v775_v29  ;;  %v771_v4 = vmul.f32 %v770_v39, %v7170_v28  ;;  %vm7454_vm3 = vmor %vm777_vm2, %vm778_vm14  ;;  %v781_v48 = vand.u32 2147483647, %v7385_v42  ;;  %v829_v36 = vor.u32 1.1754944e-38, %v828_v11 }
 0x16b   : > { %v838_v16 = vmul.f32 0.999, %v816_v35  ;;  %v821_v45 = vadd.f32 %v6200_v22, %v820_v40  ;;  %vm827_vm5 = vcmp.eq.f32.partialorder %v826_v21, 8.507059e+37  ;;  %v784_v49 = vor.u32 1.1754944e-38, %v783_v43 }
 0x16c   : > { %v835_v0 = vmul.f32 0.999, %v771_v4  ;;  %vm782_vm6 = vcmp.eq.f32.partialorder %v781_v48, 8.507059e+37  ;;  %vm843_vm7 = vcmp.gt.f32.partialorder %v7352_v8, 0.999  ;;  %v798_v26 = vand.u32 2147483648, %v709_v38 }
 0x16d   : > { %v870_v44 = vsel %vm846_vm10, %v838_v16, %v7217_v31  ;;  %v825_v47 = vsel %vm824_vm4, %v6200_v22, %v821_v45  ;;  %v780_v31 = vsel %vm7454_vm3, %v6198_v13, %v776_v56  ;;  %v6202_v30 = vpop.eup %6201  ;;  %vm847_vm8 = vcmp.gt.f32.partialorder %v7402_v54, 0.999 }
 0x16e   : > { %6051 = vmatmul.msk.f32.gmra.mxu0 %vm311_vm0, %v7399_v27  ;;  %6055 = vmatmul.msk.f32.vlgmr.msra.gmra.mxu3 %vm311_vm0, %v870_v44  ;;  %v830_v32 = vsel %vm827_vm5, %v829_v36, %v825_v47  ;;  %v785_v55 = vsel %vm782_vm6, %v784_v49, %v780_v31  ;;  %v788_v57 = vmul.f32 %v6202_v30, %v709_v38  ;;  %vm793_vm9 = vweird.f32 %v6202_v30 }
 0x16f   : > { %v831_v2 = vmul.f32 %v830_v32, %v7238_v12  ;;  %v867_v58 = vsel %vm843_vm7, %v835_v0, %v7170_v28  ;;  %v786_v59 = vmul.f32 %v785_v55, %v7139_v34  ;;  %v796_v60 = vand.u32 2147483647, %v709_v38 }
 0x170   : > { %v789_v27 = vsub.f32 1.0, %v788_v57  ;;  %vm792_vm10 = vweird.f32 %v709_v38  ;;  %v799_v54 = vor.u32 1.1754944e-38, %v798_v26  ;;  %vm844_vm13 = vcmp.gt.f32.partialorder %v7385_v42, 0.999 }
 0x171   : > { %v839_v62 = vmul.f32 0.999, %v831_v2  ;;  %v836_v8 = vmul.f32 0.999, %v786_v59  ;;  %vm794_vm11 = vmor %vm792_vm10, %vm793_vm9  ;;  %vm797_vm12 = vcmp.eq.f32.partialorder %v796_v60, 8.507059e+37  ;;  %v875_v42 = vmul.f32 %v867_v58, %v867_v58 }
 0x172   : > { %v790_v61 = vmul.f32 %v6202_v30, %v789_v27  ;;  %vm845_vm14 = vcmp.gt.f32.partialorder %v709_v38, 0.999  ;;  %v878_v17 = vmul.f32 %v870_v44, %v870_v44  ;;  %vm1926_vm6 = vcmask 253952  }
 0x173   : > { %v871_v41 = vsel %vm847_vm8, %v839_v62, %v7238_v12  ;;  %v868_v12 = vsel %vm844_vm13, %v836_v8, %v7139_v34  ;;  %v889_v34 = vsel %vm311_vm0, %v875_v42, 0.0 }
 0x174   : > { %v791_v63 = vadd.f32 %v6202_v30, %v790_v61  ;;  %v876_v22 = vmul.f32 %v868_v12, %v868_v12  ;;  %v898_v18 = vsel %vm311_vm0, %v878_v17, 0.0  ;;  %v879_v24 = vmul.f32 %v871_v41, %v871_v41 }
 0x176   : > { %6052 = vmatmul.msk.f32.gmra.mxu0 %vm311_vm0, %v867_v58  ;;  %6056 = vmatmul.msk.f32.gmra.mxu3 %vm311_vm0, %v871_v41  ;;  %v795_v37 = vsel %vm794_vm11, %v6202_v30, %v791_v63  ;;  %v892_v51 = vsel %vm311_vm0, %v876_v22, 0.0  ;;  %v901_v25 = vsel %vm311_vm0, %v879_v24, 0.0 }
 0x177   : > { %v800_v28 = vsel %vm797_vm12, %v799_v54, %v795_v37 }
 0x178   : > { %v801_v5 = vmul.f32 %v800_v28, %v7245_v20 }
 0x17a   : > { %v837_v19 = vmul.f32 0.999, %v801_v5 }
 0x17c   : > { %v869_v9 = vsel %vm845_vm14, %v837_v19, %v7245_v20 }
 0x17d   : > { %v877_v7 = vmul.f32 %v869_v9, %v869_v9 }
 0x17e   : > { %6053 = vmatmul.msk.f32.gmra.mxu0 %vm311_vm0, %v868_v12 }
 0x17f   : > { %v895_v6 = vsel %vm311_vm0, %v877_v7, 0.0 }
 0x186   : > { %6054 = vmatmul.msk.f32.gmra.mxu0 %vm311_vm0, %v869_v9 }
 0x1cf   : > { %v882_v55 = vpop.xlane.xlu1 %881 }
 0x1d0   : > { %6203 = vrsqrt.f32 %v882_v55  ;;  %vm911_vm15 = vcmp.eq.f32.partialorder %v882_v55, inf  ;;  %vm913_vm1 = vcmp.eq.f32.partialorder %v882_v55, 0.0 }
 0x1d6   : > { %v7478_v10 = vpop.f32.mrf.mxu0  ;;  %v6204_v26 = vpop.eup %6203 }
 0x1d7   : > { %v1085_v15 = vmul.f32 %v7478_v10, %v7478_v10  ;;  %v1565_v40 = vand.u32 2147483647, %v7478_v10  ;;  %v888_v59 = vpop.xlane.xlu1 %887  ;;  %v905_v60 = vmul.f32 %v6204_v26, %v882_v55 }
 0x1d8   : > { %6205 = vrsqrt.f32 %v888_v59  ;;  %vm935_vm2 = vcmp.eq.f32.partialorder %v888_v59, inf  ;;  %vm937_vm3 = vcmp.eq.f32.partialorder %v888_v59, 0.0 }
 0x1d9   : > { %v1093_v13 = vsel %vm311_vm0, %v1085_v15, 0.0  ;;  %v1573_v4 = vsel %vm311_vm0, %v1565_v40, 0.0  ;;  %v906_v8 = vmul.f32 %v6204_v26, %v905_v60 }
 0x1da   : > { %1094 = vadd.xlane.f32.xlu0 %v1093_v13 }
 0x1db   : > { %v907_v28 = vmul.f32 0.5, %v906_v8 }
 0x1dc   : > { %v885_v61 = vpop.xlane.xlu2 %884 }
 0x1dd   : > { %6207 = vrsqrt.f32 %v885_v61  ;;  %v908_v19 = vsub.f32 1.5, %v907_v28  ;;  %vm923_vm4 = vcmp.eq.f32.partialorder %v885_v61, inf  ;;  %vm925_vm5 = vcmp.eq.f32.partialorder %v885_v61, 0.0 }
 0x1de   : > { %v6206_v63 = vpop.eup %6205 }
 0x1df   : > { %v929_v54 = vmul.f32 %v6206_v63, %v888_v59  ;;  %v909_v13 = vmul.f32 %v6204_v26, %v908_v19 }
 0x1e1   : > { %v930_v12 = vmul.f32 %v6206_v63, %v929_v54 }
 0x1e2   : > { %890 = vadd.xlane.f32.xlu0 %v889_v34 }
 0x1e3   : > { %v7484_v1 = vpop.f32.mrf.mxu0  ;;  %v6208_v37 = vpop.eup %6207  ;;  %v931_v9 = vmul.f32 0.5, %v930_v12 }
 0x1e4   : > { %v1086_v3 = vmul.f32 %v7484_v1, %v7484_v1  ;;  %v1566_v36 = vand.u32 2147483647, %v7484_v1  ;;  %v917_v5 = vmul.f32 %v6208_v37, %v885_v61 }
 0x1e5   : > { %v932_v42 = vsub.f32 1.5, %v931_v9 }
 0x1e6   : > { %v1096_v20 = vsel %vm311_vm0, %v1086_v3, 0.0  ;;  %v1576_v32 = vsel %vm311_vm0, %v1566_v36, 0.0  ;;  %v918_v15 = vmul.f32 %v6208_v37, %v917_v5  ;;  %v910_v3 = vmul.f32 %v909_v13, %v882_v55 }
 0x1e7   : > { %1097 = vadd.xlane.f32.xlu2 %v1096_v20  ;;  %v933_v20 = vmul.f32 %v6206_v63, %v932_v42 }
 0x1e8   : > { %v919_v34 = vmul.f32 0.5, %v918_v15  ;;  %v912_v22 = vsel %vm911_vm15, %v882_v55, %v910_v3 }
 0x1ea   : > { %899 = vadd.xlane.f32.xlu0 %v898_v18  ;;  %v920_v17 = vsub.f32 1.5, %v919_v34  ;;  %v934_v18 = vmul.f32 %v933_v20, %v888_v59 }
 0x1eb   : > { %v7490_v23 = vpop.f32.mrf.mxu0 }
 0x1ec   : > { %v1087_v46 = vmul.f32 %v7490_v23, %v7490_v23  ;;  %v1567_v48 = vand.u32 2147483647, %v7490_v23  ;;  %v936_v24 = vsel %vm935_vm2, %v888_v59, %v934_v18 }
 0x1ee   : > { %v1099_v14 = vsel %vm311_vm0, %v1087_v46, 0.0  ;;  %v1579_v31 = vsel %vm311_vm0, %v1567_v48, 0.0  ;;  %v914_v46 = vand.u32 2147483648, %v882_v55 }
 0x1ef   : > { %1100 = vadd.xlane.f32.xlu1 %v1099_v14  ;;  %893 = vadd.xlane.f32.xlu2 %v892_v51  ;;  %v921_v14 = vmul.f32 %v6208_v37, %v920_v17 }
 0x1f0   : > { %v915_v51 = vsel %vm913_vm1, %v914_v46, %v912_v22 }
 0x1f1   : > { %v7501_v33 = vpop.f32.mrf.mxu3  ;;  %v7539_v7 = vmax.f32 %v915_v51, 1e-05 }
 0x1f2   : > { %902 = vadd.xlane.f32.xlu0 %v901_v25  ;;  %v1091_v21 = vmul.f32 %v7501_v33, %v7501_v33  ;;  %v1571_v30 = vand.u32 2147483647, %v7501_v33  ;;  %v938_v25 = vand.u32 2147483648, %v888_v59 }
 0x1f3   : > { %v7497_v52 = vpop.f32.mrf.mxu0  ;;  %6209 = vrcp.f32 %v7539_v7  ;;  %v1230_v37 = vand.u32 2147483647, %v7539_v7  ;;  %v1232_v5 = vand.u32 2147483648, %v7539_v7  ;;  %vm1226_vm8 = vweird.f32 %v7539_v7 }
 0x1f4   : > { %v1088_v53 = vmul.f32 %v7497_v52, %v7497_v52  ;;  %v1111_v29 = vsel %vm311_vm0, %v1091_v21, 0.0  ;;  %v1568_v47 = vand.u32 2147483647, %v7497_v52  ;;  %v1591_v57 = vsel %vm311_vm0, %v1571_v30, 0.0 }
 0x1f5   : > { %vm7594_vm9 = vcmp.eq.f32.partialorder %v1230_v37, 8.507059e+37 }
 0x1f6   : > { %v1102_v35 = vsel %vm311_vm0, %v1088_v53, 0.0  ;;  %v1582_v49 = vsel %vm311_vm0, %v1568_v47, 0.0  ;;  %v922_v53 = vmul.f32 %v921_v14, %v885_v61 }
 0x1f7   : > { %1103 = vadd.xlane.f32.xlu1 %v1102_v35  ;;  %896 = vadd.xlane.f32.xlu2 %v895_v6  ;;  %v939_v35 = vsel %vm937_vm3, %v938_v25, %v936_v24 }
 0x1f8   : > { %v7542_v6 = vmax.f32 %v939_v35, 1e-05  ;;  %v924_v21 = vsel %vm923_vm4, %v885_v61, %v922_v53 }
 0x1f9   : > { %v7513_v16 = vpop.f32.mrf.mxu3 }
 0x1fa   : > { %v1092_v43 = vmul.f32 %v7513_v16, %v7513_v16  ;;  %v1572_v58 = vand.u32 2147483647, %v7513_v16  ;;  %6211 = vrcp.f32 %v7542_v6  ;;  %v6059_v36 = vclamps-f32 %v7542_v6, 0.99999 }
 0x1fb   : > { %v7507_v38 = vpop.f32.mrf.mxu0  ;;  %v1260_v17 = vand.u32 2147483647, %v7542_v6  ;;  %vm1256_vm11 = vweird.f32 %v7542_v6 }
 0x1fc   : > { %v1089_v39 = vmul.f32 %v7507_v38, %v7507_v38  ;;  %v1114_v50 = vsel %vm311_vm0, %v1092_v43, 0.0  ;;  %v1569_v0 = vand.u32 2147483647, %v7507_v38  ;;  %v1594_v41 = vsel %vm311_vm0, %v1572_v58, 0.0 }
 0x1fd   : > { %v1359_v55 = vadd.f32 1.0, %v6059_v36  ;;  %v1383_v58 = vsub.f32 1.0, %v6059_v36  ;;  %vm7615_vm13 = vcmp.eq.f32.partialorder %v1260_v17, 8.507059e+37 }
 0x1fe   : > { %v1105_v11 = vsel %vm311_vm0, %v1089_v39, 0.0  ;;  %v1585_v62 = vsel %vm311_vm0, %v1569_v0, 0.0  ;;  %v926_v39 = vand.u32 2147483648, %v885_v61 }
 0x1ff   : > { %1106 = vadd.xlane.f32.xlu1 %v1105_v11  ;;  %1112 = vadd.xlane.f32.xlu2 %v1111_v29  ;;  %v6057_v11 = vclamps-f32 %v7539_v7, 0.99999 }
 0x200   : > { %v927_v29 = vsel %vm925_vm5, %v926_v39, %v924_v21  ;;  %v1233_v21 = vor.u32 1.1754944e-38, %v1232_v5 }
 0x201   : > { %v1357_v43 = vadd.f32 1.0, %v6057_v11 }
 0x203   : > { %v7516_v56 = vpop.f32.mrf.mxu0 }
 0x204   : > { %v1090_v44 = vmul.f32 %v7516_v56, %v7516_v56  ;;  %v1570_v2 = vand.u32 2147483647, %v7516_v56 }
 0x206   : > { %v1108_v45 = vsel %vm311_vm0, %v1090_v44, 0.0  ;;  %v1588_v27 = vsel %vm311_vm0, %v1570_v2, 0.0  ;;  %v7549_v44 = vpop.eup %6209 }
 0x207   : > { %1574 = vadd.xlane.f32.xlu1 %v1573_v4  ;;  %1109 = vadd.xlane.f32.xlu0 %v1108_v45  ;;  %v7551_v4 = vmax.f32 %v927_v29, 1e-05  ;;  %v1381_v45 = vsub.f32 1.0, %v6057_v11  ;;  %v1222_v48 = vmul.f32 %v7549_v44, %v7539_v7  ;;  %v7559_v47 = vpop.eup %6211  ;;  %vm1227_vm7 = vweird.f32 %v7549_v44 }
 0x208   : > { %1115 = vadd.xlane.f32.xlu2 %v1114_v50  ;;  %v294_v50 = vld [vmem:[%s11186_s2] sm:$0x1]  ;;  %vm7604_vm10 = vmor %vm1226_vm8, %vm1227_vm7  ;;  %v1262_v11 = vand.u32 2147483648, %v7542_v6  ;;  %vm1257_vm12 = vweird.f32 %v7559_v47 }
 0x209   : > { %v1223_v2 = vsub.f32 1.0, %v1222_v48  ;;  %vm7645_vm1 = vmor %vm1256_vm11, %vm1257_vm12  ;;  %vm1241_vm2 = vweird.f32 %v7551_v4 }
 0x20b   : > { %v1224_v63 = vmul.f32 %v7549_v44, %v1223_v2 }
 0x20d   : > { %v1225_v20 = vadd.f32 %v7549_v44, %v1224_v63 }
 0x20f   : > { %1580 = vadd.xlane.f32.xlu1 %v1579_v31  ;;  %1577 = vadd.xlane.f32.xlu0 %v1576_v32  ;;  %v1925_v31 = vmul.f32 %v294_v50, %v294_v50  ;;  %v1229_v29 = vsel %vm7604_vm10, %v7549_v44, %v1225_v20 }
 0x210   : > { %1583 = vadd.xlane.f32.xlu2 %v1582_v49 }
 0x211   : > { %v1927_v0 = vsel %vm1926_vm6, %v1925_v31, 0.0 }
 0x217   : > { %1592 = vadd.xlane.f32.xlu1 %v1591_v57  ;;  %1586 = vadd.xlane.f32.xlu0 %v1585_v62  ;;  %v6058_v57 = vclamps-f32 %v7551_v4, 0.99999 }
 0x218   : > { %1589 = vadd.xlane.f32.xlu2 %v1588_v27  ;;  %v1252_v27 = vmul.f32 %v7559_v47, %v7542_v6 }
 0x219   : > { %v1358_v8 = vadd.f32 1.0, %v6058_v57  ;;  %v1382_v15 = vsub.f32 1.0, %v6058_v57  ;;  %v7633_v57 = vsel %vm7594_vm9, %v1233_v21, %v1229_v29 }
 0x21a   : > { %v1253_v28 = vsub.f32 1.0, %v1252_v27  ;;  %v1263_v27 = vor.u32 1.1754944e-38, %v1262_v11 }
 0x21c   : > { %v1254_v18 = vmul.f32 %v7559_v47, %v1253_v28 }
 0x21e   : > { %v1255_v48 = vadd.f32 %v7559_v47, %v1254_v18 }
 0x21f   : > { %1595 = vadd.xlane.f32.xlu0 %v1594_v41 }
 0x220   : > { %1928 = vadd.xlane.f32.xlu2 %v1927_v0 }
 0x24d   : > { %v7546_v40 = vpop.xlane.xlu0 %1094 }
 0x24e   : > { %6213 = vrsqrt.f32 %v7546_v40  ;;  %vm1124_vm14 = vcmp.eq.f32.partialorder %v7546_v40, inf  ;;  %v1127_v2 = vand.u32 2147483648, %v7546_v40  ;;  %vm1126_vm15 = vcmp.eq.f32.partialorder %v7546_v40, 0.0 }
 0x24f   : > { %6215 = vlog2.f32 %v1357_v43 }
 0x250   : > { %6217 = vrcp.f32 %v7551_v4 }
 0x251   : > { %6219 = vlog2.f32 %v1381_v45 }
 0x254   : > { %v6214_v32 = vpop.eup %6213 }
 0x255   : > { %v1118_v49 = vmul.f32 %v6214_v32, %v7546_v40  ;;  %v7563_v30 = vpop.xlane.xlu0 %890  ;;  %v6216_v41 = vpop.eup %6215 }
 0x256   : > { %6221 = vrsqrt.f32 %v7563_v30  ;;  %v7570_v59 = vpop.eup %6217  ;;  %v1366_v19 = vmul.f32 0.6931472, %v6216_v41  ;;  %vm947_vm5 = vcmp.eq.f32.partialorder %v7563_v30, inf  ;;  %vm949_vm7 = vcmp.eq.f32.partialorder %v7563_v30, 0.0 }
 0x257   : > { %v1119_v62 = vmul.f32 %v6214_v32, %v1118_v49  ;;  %v6220_v60 = vpop.eup %6219  ;;  %6223 = vlog2.f32 %v1359_v55  ;;  %v1237_v9 = vmul.f32 %v7570_v59, %v7551_v4  ;;  %vm1242_vm3 = vweird.f32 %v7570_v59 }
 0x258   : > { %6225 = vlog2.f32 %v1383_v58  ;;  %v1390_v3 = vmul.f32 0.6931472, %v6220_v60  ;;  %v1247_v60 = vand.u32 2147483648, %v7551_v4  ;;  %vm7689_vm4 = vmor %vm1241_vm2, %vm1242_vm3  ;;  %v950_v43 = vand.u32 2147483648, %v7563_v30 }
 0x259   : > { %v1120_v26 = vmul.f32 0.5, %v1119_v62  ;;  %v1238_v24 = vsub.f32 1.0, %v1237_v9 }
 0x25a   : > { %v7572_v61 = vpop.xlane.xlu2 %1097  ;;  %v1405_v39 = vsub.f32 %v1366_v19, %v1390_v3  ;;  %v7676_v17 = vor.u32 1.1754944e-38, %v1247_v60 }
 0x25b   : > { %v1121_v54 = vsub.f32 1.5, %v1120_v26  ;;  %6227 = vrsqrt.f32 %v7572_v61  ;;  %v1239_v49 = vmul.f32 %v7570_v59, %v1238_v24  ;;  %vm1136_vm10 = vcmp.eq.f32.partialorder %v7572_v61, inf }
 0x25c   : > { %v7576_v12 = vpop.eup %6221  ;;  %6229 = vlog2.f32 %v1358_v8  ;;  %v7635_v62 = vmul.f32 0.5, %v1405_v39 }
 0x25d   : > { %v1122_v13 = vmul.f32 %v6214_v32, %v1121_v54  ;;  %v941_v42 = vmul.f32 %v7576_v12, %v7563_v30  ;;  %v7584_v34 = vpop.xlane.xlu0 %899  ;;  %v6224_v46 = vpop.eup %6223  ;;  %v7657_v6 = vadd.f32 %v7570_v59, %v1239_v49 }
 0x25e   : > { %6231 = vrsqrt.f32 %v7584_v34  ;;  %v6226_v25 = vpop.eup %6225  ;;  %v1370_v36 = vmul.f32 0.6931472, %v6224_v46  ;;  %vm983_vm12 = vcmp.eq.f32.partialorder %v7584_v34, inf  ;;  %vm985_vm3 = vcmp.eq.f32.partialorder %v7584_v34, 0.0 }
 0x25f   : > { %v942_v22 = vmul.f32 %v7576_v12, %v941_v42  ;;  %v1123_v14 = vmul.f32 %v1122_v13, %v7546_v40  ;;  %6233 = vlog2.f32 %v1382_v15  ;;  %v1394_v44 = vmul.f32 0.6931472, %v6226_v25 }
 0x260   : > { %v1244_v7 = vsel %vm7689_vm4, %v7570_v59, %v7657_v6 }
 0x261   : > { %v7619_v45 = vpop.eup %6227  ;;  %v943_v50 = vmul.f32 0.5, %v942_v22  ;;  %v1125_v32 = vsel %vm1124_vm14, %v7546_v40, %v1123_v14  ;;  %v1259_v40 = vsel %vm7645_vm1, %v7559_v47, %v1255_v48  ;;  %v1407_v28 = vsub.f32 %v1370_v36, %v1394_v44 }
 0x262   : > { %v7598_v53 = vpop.xlane.xlu1 %1100  ;;  %v7600_v35 = vpop.xlane.xlu2 %893  ;;  %v1130_v41 = vmul.f32 %v7619_v45, %v7572_v61  ;;  %v1128_v63 = vsel %vm1126_vm15, %v1127_v2, %v1125_v32  ;;  %v1245_v47 = vand.u32 2147483647, %v7551_v4  ;;  %v7683_v14 = vsel %vm7615_vm13, %v1263_v27, %v1259_v40 }
 0x263   : > { %6235 = vrsqrt.f32 %v7598_v53  ;;  %v6230_v31 = vpop.eup %6229  ;;  %v944_v8 = vsub.f32 1.5, %v943_v50  ;;  %v7672_v3 = vmax.f32 %v1128_v63, 1e-05  ;;  %v7697_v25 = vmul.f32 0.5, %v1407_v28 }
 0x264   : > { %6237 = vrsqrt.f32 %v7600_v35  ;;  %v7626_v0 = vpop.eup %6231  ;;  %v7666_v15 = vmul.f32 0.6931472, %v6230_v31  ;;  %v1131_v20 = vmul.f32 %v7619_v45, %v1130_v41  ;;  %v1139_v50 = vand.u32 2147483648, %v7572_v61 }
 0x265   : > { %v7629_v55 = vpop.xlane.xlu0 %902  ;;  %v6234_v58 = vpop.eup %6233  ;;  %v977_v37 = vmul.f32 %v7626_v0, %v7584_v34  ;;  %v945_v22 = vmul.f32 %v7576_v12, %v944_v8  ;;  %vm1148_vm8 = vcmp.eq.f32.partialorder %v7598_v53, inf  ;;  %v986_v2 = vand.u32 2147483648, %v7584_v34 }
 0x266   : > { %6239 = vrsqrt.f32 %v7629_v55  ;;  %v7668_v13 = vmul.f32 0.6931472, %v6234_v58  ;;  %v1132_v29 = vmul.f32 0.5, %v1131_v20  ;;  %vm1150_vm9 = vcmp.eq.f32.partialorder %v7598_v53, 0.0 }
 0x267   : > { %v978_v12 = vmul.f32 %v7626_v0, %v977_v37  ;;  %v946_v48 = vmul.f32 %v945_v22, %v7563_v30  ;;  %v1151_v58 = vand.u32 2147483648, %v7598_v53  ;;  %v962_v8 = vand.u32 2147483648, %v7600_v35 }
 0x268   : > { %v1406_v11 = vsub.f32 %v7666_v15, %v7668_v13  ;;  %v1133_v63 = vsub.f32 1.5, %v1132_v29  ;;  %vm959_vm11 = vcmp.eq.f32.partialorder %v7600_v35, inf  ;;  %vm1450_vm13 = vweird.f32 %v7672_v3 }
 0x269   : > { %v6236_v54 = vpop.eup %6235  ;;  %v979_v49 = vmul.f32 0.5, %v978_v12  ;;  %vm1138_vm15 = vcmp.eq.f32.partialorder %v7572_v61, 0.0  ;;  %vm961_vm2 = vcmp.eq.f32.partialorder %v7600_v35, 0.0 }
 0x26a   : > { %v1142_v5 = vmul.f32 %v6236_v54, %v7598_v53  ;;  %v7661_v19 = vpop.xlane.xlu1 %1103  ;;  %v7663_v9 = vpop.xlane.xlu2 %896 }
 0x26b   : > { %v7670_v42 = vpop.eup %6237  ;;  %6241 = vrsqrt.f32 %v7661_v19  ;;  %vm1160_vm14 = vcmp.eq.f32.partialorder %v7661_v19, inf  ;;  %vm1162_vm1 = vcmp.eq.f32.partialorder %v7661_v19, 0.0 }
 0x26c   : > { %v1143_v18 = vmul.f32 %v6236_v54, %v1142_v5  ;;  %v953_v46 = vmul.f32 %v7670_v42, %v7600_v35  ;;  %v7693_v24 = vpop.eup %6239  ;;  %6243 = vrsqrt.f32 %v7663_v9  ;;  %v998_v5 = vand.u32 2147483648, %v7629_v55 }
 0x26d   : > { %6245 = vrcp.f32 %v7672_v3  ;;  %v989_v31 = vmul.f32 %v7693_v24, %v7629_v55 }
 0x26e   : > { %v1144_v21 = vmul.f32 0.5, %v1143_v18  ;;  %v954_v39 = vmul.f32 %v7670_v42, %v953_v46  ;;  %v980_v18 = vsub.f32 1.5, %v979_v49 }
 0x26f   : > { %v990_v40 = vmul.f32 %v7693_v24, %v989_v31  ;;  %v1134_v31 = vmul.f32 %v7619_v45, %v1133_v63 }
 0x270   : > { %v1145_v36 = vsub.f32 1.5, %v1144_v21  ;;  %v955_v44 = vmul.f32 0.5, %v954_v39  ;;  %v1235_v21 = vmul.f32 %v7633_v57, %v7672_v3  ;;  %v981_v63 = vmul.f32 %v7626_v0, %v980_v18 }
 0x271   : > { %v6242_v32 = vpop.eup %6241 }
 0x272   : > { %v1146_v27 = vmul.f32 %v6236_v54, %v1145_v36  ;;  %v1154_v41 = vmul.f32 %v6242_v32, %v7661_v19  ;;  %v7719_v26 = vpop.xlane.xlu1 %1106  ;;  %v7721_v60 = vpop.eup %6243  ;;  %v948_v54 = vsel %vm947_vm5, %v7563_v30, %v946_v48  ;;  %v956_v22 = vsub.f32 1.5, %v955_v44 }
 0x273   : > { %6247 = vrsqrt.f32 %v7719_v26  ;;  %v7731_v20 = vpop.eup %6245  ;;  %v965_v46 = vmul.f32 %v7721_v60, %v7663_v9  ;;  %v7735_v12 = vpop.xlane.xlu2 %1112  ;;  %v991_v48 = vmul.f32 0.5, %v990_v40  ;;  %v1454_v36 = vand.u32 2147483647, %v7672_v3 }
 0x274   : > { %v1147_v37 = vmul.f32 %v1146_v27, %v7598_v53  ;;  %v1155_v28 = vmul.f32 %v6242_v32, %v1154_v41  ;;  %v951_v44 = vsel %vm949_vm7, %v950_v43, %v948_v54  ;;  %v1456_v27 = vand.u32 2147483648, %v7672_v3 }
 0x275   : > { %v966_v49 = vmul.f32 %v7721_v60, %v965_v46  ;;  %6249 = vrsqrt.f32 %v7735_v12  ;;  %v1446_v45 = vmul.f32 %v7731_v20, %v7672_v3  ;;  %v957_v43 = vmul.f32 %v7670_v42, %v956_v22 }
 0x276   : > { %v1149_v39 = vsel %vm1148_vm8, %v7598_v53, %v1147_v37  ;;  %v1156_v29 = vmul.f32 0.5, %v1155_v28  ;;  %v1421_v53 = vmul.f32 %v7635_v62, %v1235_v21  ;;  %v992_v54 = vsub.f32 1.5, %v991_v48 }
 0x277   : > { %v1152_v57 = vsel %vm1150_vm9, %v1151_v58, %v1149_v39  ;;  %v967_v40 = vmul.f32 0.5, %v966_v49  ;;  %v1135_v28 = vmul.f32 %v1134_v31, %v7572_v61  ;;  %v7767_v22 = vmax.f32 %v951_v44, 1e-05 }
 0x278   : > { %v1157_v41 = vsub.f32 1.5, %v1156_v29  ;;  %v7764_v46 = vmax.f32 %v1152_v57, 1e-05  ;;  %v958_v18 = vmul.f32 %v957_v43, %v7600_v35  ;;  %v982_v21 = vmul.f32 %v981_v63, %v7584_v34 }
 0x279   : > { %v6248_v30 = vpop.eup %6247  ;;  %v968_v42 = vsub.f32 1.5, %v967_v40  ;;  %v1163_v39 = vand.u32 2147483648, %v7661_v19  ;;  %vm995_vm5 = vcmp.eq.f32.partialorder %v7629_v55, inf  ;;  %6251 = vtanh.f32 %v1421_v53 }
 0x27a   : > { %v1158_v58 = vmul.f32 %v6242_v32, %v1157_v41  ;;  %v1166_v37 = vmul.f32 %v6248_v30, %v7719_v26  ;;  %v1447_v32 = vsub.f32 1.0, %v1446_v45  ;;  %v993_v48 = vmul.f32 %v7693_v24, %v992_v54 }
 0x27b   : > { %v6250_v29 = vpop.eup %6249  ;;  %vm1451_vm7 = vweird.f32 %v7731_v20  ;;  %6253 = vrcp.f32 %v7764_v46  ;;  %v969_v57 = vmul.f32 %v7721_v60, %v968_v42  ;;  %v1137_v45 = vsel %vm1136_vm10, %v7572_v61, %v1135_v28  ;;  %v7791_v63 = vpop.xlane.xlu2 %1115 }
 0x27c   : > { %v1159_v0 = vmul.f32 %v1158_v58, %v7661_v19  ;;  %v1167_v62 = vmul.f32 %v6248_v30, %v1166_v37  ;;  %v1448_v44 = vmul.f32 %v7731_v20, %v1447_v32  ;;  %v1190_v41 = vmul.f32 %v6250_v29, %v7735_v12  ;;  %vm1452_vm10 = vmor %vm1450_vm13, %vm1451_vm7  ;;  %v1575_v28 = vpop.xlane.xlu1 %1574 }
 0x27d   : > { %vm971_vm8 = vcmp.eq.f32.partialorder %v7663_v9, inf  ;;  %vm997_vm9 = vcmp.eq.f32.partialorder %v7629_v55, 0.0  ;;  %v960_v40 = vsel %vm959_vm11, %v7600_v35, %v958_v18  ;;  %v984_v60 = vsel %vm983_vm12, %v7584_v34, %v982_v21  ;;  %v7809_v21 = vpop.xlane.xlu0 %1109 }
 0x27e   : > { %v1168_v31 = vmul.f32 0.5, %v1167_v62  ;;  %v1161_v49 = vsel %vm1160_vm14, %v7661_v19, %v1159_v0  ;;  %v1449_v43 = vadd.f32 %v7731_v20, %v1448_v44  ;;  %v1191_v53 = vmul.f32 %v6250_v29, %v1190_v41 }
 0x27f   : > { %v1457_v58 = vor.u32 1.1754944e-38, %v1456_v27  ;;  %v1164_v54 = vsel %vm1162_vm1, %v1163_v39, %v1161_v49  ;;  %v994_v37 = vmul.f32 %v993_v48, %v7629_v55  ;;  %vm1455_vm11 = vcmp.eq.f32.partialorder %v1454_v36, 8.507059e+37  ;;  %v6252_v0 = vpop.eup %6251 }
 0x280   : > { %v1169_v24 = vsub.f32 1.5, %v1168_v31  ;;  %v1453_v42 = vsel %vm1452_vm10, %v7731_v20, %v1449_v43  ;;  %v970_v62 = vmul.f32 %v969_v57, %v7663_v9  ;;  %v1192_v32 = vmul.f32 0.5, %v1191_v53 }
 0x281   : > { %v1458_v18 = vsel %vm1455_vm11, %v1457_v58, %v1453_v42  ;;  %6255 = vrsqrt.f32 %v7791_v63  ;;  %v1140_v19 = vsel %vm1138_vm15, %v1139_v50, %v1137_v45  ;;  %v1437_v3 = vmul.f32 %v6252_v0, %v7478_v10  ;;  %v7817_v36 = vpop.eup %6253 }
 0x282   : > { %6257 = vrcp.f32 %v7767_v22  ;;  %v1170_v20 = vmul.f32 %v6248_v30, %v1169_v24  ;;  %v963_v27 = vsel %vm961_vm2, %v962_v8, %v960_v40  ;;  %v987_v39 = vsel %vm985_vm3, %v986_v2, %v984_v60 }
 0x283   : > { %v1193_v48 = vsub.f32 1.5, %v1192_v32  ;;  %vm1597_vm12 = vcmp.eq.f32.partialorder %v1575_v28, 0.0  ;;  %v7827_v61 = vmax.f32 %v1164_v54, 1e-05  ;;  %v996_v10 = vsel %vm995_vm5, %v7629_v55, %v994_v37 }
 0x284   : > { %v1459_v50 = vmul.f32 %v1458_v18, %v1437_v3  ;;  %6259 = vrsqrt.f32 %v7809_v21  ;;  %v972_v35 = vsel %vm971_vm8, %v7663_v9, %v970_v62  ;;  %vm973_vm13 = vcmp.eq.f32.partialorder %v7663_v9, 0.0 }
 0x285   : > { %v974_v34 = vand.u32 2147483648, %v7663_v9  ;;  %v1194_v2 = vmul.f32 %v6250_v29, %v1193_v48  ;;  %vm7840_vm14 = vcmp.eq.f32.partialorder %v1245_v47, 8.507059e+37  ;;  %v7844_v30 = vmax.f32 %v1140_v19, 1e-05 }
 0x286   : > { %v1171_v31 = vmul.f32 %v1170_v20, %v7719_v26  ;;  %v7847_v44 = vsel %vm1597_vm12, 0.0, %v1459_v50  ;;  %v1476_v49 = vmul.f32 %v7817_v36, %v7764_v46  ;;  %v7853_v41 = vmax.f32 %v963_v27, 1e-05 }
 0x287   : > { %v7851_v57 = vpop.eup %6255  ;;  %v7855_v9 = vmax.f32 %v987_v39, 1e-05  ;;  %v999_v4 = vsel %vm997_vm9, %v998_v5, %v996_v10  ;;  %v1629_v47 = vmul.f32 %v7847_v44, %v7847_v44  ;;  %6261 = vrcp.f32 %v7827_v61 }
 0x288   : > { %v7863_v29 = vpop.eup %6257  ;;  %v975_v45 = vsel %vm973_vm13, %v974_v34, %v972_v35  ;;  %v1202_v24 = vmul.f32 %v7851_v57, %v7791_v63  ;;  %v1265_v43 = vmul.f32 %v7683_v14, %v7764_v46  ;;  %vm1172_vm15 = vcmp.eq.f32.partialorder %v7719_v26, inf }
 0x289   : > { %v1195_v40 = vmul.f32 %v1194_v2, %v7735_v12  ;;  %v1637_v55 = vsel %vm311_vm0, %v1629_v47, 0.0  ;;  %v1477_v5 = vsub.f32 1.0, %v1476_v49  ;;  %6263 = vrcp.f32 %v7844_v30 }
 0x28a   : > { %v6260_v60 = vpop.eup %6259  ;;  %v7874_v53 = vmax.f32 %v999_v4, 1e-05  ;;  %v1173_v58 = vsel %vm1172_vm15, %v7719_v26, %v1171_v31  ;;  %vm1174_vm1 = vcmp.eq.f32.partialorder %v7719_v26, 0.0  ;;  %1638 = vadd.xlane.f32.xlu1 %v1637_v55  ;;  %6265 = vrcp.f32 %v7855_v9 }
 0x28b   : > { %v7879_v14 = vmax.f32 %v975_v45, 1e-05  ;;  %v1175_v54 = vand.u32 2147483648, %v7719_v26  ;;  %v1178_v37 = vmul.f32 %v6260_v60, %v7809_v21  ;;  %6267 = vrcp.f32 %v7853_v41 }
 0x28c   : > { %vm1196_vm2 = vcmp.eq.f32.partialorder %v7735_v12, inf  ;;  %v1203_v28 = vmul.f32 %v7851_v57, %v1202_v24  ;;  %v1423_v42 = vmul.f32 %v7697_v25, %v1265_v43  ;;  %v1478_v18 = vmul.f32 %v7817_v36, %v1477_v5 }
 0x28d   : > { %v1176_v0 = vsel %vm1174_vm1, %v1175_v54, %v1173_v58  ;;  %v1197_v62 = vsel %vm1196_vm2, %v7735_v12, %v1195_v40  ;;  %v1179_v32 = vmul.f32 %v6260_v60, %v1178_v37  ;;  %v7889_v19 = vpop.eup %6261  ;;  %6269 = vrcp.f32 %v7874_v53 }
 0x28e   : > { %v1199_v26 = vand.u32 2147483648, %v7735_v12  ;;  %v1249_v25 = vsel %vm7840_vm14, %v7676_v17, %v1244_v7  ;;  %v1414_v20 = vmul.f32 0.5, %v1406_v11  ;;  %6271 = vrcp.f32 %v7879_v14 }
 0x28f   : > { %vm1198_vm3 = vcmp.eq.f32.partialorder %v7735_v12, 0.0  ;;  %v1180_v3 = vmul.f32 0.5, %v1179_v32  ;;  %v1267_v27 = vmul.f32 %v7863_v29, %v7767_v22  ;;  %v7908_v51 = vpop.eup %6263  ;;  %v7910_v39 = vmax.f32 %v1176_v0, 1e-05 }
 0x290   : > { %v1200_v59 = vsel %vm1198_vm3, %v1199_v26, %v1197_v62  ;;  %v1204_v6 = vmul.f32 0.5, %v1203_v28  ;;  %6273 = vtanh.f32 %v1423_v42  ;;  %v7912_v17 = vpop.eup %6265  ;;  %v1479_v15 = vadd.f32 %v7817_v36, %v1478_v18 }
 0x291   : > { %v1181_v7 = vsub.f32 1.5, %v1180_v3  ;;  %vm1481_vm4 = vweird.f32 %v7817_v36  ;;  %v1491_v13 = vmul.f32 %v7889_v19, %v7827_v61  ;;  %v7918_v11 = vpop.eup %6267  ;;  %v1211_v12 = vand.u32 2147483648, %v7791_v63 }
 0x292   : > { %vm1480_vm5 = vweird.f32 %v7764_v46  ;;  %v1484_v48 = vand.u32 2147483647, %v7764_v46  ;;  %v1486_v10 = vand.u32 2147483648, %v7764_v46  ;;  %v7924_v50 = vmax.f32 %v1200_v59, 1e-05 }
 0x293   : > { %v1182_v35 = vmul.f32 %v6260_v60, %v1181_v7  ;;  %v1268_v34 = vsub.f32 1.0, %v1267_v27  ;;  %v6060_v2 = vclamps-f32 %v7767_v22, 0.99999  ;;  %v7927_v8 = vpop.eup %6269  ;;  %v1205_v31 = vsub.f32 1.5, %v1204_v6  ;;  %vm7934_vm9 = vmor %vm1480_vm5, %vm1481_vm4 }
 0x294   : > { %vm1184_vm7 = vcmp.eq.f32.partialorder %v7809_v21, inf  ;;  %vm1186_vm8 = vcmp.eq.f32.partialorder %v7809_v21, 0.0  ;;  %v1187_v49 = vand.u32 2147483648, %v7809_v21  ;;  %v7938_v46 = vpop.eup %6271  ;;  %6275 = vrcp.f32 %v7910_v39 }
 0x295   : > { %v1183_v47 = vmul.f32 %v1182_v35, %v7809_v21  ;;  %v1483_v45 = vsel %vm7934_vm9, %v7817_v36, %v1479_v15  ;;  %v1492_v24 = vsub.f32 1.0, %v1491_v13  ;;  %vm1485_vm10 = vcmp.eq.f32.partialorder %v1484_v48, 8.507059e+37 }
 0x296   : > { %v6274_v43 = vpop.eup %6273  ;;  %v1487_v40 = vor.u32 1.1754944e-38, %v1486_v10  ;;  %v1360_v55 = vadd.f32 1.0, %v6060_v2  ;;  %v1384_v5 = vsub.f32 1.0, %v6060_v2  ;;  %6277 = vrcp.f32 %v7924_v50 }
 0x297   : > { %v1185_v60 = vsel %vm1184_vm7, %v7809_v21, %v1183_v47  ;;  %v1269_v58 = vmul.f32 %v7863_v29, %v1268_v34  ;;  %v1250_v54 = vmul.f32 %v1249_v25, %v7844_v30  ;;  %v1206_v37 = vmul.f32 %v7851_v57, %v1205_v31  ;;  %v7960_v25 = vpop.xlane.xlu1 %1580 }
 0x298   : > { %v1488_v28 = vsel %vm1485_vm10, %v1487_v40, %v1483_v45  ;;  %v1501_v42 = vand.u32 2147483648, %v7827_v61  ;;  %v1461_v36 = vmul.f32 %v7908_v51, %v7844_v30  ;;  %v1439_v0 = vmul.f32 %v6274_v43, %v7490_v23 }
 0x299   : > { %v1493_v62 = vmul.f32 %v7889_v19, %v1492_v24  ;;  %6279 = vlog2.f32 %v1360_v55  ;;  %v1422_v32 = vmul.f32 %v1414_v20, %v1250_v54  ;;  %v1188_v18 = vsel %vm1186_vm8, %v1187_v49, %v1185_v60  ;;  %v1578_v55 = vpop.xlane.xlu0 %1577 }
 0x29a   : > { %vm1272_vm11 = vweird.f32 %v7863_v29  ;;  %6281 = vlog2.f32 %v1384_v5  ;;  %v1462_v26 = vsub.f32 1.0, %v1461_v36  ;;  %v7958_v57 = vpop.eup %6275  ;;  %v1270_v3 = vadd.f32 %v7863_v29, %v1269_v58 }
 0x29b   : > { %v1275_v27 = vand.u32 2147483647, %v7767_v22  ;;  %vm1466_vm12 = vweird.f32 %v7908_v51  ;;  %v1469_v23 = vand.u32 2147483647, %v7844_v30  ;;  %6283 = vtanh.f32 %v1422_v32 }
 0x29c   : > { %v1463_v21 = vmul.f32 %v7908_v51, %v1462_v26  ;;  %v1471_v20 = vand.u32 2147483648, %v7844_v30  ;;  %v1312_v59 = vmul.f32 %v7912_v17, %v7855_v9  ;;  %v7970_v6 = vpop.eup %6277  ;;  %v1207_v7 = vmul.f32 %v1206_v37, %v7791_v63 }
 0x29d   : > { %vm1208_vm13 = vcmp.eq.f32.partialorder %v7791_v63, inf  ;;  %v7974_v15 = vmax.f32 %v1188_v18, 1e-05  ;;  %vm1496_vm14 = vweird.f32 %v7889_v19  ;;  %vm1271_vm15 = vweird.f32 %v7767_v22 }
 0x29e   : > { %v1277_v13 = vand.u32 2147483648, %v7767_v22  ;;  %vm1599_vm1 = vcmp.eq.f32.partialorder %v7960_v25, 0.0  ;;  %vm7982_vm2 = vmor %vm1271_vm15, %vm1272_vm11  ;;  %v1464_v10 = vadd.f32 %v7908_v51, %v1463_v21  ;;  %vm1465_vm3 = vweird.f32 %v7844_v30 }
 0x29f   : > { %v1313_v35 = vsub.f32 1.0, %v1312_v59  ;;  %v6063_v34 = vclamps-f32 %v7855_v9, 0.99999  ;;  %v6280_v2 = vpop.eup %6279  ;;  %v1489_v31 = vmul.f32 %v1488_v28, %v1439_v0  ;;  %v7990_v49 = vadd.f32 %v7889_v19, %v1493_v62  ;;  %vm1467_vm7 = vmor %vm1465_vm3, %vm1466_vm12 }
 0x2a0   : > { %vm1495_vm4 = vweird.f32 %v7827_v61  ;;  %v1274_v22 = vsel %vm7982_vm2, %v7863_v29, %v1270_v3  ;;  %vm7996_vm5 = vcmp.eq.f32.partialorder %v1275_v27, 8.507059e+37  ;;  %v6282_v30 = vpop.eup %6281  ;;  %v1468_v47 = vsel %vm1467_vm7, %v7908_v51, %v1464_v10 }
 0x2a1   : > { %vm1470_vm8 = vcmp.eq.f32.partialorder %v1469_v23, 8.507059e+37  ;;  %v1472_v45 = vor.u32 1.1754944e-38, %v1471_v20  ;;  %v1314_v24 = vmul.f32 %v7912_v17, %v1313_v35  ;;  %v1372_v43 = vmul.f32 0.6931472, %v6280_v2  ;;  %v6284_v29 = vpop.eup %6283 }
 0x2a2   : > { %v1396_v40 = vmul.f32 0.6931472, %v6282_v30  ;;  %v1363_v5 = vadd.f32 1.0, %v6063_v34  ;;  %v1387_v60 = vsub.f32 1.0, %v6063_v34  ;;  %6285 = vrcp.f32 %v7974_v15 }
 0x2a3   : > { %v1278_v58 = vor.u32 1.1754944e-38, %v1277_v13  ;;  %v1473_v54 = vsel %vm1470_vm8, %v1472_v45, %v1468_v47  ;;  %vm1317_vm9 = vweird.f32 %v7912_v17  ;;  %vm1210_vm10 = vcmp.eq.f32.partialorder %v7791_v63, 0.0 }
 0x2a4   : > { %v1438_v51 = vmul.f32 %v6284_v29, %v7484_v1  ;;  %v1315_v37 = vadd.f32 %v7912_v17, %v1314_v24  ;;  %6287 = vlog2.f32 %v1363_v5  ;;  %v1536_v28 = vmul.f32 %v7970_v6, %v7924_v50 }
 0x2a5   : > { %v1279_v36 = vsel %vm7996_vm5, %v1278_v58, %v1274_v22  ;;  %vm1598_vm11 = vcmp.eq.f32.partialorder %v1578_v55, 0.0  ;;  %v1322_v0 = vand.u32 2147483648, %v7855_v9  ;;  %6289 = vlog2.f32 %v1387_v60 }
 0x2a6   : > { %v1408_v62 = vsub.f32 %v1372_v43, %v1396_v40  ;;  %v1474_v32 = vmul.f32 %v1473_v54, %v1438_v51  ;;  %vm1316_vm12 = vweird.f32 %v7855_v9  ;;  %v1320_v18 = vand.u32 2147483647, %v7855_v9 }
 0x2a7   : > { %v1209_v1 = vsel %vm1208_vm13, %v7791_v63, %v1207_v7  ;;  %v1499_v26 = vand.u32 2147483647, %v7827_v61  ;;  %v1502_v3 = vor.u32 1.1754944e-38, %v1501_v42  ;;  %vm8024_vm15 = vmor %vm1316_vm12, %vm1317_vm9  ;;  %v1297_v23 = vmul.f32 %v7938_v46, %v7879_v14 }
 0x2a8   : > { %v8032_v9 = vsel %vm1599_vm1, 0.0, %v1489_v31  ;;  %v8034_v21 = vsel %vm1598_vm11, 0.0, %v1474_v32  ;;  %v1319_v20 = vsel %vm8024_vm15, %v7912_v17, %v1315_v37  ;;  %v1537_v42 = vsub.f32 1.0, %v1536_v28  ;;  %v8039_v59 = vpop.eup %6285  ;;  %vm8045_vm13 = vmor %vm1495_vm4, %vm1496_vm14  ;;  %v1593_v37 = vpop.xlane.xlu1 %1592 }
 0x2a9   : > { %v1280_v25 = vmul.f32 %v1279_v36, %v7827_v61  ;;  %v1630_v13 = vmul.f32 %v8034_v21, %v8034_v21  ;;  %v1323_v48 = vor.u32 1.1754944e-38, %v1322_v0  ;;  %v1298_v10 = vsub.f32 1.0, %v1297_v23 }
 0x2aa   : > { %v6288_v35 = vpop.eup %6287  ;;  %v1498_v17 = vsel %vm8045_vm13, %v7889_v19, %v7990_v49  ;;  %v1416_v34 = vmul.f32 0.5, %v1408_v62  ;;  %vm1321_vm1 = vcmp.eq.f32.partialorder %v1320_v18, 8.507059e+37  ;;  %v6062_v2 = vclamps-f32 %v7879_v14, 0.99999 }
 0x2ab   : > { %v6290_v31 = vpop.eup %6289  ;;  %vm8057_vm14 = vcmp.eq.f32.partialorder %v1499_v26, 8.507059e+37  ;;  %v1640_v61 = vsel %vm311_vm0, %v1630_v13, 0.0  ;;  %v1324_v4 = vsel %vm1321_vm1, %v1323_v48, %v1319_v20  ;;  %v1378_v30 = vmul.f32 0.6931472, %v6288_v35  ;;  %v1584_v20 = vpop.xlane.xlu2 %1583 }
 0x2ac   : > { %v1299_v47 = vmul.f32 %v7938_v46, %v1298_v10  ;;  %1641 = vadd.xlane.f32.xlu0 %v1640_v61  ;;  %v1402_v45 = vmul.f32 0.6931472, %v6290_v31  ;;  %v1538_v24 = vmul.f32 %v7970_v6, %v1537_v42  ;;  %v1362_v19 = vadd.f32 1.0, %v6062_v2 }
 0x2ad   : > { %v1386_v49 = vsub.f32 1.0, %v6062_v2  ;;  %v1212_v43 = vsel %vm1210_vm10, %v1211_v12, %v1209_v1  ;;  %v1424_v40 = vmul.f32 %v1416_v34, %v1280_v25  ;;  %vm1302_vm2 = vweird.f32 %v7938_v46 }
 0x2ae   : > { %v1300_v55 = vadd.f32 %v7938_v46, %v1299_v47  ;;  %v1325_v5 = vmul.f32 %v1324_v4, %v7924_v50  ;;  %v1411_v60 = vsub.f32 %v1378_v30, %v1402_v45  ;;  %v1307_v29 = vand.u32 2147483648, %v7879_v14 }
 0x2af   : > { %6291 = vlog2.f32 %v1362_v19  ;;  %vm1301_vm3 = vweird.f32 %v7879_v14  ;;  %v1305_v58 = vand.u32 2147483647, %v7879_v14  ;;  %v1521_v63 = vmul.f32 %v8039_v59, %v7974_v15 }
 0x2b0   : > { %6293 = vlog2.f32 %v1386_v49  ;;  %v8076_v12 = vmax.f32 %v1212_v43, 1e-05  ;;  %v1419_v54 = vmul.f32 0.5, %v1411_v60  ;;  %v1539_v51 = vadd.f32 %v7970_v6, %v1538_v24  ;;  %vm8080_vm5 = vmor %vm1301_vm3, %vm1302_vm2 }
 0x2b1   : > { %vm1541_vm4 = vweird.f32 %v7970_v6  ;;  %6295 = vtanh.f32 %v1424_v40  ;;  %v1546_v28 = vand.u32 2147483648, %v7924_v50  ;;  %v1304_v14 = vsel %vm8080_vm5, %v7938_v46, %v1300_v55 }
 0x2b2   : > { %v1282_v36 = vmul.f32 %v7918_v11, %v7853_v41  ;;  %v1427_v0 = vmul.f32 %v1419_v54, %v1325_v5  ;;  %vm1540_vm7 = vweird.f32 %v7924_v50  ;;  %v1544_v62 = vand.u32 2147483647, %v7924_v50 }
 0x2b3   : > { %v1308_v32 = vor.u32 1.1754944e-38, %v1307_v29  ;;  %vm8092_vm8 = vmor %vm1540_vm7, %vm1541_vm4  ;;  %vm1306_vm9 = vcmp.eq.f32.partialorder %v1305_v58, 8.507059e+37  ;;  %v1522_v1 = vsub.f32 1.0, %v1521_v63  ;;  %v6061_v27 = vclamps-f32 %v7853_v41, 0.99999 }
 0x2b4   : > { %v1283_v26 = vsub.f32 1.0, %v1282_v36  ;;  %6297 = vrcp.f32 %v8076_v12  ;;  %v1503_v46 = vsel %vm8057_vm14, %v1502_v3, %v1498_v17  ;;  %v1543_v50 = vsel %vm8092_vm8, %v7970_v6, %v1539_v51 }
 0x2b5   : > { %v6292_v23 = vpop.eup %6291  ;;  %v1309_v42 = vsel %vm1306_vm9, %v1308_v32, %v1304_v14  ;;  %6299 = vtanh.f32 %v1427_v0  ;;  %v1547_v25 = vor.u32 1.1754944e-38, %v1546_v28  ;;  %vm1545_vm10 = vcmp.eq.f32.partialorder %v1544_v62, 8.507059e+37  ;;  %v1587_v14 = vpop.xlane.xlu0 %1586 }
 0x2b6   : > { %v6294_v7 = vpop.eup %6293  ;;  %v1376_v13 = vmul.f32 0.6931472, %v6292_v23  ;;  %v1284_v48 = vmul.f32 %v7918_v11, %v1283_v26  ;;  %v1361_v35 = vadd.f32 1.0, %v6061_v27  ;;  %v1385_v34 = vsub.f32 1.0, %v6061_v27 }
 0x2b7   : > { %v1400_v10 = vmul.f32 0.6931472, %v6294_v7  ;;  %v6296_v2 = vpop.eup %6295  ;;  %vm1600_vm11 = vcmp.eq.f32.partialorder %v1584_v20, 0.0  ;;  %v1548_v31 = vsel %vm1545_vm10, %v1547_v25, %v1543_v50  ;;  %v1310_v3 = vmul.f32 %v1309_v42, %v7974_v15  ;;  %v1590_v50 = vpop.xlane.xlu2 %1589 }
 0x2b8   : > { %v1523_v17 = vmul.f32 %v8039_v59, %v1522_v1  ;;  %vm1525_vm12 = vweird.f32 %v7974_v15  ;;  %v1285_v22 = vadd.f32 %v7918_v11, %v1284_v48  ;;  %vm1287_vm15 = vweird.f32 %v7918_v11 }
 0x2b9   : > { %v1410_v6 = vsub.f32 %v1376_v13, %v1400_v10  ;;  %6301 = vlog2.f32 %v1361_v35  ;;  %v1531_v61 = vand.u32 2147483648, %v7974_v15  ;;  %v1290_v4 = vand.u32 2147483647, %v7853_v41 }
 0x2ba   : > { %v1292_v30 = vand.u32 2147483648, %v7853_v41  ;;  %6303 = vlog2.f32 %v1385_v34  ;;  %v8112_v47 = vpop.eup %6297  ;;  %v1440_v45 = vmul.f32 %v6296_v2, %v7497_v52  ;;  %vm1286_vm13 = vweird.f32 %v7853_v41 }
 0x2bb   : > { %v1418_v24 = vmul.f32 0.5, %v1410_v6  ;;  %v1506_v19 = vmul.f32 %v7958_v57, %v7910_v39  ;;  %v6300_v49 = vpop.eup %6299  ;;  %v1524_v43 = vadd.f32 %v8039_v59, %v1523_v17  ;;  %vm1526_vm1 = vweird.f32 %v8039_v59  ;;  %vm8123_vm14 = vmor %vm1286_vm13, %vm1287_vm15 }
 0x2bc   : > { %v1529_v40 = vand.u32 2147483647, %v7974_v15  ;;  %v1631_v52 = vmul.f32 %v8032_v9, %v8032_v9  ;;  %v1504_v41 = vmul.f32 %v1503_v46, %v1440_v45  ;;  %v1289_v60 = vsel %vm8123_vm14, %v7918_v11, %v1285_v22  ;;  %vm8140_vm3 = vmor %vm1525_vm12, %vm1526_vm1 }
 0x2bd   : > { %v1426_v5 = vmul.f32 %v1418_v24, %v1310_v3  ;;  %v1327_v29 = vmul.f32 %v7927_v8, %v7874_v53  ;;  %v1532_v58 = vor.u32 1.1754944e-38, %v1531_v61  ;;  %vm1291_vm2 = vcmp.eq.f32.partialorder %v1290_v4, 8.507059e+37 }
 0x2be   : > { %v1293_v63 = vor.u32 1.1754944e-38, %v1292_v30  ;;  %v1643_v54 = vsel %vm311_vm0, %v1631_v52, 0.0  ;;  %v1443_v28 = vmul.f32 %v6300_v49, %v7501_v33  ;;  %v1507_v11 = vsub.f32 1.0, %v1506_v19 }
 0x2bf   : > { %v6302_v51 = vpop.eup %6301  ;;  %6305 = vtanh.f32 %v1426_v5  ;;  %1644 = vadd.xlane.f32.xlu1 %v1643_v54  ;;  %v1328_v36 = vsub.f32 1.0, %v1327_v29  ;;  %v1528_v62 = vsel %vm8140_vm3, %v8039_v59, %v1524_v43  ;;  %v6064_v33 = vclamps-f32 %v7874_v53, 0.99999 }
 0x2c0   : > { %v6304_v0 = vpop.eup %6303  ;;  %v1294_v32 = vsel %vm1291_vm2, %v1293_v63, %v1289_v60  ;;  %v1374_v18 = vmul.f32 0.6931472, %v6302_v51  ;;  %v8149_v1 = vsel %vm1600_vm11, 0.0, %v1504_v41  ;;  %v1549_v15 = vmul.f32 %v1548_v31, %v1443_v28 }
 0x2c1   : > { %v1398_v26 = vmul.f32 0.6931472, %v6304_v0  ;;  %v1329_v27 = vmul.f32 %v7927_v8, %v1328_v36  ;;  %vm1603_vm4 = vcmp.eq.f32.partialorder %v1593_v37, 0.0  ;;  %vm1530_vm5 = vcmp.eq.f32.partialorder %v1529_v40, 8.507059e+37 }
 0x2c2   : > { %v1364_v23 = vadd.f32 1.0, %v6064_v33  ;;  %v1388_v46 = vsub.f32 1.0, %v6064_v33  ;;  %v1533_v42 = vsel %vm1530_vm5, %v1532_v58, %v1528_v62  ;;  %v1295_v7 = vmul.f32 %v1294_v32, %v7910_v39 }
 0x2c3   : > { %v1409_v59 = vsub.f32 %v1374_v18, %v1398_v26  ;;  %v1508_v25 = vmul.f32 %v7958_v57, %v1507_v11  ;;  %v1330_v13 = vadd.f32 %v7927_v8, %v1329_v27  ;;  %vm1332_vm7 = vweird.f32 %v7927_v8 }
 0x2c4   : > { %6307 = vlog2.f32 %v1364_v23  ;;  %v1632_v20 = vmul.f32 %v8149_v1, %v8149_v1  ;;  %v8158_v10 = vsel %vm1603_vm4, 0.0, %v1549_v15  ;;  %v1337_v34 = vand.u32 2147483648, %v7874_v53 }
 0x2c5   : > { %v6306_v48 = vpop.eup %6305  ;;  %v1417_v35 = vmul.f32 0.5, %v1409_v59  ;;  %6309 = vlog2.f32 %v1388_v46  ;;  %vm1602_vm8 = vcmp.eq.f32.partialorder %v1590_v50, 0.0  ;;  %vm1331_vm9 = vweird.f32 %v7874_v53  ;;  %v1596_v50 = vpop.xlane.xlu0 %1595 }
 0x2c6   : > { %v1442_v2 = vmul.f32 %v6306_v48, %v7516_v56  ;;  %v1335_v31 = vand.u32 2147483647, %v7874_v53  ;;  %vm1511_vm10 = vweird.f32 %v7958_v57  ;;  %vm8165_vm11 = vmor %vm1331_vm9, %vm1332_vm7  ;;  %v1551_v6 = vmul.f32 %v8112_v47, %v8076_v12 }
 0x2c7   : > { %v1425_v3 = vmul.f32 %v1417_v35, %v1295_v7  ;;  %v1646_v22 = vsel %vm311_vm0, %v1632_v20, 0.0  ;;  %v1509_v56 = vadd.f32 %v7958_v57, %v1508_v25  ;;  %v1334_v4 = vsel %vm8165_vm11, %v7927_v8, %v1330_v13 }
 0x2c8   : > { %v1534_v61 = vmul.f32 %v1533_v42, %v1442_v2  ;;  %1647 = vadd.xlane.f32.xlu2 %v1646_v22  ;;  %v1635_v53 = vmul.f32 %v8158_v10, %v8158_v10  ;;  %vm1510_vm12 = vweird.f32 %v7910_v39  ;;  %v1516_v30 = vand.u32 2147483648, %v7910_v39  ;;  %v1929_v42 = vpop.xlane.xlu2 %1928 }
 0x2c9   : > { %6311 = vtanh.f32 %v1425_v3  ;;  %v1338_v45 = vor.u32 1.1754944e-38, %v1337_v34  ;;  %v1514_v49 = vand.u32 2147483647, %v7910_v39  ;;  %vm1336_vm15 = vcmp.eq.f32.partialorder %v1335_v31, 8.507059e+37  ;;  %vm1512_vm13 = vmor %vm1510_vm12, %vm1511_vm10 }
 0x2ca   : > { %v6308_v24 = vpop.eup %6307  ;;  %v8181_v19 = vsel %vm1602_vm8, 0.0, %v1534_v61  ;;  %v1655_v43 = vsel %vm311_vm0, %v1635_v53, 0.0  ;;  %v1552_v52 = vsub.f32 1.0, %v1551_v6  ;;  %v1513_v5 = vsel %vm1512_vm13, %v7958_v57, %v1509_v56 }
 0x2cb   : > { %v6310_v8 = vpop.eup %6309  ;;  %v1339_v40 = vsel %vm1336_vm15, %v1338_v45, %v1334_v4  ;;  %v1380_v55 = vmul.f32 0.6931472, %v6308_v24  ;;  %1656 = vadd.xlane.f32.xlu1 %v1655_v43  ;;  %v1634_v41 = vmul.f32 %v8181_v19, %v8181_v19  ;;  %v1517_v29 = vor.u32 1.1754944e-38, %v1516_v30 }
 0x2cc   : > { %v1404_v60 = vmul.f32 0.6931472, %v6310_v8  ;;  %vm1515_vm1 = vcmp.eq.f32.partialorder %v1514_v49, 8.507059e+37  ;;  %v1340_v58 = vmul.f32 %v1339_v40, %v8076_v12  ;;  %v1553_v37 = vmul.f32 %v8112_v47, %v1552_v52 }
 0x2cd   : > { %v1652_v39 = vsel %vm311_vm0, %v1634_v41, 0.0  ;;  %v1518_v51 = vsel %vm1515_vm1, %v1517_v29, %v1513_v5  ;;  %vm1601_vm14 = vcmp.eq.f32.partialorder %v1587_v14, 0.0  ;;  %vm1556_vm2 = vweird.f32 %v8112_v47 }
 0x2ce   : > { %v1412_v63 = vsub.f32 %v1380_v55, %v1404_v60  ;;  %v1554_v57 = vadd.f32 %v8112_v47, %v1553_v37  ;;  %v1561_v32 = vand.u32 2147483648, %v8076_v12  ;;  %vm1555_vm3 = vweird.f32 %v8076_v12  ;;  %v6829_v60 = vld [vmem:[%s11186_s2] sm:$0x1] }
 0x2cf   : > { %v6312_v54 = vpop.eup %6311  ;;  %v1559_v18 = vand.u32 2147483647, %v8076_v12  ;;  %vm1557_vm4 = vmor %vm1555_vm3, %vm1556_vm2  ;;  %vm1604_vm7 = vcmp.eq.f32.partialorder %v1596_v50, 0.0  ;;  %vm1937_vm8 = vcmp.eq.f32.partialorder %v1929_v42, inf  ;;  %v1940_v2 = vand.u32 2147483648, %v1929_v42 }
 0x2d0   : > { %v1441_v28 = vmul.f32 %v6312_v54, %v7507_v38  ;;  %v1420_v11 = vmul.f32 0.5, %v1412_v63  ;;  %1653 = vadd.xlane.f32.xlu2 %v1652_v39  ;;  %v1558_v33 = vsel %vm1557_vm4, %v8112_v47, %v1554_v57  ;;  %v1562_v26 = vor.u32 1.1754944e-38, %v1561_v32 }
 0x2d1   : > { %vm1560_vm5 = vcmp.eq.f32.partialorder %v1559_v18, 8.507059e+37  ;;  %vm1939_vm9 = vcmp.eq.f32.partialorder %v1929_v42, 0.0 }
 0x2d2   : > { %v1519_v36 = vmul.f32 %v1518_v51, %v1441_v28  ;;  %v1428_v0 = vmul.f32 %v1420_v11, %v1340_v58  ;;  %v1563_v23 = vsel %vm1560_vm5, %v1562_v26, %v1558_v33 }
 0x2d4   : > { %v8196_v62 = vsel %vm1601_vm14, 0.0, %v1519_v36  ;;  %6313 = vtanh.f32 %v1428_v0 }
 0x2d5   : > { %v1633_v38 = vmul.f32 %v8196_v62, %v8196_v62  ;;  %6315 = vrsqrt.f32 %v1929_v42 }
 0x2d7   : > { %v1649_v15 = vsel %vm311_vm0, %v1633_v38, 0.0 }
 0x2d8   : > { %1650 = vadd.xlane.f32.xlu0 %v1649_v15 }
 0x2da   : > { %v6314_v27 = vpop.eup %6313 }
 0x2db   : > { %v1444_v46 = vmul.f32 %v6314_v27, %v7513_v16  ;;  %v6316_v25 = vpop.eup %6315 }
 0x2dc   : > { %v1931_v13 = vmul.f32 %v6316_v25, %v1929_v42 }
 0x2dd   : > { %v1564_v7 = vmul.f32 %v1563_v23, %v1444_v46 }
 0x2de   : > { %v1932_v20 = vmul.f32 %v6316_v25, %v1931_v13 }
 0x2df   : > { %v8206_v12 = vsel %vm1604_vm7, 0.0, %v1564_v7 }
 0x2e0   : > { %v1636_v59 = vmul.f32 %v8206_v12, %v8206_v12  ;;  %v1933_v48 = vmul.f32 0.5, %v1932_v20 }
 0x2e2   : > { %v1658_v47 = vsel %vm311_vm0, %v1636_v59, 0.0  ;;  %v1934_v35 = vsub.f32 1.5, %v1933_v48 }
 0x2e3   : > { %1659 = vadd.xlane.f32.xlu0 %v1658_v47 }
 0x2e4   : > { %v1935_v34 = vmul.f32 %v6316_v25, %v1934_v35 }
 0x2e6   : > { %v1936_v16 = vmul.f32 %v1935_v34, %v1929_v42 }
 0x2e8   : > { %v1938_v3 = vsel %vm1937_vm8, %v1929_v42, %v1936_v16 }
 0x2e9   : > { %v1941_v17 = vsel %vm1939_vm9, %v1940_v2, %v1938_v3 }
 0x2ea   : > { %v1942_v22 = vmax.f32 %v1941_v17, 1e-05 }
 0x2ec   : > { %vm1950_vm10 = vweird.f32 %v1942_v22  ;;  %v1954_v8 = vand.u32 2147483647, %v1942_v22  ;;  %v1956_v40 = vand.u32 2147483648, %v1942_v22 }
 0x2ee   : > { %vm1955_vm15 = vcmp.eq.f32.partialorder %v1954_v8, 8.507059e+37  ;;  %v1957_v41 = vor.u32 1.1754944e-38, %v1956_v40 }
 0x2fd   : > { %v1639_v31 = vpop.xlane.xlu1 %1638 }
 0x2fe   : > { %6317 = vrsqrt.f32 %v1639_v31  ;;  %vm1668_vm13 = vcmp.eq.f32.partialorder %v1639_v31, inf  ;;  %v1671_v37 = vand.u32 2147483648, %v1639_v31  ;;  %vm1670_vm1 = vcmp.eq.f32.partialorder %v1639_v31, 0.0 }
 0x2ff   : > { %6319 = vrcp.f32 %v1942_v22 }
 0x300   : > { %6321 = vtanh.f32 %v1942_v22 }
 0x304   : > { %v6318_v6 = vpop.eup %6317 }
 0x305   : > { %v1662_v61 = vmul.f32 %v6318_v6, %v1639_v31  ;;  %v6320_v53 = vpop.eup %6319 }
 0x306   : > { %v1946_v45 = vmul.f32 %v6320_v53, %v1942_v22  ;;  %vm1951_vm11 = vweird.f32 %v6320_v53  ;;  %v6322_v52 = vpop.eup %6321 }
 0x307   : > { %v1663_v56 = vmul.f32 %v6318_v6, %v1662_v61  ;;  %vm1952_vm12 = vmor %vm1950_vm10, %vm1951_vm11  ;;  %v1944_v29 = vmul.f32 %v6829_v60, %v6322_v52 }
 0x308   : > { %v1947_v24 = vsub.f32 1.0, %v1946_v45 }
 0x309   : > { %v1664_v4 = vmul.f32 0.5, %v1663_v56 }
 0x30a   : > { %v1948_v43 = vmul.f32 %v6320_v53, %v1947_v24 }
 0x30b   : > { %v1665_v30 = vsub.f32 1.5, %v1664_v4 }
 0x30c   : > { %v1949_v55 = vadd.f32 %v6320_v53, %v1948_v43 }
 0x30d   : > { %v1666_v49 = vmul.f32 %v6318_v6, %v1665_v30 }
 0x30e   : > { %v1953_v39 = vsel %vm1952_vm12, %v6320_v53, %v1949_v55 }
 0x30f   : > { %v1667_v5 = vmul.f32 %v1666_v49, %v1639_v31  ;;  %v1958_v58 = vsel %vm1955_vm15, %v1957_v41, %v1953_v39 }
 0x310   : > { %v1959_v63 = vmul.f32 %v1958_v58, %v1944_v29 }
 0x311   : > { %v1669_v54 = vsel %vm1668_vm13, %v1639_v31, %v1667_v5 }
 0x312   : > { %v1992_v51 = vmul.f32 %v1959_v63, %v1959_v63  ;;  %v1672_v14 = vsel %vm1670_vm1, %v1671_v37, %v1669_v54  ;;  %v8230_v30 = vperm.slane %v1959_v63, 0 }
 0x313   : > { %v1757_v36 = vmax.f32 %v1672_v14, 1e-05 }
 0x314   : > { %v1993_v11 = vsel %vm1926_vm6, %v1992_v51, 0.0 }
 0x315   : > { %1994 = vadd.xlane.f32.xlu1 %v1993_v11  ;;  %v1776_v59 = vand.u32 2147483648, %v1757_v36  ;;  %v1774_v13 = vand.u32 2147483647, %v1757_v36  ;;  %vm1770_vm4 = vweird.f32 %v1757_v36  ;;  %vm1893_vm8 = vcmp.gt.f32.partialorder %v1757_v36, 0.999 }
 0x317   : > { %v1777_v35 = vor.u32 1.1754944e-38, %v1776_v59  ;;  %vm1775_vm7 = vcmp.eq.f32.partialorder %v1774_v13, 8.507059e+37 }
 0x31f   : > { %v1642_v28 = vpop.xlane.xlu0 %1641 }
 0x320   : > { %6323 = vrsqrt.f32 %v1642_v28  ;;  %vm1680_vm14 = vcmp.eq.f32.partialorder %v1642_v28, inf  ;;  %v1683_v46 = vand.u32 2147483648, %v1642_v28  ;;  %vm1682_vm2 = vcmp.eq.f32.partialorder %v1642_v28, 0.0 }
 0x321   : > { %6325 = vrcp.f32 %v1757_v36 }
 0x326   : > { %v6324_v0 = vpop.eup %6323 }
 0x327   : > { %v1674_v57 = vmul.f32 %v6324_v0, %v1642_v28  ;;  %v6326_v33 = vpop.eup %6325 }
 0x328   : > { %v1766_v23 = vmul.f32 %v6326_v33, %v1757_v36  ;;  %vm1771_vm3 = vweird.f32 %v6326_v33 }
 0x329   : > { %v1675_v32 = vmul.f32 %v6324_v0, %v1674_v57  ;;  %vm1772_vm5 = vmor %vm1770_vm4, %vm1771_vm3 }
 0x32a   : > { %v1767_v42 = vsub.f32 1.0, %v1766_v23 }
 0x32b   : > { %v1676_v18 = vmul.f32 0.5, %v1675_v32 }
 0x32c   : > { %v1768_v25 = vmul.f32 %v6326_v33, %v1767_v42 }
 0x32d   : > { %v1677_v38 = vsub.f32 1.5, %v1676_v18 }
 0x32e   : > { %v1769_v20 = vadd.f32 %v6326_v33, %v1768_v25 }
 0x32f   : > { %v1678_v15 = vmul.f32 %v6324_v0, %v1677_v38 }
 0x330   : > { %v1773_v16 = vsel %vm1772_vm5, %v6326_v33, %v1769_v20 }
 0x331   : > { %v1679_v26 = vmul.f32 %v1678_v15, %v1642_v28  ;;  %v1778_v31 = vsel %vm1775_vm7, %v1777_v35, %v1773_v16 }
 0x332   : > { %v8215_v27 = vpop.xlane.xlu1 %1644  ;;  %v1779_v17 = vmul.f32 %v1778_v31, %v7847_v44 }
 0x333   : > { %6327 = vrsqrt.f32 %v8215_v27  ;;  %v1681_v50 = vsel %vm1680_vm14, %v1642_v28, %v1679_v26  ;;  %vm1692_vm9 = vcmp.eq.f32.partialorder %v8215_v27, inf  ;;  %vm1694_vm10 = vcmp.eq.f32.partialorder %v8215_v27, 0.0 }
 0x334   : > { %v1684_v7 = vsel %vm1682_vm2, %v1683_v46, %v1681_v50  ;;  %v1885_v4 = vmul.f32 0.999, %v1779_v17  ;;  %v1695_v5 = vand.u32 2147483648, %v8215_v27 }
 0x335   : > { %v8218_v47 = vmax.f32 %v1684_v7, 1e-05 }
 0x336   : > { %v8234_v49 = vsel %vm1893_vm8, %v1885_v4, %v7847_v44 }
 0x337   : > { %6329 = vrcp.f32 %v8218_v47  ;;  %v1997_v55 = vmul.f32 %v8230_v30, %v8234_v49  ;;  %v1960_v52 = vmul.f32 %v8234_v49, %v8234_v49  ;;  %v1789_v44 = vand.u32 2147483647, %v8218_v47 }
 0x338   : > { %v1791_v63 = vand.u32 2147483648, %v8218_v47  ;;  %vm1785_vm12 = vweird.f32 %v8218_v47  ;;  %vm1894_vm1 = vcmp.gt.f32.partialorder %v8218_v47, 0.999 }
 0x339   : > { %v6328_v48 = vpop.eup %6327  ;;  %v2005_v39 = vsel %vm311_vm0, %v1997_v55, 0.0  ;;  %v1968_v58 = vsel %vm311_vm0, %v1960_v52, 0.0  ;;  %vm1790_vm13 = vcmp.eq.f32.partialorder %v1789_v44, 8.507059e+37 }
 0x33a   : > { %v1686_v34 = vmul.f32 %v6328_v48, %v8215_v27  ;;  %2006 = vadd.xlane.f32.xlu2 %v2005_v39  ;;  %1969 = vadd.xlane.f32.xlu0 %v1968_v58  ;;  %v1792_v32 = vor.u32 1.1754944e-38, %v1791_v63 }
 0x33b   : > { %v8222_v2 = vpop.xlane.xlu2 %1647 }
 0x33c   : > { %v1687_v3 = vmul.f32 %v6328_v48, %v1686_v34  ;;  %6331 = vrsqrt.f32 %v8222_v2  ;;  %vm1704_vm14 = vcmp.eq.f32.partialorder %v8222_v2, inf  ;;  %vm1706_vm2 = vcmp.eq.f32.partialorder %v8222_v2, 0.0 }
 0x33d   : > { %v6330_v6 = vpop.eup %6329  ;;  %v1707_v59 = vand.u32 2147483648, %v8222_v2 }
 0x33e   : > { %v1688_v22 = vmul.f32 0.5, %v1687_v3  ;;  %v8226_v61 = vpop.xlane.xlu1 %1656  ;;  %v1781_v53 = vmul.f32 %v6330_v6, %v8218_v47  ;;  %vm1786_vm11 = vweird.f32 %v6330_v6 }
 0x33f   : > { %6333 = vrsqrt.f32 %v8226_v61  ;;  %vm1787_vm15 = vmor %vm1785_vm12, %vm1786_vm11  ;;  %vm1740_vm3 = vcmp.eq.f32.partialorder %v8226_v61, inf  ;;  %vm1742_vm4 = vcmp.eq.f32.partialorder %v8226_v61, 0.0  ;;  %v1743_v31 = vand.u32 2147483648, %v8226_v61 }
 0x340   : > { %v1689_v56 = vsub.f32 1.5, %v1688_v22  ;;  %v1782_v43 = vsub.f32 1.0, %v1781_v53 }
 0x342   : > { %v6332_v45 = vpop.eup %6331  ;;  %v1690_v24 = vmul.f32 %v6328_v48, %v1689_v56  ;;  %v1783_v37 = vmul.f32 %v6330_v6, %v1782_v43 }
 0x343   : > { %v1698_v8 = vmul.f32 %v6332_v45, %v8222_v2  ;;  %v8238_v40 = vpop.xlane.xlu2 %1653 }
 0x344   : > { %v1691_v41 = vmul.f32 %v1690_v24, %v8215_v27  ;;  %6335 = vrsqrt.f32 %v8238_v40  ;;  %v1784_v0 = vadd.f32 %v6330_v6, %v1783_v37  ;;  %vm1728_vm5 = vcmp.eq.f32.partialorder %v8238_v40, inf }
 0x345   : > { %v6334_v60 = vpop.eup %6333  ;;  %v1699_v29 = vmul.f32 %v6332_v45, %v1698_v8  ;;  %vm1730_vm7 = vcmp.eq.f32.partialorder %v8238_v40, 0.0  ;;  %v1731_v44 = vand.u32 2147483648, %v8238_v40 }
 0x346   : > { %v1693_v54 = vsel %vm1692_vm9, %v8215_v27, %v1691_v41  ;;  %v1734_v51 = vmul.f32 %v6334_v60, %v8226_v61  ;;  %v1788_v33 = vsel %vm1787_vm15, %v6330_v6, %v1784_v0 }
 0x347   : > { %v1696_v28 = vsel %vm1694_vm10, %v1695_v5, %v1693_v54  ;;  %v1700_v14 = vmul.f32 0.5, %v1699_v29  ;;  %v1793_v23 = vsel %vm1790_vm13, %v1792_v32, %v1788_v33 }
 0x348   : > { %v8257_v11 = vmax.f32 %v1696_v28, 1e-05  ;;  %v1735_v36 = vmul.f32 %v6334_v60, %v1734_v51  ;;  %v1794_v7 = vmul.f32 %v1793_v23, %v8034_v21 }
 0x349   : > { %v1701_v57 = vsub.f32 1.5, %v1700_v14 }
 0x34a   : > { %v6336_v18 = vpop.eup %6335  ;;  %6337 = vrcp.f32 %v8257_v11  ;;  %v1736_v38 = vmul.f32 0.5, %v1735_v36  ;;  %v1886_v48 = vmul.f32 0.999, %v1794_v7  ;;  %v1804_v29 = vand.u32 2147483647, %v8257_v11 }
 0x34b   : > { %v1702_v15 = vmul.f32 %v6332_v45, %v1701_v57  ;;  %v8261_v26 = vpop.xlane.xlu0 %1650  ;;  %v1722_v27 = vmul.f32 %v6336_v18, %v8238_v40  ;;  %v1806_v45 = vand.u32 2147483648, %v8257_v11  ;;  %vm1800_vm9 = vweird.f32 %v8257_v11 }
 0x34c   : > { %v1737_v46 = vsub.f32 1.5, %v1736_v38  ;;  %6339 = vrsqrt.f32 %v8261_v26  ;;  %v8282_v6 = vsel %vm1894_vm1, %v1886_v48, %v8034_v21  ;;  %vm1716_vm10 = vcmp.eq.f32.partialorder %v8261_v26, inf }
 0x34d   : > { %v1703_v50 = vmul.f32 %v1702_v15, %v8222_v2  ;;  %v1723_v42 = vmul.f32 %v6336_v18, %v1722_v27  ;;  %v1998_v4 = vmul.f32 %v8230_v30, %v8282_v6  ;;  %v1961_v53 = vmul.f32 %v8282_v6, %v8282_v6 }
 0x34e   : > { %v1738_v25 = vmul.f32 %v6334_v60, %v1737_v46  ;;  %v1807_v51 = vor.u32 1.1754944e-38, %v1806_v45  ;;  %vm1718_vm12 = vcmp.eq.f32.partialorder %v8261_v26, 0.0  ;;  %vm1805_vm15 = vcmp.eq.f32.partialorder %v1804_v29, 8.507059e+37 }
 0x34f   : > { %v1705_v13 = vsel %vm1704_vm14, %v8222_v2, %v1703_v50  ;;  %v1724_v20 = vmul.f32 0.5, %v1723_v42  ;;  %v2008_v8 = vsel %vm311_vm0, %v1998_v4, 0.0  ;;  %v1971_v55 = vsel %vm311_vm0, %v1961_v53, 0.0 }
 0x350   : > { %v6338_v35 = vpop.eup %6337  ;;  %v1708_v34 = vsel %vm1706_vm2, %v1707_v59, %v1705_v13  ;;  %v1739_v16 = vmul.f32 %v1738_v25, %v8226_v61  ;;  %2009 = vadd.xlane.f32.xlu1 %v2008_v8  ;;  %1972 = vadd.xlane.f32.xlu2 %v1971_v55  ;;  %vm1895_vm13 = vcmp.gt.f32.partialorder %v8257_v11, 0.999 }
 0x351   : > { %v8277_v3 = vmax.f32 %v1708_v34, 1e-05  ;;  %v1725_v17 = vsub.f32 1.5, %v1724_v20  ;;  %v1796_v2 = vmul.f32 %v6338_v35, %v8257_v11  ;;  %vm1801_vm8 = vweird.f32 %v6338_v35 }
 0x352   : > { %v6340_v22 = vpop.eup %6339  ;;  %v1741_v56 = vsel %vm1740_vm3, %v8226_v61, %v1739_v16  ;;  %vm1802_vm11 = vmor %vm1800_vm9, %vm1801_vm8 }
 0x353   : > { %6341 = vrcp.f32 %v8277_v3  ;;  %v1744_v47 = vsel %vm1742_vm4, %v1743_v31, %v1741_v56  ;;  %v1710_v21 = vmul.f32 %v6340_v22, %v8261_v26  ;;  %v1726_v24 = vmul.f32 %v6336_v18, %v1725_v17 }
 0x354   : > { %v8295_v43 = vmax.f32 %v1744_v47, 1e-05  ;;  %v1797_v52 = vsub.f32 1.0, %v1796_v2  ;;  %v1819_v36 = vand.u32 2147483647, %v8277_v3  ;;  %v1821_v0 = vand.u32 2147483648, %v8277_v3 }
 0x355   : > { %v1711_v41 = vmul.f32 %v6340_v22, %v1710_v21  ;;  %v1727_v5 = vmul.f32 %v1726_v24, %v8238_v40  ;;  %v1719_v18 = vand.u32 2147483648, %v8261_v26  ;;  %vm1815_vm1 = vweird.f32 %v8277_v3 }
 0x356   : > { %6343 = vrcp.f32 %v8295_v43  ;;  %v8303_v61 = vpop.xlane.xlu0 %1659  ;;  %v1798_v60 = vmul.f32 %v6338_v35, %v1797_v52  ;;  %vm8324_vm14 = vcmp.eq.f32.partialorder %v1819_v36, 8.507059e+37  ;;  %v1822_v42 = vor.u32 1.1754944e-38, %v1821_v0 }
 0x357   : > { %v1712_v39 = vmul.f32 0.5, %v1711_v41  ;;  %v1729_v58 = vsel %vm1728_vm5, %v8238_v40, %v1727_v5  ;;  %6345 = vrsqrt.f32 %v8303_v61  ;;  %vm1896_vm3 = vcmp.gt.f32.partialorder %v8277_v3, 0.999 }
 0x358   : > { %v1732_v63 = vsel %vm1730_vm7, %v1731_v44, %v1729_v58  ;;  %v1799_v54 = vadd.f32 %v6338_v35, %v1798_v60  ;;  %v1866_v34 = vand.u32 2147483648, %v8295_v43  ;;  %vm1752_vm4 = vcmp.eq.f32.partialorder %v8303_v61, inf }
 0x359   : > { %v6342_v37 = vpop.eup %6341  ;;  %v1713_v28 = vsub.f32 1.5, %v1712_v39  ;;  %v8312_v14 = vmax.f32 %v1732_v63, 1e-05  ;;  %vm1860_vm8 = vweird.f32 %v8295_v43  ;;  %vm1754_vm9 = vcmp.eq.f32.partialorder %v8303_v61, 0.0 }
 0x35a   : > { %v1803_v40 = vsel %vm1802_vm11, %v6338_v35, %v1799_v54  ;;  %v1811_v57 = vmul.f32 %v6342_v37, %v8277_v3  ;;  %vm1816_vm2 = vweird.f32 %v6342_v37  ;;  %v1864_v35 = vand.u32 2147483647, %v8295_v43 }
 0x35b   : > { %v1714_v32 = vmul.f32 %v6340_v22, %v1713_v28  ;;  %6347 = vrcp.f32 %v8312_v14  ;;  %v1808_v38 = vsel %vm1805_vm15, %v1807_v51, %v1803_v40  ;;  %vm1817_vm5 = vmor %vm1815_vm1, %vm1816_vm2  ;;  %v1755_v41 = vand.u32 2147483648, %v8303_v61 }
 0x35c   : > { %v6344_v33 = vpop.eup %6343  ;;  %v1809_v15 = vmul.f32 %v1808_v38, %v8032_v9  ;;  %v1812_v27 = vsub.f32 1.0, %v1811_v57  ;;  %v1867_v5 = vor.u32 1.1754944e-38, %v1866_v34  ;;  %vm1865_vm11 = vcmp.eq.f32.partialorder %v1864_v35, 8.507059e+37 }
 0x35d   : > { %v6346_v23 = vpop.eup %6345  ;;  %v1715_v46 = vmul.f32 %v1714_v32, %v8261_v26  ;;  %v1856_v7 = vmul.f32 %v6344_v33, %v8295_v43  ;;  %vm1861_vm7 = vweird.f32 %v6344_v33  ;;  %v1851_v28 = vand.u32 2147483648, %v8312_v14 }
 0x35e   : > { %v1746_v59 = vmul.f32 %v6346_v23, %v8303_v61  ;;  %v1887_v25 = vmul.f32 0.999, %v1809_v15  ;;  %v1813_v13 = vmul.f32 %v6342_v37, %v1812_v27  ;;  %v1849_v32 = vand.u32 2147483647, %v8312_v14 }
 0x35f   : > { %v1717_v20 = vsel %vm1716_vm10, %v8261_v26, %v1715_v46  ;;  %v1857_v48 = vsub.f32 1.0, %v1856_v7  ;;  %vm1862_vm10 = vmor %vm1860_vm8, %vm1861_vm7  ;;  %vm1898_vm7 = vcmp.gt.f32.partialorder %v8312_v14, 0.999 }
 0x360   : > { %v1720_v16 = vsel %vm1718_vm12, %v1719_v18, %v1717_v20  ;;  %v1747_v31 = vmul.f32 %v6346_v23, %v1746_v59  ;;  %v8341_v17 = vsel %vm1895_vm13, %v1887_v25, %v8032_v9  ;;  %v1814_v2 = vadd.f32 %v6342_v37, %v1813_v13 }
 0x361   : > { %v8343_v22 = vpop.eup %6347  ;;  %v8345_v56 = vmax.f32 %v1720_v16, 1e-05  ;;  %v1999_v4 = vmul.f32 %v8230_v30, %v8341_v17  ;;  %v1962_v26 = vmul.f32 %v8341_v17, %v8341_v17  ;;  %v1858_v11 = vmul.f32 %v6344_v33, %v1857_v48 }
 0x362   : > { %v1748_v9 = vmul.f32 0.5, %v1747_v31  ;;  %v1818_v53 = vsel %vm1817_vm5, %v6342_v37, %v1814_v2  ;;  %v1841_v45 = vmul.f32 %v8343_v22, %v8312_v14  ;;  %vm1845_vm12 = vweird.f32 %v8312_v14 }
 0x363   : > { %6349 = vrcp.f32 %v8345_v56  ;;  %v2011_v47 = vsel %vm311_vm0, %v1999_v4, 0.0  ;;  %v1974_v21 = vsel %vm311_vm0, %v1962_v26, 0.0  ;;  %v1823_v24 = vsel %vm8324_vm14, %v1822_v42, %v1818_v53 }
 0x364   : > { %v1749_v8 = vsub.f32 1.5, %v1748_v9  ;;  %2012 = vadd.xlane.f32.xlu0 %v2011_v47  ;;  %1975 = vadd.xlane.f32.xlu1 %v1974_v21  ;;  %v1824_v55 = vmul.f32 %v1823_v24, %v8149_v1  ;;  %v1859_v52 = vadd.f32 %v6344_v33, %v1858_v11  ;;  %v1842_v44 = vsub.f32 1.0, %v1841_v45 }
 0x365   : > { %vm1846_vm15 = vweird.f32 %v8343_v22  ;;  %vm1899_vm13 = vcmp.gt.f32.partialorder %v8295_v43, 0.999  ;;  %v1852_v42 = vor.u32 1.1754944e-38, %v1851_v28  ;;  %v1834_v7 = vand.u32 2147483647, %v8345_v56 }
 0x366   : > { %v1750_v60 = vmul.f32 %v6346_v23, %v1749_v8  ;;  %v1888_v29 = vmul.f32 0.999, %v1824_v55  ;;  %v1863_v39 = vsel %vm1862_vm10, %v6344_v33, %v1859_v52  ;;  %v1843_v63 = vmul.f32 %v8343_v22, %v1842_v44  ;;  %vm8390_vm1 = vmor %vm1845_vm12, %vm1846_vm15 }
 0x367   : > { %v1868_v58 = vsel %vm1865_vm11, %v1867_v5, %v1863_v39  ;;  %v1836_v59 = vand.u32 2147483648, %v8345_v56  ;;  %vm1850_vm14 = vcmp.eq.f32.partialorder %v1849_v32, 8.507059e+37  ;;  %vm1835_vm5 = vcmp.eq.f32.partialorder %v1834_v7, 8.507059e+37 }
 0x368   : > { %v1751_v54 = vmul.f32 %v1750_v60, %v8303_v61  ;;  %v8373_v51 = vsel %vm1896_vm3, %v1888_v29, %v8149_v1  ;;  %v1869_v37 = vmul.f32 %v1868_v58, %v8158_v10  ;;  %v1844_v57 = vadd.f32 %v8343_v22, %v1843_v63 }
 0x369   : > { %v6350_v36 = vpop.eup %6349  ;;  %v1963_v0 = vmul.f32 %v8373_v51, %v8373_v51  ;;  %v2000_v40 = vmul.f32 %v8230_v30, %v8373_v51  ;;  %vm1830_vm3 = vweird.f32 %v8345_v56  ;;  %v1837_v35 = vor.u32 1.1754944e-38, %v1836_v59 }
 0x36a   : > { %v1753_v1 = vsel %vm1752_vm4, %v8303_v61, %v1751_v54  ;;  %v1891_v3 = vmul.f32 0.999, %v1869_v37  ;;  %v1826_v18 = vmul.f32 %v6350_v36, %v8345_v56  ;;  %v1848_v23 = vsel %vm8390_vm1, %v8343_v22, %v1844_v57 }
 0x36b   : > { %v1756_v33 = vsel %vm1754_vm9, %v1755_v41, %v1753_v1  ;;  %v1977_v15 = vsel %vm311_vm0, %v1963_v0, 0.0  ;;  %v2014_v27 = vsel %vm311_vm0, %v2000_v40, 0.0  ;;  %vm1831_vm2 = vweird.f32 %v6350_v36 }
 0x36c   : > { %v8401_v43 = vmax.f32 %v1756_v33, 1e-05  ;;  %1978 = vadd.xlane.f32.xlu0 %v1977_v15  ;;  %2015 = vadd.xlane.f32.xlu2 %v2014_v27  ;;  %v8404_v46 = vsel %vm1899_vm13, %v1891_v3, %v8158_v10  ;;  %v1827_v50 = vsub.f32 1.0, %v1826_v18  ;;  %v1853_v13 = vsel %vm1850_vm14, %v1852_v42, %v1848_v23  ;;  %vm1832_vm4 = vmor %vm1830_vm3, %vm1831_vm2 }
 0x36d   : > { %v2003_v61 = vmul.f32 %v8230_v30, %v8404_v46  ;;  %v1854_v20 = vmul.f32 %v1853_v13, %v8181_v19  ;;  %vm1897_vm8 = vcmp.gt.f32.partialorder %v8345_v56, 0.999  ;;  %v1966_v60 = vmul.f32 %v8404_v46, %v8404_v46 }
 0x36e   : > { %6351 = vrcp.f32 %v8401_v43  ;;  %v1828_v25 = vmul.f32 %v6350_v36, %v1827_v50  ;;  %v1879_v14 = vand.u32 2147483647, %v8401_v43  ;;  %vm1875_vm10 = vweird.f32 %v8401_v43 }
 0x36f   : > { %v2023_v10 = vsel %vm311_vm0, %v2003_v61, 0.0  ;;  %v1890_v34 = vmul.f32 0.999, %v1854_v20  ;;  %v1986_v63 = vsel %vm311_vm0, %v1966_v60, 0.0  ;;  %vm1900_vm15 = vcmp.gt.f32.partialorder %v8401_v43, 0.999 }
 0x370   : > { %v1829_v48 = vadd.f32 %v6350_v36, %v1828_v25  ;;  %vm1880_vm12 = vcmp.eq.f32.partialorder %v1879_v14, 8.507059e+37 }
 0x371   : > { %v8416_v2 = vsel %vm1898_vm7, %v1890_v34, %v8181_v19  ;;  %v1881_v19 = vand.u32 2147483648, %v8401_v43 }
 0x372   : > { %v1833_v16 = vsel %vm1832_vm4, %v6350_v36, %v1829_v48  ;;  %v1965_v9 = vmul.f32 %v8416_v2, %v8416_v2  ;;  %v2002_v41 = vmul.f32 %v8230_v30, %v8416_v2 }
 0x373   : > { %v1838_v31 = vsel %vm1835_vm5, %v1837_v35, %v1833_v16  ;;  %v1882_v52 = vor.u32 1.1754944e-38, %v1881_v19 }
 0x374   : > { %v6352_v22 = vpop.eup %6351  ;;  %2024 = vadd.xlane.f32.xlu0 %v2023_v10  ;;  %v1839_v4 = vmul.f32 %v1838_v31, %v8196_v62  ;;  %v1983_v8 = vsel %vm311_vm0, %v1965_v9, 0.0  ;;  %v2020_v39 = vsel %vm311_vm0, %v2002_v41, 0.0 }
 0x375   : > { %v1871_v26 = vmul.f32 %v6352_v22, %v8401_v43  ;;  %vm1876_vm9 = vweird.f32 %v6352_v22 }
 0x376   : > { %v1889_v11 = vmul.f32 0.999, %v1839_v4  ;;  %vm1877_vm11 = vmor %vm1875_vm10, %vm1876_vm9 }
 0x377   : > { %v1872_v53 = vsub.f32 1.0, %v1871_v26 }
 0x378   : > { %v8424_v45 = vsel %vm1897_vm8, %v1889_v11, %v8196_v62 }
 0x379   : > { %v2001_v47 = vmul.f32 %v8230_v30, %v8424_v45  ;;  %v1964_v21 = vmul.f32 %v8424_v45, %v8424_v45  ;;  %v1873_v24 = vmul.f32 %v6352_v22, %v1872_v53 }
 0x37b   : > { %v2017_v56 = vsel %vm311_vm0, %v2001_v47, 0.0  ;;  %v1980_v55 = vsel %vm311_vm0, %v1964_v21, 0.0  ;;  %v1874_v62 = vadd.f32 %v6352_v22, %v1873_v24 }
 0x37c   : > { %2018 = vadd.xlane.f32.xlu1 %v2017_v56  ;;  %1981 = vadd.xlane.f32.xlu2 %v1980_v55 }
 0x37d   : > { %1984 = vadd.xlane.f32.xlu0 %v1983_v8  ;;  %v1878_v5 = vsel %vm1877_vm11, %v6352_v22, %v1874_v62 }
 0x37e   : > { %v1883_v44 = vsel %vm1880_vm12, %v1882_v52, %v1878_v5 }
 0x37f   : > { %v1884_v29 = vmul.f32 %v1883_v44, %v8206_v12 }
 0x381   : > { %v1892_v58 = vmul.f32 0.999, %v1884_v29 }
 0x383   : > { %v8445_v54 = vsel %vm1900_vm15, %v1892_v58, %v8206_v12 }
 0x384   : > { %1987 = vadd.xlane.f32.xlu1 %v1986_v63  ;;  %2021 = vadd.xlane.f32.xlu2 %v2020_v39  ;;  %v2004_v37 = vmul.f32 %v8230_v30, %v8445_v54  ;;  %v1967_v28 = vmul.f32 %v8445_v54, %v8445_v54 }
 0x386   : > { %v2026_v36 = vsel %vm311_vm0, %v2004_v37, 0.0  ;;  %v1989_v0 = vsel %vm311_vm0, %v1967_v28, 0.0 }
 0x388   : > { %v1995_v40 = vpop.xlane.xlu1 %1994 }
 0x389   : > { %v8453_v1 = vperm.slane %v1995_v40, 0 }
 0x38c   : > { %2027 = vadd.xlane.f32.xlu1 %v2026_v36  ;;  %1990 = vadd.xlane.f32.xlu2 %v1989_v0 }
 0x3ad   : > { %v2007_v57 = vpop.xlane.xlu2 %2006  ;;  %v1970_v32 = vpop.xlane.xlu0 %1969 }
 0x3ae   : > { %v2029_v3 = vmul.f32 2.0, %v2007_v57  ;;  %v2086_v18 = vmul.f32 %v8453_v1, %v1970_v32  ;;  %v2062_v61 = vsub.f32 1.0, %v1970_v32 }
 0x3b0   : > { %v2037_v12 = vadd.f32 1.0, %v2029_v3  ;;  %v2070_v34 = vmul.f32 %v2062_v61, %v8230_v30 }
 0x3b2   : > { %v2094_v38 = vadd.f32 %v2086_v18, %v2037_v12  ;;  %v2046_v27 = vadd.f32 %v8453_v1, %v2037_v12 }
 0x3b4   : > { %v2102_v33 = vadd.f32 1e-05, %v2094_v38  ;;  %v2054_v13 = vmul.f32 %v2046_v27, %v8234_v49 }
 0x3b6   : > { %6353 = vrcp.f32 %v2102_v33  ;;  %v2121_v20 = vand.u32 2147483648, %v2102_v33  ;;  %v2119_v35 = vand.u32 2147483647, %v2102_v33  ;;  %vm2115_vm1 = vweird.f32 %v2102_v33 }
 0x3b7   : > { %v2078_v4 = vadd.f32 %v2070_v34, %v2054_v13 }
 0x3b8   : > { %v2122_v22 = vor.u32 1.1754944e-38, %v2121_v20  ;;  %vm2120_vm2 = vcmp.eq.f32.partialorder %v2119_v35, 8.507059e+37 }
 0x3bc   : > { %v6354_v15 = vpop.eup %6353 }
 0x3bd   : > { %v2111_v50 = vmul.f32 %v6354_v15, %v2102_v33  ;;  %vm2116_vm13 = vweird.f32 %v6354_v15 }
 0x3be   : > { %vm2117_vm14 = vmor %vm2115_vm1, %vm2116_vm13 }
 0x3bf   : > { %v2112_v7 = vsub.f32 1.0, %v2111_v50 }
 0x3c1   : > { %v2113_v10 = vmul.f32 %v6354_v15, %v2112_v7 }
 0x3c3   : > { %v2010_v23 = vpop.xlane.xlu1 %2009  ;;  %v1973_v43 = vpop.xlane.xlu2 %1972  ;;  %v2114_v31 = vadd.f32 %v6354_v15, %v2113_v10 }
 0x3c4   : > { %v2030_v42 = vmul.f32 2.0, %v2010_v23  ;;  %v2087_v25 = vmul.f32 %v8453_v1, %v1973_v43  ;;  %v2063_v52 = vsub.f32 1.0, %v1973_v43 }
 0x3c5   : > { %v2118_v26 = vsel %vm2117_vm14, %v6354_v15, %v2114_v31 }
 0x3c6   : > { %v2038_v59 = vadd.f32 1.0, %v2030_v42  ;;  %v2123_v11 = vsel %vm2120_vm2, %v2122_v22, %v2118_v26  ;;  %v2071_v63 = vmul.f32 %v2063_v52, %v8230_v30 }
 0x3c7   : > { %v8460_v9 = vmul.f32 %v2123_v11, %v2078_v4 }
 0x3c8   : > { %v2095_v48 = vadd.f32 %v2087_v25, %v2038_v59  ;;  %v2047_v8 = vadd.f32 %v8453_v1, %v2038_v59 }
 0x3c9   : > { %v2230_v49 = vmul.f32 %v8460_v9, %v8460_v9 }
 0x3ca   : > { %v2103_v16 = vadd.f32 1e-05, %v2095_v48  ;;  %v2055_v60 = vmul.f32 %v2047_v8, %v8282_v6 }
 0x3cb   : > { %v2238_v47 = vsel %vm311_vm0, %v2230_v49, 0.0 }
 0x3cc   : > { %6355 = vrcp.f32 %v2103_v16  ;;  %2239 = vadd.xlane.f32.xlu0 %v2238_v47  ;;  %v2136_v44 = vand.u32 2147483648, %v2103_v16  ;;  %v2134_v29 = vand.u32 2147483647, %v2103_v16  ;;  %vm2130_vm4 = vweird.f32 %v2103_v16 }
 0x3cd   : > { %v2079_v40 = vadd.f32 %v2071_v63, %v2055_v60 }
 0x3ce   : > { %v2137_v0 = vor.u32 1.1754944e-38, %v2136_v44  ;;  %vm2135_vm7 = vcmp.eq.f32.partialorder %v2134_v29, 8.507059e+37 }
 0x3d2   : > { %v6356_v53 = vpop.eup %6355 }
 0x3d3   : > { %v2126_v21 = vmul.f32 %v6356_v53, %v2103_v16  ;;  %vm2131_vm3 = vweird.f32 %v6356_v53 }
 0x3d4   : > { %vm2132_vm5 = vmor %vm2130_vm4, %vm2131_vm3 }
 0x3d5   : > { %v2127_v56 = vsub.f32 1.0, %v2126_v21 }
 0x3d7   : > { %v1976_v14 = vpop.xlane.xlu1 %1975  ;;  %v2013_v19 = vpop.xlane.xlu0 %2012  ;;  %v2128_v5 = vmul.f32 %v6356_v53, %v2127_v56 }
 0x3d8   : > { %v2031_v24 = vmul.f32 2.0, %v2013_v19  ;;  %v2088_v55 = vmul.f32 %v8453_v1, %v1976_v14  ;;  %v2064_v50 = vsub.f32 1.0, %v1976_v14 }
 0x3d9   : > { %v2129_v58 = vadd.f32 %v6356_v53, %v2128_v5 }
 0x3da   : > { %v2039_v62 = vadd.f32 1.0, %v2031_v24  ;;  %v2072_v13 = vmul.f32 %v2064_v50, %v8230_v30 }
 0x3db   : > { %v2133_v57 = vsel %vm2132_vm5, %v6356_v53, %v2129_v58 }
 0x3dc   : > { %v2096_v41 = vadd.f32 %v2088_v55, %v2039_v62  ;;  %v2138_v6 = vsel %vm2135_vm7, %v2137_v0, %v2133_v57  ;;  %v2048_v27 = vadd.f32 %v8453_v1, %v2039_v62 }
 0x3dd   : > { %v8470_v12 = vmul.f32 %v2138_v6, %v2079_v40 }
 0x3de   : > { %v2104_v39 = vadd.f32 1e-05, %v2096_v41  ;;  %v2056_v7 = vmul.f32 %v2048_v27, %v8341_v17 }
 0x3df   : > { %v2016_v37 = vpop.xlane.xlu2 %2015  ;;  %v1979_v28 = vpop.xlane.xlu0 %1978  ;;  %v2231_v38 = vmul.f32 %v8470_v12, %v8470_v12 }
 0x3e0   : > { %6357 = vrcp.f32 %v2104_v39  ;;  %v2032_v36 = vmul.f32 2.0, %v2016_v37  ;;  %v2089_v3 = vmul.f32 %v8453_v1, %v1979_v28  ;;  %v2151_v61 = vand.u32 2147483648, %v2104_v39 }
 0x3e1   : > { %v2241_v43 = vsel %vm311_vm0, %v2231_v38, 0.0  ;;  %v2149_v25 = vand.u32 2147483647, %v2104_v39  ;;  %vm2145_vm9 = vweird.f32 %v2104_v39  ;;  %v2080_v16 = vadd.f32 %v2072_v13, %v2056_v7 }
 0x3e2   : > { %v2040_v32 = vadd.f32 1.0, %v2032_v36  ;;  %2242 = vadd.xlane.f32.xlu1 %v2241_v43  ;;  %v2152_v34 = vor.u32 1.1754944e-38, %v2151_v61  ;;  %v2065_v49 = vsub.f32 1.0, %v1979_v28 }
 0x3e3   : > { %vm2150_vm11 = vcmp.eq.f32.partialorder %v2149_v25, 8.507059e+37 }
 0x3e4   : > { %v2097_v18 = vadd.f32 %v2089_v3, %v2040_v32  ;;  %v2049_v10 = vadd.f32 %v8453_v1, %v2040_v32  ;;  %v2073_v41 = vmul.f32 %v2065_v49, %v8230_v30 }
 0x3e6   : > { %v6358_v33 = vpop.eup %6357  ;;  %v2105_v15 = vadd.f32 1e-05, %v2097_v18  ;;  %v2057_v19 = vmul.f32 %v2049_v10, %v8373_v51 }
 0x3e7   : > { %v2141_v23 = vmul.f32 %v6358_v33, %v2104_v39  ;;  %vm2146_vm8 = vweird.f32 %v6358_v33  ;;  %v2025_v35 = vpop.xlane.xlu0 %2024 }
 0x3e8   : > { %6359 = vrcp.f32 %v2105_v15  ;;  %vm2147_vm10 = vmor %vm2145_vm9, %vm2146_vm8  ;;  %v2166_v56 = vand.u32 2147483648, %v2105_v15  ;;  %v2035_v62 = vmul.f32 2.0, %v2025_v35  ;;  %v2164_v52 = vand.u32 2147483647, %v2105_v15 }
 0x3e9   : > { %v2142_v42 = vsub.f32 1.0, %v2141_v23  ;;  %vm2160_vm15 = vweird.f32 %v2105_v15  ;;  %v2081_v60 = vadd.f32 %v2073_v41, %v2057_v19 }
 0x3ea   : > { %v2167_v63 = vor.u32 1.1754944e-38, %v2166_v56  ;;  %v2043_v37 = vadd.f32 1.0, %v2035_v62  ;;  %vm2165_vm1 = vcmp.eq.f32.partialorder %v2164_v52, 8.507059e+37 }
 0x3eb   : > { %v2143_v59 = vmul.f32 %v6358_v33, %v2142_v42 }
 0x3ed   : > { %v2144_v20 = vadd.f32 %v6358_v33, %v2143_v59 }
 0x3ee   : > { %v6360_v48 = vpop.eup %6359 }
 0x3ef   : > { %v2156_v31 = vmul.f32 %v6360_v48, %v2105_v15  ;;  %v2019_v22 = vpop.xlane.xlu1 %2018  ;;  %v8479_v4 = vpop.xlane.xlu2 %1981  ;;  %v2148_v26 = vsel %vm2147_vm10, %v6358_v33, %v2144_v20  ;;  %vm2161_vm12 = vweird.f32 %v6360_v48 }
 0x3f0   : > { %v2033_v17 = vmul.f32 2.0, %v2019_v22  ;;  %v2153_v11 = vsel %vm2150_vm11, %v2152_v34, %v2148_v26  ;;  %v2090_v21 = vmul.f32 %v8453_v1, %v8479_v4  ;;  %vm2162_vm13 = vmor %vm2160_vm15, %vm2161_vm12  ;;  %v1985_v36 = vpop.xlane.xlu0 %1984  ;;  %v2066_v7 = vsub.f32 1.0, %v8479_v4 }
 0x3f1   : > { %v2157_v53 = vsub.f32 1.0, %v2156_v31  ;;  %v8481_v14 = vmul.f32 %v2153_v11, %v2080_v16  ;;  %v2091_v6 = vmul.f32 %v8453_v1, %v1985_v36  ;;  %v2052_v4 = vadd.f32 %v8453_v1, %v2043_v37 }
 0x3f2   : > { %v2041_v47 = vadd.f32 1.0, %v2033_v17  ;;  %v2074_v22 = vmul.f32 %v2066_v7, %v8230_v30  ;;  %v2067_v17 = vsub.f32 1.0, %v1985_v36 }
 0x3f3   : > { %v2232_v24 = vmul.f32 %v8481_v14, %v8481_v14  ;;  %v2158_v8 = vmul.f32 %v6360_v48, %v2157_v53 }
 0x3f4   : > { %v2098_v55 = vadd.f32 %v2090_v21, %v2041_v47  ;;  %v2050_v33 = vadd.f32 %v8453_v1, %v2041_v47 }
 0x3f5   : > { %v2244_v5 = vsel %vm311_vm0, %v2232_v24, 0.0  ;;  %v2159_v44 = vadd.f32 %v6360_v48, %v2158_v8 }
 0x3f6   : > { %v2106_v51 = vadd.f32 1e-05, %v2098_v55  ;;  %2245 = vadd.xlane.f32.xlu2 %v2244_v5  ;;  %v2058_v25 = vmul.f32 %v2050_v33, %v8424_v45 }
 0x3f7   : > { %v1988_v29 = vpop.xlane.xlu1 %1987  ;;  %v2022_v39 = vpop.xlane.xlu2 %2021  ;;  %v2163_v58 = vsel %vm2162_vm13, %v6360_v48, %v2159_v44 }
 0x3f8   : > { %6361 = vrcp.f32 %v2106_v51  ;;  %v2092_v28 = vmul.f32 %v8453_v1, %v1988_v29  ;;  %v2034_v0 = vmul.f32 2.0, %v2022_v39  ;;  %v2168_v40 = vsel %vm2165_vm1, %v2167_v63, %v2163_v58 }
 0x3f9   : > { %v8491_v32 = vmul.f32 %v2168_v40, %v2081_v60  ;;  %v2068_v20 = vsub.f32 1.0, %v1988_v29  ;;  %v2181_v35 = vand.u32 2147483648, %v2106_v51  ;;  %v2179_v16 = vand.u32 2147483647, %v2106_v51 }
 0x3fa   : > { %v2100_v57 = vadd.f32 %v2092_v28, %v2043_v37  ;;  %v2042_v3 = vadd.f32 1.0, %v2034_v0  ;;  %vm2175_vm2 = vweird.f32 %v2106_v51  ;;  %v2082_v49 = vadd.f32 %v2074_v22, %v2058_v25 }
 0x3fb   : > { %v2233_v38 = vmul.f32 %v8491_v32, %v8491_v32  ;;  %v2076_v53 = vmul.f32 %v2068_v20, %v8230_v30  ;;  %v2182_v47 = vor.u32 1.1754944e-38, %v2181_v35  ;;  %vm2180_vm4 = vcmp.eq.f32.partialorder %v2179_v16, 8.507059e+37 }
 0x3fc   : > { %v8494_v18 = vadd.f32 1e-05, %v2100_v57  ;;  %v2099_v15 = vadd.f32 %v2091_v6, %v2042_v3  ;;  %v2051_v8 = vadd.f32 %v8453_v1, %v2042_v3  ;;  %v2075_v60 = vmul.f32 %v2067_v17, %v8230_v30 }
 0x3fd   : > { %v2247_v23 = vsel %vm311_vm0, %v2233_v38, 0.0 }
 0x3fe   : > { %v6362_v27 = vpop.eup %6361  ;;  %6363 = vrcp.f32 %v8494_v18  ;;  %v8501_v50 = vadd.f32 1e-05, %v2099_v15  ;;  %2248 = vadd.xlane.f32.xlu0 %v2247_v23  ;;  %v2211_v52 = vand.u32 2147483648, %v8494_v18  ;;  %v2209_v44 = vand.u32 2147483647, %v8494_v18 }
 0x3ff   : > { %v2171_v43 = vmul.f32 %v6362_v27, %v2106_v51  ;;  %v2028_v42 = vpop.xlane.xlu1 %2027  ;;  %v8503_v61 = vpop.xlane.xlu2 %1990  ;;  %vm2176_vm14 = vweird.f32 %v6362_v27  ;;  %v2060_v51 = vmul.f32 %v2052_v4, %v8404_v46  ;;  %vm2205_vm7 = vweird.f32 %v8494_v18 }
 0x400   : > { %v2036_v59 = vmul.f32 2.0, %v2028_v42  ;;  %6365 = vrcp.f32 %v8501_v50  ;;  %v2093_v10 = vmul.f32 %v8453_v1, %v8503_v61  ;;  %vm2177_vm3 = vmor %vm2175_vm2, %vm2176_vm14  ;;  %v2059_v39 = vmul.f32 %v2051_v8, %v8416_v2 }
 0x401   : > { %v2172_v13 = vsub.f32 1.0, %v2171_v43  ;;  %v2196_v37 = vand.u32 2147483648, %v8501_v50  ;;  %v2212_v28 = vor.u32 1.1754944e-38, %v2211_v52  ;;  %v2194_v0 = vand.u32 2147483647, %v8501_v50 }
 0x402   : > { %v2044_v48 = vadd.f32 1.0, %v2036_v59  ;;  %v2084_v46 = vadd.f32 %v2076_v53, %v2060_v51  ;;  %vm2210_vm10 = vcmp.eq.f32.partialorder %v2209_v44, 8.507059e+37  ;;  %vm2190_vm11 = vweird.f32 %v8501_v50 }
 0x403   : > { %v2173_v34 = vmul.f32 %v6362_v27, %v2172_v13  ;;  %v2197_v15 = vor.u32 1.1754944e-38, %v2196_v37  ;;  %vm2195_vm15 = vcmp.eq.f32.partialorder %v2194_v0, 8.507059e+37  ;;  %v2069_v43 = vsub.f32 1.0, %v8503_v61 }
 0x404   : > { %v6364_v31 = vpop.eup %6363  ;;  %v2101_v26 = vadd.f32 %v2093_v10, %v2044_v48  ;;  %v2053_v2 = vadd.f32 %v8453_v1, %v2044_v48 }
 0x405   : > { %v2201_v45 = vmul.f32 %v6364_v31, %v8494_v18  ;;  %v2174_v11 = vadd.f32 %v6362_v27, %v2173_v34  ;;  %vm2206_vm5 = vweird.f32 %v6364_v31  ;;  %v2077_v10 = vmul.f32 %v2069_v43, %v8230_v30 }
 0x406   : > { %v8514_v19 = vadd.f32 1e-05, %v2101_v26  ;;  %v6366_v21 = vpop.eup %6365  ;;  %vm2207_vm8 = vmor %vm2205_vm7, %vm2206_vm5  ;;  %v2061_v59 = vmul.f32 %v2053_v2, %v8445_v54 }
 0x407   : > { %v2202_v24 = vsub.f32 1.0, %v2201_v45  ;;  %v2178_v56 = vsel %vm2177_vm3, %v6362_v27, %v2174_v11  ;;  %v2186_v55 = vmul.f32 %v6366_v21, %v8501_v50  ;;  %vm2191_vm9 = vweird.f32 %v6366_v21 }
 0x408   : > { %6367 = vrcp.f32 %v8514_v19  ;;  %v2183_v62 = vsel %vm2180_vm4, %v2182_v47, %v2178_v56  ;;  %vm2192_vm12 = vmor %vm2190_vm11, %vm2191_vm9  ;;  %v2083_v27 = vadd.f32 %v2075_v60, %v2059_v39  ;;  %v2226_v50 = vand.u32 2147483648, %v8514_v19 }
 0x409   : > { %v8520_v41 = vmul.f32 %v2183_v62, %v2082_v49  ;;  %v2203_v5 = vmul.f32 %v6364_v31, %v2202_v24  ;;  %v2187_v29 = vsub.f32 1.0, %v2186_v55  ;;  %v2224_v48 = vand.u32 2147483647, %v8514_v19 }
 0x40a   : > { %vm2220_vm1 = vweird.f32 %v8514_v19  ;;  %v2227_v34 = vor.u32 1.1754944e-38, %v2226_v50  ;;  %v2085_v16 = vadd.f32 %v2077_v10, %v2061_v59 }
 0x40b   : > { %v2234_v58 = vmul.f32 %v8520_v41, %v8520_v41  ;;  %v2204_v63 = vadd.f32 %v6364_v31, %v2203_v5  ;;  %v2188_v36 = vmul.f32 %v6366_v21, %v2187_v29  ;;  %vm2225_vm2 = vcmp.eq.f32.partialorder %v2224_v48, 8.507059e+37 }
 0x40d   : > { %v2250_v40 = vsel %vm311_vm0, %v2234_v58, 0.0  ;;  %v2208_v57 = vsel %vm2207_vm8, %v6364_v31, %v2204_v63  ;;  %v2189_v18 = vadd.f32 %v6366_v21, %v2188_v36 }
 0x40e   : > { %v6368_v3 = vpop.eup %6367  ;;  %2251 = vadd.xlane.f32.xlu1 %v2250_v40  ;;  %v2213_v6 = vsel %vm2210_vm10, %v2212_v28, %v2208_v57 }
 0x40f   : > { %v2216_v38 = vmul.f32 %v6368_v3, %v8514_v19  ;;  %v8535_v33 = vmul.f32 %v2213_v6, %v2084_v46  ;;  %v2193_v23 = vsel %vm2192_vm12, %v6366_v21, %v2189_v18  ;;  %vm2221_vm13 = vweird.f32 %v6368_v3 }
 0x410   : > { %v2198_v7 = vsel %vm2195_vm15, %v2197_v15, %v2193_v23  ;;  %vm2222_vm14 = vmor %vm2220_vm1, %vm2221_vm13 }
 0x411   : > { %v2217_v42 = vsub.f32 1.0, %v2216_v38  ;;  %v2236_v1 = vmul.f32 %v8535_v33, %v8535_v33  ;;  %v8541_v25 = vmul.f32 %v2198_v7, %v2083_v27 }
 0x413   : > { %v2256_v13 = vsel %vm311_vm0, %v2236_v1, 0.0  ;;  %v2218_v20 = vmul.f32 %v6368_v3, %v2217_v42  ;;  %v2235_v61 = vmul.f32 %v8541_v25, %v8541_v25 }
 0x414   : > { %2257 = vadd.xlane.f32.xlu2 %v2256_v13 }
 0x415   : > { %v2219_v35 = vadd.f32 %v6368_v3, %v2218_v20  ;;  %v2253_v54 = vsel %vm311_vm0, %v2235_v61, 0.0 }
 0x416   : > { %2254 = vadd.xlane.f32.xlu0 %v2253_v54 }
 0x417   : > { %v2223_v31 = vsel %vm2222_vm14, %v6368_v3, %v2219_v35 }
 0x418   : > { %v2228_v22 = vsel %vm2225_vm2, %v2227_v34, %v2223_v31  ;;  %v298_v31 = vld [vmem:[%s11187_s3 + $0x18] sm:$0xff] }
 0x419   : > { %v8551_v4 = vmul.f32 %v2228_v22, %v2085_v16  ;;  %6065 = vmatpush.xpose.msk.msra.mxu1 %vm311_vm0, %v298_v31  ;;  %6109 = vmatpush.xpose.msk.msrb.mxu3 %vm311_vm0, %v298_v31 }
 0x41b   : > { %v2237_v26 = vmul.f32 %v8551_v4, %v8551_v4 }
 0x41d   : > { %v2259_v45 = vsel %vm311_vm0, %v2237_v26, 0.0 }
 0x41e   : > { %2260 = vadd.xlane.f32.xlu1 %v2259_v45 }
 0x43f   : > { %v2240_v30 = vpop.xlane.xlu0 %2239 }
 0x440   : > { %6369 = vrsqrt.f32 %v2240_v30  ;;  %vm2269_vm3 = vcmp.eq.f32.partialorder %v2240_v30, inf  ;;  %v2272_v8 = vand.u32 2147483648, %v2240_v30  ;;  %vm2271_vm4 = vcmp.eq.f32.partialorder %v2240_v30, 0.0 }
 0x446   : > { %v6370_v17 = vpop.eup %6369 }
 0x447   : > { %v2263_v11 = vmul.f32 %v6370_v17, %v2240_v30 }
 0x449   : > { %v2264_v49 = vmul.f32 %v6370_v17, %v2263_v11 }
 0x44b   : > { %v2265_v53 = vmul.f32 0.5, %v2264_v49 }
 0x44d   : > { %v2266_v19 = vsub.f32 1.5, %v2265_v53 }
 0x44f   : > { %v2267_v47 = vmul.f32 %v6370_v17, %v2266_v19 }
 0x451   : > { %v2268_v24 = vmul.f32 %v2267_v47, %v2240_v30 }
 0x453   : > { %v2270_v56 = vsel %vm2269_vm3, %v2240_v30, %v2268_v24 }
 0x454   : > { %v2273_v55 = vsel %vm2271_vm4, %v2272_v8, %v2270_v56 }
 0x455   : > { %v2243_v21 = vpop.xlane.xlu1 %2242  ;;  %v2358_v62 = vmax.f32 %v2273_v55, 1e-05 }
 0x456   : > { %6371 = vrsqrt.f32 %v2243_v21  ;;  %vm2281_vm5 = vcmp.eq.f32.partialorder %v2243_v21, inf  ;;  %v2284_v36 = vand.u32 2147483648, %v2243_v21  ;;  %vm2283_vm7 = vcmp.eq.f32.partialorder %v2243_v21, 0.0 }
 0x457   : > { %6373 = vrcp.f32 %v2358_v62  ;;  %v2377_v40 = vand.u32 2147483648, %v2358_v62  ;;  %v2375_v2 = vand.u32 2147483647, %v2358_v62  ;;  %vm2371_vm9 = vweird.f32 %v2358_v62 }
 0x458   : > { %vm2494_vm12 = vcmp.gt.f32.partialorder %v2358_v62, 0.999 }
 0x459   : > { %v2378_v23 = vor.u32 1.1754944e-38, %v2377_v40  ;;  %vm2376_vm11 = vcmp.eq.f32.partialorder %v2375_v2, 8.507059e+37  ;;  %v295_v40 = vld [vmem:[%s11187_s3] sm:$0xff] }
 0x45c   : > { %v6372_v52 = vpop.eup %6371 }
 0x45d   : > { %v2275_v5 = vmul.f32 %v6372_v52, %v2243_v21  ;;  %v6374_v60 = vpop.eup %6373 }
 0x45e   : > { %v2367_v63 = vmul.f32 %v6374_v60, %v2358_v62  ;;  %vm2372_vm8 = vweird.f32 %v6374_v60 }
 0x45f   : > { %v2276_v44 = vmul.f32 %v6372_v52, %v2275_v5  ;;  %vm2373_vm10 = vmor %vm2371_vm9, %vm2372_vm8 }
 0x460   : > { %v2368_v28 = vsub.f32 1.0, %v2367_v63 }
 0x461   : > { %v2277_v51 = vmul.f32 0.5, %v2276_v44 }
 0x462   : > { %v2369_v46 = vmul.f32 %v6374_v60, %v2368_v28 }
 0x463   : > { %v2278_v29 = vsub.f32 1.5, %v2277_v51  ;;  %v296_v51 = vld [vmem:[%s11187_s3 + $0x8] sm:$0xff] }
 0x464   : > { %v2370_v38 = vadd.f32 %v6374_v60, %v2369_v46 }
 0x465   : > { %v2279_v58 = vmul.f32 %v6372_v52, %v2278_v29 }
 0x466   : > { %v2374_v43 = vsel %vm2373_vm10, %v6374_v60, %v2370_v38 }
 0x467   : > { %v2280_v37 = vmul.f32 %v2279_v58, %v2243_v21  ;;  %v2379_v1 = vsel %vm2376_vm11, %v2378_v23, %v2374_v43 }
 0x468   : > { %v2380_v7 = vmul.f32 %v2379_v1, %v8460_v9 }
 0x469   : > { %v2246_v39 = vpop.xlane.xlu2 %2245  ;;  %v2282_v0 = vsel %vm2281_vm5, %v2243_v21, %v2280_v37  ;;  %v297_v21 = vld [vmem:[%s11187_s3 + $0x10] sm:$0xff] }
 0x46a   : > { %6375 = vrsqrt.f32 %v2246_v39  ;;  %v2285_v3 = vsel %vm2283_vm7, %v2284_v36, %v2282_v0  ;;  %v2486_v50 = vmul.f32 0.999, %v2380_v7  ;;  %vm2293_vm15 = vcmp.eq.f32.partialorder %v2246_v39, inf  ;;  %6066 = vmatpush.xpose.msk.msra.mxu1 %vm311_vm0, %v297_v21  ;;  %6110 = vmatpush.xpose.msk.msrb.mxu3 %vm311_vm0, %v297_v21 }
 0x46b   : > { %v8556_v6 = vmax.f32 %v2285_v3, 1e-05  ;;  %v2296_v16 = vand.u32 2147483648, %v2246_v39  ;;  %vm2295_vm13 = vcmp.eq.f32.partialorder %v2246_v39, 0.0 }
 0x46c   : > { %v8564_v61 = vsel %vm2494_vm12, %v2486_v50, %v8460_v9 }
 0x46d   : > { %6377 = vrcp.f32 %v8556_v6  ;;  %v2534_v34 = vmul.f32 0.044715, %v8564_v61  ;;  %v2390_v11 = vand.u32 2147483647, %v8556_v6  ;;  %v2392_v49 = vand.u32 2147483648, %v8556_v6 }
 0x46e   : > { %vm2386_vm14 = vweird.f32 %v8556_v6  ;;  %6067 = vmatpush.xpose.msk.msra.mxu1 %vm311_vm0, %v296_v51  ;;  %6111 = vmatpush.xpose.msk.msrb.mxu3 %vm311_vm0, %v296_v51  ;;  %vm2495_vm7 = vcmp.gt.f32.partialorder %v8556_v6, 0.999  ;;  %v2526_v23 = vmul.f32 0.5, %v8564_v61 }
 0x46f   : > { %v2542_v9 = vmul.f32 %v2534_v34, %v8564_v61  ;;  %v2393_v62 = vor.u32 1.1754944e-38, %v2392_v49  ;;  %vm2391_vm3 = vcmp.eq.f32.partialorder %v2390_v11, 8.507059e+37 }
 0x470   : > { %v6376_v57 = vpop.eup %6375 }
 0x471   : > { %v2287_v18 = vmul.f32 %v6376_v57, %v2246_v39  ;;  %v8558_v15 = vpop.xlane.xlu0 %2248  ;;  %v2550_v47 = vmul.f32 %v2542_v9, %v8564_v61 }
 0x472   : > { %6379 = vrsqrt.f32 %v8558_v15  ;;  %vm2305_vm4 = vcmp.eq.f32.partialorder %v8558_v15, inf  ;;  %v2308_v58 = vand.u32 2147483648, %v8558_v15  ;;  %vm2307_vm5 = vcmp.eq.f32.partialorder %v8558_v15, 0.0  ;;  %6068 = vmatpush.xpose.msk.msra.mxu1 %vm311_vm0, %v295_v40  ;;  %6112 = vmatpush.xpose.msk.msrb.mxu3 %vm311_vm0, %v295_v40 }
 0x473   : > { %v2288_v27 = vmul.f32 %v6376_v57, %v2287_v18  ;;  %v6378_v13 = vpop.eup %6377  ;;  %v2558_v55 = vadd.f32 %v2550_v47, %v8564_v61 }
 0x474   : > { %v2382_v10 = vmul.f32 %v6378_v13, %v8556_v6  ;;  %vm2387_vm1 = vweird.f32 %v6378_v13 }
 0x475   : > { %v2289_v42 = vmul.f32 0.5, %v2288_v27  ;;  %vm2388_vm2 = vmor %vm2386_vm14, %vm2387_vm1  ;;  %v2566_v5 = vmul.f32 0.7978846, %v2558_v55 }
 0x476   : > { %v2383_v22 = vsub.f32 1.0, %v2382_v10 }
 0x477   : > { %v2290_v59 = vsub.f32 1.5, %v2289_v42 }
 0x478   : > { %v6380_v48 = vpop.eup %6379  ;;  %v2384_v17 = vmul.f32 %v6378_v13, %v2383_v22 }
 0x479   : > { %v2291_v20 = vmul.f32 %v6376_v57, %v2290_v59  ;;  %v2299_v54 = vmul.f32 %v6380_v48, %v8558_v15 }
 0x47a   : > { %v2385_v24 = vadd.f32 %v6378_v13, %v2384_v17 }
 0x47b   : > { %v2292_v35 = vmul.f32 %v2291_v20, %v2246_v39  ;;  %v2300_v45 = vmul.f32 %v6380_v48, %v2299_v54 }
 0x47c   : > { %v2389_v44 = vsel %vm2388_vm2, %v6378_v13, %v2385_v24 }
 0x47d   : > { %v2294_v26 = vsel %vm2293_vm15, %v2246_v39, %v2292_v35  ;;  %v2301_v19 = vmul.f32 0.5, %v2300_v45  ;;  %v2394_v60 = vsel %vm2391_vm3, %v2393_v62, %v2389_v44 }
 0x47e   : > { %v2297_v30 = vsel %vm2295_vm13, %v2296_v16, %v2294_v26  ;;  %v2395_v39 = vmul.f32 %v2394_v60, %v8470_v12 }
 0x47f   : > { %v8577_v53 = vmax.f32 %v2297_v30, 1e-05  ;;  %v2302_v8 = vsub.f32 1.5, %v2301_v19 }
 0x480   : > { %v2487_v36 = vmul.f32 0.999, %v2395_v39 }
 0x481   : > { %6381 = vrcp.f32 %v8577_v53  ;;  %v8584_v56 = vpop.xlane.xlu1 %2251  ;;  %v2303_v52 = vmul.f32 %v6380_v48, %v2302_v8  ;;  %vm2401_vm8 = vweird.f32 %v8577_v53  ;;  %v2405_v7 = vand.u32 2147483647, %v8577_v53 }
 0x482   : > { %6383 = vrsqrt.f32 %v8584_v56  ;;  %v2519_v2 = vsel %vm2495_vm7, %v2487_v36, %v8470_v12  ;;  %vm2317_vm9 = vcmp.eq.f32.partialorder %v8584_v56, inf  ;;  %v2407_v20 = vand.u32 2147483648, %v8577_v53 }
 0x483   : > { %v2304_v29 = vmul.f32 %v2303_v52, %v8558_v15  ;;  %6385 = vtanh.f32 %v2566_v5  ;;  %v2535_v38 = vmul.f32 0.044715, %v2519_v2  ;;  %vm2319_vm10 = vcmp.eq.f32.partialorder %v8584_v56, 0.0 }
 0x484   : > { %v2320_v35 = vand.u32 2147483648, %v8584_v56  ;;  %vm8639_vm12 = vcmp.eq.f32.partialorder %v2405_v7, 8.507059e+37  ;;  %vm2496_vm15 = vcmp.gt.f32.partialorder %v8577_v53, 0.999  ;;  %v2408_v11 = vor.u32 1.1754944e-38, %v2407_v20 }
 0x485   : > { %v2306_v37 = vsel %vm2305_vm4, %v8558_v15, %v2304_v29  ;;  %v2543_v42 = vmul.f32 %v2535_v38, %v2519_v2  ;;  %v2527_v24 = vmul.f32 0.5, %v2519_v2 }
 0x486   : > { %v2309_v46 = vsel %vm2307_vm5, %v2308_v58, %v2306_v37 }
 0x487   : > { %v8600_v63 = vpop.eup %6381  ;;  %v8604_v28 = vpop.xlane.xlu2 %2257  ;;  %v8611_v57 = vmax.f32 %v2309_v46, 1e-05  ;;  %v2551_v13 = vmul.f32 %v2543_v42, %v2519_v2 }
 0x488   : > { %v6384_v0 = vpop.eup %6383  ;;  %6387 = vrsqrt.f32 %v8604_v28  ;;  %v2397_v15 = vmul.f32 %v8600_v63, %v8577_v53  ;;  %vm2402_vm11 = vweird.f32 %v8600_v63  ;;  %vm2341_vm13 = vcmp.eq.f32.partialorder %v8604_v28, inf }
 0x489   : > { %v2311_v3 = vmul.f32 %v6384_v0, %v8584_v56  ;;  %v8617_v18 = vpop.xlane.xlu0 %2254  ;;  %v6386_v27 = vpop.eup %6385  ;;  %6389 = vrcp.f32 %v8611_v57  ;;  %v2559_v34 = vadd.f32 %v2551_v13, %v2519_v2  ;;  %v2344_v17 = vand.u32 2147483648, %v8604_v28  ;;  %vm2403_vm14 = vmor %vm2401_vm8, %vm2402_vm11 }
 0x48a   : > { %6391 = vrsqrt.f32 %v8617_v18  ;;  %v2582_v43 = vadd.f32 1.0, %v6386_v27  ;;  %v2398_v12 = vsub.f32 1.0, %v2397_v15  ;;  %vm2343_vm1 = vcmp.eq.f32.partialorder %v8604_v28, 0.0 }
 0x48b   : > { %v2312_v6 = vmul.f32 %v6384_v0, %v2311_v3  ;;  %v2567_v8 = vmul.f32 0.7978846, %v2559_v34  ;;  %vm2329_vm2 = vcmp.eq.f32.partialorder %v8617_v18, inf  ;;  %vm2331_vm3 = vcmp.eq.f32.partialorder %v8617_v18, 0.0 }
 0x48c   : > { %v2590_v50 = vmul.f32 %v2582_v43, %v2526_v23  ;;  %v2399_v10 = vmul.f32 %v8600_v63, %v2398_v12  ;;  %v2420_v36 = vand.u32 2147483647, %v8611_v57  ;;  %v2332_v15 = vand.u32 2147483648, %v8617_v18 }
 0x48d   : > { %v2313_v1 = vmul.f32 0.5, %v2312_v6  ;;  %vm2416_vm5 = vweird.f32 %v8611_v57 }
 0x48e   : > { %v6388_v59 = vpop.eup %6387  ;;  %6069 = vmatmul.msk.f32.vlgmr.msra.gmra.mxu1 %vm311_vm0, %v2590_v50  ;;  %v2598_v54 = vmul.f32 %v2590_v50, %v2590_v50  ;;  %v2400_v45 = vadd.f32 %v8600_v63, %v2399_v10  ;;  %vm2421_vm8 = vcmp.eq.f32.partialorder %v2420_v36, 8.507059e+37 }
 0x48f   : > { %v2314_v48 = vsub.f32 1.5, %v2313_v1  ;;  %v2335_v61 = vmul.f32 %v6388_v59, %v8604_v28  ;;  %v8634_v16 = vpop.eup %6389 }
 0x490   : > { %v6392_v30 = vpop.eup %6391  ;;  %v2606_v21 = vsel %vm311_vm0, %v2598_v54, 0.0  ;;  %v2404_v55 = vsel %vm2403_vm14, %v8600_v63, %v2400_v45  ;;  %v2412_v62 = vmul.f32 %v8634_v16, %v8611_v57  ;;  %vm2417_vm4 = vweird.f32 %v8634_v16 }
 0x491   : > { %v2315_v31 = vmul.f32 %v6384_v0, %v2314_v48  ;;  %v2336_v22 = vmul.f32 %v6388_v59, %v2335_v61  ;;  %v8636_v26 = vpop.xlane.xlu1 %2260  ;;  %v2323_v47 = vmul.f32 %v6392_v30, %v8617_v18  ;;  %2607 = vadd.xlane.f32.xlu2 %v2606_v21  ;;  %v2409_v51 = vsel %vm8639_vm12, %v2408_v11, %v2404_v55  ;;  %vm2418_vm7 = vmor %vm2416_vm5, %vm2417_vm4 }
 0x492   : > { %6393 = vrsqrt.f32 %v8636_v26  ;;  %v2410_v29 = vmul.f32 %v2409_v51, %v8481_v14  ;;  %v2413_v39 = vsub.f32 1.0, %v2412_v62  ;;  %vm2355_vm12 = vcmp.eq.f32.partialorder %v8636_v26, 0.0 }
 0x493   : > { %v2316_v49 = vmul.f32 %v2315_v31, %v8584_v56  ;;  %v2337_v19 = vmul.f32 0.5, %v2336_v22  ;;  %v2324_v44 = vmul.f32 %v6392_v30, %v2323_v47  ;;  %6395 = vtanh.f32 %v2567_v8 }
 0x494   : > { %v2488_v46 = vmul.f32 0.999, %v2410_v29  ;;  %v2414_v40 = vmul.f32 %v8634_v16, %v2413_v39 }
 0x495   : > { %v2318_v52 = vsel %vm2317_vm9, %v8584_v56, %v2316_v49  ;;  %v2338_v5 = vsub.f32 1.5, %v2337_v19  ;;  %v2325_v37 = vmul.f32 0.5, %v2324_v44  ;;  %v2422_v56 = vand.u32 2147483648, %v8611_v57 }
 0x496   : > { %v2321_v60 = vsel %vm2319_vm10, %v2320_v35, %v2318_v52  ;;  %v8681_v27 = vsel %vm2496_vm15, %v2488_v46, %v8481_v14  ;;  %v2415_v6 = vadd.f32 %v8634_v16, %v2414_v40  ;;  %vm2353_vm9 = vcmp.eq.f32.partialorder %v8636_v26, inf }
 0x497   : > { %v8667_v58 = vmax.f32 %v2321_v60, 1e-05  ;;  %v2339_v63 = vmul.f32 %v6388_v59, %v2338_v5  ;;  %v2326_v2 = vsub.f32 1.5, %v2325_v37  ;;  %v2536_v53 = vmul.f32 0.044715, %v8681_v27 }
 0x498   : > { %v6394_v0 = vpop.eup %6393  ;;  %v2419_v14 = vsel %vm2418_vm7, %v8634_v16, %v2415_v6  ;;  %v2423_v7 = vor.u32 1.1754944e-38, %v2422_v56  ;;  %vm2497_vm10 = vcmp.gt.f32.partialorder %v8611_v57, 0.999 }
 0x499   : > { %6397 = vrcp.f32 %v8667_v58  ;;  %v2340_v3 = vmul.f32 %v2339_v63, %v8604_v28  ;;  %v2347_v38 = vmul.f32 %v6394_v0, %v8636_v26  ;;  %v2327_v43 = vmul.f32 %v6392_v30, %v2326_v2  ;;  %v6396_v1 = vpop.eup %6395 }
 0x49a   : > { %v2583_v20 = vadd.f32 1.0, %v6396_v1  ;;  %v2544_v48 = vmul.f32 %v2536_v53, %v8681_v27  ;;  %v2424_v61 = vsel %vm2421_vm8, %v2423_v7, %v2419_v14  ;;  %v2356_v30 = vand.u32 2147483648, %v8636_v26 }
 0x49b   : > { %v2342_v23 = vsel %vm2341_vm13, %v8604_v28, %v2340_v3  ;;  %v2348_v42 = vmul.f32 %v6394_v0, %v2347_v38  ;;  %v2328_v50 = vmul.f32 %v2327_v43, %v8617_v18  ;;  %v2425_v31 = vmul.f32 %v2424_v61, %v8491_v32 }
 0x49c   : > { %v2345_v12 = vsel %vm2343_vm1, %v2344_v17, %v2342_v23  ;;  %v2591_v54 = vmul.f32 %v2583_v20, %v2527_v24  ;;  %v2552_v16 = vmul.f32 %v2544_v48, %v8681_v27  ;;  %v2437_v24 = vand.u32 2147483648, %v8667_v58 }
 0x49d   : > { %v8692_v59 = vmax.f32 %v2345_v12, 1e-05  ;;  %v2349_v13 = vmul.f32 0.5, %v2348_v42  ;;  %v2330_v10 = vsel %vm2329_vm2, %v8617_v18, %v2328_v50  ;;  %v2489_v49 = vmul.f32 0.999, %v2425_v31 }
 0x49e   : > { %v2333_v34 = vsel %vm2331_vm3, %v2332_v15, %v2330_v10  ;;  %6070 = vmatmul.msk.f32.gmra.mxu1 %vm311_vm0, %v2591_v54  ;;  %v2599_v17 = vmul.f32 %v2591_v54, %v2591_v54  ;;  %v2560_v11 = vadd.f32 %v2552_v16, %v8681_v27  ;;  %v2435_v18 = vand.u32 2147483647, %v8667_v58 }
 0x49f   : > { %v6398_v28 = vpop.eup %6397  ;;  %6399 = vrcp.f32 %v8692_v59  ;;  %v2350_v35 = vsub.f32 1.5, %v2349_v13  ;;  %v8707_v45 = vmax.f32 %v2333_v34, 1e-05  ;;  %v8720_v55 = vsel %vm2497_vm10, %v2489_v49, %v8491_v32 }
 0x4a0   : > { %v2427_v22 = vmul.f32 %v6398_v28, %v8667_v58  ;;  %v2609_v21 = vsel %vm311_vm0, %v2599_v17, 0.0  ;;  %v2568_v8 = vmul.f32 0.7978846, %v2560_v11  ;;  %vm2432_vm11 = vweird.f32 %v6398_v28 }
 0x4a1   : > { %v2351_v9 = vmul.f32 %v6394_v0, %v2350_v35  ;;  %6401 = vrcp.f32 %v8707_v45  ;;  %2610 = vadd.xlane.f32.xlu0 %v2609_v21  ;;  %v2537_v44 = vmul.f32 0.044715, %v8720_v55  ;;  %vm2431_vm15 = vweird.f32 %v8667_v58 }
 0x4a2   : > { %v2428_v19 = vsub.f32 1.0, %v2427_v22  ;;  %6403 = vtanh.f32 %v2568_v8  ;;  %vm2433_vm13 = vmor %vm2431_vm15, %vm2432_vm11  ;;  %v2438_v39 = vor.u32 1.1754944e-38, %v2437_v24  ;;  %vm2436_vm1 = vcmp.eq.f32.partialorder %v2435_v18, 8.507059e+37 }
 0x4a3   : > { %v2352_v47 = vmul.f32 %v2351_v9, %v8636_v26  ;;  %v2545_v29 = vmul.f32 %v2537_v44, %v8720_v55  ;;  %v2528_v0 = vmul.f32 0.5, %v8681_v27  ;;  %vm2498_vm2 = vcmp.gt.f32.partialorder %v8667_v58, 0.999 }
 0x4a4   : > { %v2429_v62 = vmul.f32 %v6398_v28, %v2428_v19  ;;  %vm2461_vm3 = vweird.f32 %v8692_v59  ;;  %v2465_v15 = vand.u32 2147483647, %v8692_v59  ;;  %v2452_v53 = vand.u32 2147483648, %v8707_v45 }
 0x4a5   : > { %v6400_v52 = vpop.eup %6399  ;;  %v2354_v5 = vsel %vm2353_vm9, %v8636_v26, %v2352_v47  ;;  %v2467_v26 = vand.u32 2147483648, %v8692_v59  ;;  %v2553_v46 = vmul.f32 %v2545_v29, %v8720_v55  ;;  %v2450_v50 = vand.u32 2147483647, %v8707_v45 }
 0x4a6   : > { %v2357_v51 = vsel %vm2355_vm12, %v2356_v30, %v2354_v5  ;;  %v2430_v60 = vadd.f32 %v6398_v28, %v2429_v62  ;;  %v2457_v57 = vmul.f32 %v6400_v52, %v8692_v59  ;;  %vm2462_vm14 = vweird.f32 %v6400_v52 }
 0x4a7   : > { %v8729_v32 = vmax.f32 %v2357_v51, 1e-05  ;;  %v6402_v36 = vpop.eup %6401  ;;  %v2561_v38 = vadd.f32 %v2553_v46, %v8720_v55  ;;  %v2468_v43 = vor.u32 1.1754944e-38, %v2467_v26  ;;  %vm2463_vm4 = vmor %vm2461_vm3, %vm2462_vm14  ;;  %vm2466_vm7 = vcmp.eq.f32.partialorder %v2465_v15, 8.507059e+37 }
 0x4a8   : > { %v2434_v63 = vsel %vm2433_vm13, %v6398_v28, %v2430_v60  ;;  %v2458_v37 = vsub.f32 1.0, %v2457_v57  ;;  %v2442_v2 = vmul.f32 %v6402_v36, %v8707_v45  ;;  %v6404_v6 = vpop.eup %6403  ;;  %vm2447_vm5 = vweird.f32 %v6402_v36 }
 0x4a9   : > { %6405 = vrcp.f32 %v8729_v32  ;;  %v2439_v40 = vsel %vm2436_vm1, %v2438_v39, %v2434_v63  ;;  %v2584_v1 = vadd.f32 1.0, %v6404_v6  ;;  %v2569_v12 = vmul.f32 0.7978846, %v2561_v38 }
 0x4aa   : > { %v2440_v56 = vmul.f32 %v2439_v40, %v8520_v41  ;;  %v2459_v3 = vmul.f32 %v6400_v52, %v2458_v37  ;;  %v2443_v42 = vsub.f32 1.0, %v2442_v2  ;;  %vm2446_vm8 = vweird.f32 %v8707_v45 }
 0x4ab   : > { %v2592_v20 = vmul.f32 %v2584_v1, %v2528_v0  ;;  %6407 = vtanh.f32 %v2569_v12  ;;  %vm2448_vm9 = vmor %vm2446_vm8, %vm2447_vm5  ;;  %v2453_v34 = vor.u32 1.1754944e-38, %v2452_v53  ;;  %vm2451_vm10 = vcmp.eq.f32.partialorder %v2450_v50, 8.507059e+37 }
 0x4ac   : > { %v2490_v23 = vmul.f32 0.999, %v2440_v56  ;;  %v2460_v27 = vadd.f32 %v6400_v52, %v2459_v3  ;;  %v2444_v58 = vmul.f32 %v6402_v36, %v2443_v42  ;;  %vm2500_vm11 = vcmp.gt.f32.partialorder %v8692_v59, 0.999 }
 0x4ad   : > { %6071 = vmatmul.msk.f32.gmra.mxu1 %vm311_vm0, %v2592_v20  ;;  %v2482_v19 = vand.u32 2147483648, %v8729_v32  ;;  %v2480_v24 = vand.u32 2147483647, %v8729_v32  ;;  %v2529_v8 = vmul.f32 0.5, %v8720_v55  ;;  %vm2499_vm15 = vcmp.gt.f32.partialorder %v8707_v45, 0.999 }
 0x4ae   : > { %v8744_v14 = vsel %vm2498_vm2, %v2490_v23, %v8520_v41  ;;  %v2464_v7 = vsel %vm2463_vm4, %v6400_v52, %v2460_v27  ;;  %v2445_v28 = vadd.f32 %v6402_v36, %v2444_v58  ;;  %v2600_v41 = vmul.f32 %v2592_v20, %v2592_v20 }
 0x4af   : > { %v6406_v13 = vpop.eup %6405  ;;  %v2538_v48 = vmul.f32 0.044715, %v8744_v14  ;;  %v2469_v61 = vsel %vm2466_vm7, %v2468_v43, %v2464_v7  ;;  %vm2476_vm13 = vweird.f32 %v8729_v32  ;;  %vm2481_vm14 = vcmp.eq.f32.partialorder %v2480_v24, 8.507059e+37 }
 0x4b0   : > { %v2472_v10 = vmul.f32 %v6406_v13, %v8729_v32  ;;  %v2470_v54 = vmul.f32 %v2469_v61, %v8535_v33  ;;  %v2449_v16 = vsel %vm2448_vm9, %v6402_v36, %v2445_v28  ;;  %v2612_v22 = vsel %vm311_vm0, %v2600_v41, 0.0 }
 0x4b1   : > { %v2546_v35 = vmul.f32 %v2538_v48, %v8744_v14  ;;  %v2454_v17 = vsel %vm2451_vm10, %v2453_v34, %v2449_v16  ;;  %2613 = vadd.xlane.f32.xlu2 %v2612_v22  ;;  %v6408_v18 = vpop.eup %6407  ;;  %vm2477_vm12 = vweird.f32 %v6406_v13  ;;  %vm2501_vm2 = vcmp.gt.f32.partialorder %v8729_v32, 0.999 }
 0x4b2   : > { %v2473_v31 = vsub.f32 1.0, %v2472_v10  ;;  %v2492_v30 = vmul.f32 0.999, %v2470_v54  ;;  %v2455_v11 = vmul.f32 %v2454_v17, %v8541_v25  ;;  %v2585_v62 = vadd.f32 1.0, %v6408_v18  ;;  %vm2478_vm1 = vmor %vm2476_vm13, %vm2477_vm12 }
 0x4b3   : > { %v2554_v9 = vmul.f32 %v2546_v35, %v8744_v14  ;;  %v2530_v3 = vmul.f32 0.5, %v8744_v14 }
 0x4b4   : > { %v2474_v49 = vmul.f32 %v6406_v13, %v2473_v31  ;;  %v2524_v21 = vsel %vm2500_vm11, %v2492_v30, %v8535_v33  ;;  %v2491_v5 = vmul.f32 0.999, %v2455_v11  ;;  %v2593_v51 = vmul.f32 %v2585_v62, %v2529_v8 }
 0x4b5   : > { %v2562_v47 = vadd.f32 %v2554_v9, %v8744_v14  ;;  %v2540_v52 = vmul.f32 0.044715, %v2524_v21  ;;  %v2483_v33 = vor.u32 1.1754944e-38, %v2482_v19  ;;  %v2532_v1 = vmul.f32 0.5, %v2524_v21 }
 0x4b6   : > { %v2475_v59 = vadd.f32 %v6406_v13, %v2474_v49  ;;  %v2523_v57 = vsel %vm2499_vm15, %v2491_v5, %v8541_v25  ;;  %6072 = vmatmul.msk.f32.gmra.mxu1 %vm311_vm0, %v2593_v51  ;;  %v2601_v41 = vmul.f32 %v2593_v51, %v2593_v51 }
 0x4b7   : > { %v2570_v44 = vmul.f32 0.7978846, %v2562_v47  ;;  %v2548_v60 = vmul.f32 %v2540_v52, %v2524_v21  ;;  %v2539_v29 = vmul.f32 0.044715, %v2523_v57 }
 0x4b8   : > { %v2479_v39 = vsel %vm2478_vm1, %v6406_v13, %v2475_v59  ;;  %v2615_v35 = vsel %vm311_vm0, %v2601_v41, 0.0 }
 0x4b9   : > { %6409 = vtanh.f32 %v2570_v44  ;;  %v2556_v55 = vmul.f32 %v2548_v60, %v2524_v21  ;;  %v2484_v63 = vsel %vm2481_vm14, %v2483_v33, %v2479_v39  ;;  %v2547_v37 = vmul.f32 %v2539_v29, %v2523_v57 }
 0x4ba   : > { %v2485_v45 = vmul.f32 %v2484_v63, %v8551_v4 }
 0x4bb   : > { %v2564_v26 = vadd.f32 %v2556_v55, %v2524_v21  ;;  %v2555_v36 = vmul.f32 %v2547_v37, %v2523_v57 }
 0x4bc   : > { %v2493_v0 = vmul.f32 0.999, %v2485_v45 }
 0x4bd   : > { %v2572_v46 = vmul.f32 0.7978846, %v2564_v26  ;;  %v2563_v40 = vadd.f32 %v2555_v36, %v2523_v57 }
 0x4be   : > { %v2525_v56 = vsel %vm2501_vm2, %v2493_v0, %v8551_v4  ;;  %v2531_v4 = vmul.f32 0.5, %v2523_v57 }
 0x4bf   : > { %v6410_v25 = vpop.eup %6409  ;;  %6411 = vtanh.f32 %v2572_v46  ;;  %v2541_v38 = vmul.f32 0.044715, %v2525_v56  ;;  %v2571_v15 = vmul.f32 0.7978846, %v2563_v40  ;;  %v2533_v13 = vmul.f32 0.5, %v2525_v56 }
 0x4c0   : > { %v2586_v2 = vadd.f32 1.0, %v6410_v25 }
 0x4c1   : > { %v2549_v23 = vmul.f32 %v2541_v38, %v2525_v56  ;;  %6413 = vtanh.f32 %v2571_v15 }
 0x4c2   : > { %v2594_v6 = vmul.f32 %v2586_v2, %v2530_v3 }
 0x4c3   : > { %v2557_v27 = vmul.f32 %v2549_v23, %v2525_v56 }
 0x4c4   : > { %6073 = vmatmul.msk.f32.gmra.mxu1 %vm311_vm0, %v2594_v6  ;;  %v2602_v31 = vmul.f32 %v2594_v6, %v2594_v6 }
 0x4c5   : > { %v6412_v43 = vpop.eup %6411  ;;  %v2565_v42 = vadd.f32 %v2557_v27, %v2525_v56 }
 0x4c6   : > { %v2588_v32 = vadd.f32 1.0, %v6412_v43  ;;  %v2618_v22 = vsel %vm311_vm0, %v2602_v31, 0.0 }
 0x4c7   : > { %v2573_v12 = vmul.f32 0.7978846, %v2565_v42  ;;  %v6414_v53 = vpop.eup %6413 }
 0x4c8   : > { %v2596_v7 = vmul.f32 %v2588_v32, %v2532_v1  ;;  %v2587_v58 = vadd.f32 1.0, %v6414_v53 }
 0x4c9   : > { %6415 = vtanh.f32 %v2573_v12 }
 0x4ca   : > { %6075 = vmatmul.msk.f32.vlgmr.msrb.gmra.mxu3 %vm311_vm0, %v2596_v7  ;;  %v2595_v14 = vmul.f32 %v2587_v58, %v2531_v4  ;;  %v2604_v24 = vmul.f32 %v2596_v7, %v2596_v7 }
 0x4cc   : > { %6074 = vmatmul.msk.f32.gmra.mxu1 %vm311_vm0, %v2595_v14  ;;  %v2603_v11 = vmul.f32 %v2595_v14, %v2595_v14  ;;  %v2624_v5 = vsel %vm311_vm0, %v2604_v24, 0.0 }
 0x4ce   : > { %v2621_v18 = vsel %vm311_vm0, %v2603_v11, 0.0 }
 0x4cf   : > { %v6416_v50 = vpop.eup %6415 }
 0x4d0   : > { %v2589_v20 = vadd.f32 1.0, %v6416_v50 }
 0x4d2   : > { %v2597_v48 = vmul.f32 %v2589_v20, %v2533_v13 }
 0x4d4   : > { %6076 = vmatmul.msk.f32.gmra.mxu3 %vm311_vm0, %v2597_v48  ;;  %v2605_v21 = vmul.f32 %v2597_v48, %v2597_v48 }
 0x4d6   : > { %v2627_v62 = vsel %vm311_vm0, %v2605_v21, 0.0 }
 0x504   : > { %v2608_v56 = vpop.xlane.xlu2 %2607 }
 0x505   : > { %6417 = vrsqrt.f32 %v2608_v56  ;;  %vm2637_vm3 = vcmp.eq.f32.partialorder %v2608_v56, inf  ;;  %vm2639_vm4 = vcmp.eq.f32.partialorder %v2608_v56, 0.0 }
 0x50b   : > { %v8775_v61 = vpop.f32.mrf.mxu1  ;;  %v6418_v6 = vpop.eup %6417 }
 0x50c   : > { %v2811_v28 = vmul.f32 %v8775_v61, %v8775_v61  ;;  %v3291_v59 = vand.u32 2147483647, %v8775_v61  ;;  %v2631_v43 = vmul.f32 %v6418_v6, %v2608_v56 }
 0x50e   : > { %v2819_v10 = vsel %vm311_vm0, %v2811_v28, 0.0  ;;  %v3299_v51 = vsel %vm311_vm0, %v3291_v59, 0.0  ;;  %v2632_v1 = vmul.f32 %v6418_v6, %v2631_v43 }
 0x50f   : > { %2820 = vadd.xlane.f32.xlu1 %v2819_v10 }
 0x510   : > { %v2633_v53 = vmul.f32 0.5, %v2632_v1 }
 0x512   : > { %v2634_v4 = vsub.f32 1.5, %v2633_v53 }
 0x514   : > { %v2611_v27 = vpop.xlane.xlu0 %2610  ;;  %v2635_v50 = vmul.f32 %v6418_v6, %v2634_v4 }
 0x515   : > { %6419 = vrsqrt.f32 %v2611_v27  ;;  %vm2649_vm5 = vcmp.eq.f32.partialorder %v2611_v27, inf  ;;  %v2652_v21 = vand.u32 2147483648, %v2611_v27  ;;  %vm2651_vm7 = vcmp.eq.f32.partialorder %v2611_v27, 0.0 }
 0x516   : > { %v2636_v48 = vmul.f32 %v2635_v50, %v2608_v56 }
 0x517   : > { %2616 = vadd.xlane.f32.xlu1 %v2615_v35  ;;  %v2640_v35 = vand.u32 2147483648, %v2608_v56 }
 0x518   : > { %v2638_v41 = vsel %vm2637_vm3, %v2608_v56, %v2636_v48 }
 0x519   : > { %v2641_v31 = vsel %vm2639_vm4, %v2640_v35, %v2638_v41 }
 0x51b   : > { %v8781_v54 = vpop.f32.mrf.mxu1  ;;  %v6420_v12 = vpop.eup %6419 }
 0x51c   : > { %v2812_v34 = vmul.f32 %v8781_v54, %v8781_v54  ;;  %v3292_v39 = vand.u32 2147483647, %v8781_v54  ;;  %v2643_v7 = vmul.f32 %v6420_v12, %v2611_v27 }
 0x51e   : > { %v2822_v16 = vsel %vm311_vm0, %v2812_v34, 0.0  ;;  %v3302_v37 = vsel %vm311_vm0, %v3292_v39, 0.0  ;;  %v2644_v14 = vmul.f32 %v6420_v12, %v2643_v7 }
 0x51f   : > { %2823 = vadd.xlane.f32.xlu0 %v2822_v16 }
 0x520   : > { %v2645_v20 = vmul.f32 0.5, %v2644_v14 }
 0x522   : > { %v2646_v10 = vsub.f32 1.5, %v2645_v20 }
 0x524   : > { %v2614_v32 = vpop.xlane.xlu2 %2613  ;;  %v2647_v16 = vmul.f32 %v6420_v12, %v2646_v10 }
 0x525   : > { %6421 = vrsqrt.f32 %v2614_v32  ;;  %vm2661_vm8 = vcmp.eq.f32.partialorder %v2614_v32, inf  ;;  %vm2663_vm9 = vcmp.eq.f32.partialorder %v2614_v32, 0.0 }
 0x526   : > { %v2648_v11 = vmul.f32 %v2647_v16, %v2611_v27 }
 0x527   : > { %2619 = vadd.xlane.f32.xlu0 %v2618_v22 }
 0x52a   : > { %v8787_v9 = vpop.f32.mrf.mxu1 }
 0x52b   : > { %v2813_v30 = vmul.f32 %v8787_v9, %v8787_v9  ;;  %v3293_v45 = vand.u32 2147483647, %v8787_v9  ;;  %v6422_v58 = vpop.eup %6421 }
 0x52c   : > { %v2655_v13 = vmul.f32 %v6422_v58, %v2614_v32 }
 0x52d   : > { %v2825_v17 = vsel %vm311_vm0, %v2813_v30, 0.0  ;;  %v3305_v0 = vsel %vm311_vm0, %v3293_v45, 0.0 }
 0x52e   : > { %2826 = vadd.xlane.f32.xlu2 %v2825_v17  ;;  %v2656_v28 = vmul.f32 %v6422_v58, %v2655_v13  ;;  %v8834_v17 = vmax.f32 %v2641_v31, 1e-05 }
 0x530   : > { %v2657_v34 = vmul.f32 0.5, %v2656_v28  ;;  %v6077_v24 = vclamps-f32 %v8834_v17, 0.99999  ;;  %v2956_v14 = vand.u32 2147483647, %v8834_v17  ;;  %vm2952_vm15 = vweird.f32 %v8834_v17 }
 0x531   : > { %v2958_v48 = vand.u32 2147483648, %v8834_v17 }
 0x532   : > { %v2658_v30 = vsub.f32 1.5, %v2657_v34  ;;  %v3083_v59 = vadd.f32 1.0, %v6077_v24  ;;  %vm2957_vm1 = vcmp.eq.f32.partialorder %v2956_v14, 8.507059e+37 }
 0x533   : > { %v8792_v49 = vpop.f32.mrf.mxu1 }
 0x534   : > { %v2814_v19 = vmul.f32 %v8792_v49, %v8792_v49  ;;  %v3294_v2 = vand.u32 2147483647, %v8792_v49 }
 0x536   : > { %v2828_v47 = vsel %vm311_vm0, %v2814_v19, 0.0  ;;  %2622 = vadd.xlane.f32.xlu2 %v2621_v18  ;;  %v3308_v15 = vsel %vm311_vm0, %v3294_v2, 0.0  ;;  %v2659_v19 = vmul.f32 %v6422_v58, %v2658_v30  ;;  %v2650_v18 = vsel %vm2649_vm5, %v2611_v27, %v2648_v11 }
 0x537   : > { %2829 = vadd.xlane.f32.xlu1 %v2828_v47 }
 0x53e   : > { %2628 = vadd.xlane.f32.xlu2 %v2627_v62 }
 0x53f   : > { %2625 = vadd.xlane.f32.xlu1 %v2624_v5  ;;  %v2660_v5 = vmul.f32 %v2659_v19, %v2614_v32 }
 0x541   : > { %v8798_v8 = vpop.f32.mrf.mxu1  ;;  %v2662_v39 = vsel %vm2661_vm8, %v2614_v32, %v2660_v5 }
 0x542   : > { %v2815_v52 = vmul.f32 %v8798_v8, %v8798_v8  ;;  %v3295_v26 = vand.u32 2147483647, %v8798_v8 }
 0x544   : > { %v2831_v44 = vsel %vm311_vm0, %v2815_v52, 0.0  ;;  %v3311_v25 = vsel %vm311_vm0, %v3295_v26, 0.0  ;;  %v2653_v52 = vsel %vm2651_vm7, %v2652_v21, %v2650_v18  ;;  %v2959_v18 = vor.u32 1.1754944e-38, %v2958_v48 }
 0x545   : > { %2832 = vadd.xlane.f32.xlu0 %v2831_v44 }
 0x547   : > { %3300 = vadd.xlane.f32.xlu1 %v3299_v51 }
 0x549   : > { %v8807_v60 = vpop.f32.mrf.mxu1 }
 0x54a   : > { %v2816_v57 = vmul.f32 %v8807_v60, %v8807_v60  ;;  %v3296_v3 = vand.u32 2147483647, %v8807_v60 }
 0x54c   : > { %v2834_v29 = vsel %vm311_vm0, %v2816_v57, 0.0  ;;  %v3314_v38 = vsel %vm311_vm0, %v3296_v3, 0.0  ;;  %v8840_v57 = vmax.f32 %v2653_v52, 1e-05 }
 0x54d   : > { %v8811_v33 = vpop.f32.mrf.mxu3  ;;  %2835 = vadd.xlane.f32.xlu0 %v2834_v29 }
 0x54e   : > { %v2817_v55 = vmul.f32 %v8811_v33, %v8811_v33  ;;  %v3297_v23 = vand.u32 2147483647, %v8811_v33  ;;  %v2971_v21 = vand.u32 2147483647, %v8840_v57  ;;  %vm2967_vm4 = vweird.f32 %v8840_v57 }
 0x54f   : > { %3303 = vadd.xlane.f32.xlu1 %v3302_v37 }
 0x550   : > { %v2837_v63 = vsel %vm311_vm0, %v2817_v55, 0.0  ;;  %v3317_v42 = vsel %vm311_vm0, %v3297_v23, 0.0  ;;  %v3107_v55 = vsub.f32 1.0, %v6077_v24  ;;  %vm8921_vm7 = vcmp.eq.f32.partialorder %v2971_v21, 8.507059e+37 }
 0x551   : > { %2838 = vadd.xlane.f32.xlu2 %v2837_v63  ;;  %v2664_v63 = vand.u32 2147483648, %v2614_v32 }
 0x553   : > { %v2665_v26 = vsel %vm2663_vm9, %v2664_v63, %v2662_v39  ;;  %v2973_v39 = vand.u32 2147483648, %v8840_v57 }
 0x557   : > { %v8821_v36 = vpop.f32.mrf.mxu3  ;;  %3312 = vadd.xlane.f32.xlu1 %v3311_v25 }
 0x558   : > { %v2818_v46 = vmul.f32 %v8821_v36, %v8821_v36 }
 0x559   : > { %3306 = vadd.xlane.f32.xlu2 %v3305_v0 }
 0x55a   : > { %v2840_v40 = vsel %vm311_vm0, %v2818_v46, 0.0 }
 0x55b   : > { %2841 = vadd.xlane.f32.xlu0 %v2840_v40  ;;  %v8848_v40 = vmax.f32 %v2665_v26, 1e-05 }
 0x55d   : > { %v6079_v58 = vclamps-f32 %v8848_v40, 0.99999 }
 0x55f   : > { %v3085_v16 = vadd.f32 1.0, %v6079_v58  ;;  %v3109_v11 = vsub.f32 1.0, %v6079_v58 }
 0x561   : > { %3315 = vadd.xlane.f32.xlu2 %v3314_v38  ;;  %v6078_v38 = vclamps-f32 %v8840_v57, 0.99999 }
 0x563   : > { %3309 = vadd.xlane.f32.xlu0 %v3308_v15  ;;  %v3084_v12 = vadd.f32 1.0, %v6078_v38  ;;  %v3108_v50 = vsub.f32 1.0, %v6078_v38 }
 0x569   : > { %3318 = vadd.xlane.f32.xlu2 %v3317_v42 }
 0x582   : > { %v2821_v22 = vpop.xlane.xlu1 %2820 }
 0x583   : > { %6423 = vrsqrt.f32 %v2821_v22  ;;  %vm2850_vm10 = vcmp.eq.f32.partialorder %v2821_v22, inf  ;;  %v2853_v56 = vand.u32 2147483648, %v2821_v22  ;;  %vm2852_vm11 = vcmp.eq.f32.partialorder %v2821_v22, 0.0 }
 0x584   : > { %6425 = vrcp.f32 %v8834_v17 }
 0x585   : > { %6427 = vlog2.f32 %v3083_v59 }
 0x586   : > { %6429 = vrcp.f32 %v8840_v57 }
 0x587   : > { %6431 = vlog2.f32 %v3107_v55 }
 0x589   : > { %v6424_v47 = vpop.eup %6423 }
 0x58a   : > { %v2844_v62 = vmul.f32 %v6424_v47, %v2821_v22  ;;  %v8838_v51 = vpop.eup %6425  ;;  %v8857_v32 = vpop.xlane.xlu1 %2616 }
 0x58b   : > { %v2948_v45 = vmul.f32 %v8838_v51, %v8834_v17  ;;  %v6428_v15 = vpop.eup %6427  ;;  %vm2953_vm12 = vweird.f32 %v8838_v51 }
 0x58c   : > { %v2845_v44 = vmul.f32 %v6424_v47, %v2844_v62  ;;  %v8851_v23 = vpop.eup %6429  ;;  %v3092_v28 = vmul.f32 0.6931472, %v6428_v15  ;;  %vm8875_vm13 = vmor %vm2952_vm15, %vm2953_vm12 }
 0x58d   : > { %v2949_v3 = vsub.f32 1.0, %v2948_v45  ;;  %v6432_v43 = vpop.eup %6431  ;;  %v2963_v4 = vmul.f32 %v8851_v23, %v8840_v57  ;;  %vm2968_vm14 = vweird.f32 %v8851_v23 }
 0x58e   : > { %v2846_v29 = vmul.f32 0.5, %v2845_v44  ;;  %v3116_v10 = vmul.f32 0.6931472, %v6432_v43  ;;  %vm8917_vm5 = vmor %vm2967_vm4, %vm2968_vm14 }
 0x58f   : > { %v2950_v42 = vmul.f32 %v8838_v51, %v2949_v3  ;;  %v2964_v34 = vsub.f32 1.0, %v2963_v4 }
 0x590   : > { %v2847_v37 = vsub.f32 1.5, %v2846_v29 }
 0x591   : > { %v2951_v20 = vadd.f32 %v8838_v51, %v2950_v42  ;;  %v2965_v59 = vmul.f32 %v8851_v23, %v2964_v34 }
 0x592   : > { %v2848_v0 = vmul.f32 %v6424_v47, %v2847_v37  ;;  %v8845_v46 = vpop.xlane.xlu0 %2823  ;;  %v3131_v47 = vsub.f32 %v3092_v28, %v3116_v10  ;;  %v299_v10 = vld [vmem:[%s11188_s4] sm:$0x1] }
 0x593   : > { %6433 = vrsqrt.f32 %v8845_v46  ;;  %v2955_v17 = vsel %vm8875_vm13, %v8838_v51, %v2951_v20  ;;  %vm2862_vm2 = vcmp.eq.f32.partialorder %v8845_v46, inf  ;;  %vm2864_vm3 = vcmp.eq.f32.partialorder %v8845_v46, 0.0 }
 0x594   : > { %v2849_v25 = vmul.f32 %v2848_v0, %v2821_v22  ;;  %6435 = vrcp.f32 %v8848_v40  ;;  %v2960_v51 = vsel %vm2957_vm1, %v2959_v18, %v2955_v17  ;;  %v2865_v0 = vand.u32 2147483648, %v8845_v46 }
 0x595   : > { %v2988_v18 = vand.u32 2147483648, %v8848_v40  ;;  %v3651_v21 = vmul.f32 %v299_v10, %v299_v10 }
 0x596   : > { %v2851_v2 = vsel %vm2850_vm10, %v2821_v22, %v2849_v25  ;;  %vm2982_vm10 = vweird.f32 %v8848_v40 }
 0x597   : > { %v2854_v6 = vsel %vm2852_vm11, %v2853_v56, %v2851_v2  ;;  %v2966_v2 = vadd.f32 %v8851_v23, %v2965_v59 }
 0x598   : > { %v8853_v27 = vmax.f32 %v2854_v6, 1e-05  ;;  %v3139_v6 = vmul.f32 0.5, %v3131_v47 }
 0x599   : > { %v6434_v1 = vpop.eup %6433 }
 0x59a   : > { %6437 = vrcp.f32 %v8853_v27  ;;  %v2856_v53 = vmul.f32 %v6434_v1, %v8845_v46  ;;  %v8861_v7 = vpop.xlane.xlu0 %2619  ;;  %v8873_v41 = vpop.eup %6435  ;;  %v2961_v3 = vmul.f32 %v2960_v51, %v8853_v27  ;;  %vm3176_vm12 = vweird.f32 %v8853_v27 }
 0x59b   : > { %6439 = vrsqrt.f32 %v8861_v7  ;;  %v2978_v24 = vmul.f32 %v8873_v41, %v8848_v40  ;;  %vm2983_vm8 = vweird.f32 %v8873_v41  ;;  %vm2685_vm1 = vcmp.eq.f32.partialorder %v8861_v7, inf }
 0x59c   : > { %6441 = vrsqrt.f32 %v8857_v32  ;;  %v2857_v13 = vmul.f32 %v6434_v1, %v2856_v53  ;;  %v3147_v28 = vmul.f32 %v3139_v6, %v2961_v3  ;;  %vm8968_vm15 = vmor %vm2982_vm10, %vm2983_vm8  ;;  %vm2675_vm10 = vcmp.eq.f32.partialorder %v8857_v32, 0.0 }
 0x59d   : > { %6443 = vlog2.f32 %v3084_v12  ;;  %v2979_v25 = vsub.f32 1.0, %v2978_v24 }
 0x59e   : > { %v2858_v35 = vmul.f32 0.5, %v2857_v13  ;;  %6445 = vlog2.f32 %v3108_v50  ;;  %v2974_v50 = vor.u32 1.1754944e-38, %v2973_v39 }
 0x59f   : > { %6447 = vlog2.f32 %v3085_v16  ;;  %v2980_v13 = vmul.f32 %v8873_v41, %v2979_v25 }
 0x5a0   : > { %v8879_v22 = vpop.eup %6437  ;;  %v2859_v30 = vsub.f32 1.5, %v2858_v35  ;;  %v2970_v35 = vsel %vm8917_vm5, %v8851_v23, %v2966_v2 }
 0x5a1   : > { %v8884_v19 = vpop.eup %6439  ;;  %v8891_v5 = vpop.xlane.xlu2 %2826  ;;  %v3172_v29 = vmul.f32 %v8879_v22, %v8853_v27  ;;  %v2981_v24 = vadd.f32 %v8873_v41, %v2980_v13  ;;  %vm3177_vm9 = vweird.f32 %v8879_v22  ;;  %v3298_v13 = vand.u32 2147483647, %v8821_v36 }
 0x5a2   : > { %v8889_v62 = vpop.eup %6441  ;;  %v2860_v52 = vmul.f32 %v6434_v1, %v2859_v30  ;;  %v2679_v44 = vmul.f32 %v8884_v19, %v8861_v7  ;;  %6449 = vrsqrt.f32 %v8891_v5  ;;  %v2986_v30 = vand.u32 2147483647, %v8848_v40  ;;  %vm8978_vm13 = vmor %vm3176_vm12, %vm3177_vm9 }
 0x5a3   : > { %v6444_v55 = vpop.eup %6443  ;;  %6451 = vlog2.f32 %v3109_v11  ;;  %v2667_v26 = vmul.f32 %v8889_v62, %v8857_v32  ;;  %v3173_v43 = vsub.f32 1.0, %v3172_v29  ;;  %v3652_v29 = vsel %vm1926_vm6, %v3651_v21, 0.0 }
 0x5a4   : > { %v2861_v63 = vmul.f32 %v2860_v52, %v8845_v46  ;;  %v2680_v37 = vmul.f32 %v8884_v19, %v2679_v44  ;;  %v6446_v45 = vpop.eup %6445  ;;  %v3094_v12 = vmul.f32 0.6931472, %v6444_v55  ;;  %3653 = vadd.xlane.f32.xlu1 %v3652_v29  ;;  %vm8958_vm11 = vcmp.eq.f32.partialorder %v2986_v30, 8.507059e+37 }
 0x5a5   : > { %v6448_v42 = vpop.eup %6447  ;;  %v3118_v53 = vmul.f32 0.6931472, %v6446_v45  ;;  %v2668_v58 = vmul.f32 %v8889_v62, %v2667_v26  ;;  %v3174_v31 = vmul.f32 %v8879_v22, %v3173_v43  ;;  %v3182_v26 = vand.u32 2147483648, %v8853_v27 }
 0x5a6   : > { %v2863_v56 = vsel %vm2862_vm2, %v8845_v46, %v2861_v63  ;;  %v2681_v15 = vmul.f32 0.5, %v2680_v37  ;;  %v8945_v52 = vmul.f32 0.6931472, %v6448_v42  ;;  %v2975_v63 = vsel %vm8921_vm7, %v2974_v50, %v2970_v35 }
 0x5a7   : > { %v2866_v38 = vsel %vm2864_vm3, %v2865_v0, %v2863_v56  ;;  %v3132_v11 = vsub.f32 %v3094_v12, %v3118_v53  ;;  %v2669_v47 = vmul.f32 0.5, %v2668_v58  ;;  %v3175_v51 = vadd.f32 %v8879_v22, %v3174_v31 }
 0x5a8   : > { %v8911_v1 = vmax.f32 %v2866_v38, 1e-05  ;;  %v6450_v4 = vpop.eup %6449  ;;  %v2682_v34 = vsub.f32 1.5, %v2681_v15  ;;  %v3180_v38 = vand.u32 2147483647, %v8853_v27  ;;  %v2989_v15 = vor.u32 1.1754944e-38, %v2988_v18 }
 0x5a9   : > { %v6452_v20 = vpop.eup %6451  ;;  %v2868_v57 = vmul.f32 %v6450_v4, %v8891_v5  ;;  %v8928_v48 = vpop.xlane.xlu2 %2622  ;;  %v2670_v45 = vsub.f32 1.5, %v2669_v47  ;;  %v3140_v0 = vmul.f32 0.5, %v3132_v11  ;;  %v3179_v42 = vsel %vm8978_vm13, %v8879_v22, %v3175_v51 }
 0x5aa   : > { %6453 = vrcp.f32 %v8911_v1  ;;  %v8936_v16 = vpop.xlane.xlu1 %2829  ;;  %v8947_v44 = vmul.f32 0.6931472, %v6452_v20  ;;  %v2683_v59 = vmul.f32 %v8884_v19, %v2682_v34  ;;  %v2985_v12 = vsel %vm8968_vm15, %v8873_v41, %v2981_v24 }
 0x5ab   : > { %6455 = vrsqrt.f32 %v8928_v48  ;;  %v2869_v17 = vmul.f32 %v6450_v4, %v2868_v57  ;;  %v2671_v14 = vmul.f32 %v8889_v62, %v2670_v45  ;;  %v3183_v41 = vor.u32 1.1754944e-38, %v3182_v26 }
 0x5ac   : > { %6457 = vrsqrt.f32 %v8936_v16  ;;  %v2684_v6 = vmul.f32 %v2683_v59, %v8861_v7  ;;  %v3133_v53 = vsub.f32 %v8945_v52, %v8947_v44  ;;  %vm3181_vm14 = vcmp.eq.f32.partialorder %v3180_v38, 8.507059e+37 }
 0x5ad   : > { %v2870_v23 = vmul.f32 0.5, %v2869_v17  ;;  %6459 = vtanh.f32 %v3147_v28  ;;  %v2976_v20 = vmul.f32 %v2975_v63, %v8911_v1  ;;  %vm2874_vm2 = vcmp.eq.f32.partialorder %v8891_v5, inf }
 0x5ae   : > { %v2686_v57 = vsel %vm2685_vm1, %v8861_v7, %v2684_v6  ;;  %v3184_v28 = vsel %vm3181_vm14, %v3183_v41, %v3179_v42  ;;  %v2688_v35 = vand.u32 2147483648, %v8861_v7  ;;  %v2877_v30 = vand.u32 2147483648, %v8891_v5 }
 0x5af   : > { %v2871_v55 = vsub.f32 1.5, %v2870_v23  ;;  %vm2687_vm3 = vcmp.eq.f32.partialorder %v8861_v7, 0.0  ;;  %v9018_v11 = vsel %vm8958_vm11, %v2989_v15, %v2985_v12  ;;  %vm2876_vm4 = vcmp.eq.f32.partialorder %v8891_v5, 0.0 }
 0x5b0   : > { %v8953_v39 = vpop.eup %6453  ;;  %v2689_v47 = vsel %vm2687_vm3, %v2688_v35, %v2686_v57  ;;  %v2672_v29 = vmul.f32 %v2671_v14, %v8857_v32  ;;  %vm2673_vm7 = vcmp.eq.f32.partialorder %v8857_v32, inf  ;;  %vm3191_vm9 = vweird.f32 %v8911_v1 }
 0x5b1   : > { %v8962_v19 = vpop.eup %6455  ;;  %v2872_v40 = vmul.f32 %v6450_v4, %v2871_v55  ;;  %v3187_v46 = vmul.f32 %v8953_v39, %v8911_v1  ;;  %v9023_v21 = vpop.xlane.xlu2 %2628  ;;  %v9029_v55 = vmul.f32 0.5, %v3133_v53  ;;  %v9035_v63 = vmax.f32 %v2689_v47, 1e-05 }
 0x5b2   : > { %v8972_v56 = vpop.eup %6457  ;;  %v2691_v3 = vmul.f32 %v8962_v19, %v8928_v48  ;;  %v8984_v43 = vpop.xlane.xlu1 %2625  ;;  %vm3192_vm8 = vweird.f32 %v8953_v39  ;;  %v2674_v15 = vsel %vm2673_vm7, %v8857_v32, %v2672_v29  ;;  %v3197_v6 = vand.u32 2147483648, %v8911_v1 }
 0x5b3   : > { %v6460_v4 = vpop.eup %6459  ;;  %v2873_v58 = vmul.f32 %v2872_v40, %v8891_v5  ;;  %6461 = vrsqrt.f32 %v8984_v43  ;;  %v2880_v22 = vmul.f32 %v8972_v56, %v8936_v16  ;;  %v3188_v31 = vsub.f32 1.0, %v3187_v46  ;;  %vm9060_vm11 = vmor %vm3191_vm9, %vm3192_vm8 }
 0x5b4   : > { %v2692_v27 = vmul.f32 %v8962_v19, %v2691_v3  ;;  %v3163_v34 = vmul.f32 %v6460_v4, %v8775_v61  ;;  %v3148_v61 = vmul.f32 %v3140_v0, %v2976_v20  ;;  %v3195_v53 = vand.u32 2147483647, %v8911_v1 }
 0x5b5   : > { %v2875_v10 = vsel %vm2874_vm2, %v8891_v5, %v2873_v58  ;;  %v2881_v17 = vmul.f32 %v8972_v56, %v2880_v22  ;;  %v3189_v59 = vmul.f32 %v8953_v39, %v3188_v31  ;;  %v9032_v5 = vsel %vm311_vm0, %v3298_v13, 0.0 }
 0x5b6   : > { %v2693_v62 = vmul.f32 0.5, %v2692_v27  ;;  %v3185_v24 = vmul.f32 %v3184_v28, %v3163_v34  ;;  %v2878_v23 = vsel %vm2876_vm4, %v2877_v30, %v2875_v10  ;;  %v2676_v4 = vand.u32 2147483648, %v8857_v32 }
 0x5b7   : > { %v2882_v37 = vmul.f32 0.5, %v2881_v17  ;;  %v9038_v26 = vmax.f32 %v2878_v23, 1e-05  ;;  %v3190_v38 = vadd.f32 %v8953_v39, %v3189_v59  ;;  %vm2697_vm12 = vcmp.eq.f32.partialorder %v8928_v48, inf }
 0x5b8   : > { %v9002_v50 = vpop.xlane.xlu0 %2832  ;;  %v2694_v52 = vsub.f32 1.5, %v2693_v62  ;;  %v2677_v32 = vsel %vm2675_vm10, %v2676_v4, %v2674_v15  ;;  %v3198_v13 = vor.u32 1.1754944e-38, %v3197_v6  ;;  %vm3196_vm15 = vcmp.eq.f32.partialorder %v3195_v53, 8.507059e+37 }
 0x5b9   : > { %6463 = vrsqrt.f32 %v9002_v50  ;;  %v9020_v18 = vpop.eup %6461  ;;  %v2883_v42 = vsub.f32 1.5, %v2882_v37  ;;  %v3194_v1 = vsel %vm9060_vm11, %v8953_v39, %v3190_v38  ;;  %vm2699_vm13 = vcmp.eq.f32.partialorder %v8928_v48, 0.0 }
 0x5ba   : > { %v2703_v7 = vmul.f32 %v9020_v18, %v8984_v43  ;;  %v3301_v44 = vpop.xlane.xlu1 %3300  ;;  %6465 = vtanh.f32 %v3148_v61  ;;  %v2695_v40 = vmul.f32 %v8962_v19, %v2694_v52  ;;  %v3199_v39 = vsel %vm3196_vm15, %v3198_v13, %v3194_v1 }
 0x5bb   : > { %vm3323_vm5 = vcmp.eq.f32.partialorder %v3301_v44, 0.0  ;;  %v2884_v20 = vmul.f32 %v8972_v56, %v2883_v42  ;;  %v2700_v47 = vand.u32 2147483648, %v8928_v48  ;;  %vm2898_vm1 = vcmp.eq.f32.partialorder %v9002_v50, inf }
 0x5bc   : > { %v2704_v0 = vmul.f32 %v9020_v18, %v2703_v7  ;;  %v9041_v25 = vsel %vm3323_vm5, 0.0, %v3185_v24  ;;  %v2696_v14 = vmul.f32 %v2695_v40, %v8928_v48  ;;  %vm2900_vm14 = vcmp.eq.f32.partialorder %v9002_v50, 0.0 }
 0x5bd   : > { %v3355_v19 = vmul.f32 %v9041_v25, %v9041_v25  ;;  %v2901_v24 = vand.u32 2147483648, %v9002_v50  ;;  %v2885_v23 = vmul.f32 %v2884_v20, %v8936_v16  ;;  %vm2886_vm3 = vcmp.eq.f32.partialorder %v8936_v16, inf }
 0x5be   : > { %v2705_v58 = vmul.f32 0.5, %v2704_v0  ;;  %v2698_v35 = vsel %vm2697_vm12, %v8928_v48, %v2696_v14  ;;  %v2991_v48 = vmul.f32 %v9018_v11, %v9038_v26  ;;  %vm2888_vm4 = vcmp.eq.f32.partialorder %v8936_v16, 0.0 }
 0x5bf   : > { %v6464_v51 = vpop.eup %6463  ;;  %v3363_v62 = vsel %vm311_vm0, %v3355_v19, 0.0  ;;  %v2887_v38 = vsel %vm2886_vm3, %v8936_v16, %v2885_v23  ;;  %vm2709_vm5 = vcmp.eq.f32.partialorder %v8984_v43, inf  ;;  %vm3012_vm7 = vweird.f32 %v9035_v63 }
 0x5c0   : > { %v2892_v45 = vmul.f32 %v6464_v51, %v9002_v50  ;;  %v9044_v2 = vpop.xlane.xlu0 %2835  ;;  %v6466_v41 = vpop.eup %6465  ;;  %v2706_v10 = vsub.f32 1.5, %v2705_v58  ;;  %3364 = vadd.xlane.f32.xlu0 %v3363_v62  ;;  %v6081_v1 = vclamps-f32 %v9035_v63, 0.99999  ;;  %vm2711_vm9 = vcmp.eq.f32.partialorder %v8984_v43, 0.0 }
 0x5c1   : > { %6467 = vrsqrt.f32 %v9044_v2  ;;  %v3164_v56 = vmul.f32 %v6466_v41, %v8781_v54  ;;  %v2701_v54 = vsel %vm2699_vm13, %v2700_v47, %v2698_v35  ;;  %vm2910_vm8 = vcmp.eq.f32.partialorder %v9044_v2, inf }
 0x5c2   : > { %v2893_v3 = vmul.f32 %v6464_v51, %v2892_v45  ;;  %6469 = vrcp.f32 %v9038_v26  ;;  %v3304_v30 = vpop.xlane.xlu1 %3303  ;;  %v9110_v15 = vmax.f32 %v2701_v54, 1e-05  ;;  %vm2912_vm10 = vcmp.eq.f32.partialorder %v9044_v2, 0.0 }
 0x5c3   : > { %6471 = vrcp.f32 %v9035_v63  ;;  %v3200_v44 = vmul.f32 %v3199_v39, %v3164_v56  ;;  %vm3324_vm2 = vcmp.eq.f32.partialorder %v3304_v30, 0.0  ;;  %vm3206_vm15 = vweird.f32 %v9038_v26 }
 0x5c4   : > { %v2894_v12 = vmul.f32 0.5, %v2893_v3  ;;  %v9058_v27 = vpop.xlane.xlu2 %2838  ;;  %v9102_v3 = vmax.f32 %v2677_v32, 1e-05  ;;  %v2913_v32 = vand.u32 2147483648, %v9044_v2 }
 0x5c5   : > { %6473 = vrsqrt.f32 %v9058_v27  ;;  %v9112_v42 = vsel %vm3324_vm2, 0.0, %v3200_v44  ;;  %v3212_v44 = vand.u32 2147483648, %v9038_v26 }
 0x5c6   : > { %v2895_v22 = vsub.f32 1.5, %v2894_v12  ;;  %6475 = vrsqrt.f32 %v9023_v21  ;;  %v2889_v12 = vand.u32 2147483648, %v8936_v16  ;;  %v3356_v14 = vmul.f32 %v9112_v42, %v9112_v42 }
 0x5c7   : > { %v6468_v28 = vpop.eup %6467 }
 0x5c8   : > { %v2896_v57 = vmul.f32 %v6464_v51, %v2895_v22  ;;  %v2904_v31 = vmul.f32 %v6468_v28, %v9044_v2  ;;  %v9079_v17 = vpop.eup %6469  ;;  %v2707_v51 = vmul.f32 %v9020_v18, %v2706_v10  ;;  %3321 = vadd.xlane.f32.xlu0 %v9032_v5  ;;  %v2890_v58 = vsel %vm2888_vm4, %v2889_v12, %v2887_v38 }
 0x5c9   : > { %v9085_v61 = vpop.eup %6471  ;;  %v3149_v22 = vmul.f32 %v9029_v55, %v2991_v48  ;;  %v3366_v13 = vsel %vm311_vm0, %v3356_v14, 0.0  ;;  %v2712_v55 = vand.u32 2147483648, %v8984_v43  ;;  %v3087_v10 = vadd.f32 1.0, %v6081_v1 }
 0x5ca   : > { %v2897_v34 = vmul.f32 %v2896_v57, %v9002_v50  ;;  %v2905_v7 = vmul.f32 %v6468_v28, %v2904_v31  ;;  %v3008_v18 = vmul.f32 %v9085_v61, %v9035_v63  ;;  %v2708_v19 = vmul.f32 %v2707_v51, %v8984_v43  ;;  %3367 = vadd.xlane.f32.xlu1 %v3366_v13 }
 0x5cb   : > { %v9089_v59 = vpop.eup %6473  ;;  %vm3013_vm11 = vweird.f32 %v9085_v61  ;;  %v9143_v31 = vmax.f32 %v2890_v58, 1e-05  ;;  %vm3207_vm12 = vweird.f32 %v9079_v17  ;;  %v3016_v51 = vand.u32 2147483647, %v9035_v63 }
 0x5cc   : > { %v2899_v52 = vsel %vm2898_vm1, %v9002_v50, %v2897_v34  ;;  %v2906_v45 = vmul.f32 0.5, %v2905_v7  ;;  %v2916_v0 = vmul.f32 %v9089_v59, %v9058_v27  ;;  %v3202_v50 = vmul.f32 %v9079_v17, %v9038_v26  ;;  %v9100_v40 = vpop.eup %6475  ;;  %vm9163_vm13 = vmor %vm3012_vm7, %vm3013_vm11 }
 0x5cd   : > { %v2902_v29 = vsel %vm2900_vm14, %v2901_v24, %v2899_v52  ;;  %v2715_v46 = vmul.f32 %v9100_v40, %v9023_v21  ;;  %v3009_v16 = vsub.f32 1.0, %v3008_v18  ;;  %v2710_v41 = vsel %vm2709_vm5, %v8984_v43, %v2708_v19  ;;  %vm9171_vm1 = vmor %vm3206_vm15, %vm3207_vm12 }
 0x5ce   : > { %v9094_v37 = vmax.f32 %v2902_v29, 1e-05  ;;  %v2907_v6 = vsub.f32 1.5, %v2906_v45  ;;  %v2917_v53 = vmul.f32 %v9089_v59, %v2916_v0  ;;  %v3203_v4 = vsub.f32 1.0, %v3202_v50 }
 0x5cf   : > { %v3111_v34 = vsub.f32 1.0, %v6081_v1  ;;  %v2713_v30 = vsel %vm2711_vm9, %v2712_v55, %v2710_v41  ;;  %v2716_v56 = vmul.f32 %v9100_v40, %v2715_v46  ;;  %v3018_v52 = vand.u32 2147483648, %v9035_v63 }
 0x5d0   : > { %6477 = vrcp.f32 %v9094_v37  ;;  %v2908_v11 = vmul.f32 %v6468_v28, %v2907_v6  ;;  %v2918_v57 = vmul.f32 0.5, %v2917_v53  ;;  %v3204_v62 = vmul.f32 %v9079_v17, %v3203_v4 }
 0x5d1   : > { %6479 = vrcp.f32 %v9110_v15  ;;  %v3010_v28 = vmul.f32 %v9085_v61, %v3009_v16  ;;  %v9169_v29 = vmul.f32 0.5, %v2716_v56  ;;  %v3210_v0 = vand.u32 2147483647, %v9038_v26 }
 0x5d2   : > { %v2909_v5 = vmul.f32 %v2908_v11, %v9044_v2  ;;  %6481 = vtanh.f32 %v3149_v22  ;;  %v2919_v24 = vsub.f32 1.5, %v2918_v57  ;;  %v3205_v43 = vadd.f32 %v9079_v17, %v3204_v62 }
 0x5d3   : > { %6483 = vlog2.f32 %v3087_v10  ;;  %v9178_v18 = vmax.f32 %v2713_v30, 1e-05  ;;  %v3019_v26 = vor.u32 1.1754944e-38, %v3018_v52  ;;  %vm2922_vm14 = vcmp.eq.f32.partialorder %v9058_v27, inf }
 0x5d4   : > { %v2911_v20 = vsel %vm2910_vm8, %v9044_v2, %v2909_v5  ;;  %v3011_v2 = vadd.f32 %v9085_v61, %v3010_v28  ;;  %6485 = vlog2.f32 %v3111_v34  ;;  %v2920_v38 = vmul.f32 %v9089_v59, %v2919_v24 }
 0x5d5   : > { %v2914_v35 = vsel %vm2912_vm10, %v2913_v32, %v2911_v20  ;;  %6487 = vrcp.f32 %v9102_v3  ;;  %v3209_v63 = vsel %vm9171_vm1, %v9079_v17, %v3205_v43  ;;  %v3213_v53 = vor.u32 1.1754944e-38, %v3212_v44 }
 0x5d6   : > { %v9140_v39 = vpop.eup %6477  ;;  %v9151_v23 = vmax.f32 %v2914_v35, 1e-05  ;;  %6489 = vrcp.f32 %v9143_v31  ;;  %v3015_v6 = vsel %vm9163_vm13, %v9085_v61, %v3011_v2  ;;  %vm3017_vm2 = vcmp.eq.f32.partialorder %v3016_v51, 8.507059e+37  ;;  %v3307_v35 = vpop.xlane.xlu2 %3306 }
 0x5d7   : > { %v9146_v47 = vpop.eup %6479  ;;  %v3232_v7 = vmul.f32 %v9140_v39, %v9094_v37  ;;  %vm3211_vm3 = vcmp.eq.f32.partialorder %v3210_v0, 8.507059e+37  ;;  %v3020_v58 = vsel %vm3017_vm2, %v3019_v26, %v3015_v6  ;;  %v6082_v46 = vclamps-f32 %v9110_v15, 0.99999 }
 0x5d8   : > { %v3023_v50 = vmul.f32 %v9146_v47, %v9110_v15  ;;  %v6482_v48 = vpop.eup %6481  ;;  %6491 = vrcp.f32 %v9151_v23  ;;  %vm2924_vm4 = vcmp.eq.f32.partialorder %v9058_v27, 0.0  ;;  %v3214_v16 = vsel %vm3211_vm3, %v3213_v53, %v3209_v63  ;;  %v3313_v63 = vpop.xlane.xlu1 %3312 }
 0x5d9   : > { %v6484_v12 = vpop.eup %6483  ;;  %v3233_v19 = vsub.f32 1.0, %v3232_v7  ;;  %6493 = vrcp.f32 %v9178_v18  ;;  %v3165_v61 = vmul.f32 %v6482_v48, %v8787_v9  ;;  %v2921_v1 = vmul.f32 %v2920_v38, %v9058_v27 }
 0x5da   : > { %v3024_v11 = vsub.f32 1.0, %v3023_v50  ;;  %v3100_v4 = vmul.f32 0.6931472, %v6484_v12  ;;  %v6486_v59 = vpop.eup %6485  ;;  %v3088_v32 = vadd.f32 1.0, %v6082_v46  ;;  %v3112_v13 = vsub.f32 1.0, %v6082_v46 }
 0x5db   : > { %v9191_v14 = vpop.eup %6487  ;;  %v3124_v5 = vmul.f32 0.6931472, %v6486_v59  ;;  %v3234_v41 = vmul.f32 %v9140_v39, %v3233_v19  ;;  %v3021_v20 = vmul.f32 %v3020_v58, %v9094_v37  ;;  %vm3028_vm5 = vweird.f32 %v9146_v47 }
 0x5dc   : > { %v3025_v17 = vmul.f32 %v9146_v47, %v3024_v11  ;;  %v9196_v22 = vpop.eup %6489  ;;  %v2925_v9 = vand.u32 2147483648, %v9058_v27  ;;  %v3215_v55 = vmul.f32 %v3214_v16, %v3165_v61  ;;  %v3033_v10 = vand.u32 2147483648, %v9110_v15 }
 0x5dd   : > { %v3135_v57 = vsub.f32 %v3100_v4, %v3124_v5  ;;  %6495 = vlog2.f32 %v3088_v32  ;;  %vm3027_vm7 = vweird.f32 %v9110_v15  ;;  %v3031_v30 = vand.u32 2147483647, %v9110_v15 }
 0x5de   : > { %v3026_v62 = vadd.f32 %v9146_v47, %v3025_v17  ;;  %v9203_v28 = vpop.eup %6491  ;;  %6497 = vlog2.f32 %v3112_v13  ;;  %v2923_v56 = vsel %vm2922_vm14, %v9058_v27, %v2921_v1  ;;  %v3235_v24 = vadd.f32 %v9140_v39, %v3234_v41  ;;  %vm9217_vm9 = vmor %vm3027_vm7, %vm3028_vm5 }
 0x5df   : > { %v3143_v34 = vmul.f32 0.5, %v3135_v57  ;;  %vm3237_vm8 = vweird.f32 %v9140_v39  ;;  %v3242_v43 = vand.u32 2147483648, %v9094_v37  ;;  %v9221_v52 = vpop.eup %6493  ;;  %v3247_v44 = vmul.f32 %v9203_v28, %v9151_v23 }
 0x5e0   : > { %v3030_v7 = vsel %vm9217_vm9, %v9146_v47, %v3026_v62  ;;  %v2993_v54 = vmul.f32 %v9191_v14, %v9102_v3  ;;  %vm3325_vm10 = vcmp.eq.f32.partialorder %v3307_v35, 0.0  ;;  %vm3236_vm11 = vweird.f32 %v9094_v37 }
 0x5e1   : > { %v3151_v15 = vmul.f32 %v3143_v34, %v3021_v20  ;;  %v3240_v51 = vand.u32 2147483647, %v9094_v37  ;;  %v3034_v45 = vor.u32 1.1754944e-38, %v3033_v10  ;;  %v9232_v0 = vsel %vm3325_vm10, 0.0, %v3215_v55  ;;  %vm9234_vm12 = vmor %vm3236_vm11, %vm3237_vm8  ;;  %v9271_v34 = vpop.xlane.xlu0 %2841 }
 0x5e2   : > { %vm3032_vm15 = vcmp.eq.f32.partialorder %v3031_v30, 8.507059e+37  ;;  %v2994_v47 = vsub.f32 1.0, %v2993_v54  ;;  %v2926_v38 = vsel %vm2924_vm4, %v2925_v9, %v2923_v56  ;;  %v3239_v6 = vsel %vm9234_vm12, %v9140_v39, %v3235_v24 }
 0x5e3   : > { %6499 = vtanh.f32 %v3151_v15  ;;  %v6496_v48 = vpop.eup %6495  ;;  %v3035_v37 = vsel %vm3032_vm15, %v3034_v45, %v3030_v7  ;;  %v6080_v12 = vclamps-f32 %v9102_v3, 0.99999  ;;  %v3243_v19 = vor.u32 1.1754944e-38, %v3242_v43 }
 0x5e4   : > { %v6498_v26 = vpop.eup %6497  ;;  %v3102_v11 = vmul.f32 0.6931472, %v6496_v48  ;;  %v3248_v53 = vsub.f32 1.0, %v3247_v44  ;;  %v2995_v4 = vmul.f32 %v9191_v14, %v2994_v47  ;;  %vm3241_vm13 = vcmp.eq.f32.partialorder %v3240_v51, 8.507059e+37 }
 0x5e5   : > { %v3126_v59 = vmul.f32 0.6931472, %v6498_v26  ;;  %v3086_v58 = vadd.f32 1.0, %v6080_v12  ;;  %v3110_v17 = vsub.f32 1.0, %v6080_v12  ;;  %v9245_v27 = vmax.f32 %v2926_v38, 1e-05 }
 0x5e6   : > { %v3244_v46 = vsel %vm3241_vm13, %v3243_v19, %v3239_v6  ;;  %vm3327_vm1 = vcmp.eq.f32.partialorder %v3313_v63, 0.0  ;;  %v3036_v61 = vmul.f32 %v3035_v37, %v9151_v23  ;;  %v2996_v16 = vadd.f32 %v9191_v14, %v2995_v4 }
 0x5e7   : > { %v3136_v39 = vsub.f32 %v3102_v11, %v3126_v59  ;;  %vm2998_vm14 = vweird.f32 %v9191_v14  ;;  %6501 = vlog2.f32 %v3086_v58  ;;  %v3249_v1 = vmul.f32 %v9203_v28, %v3248_v53 }
 0x5e8   : > { %vm2997_vm2 = vweird.f32 %v9102_v3  ;;  %v3003_v41 = vand.u32 2147483648, %v9102_v3  ;;  %6503 = vlog2.f32 %v3110_v17  ;;  %v3001_v20 = vand.u32 2147483647, %v9102_v3  ;;  %v3316_v17 = vpop.xlane.xlu2 %3315 }
 0x5e9   : > { %v6500_v5 = vpop.eup %6499  ;;  %v3144_v13 = vmul.f32 0.5, %v3136_v39  ;;  %v3217_v57 = vmul.f32 %v9196_v22, %v9143_v31  ;;  %6505 = vrcp.f32 %v9245_v27  ;;  %vm3252_vm3 = vweird.f32 %v9203_v28  ;;  %vm9260_vm4 = vmor %vm2997_vm2, %vm2998_vm14 }
 0x5ea   : > { %v3167_v32 = vmul.f32 %v6500_v5, %v8798_v8  ;;  %v3255_v62 = vand.u32 2147483647, %v9151_v23  ;;  %v3357_v55 = vmul.f32 %v9232_v0, %v9232_v0  ;;  %v3000_v3 = vsel %vm9260_vm4, %v9191_v14, %v2996_v16 }
 0x5eb   : > { %v3152_v10 = vmul.f32 %v3144_v13, %v3036_v61  ;;  %v3038_v35 = vmul.f32 %v9221_v52, %v9178_v18  ;;  %v3250_v30 = vadd.f32 %v9203_v28, %v3249_v1  ;;  %v3257_v56 = vand.u32 2147483648, %v9151_v23 }
 0x5ec   : > { %v3245_v8 = vmul.f32 %v3244_v46, %v3167_v32  ;;  %v3004_v24 = vor.u32 1.1754944e-38, %v3003_v41  ;;  %v3369_v43 = vsel %vm311_vm0, %v3357_v55, 0.0  ;;  %vm3002_vm5 = vcmp.eq.f32.partialorder %v3001_v20, 8.507059e+37 }
 0x5ed   : > { %v6502_v2 = vpop.eup %6501  ;;  %6507 = vtanh.f32 %v3152_v10  ;;  %v3218_v15 = vsub.f32 1.0, %v3217_v57  ;;  %3370 = vadd.xlane.f32.xlu2 %v3369_v43  ;;  %v3039_v7 = vsub.f32 1.0, %v3038_v35  ;;  %vm3251_vm7 = vweird.f32 %v9151_v23 }
 0x5ee   : > { %v6504_v44 = vpop.eup %6503  ;;  %v3005_v14 = vsel %vm3002_vm5, %v3004_v24, %v3000_v3  ;;  %v3098_v54 = vmul.f32 0.6931472, %v6502_v2  ;;  %v6083_v51 = vclamps-f32 %v9178_v18, 0.99999  ;;  %6509 = vrsqrt.f32 %v9271_v34  ;;  %vm9284_vm8 = vmor %vm3251_vm7, %vm3252_vm3 }
 0x5ef   : > { %v9280_v45 = vsel %vm3327_vm1, 0.0, %v3245_v8  ;;  %v3122_v47 = vmul.f32 0.6931472, %v6504_v44  ;;  %v3040_v48 = vmul.f32 %v9221_v52, %v3039_v7  ;;  %v9289_v38 = vpop.eup %6505  ;;  %v3254_v23 = vsel %vm9284_vm8, %v9203_v28, %v3250_v30 }
 0x5f0   : > { %vm3256_vm9 = vcmp.eq.f32.partialorder %v3255_v62, 8.507059e+37  ;;  %v3089_v6 = vadd.f32 1.0, %v6083_v51  ;;  %v3113_v63 = vsub.f32 1.0, %v6083_v51  ;;  %v3258_v37 = vor.u32 1.1754944e-38, %v3257_v56  ;;  %v3310_v51 = vpop.xlane.xlu0 %3309 }
 0x5f1   : > { %v3006_v12 = vmul.f32 %v3005_v14, %v9143_v31  ;;  %v3134_v26 = vsub.f32 %v3098_v54, %v3122_v47  ;;  %v3219_v19 = vmul.f32 %v9196_v22, %v3218_v15  ;;  %v3041_v11 = vadd.f32 %v9221_v52, %v3040_v48 }
 0x5f2   : > { %vm3043_vm10 = vweird.f32 %v9221_v52  ;;  %6511 = vlog2.f32 %v3089_v6  ;;  %v3359_v53 = vmul.f32 %v9280_v45, %v9280_v45  ;;  %v3259_v59 = vsel %vm3256_vm9, %v3258_v37, %v3254_v23 }
 0x5f3   : > { %v6508_v4 = vpop.eup %6507  ;;  %v3142_v28 = vmul.f32 0.5, %v3134_v26  ;;  %v3048_v58 = vand.u32 2147483648, %v9178_v18  ;;  %6513 = vlog2.f32 %v3113_v63  ;;  %vm3042_vm11 = vweird.f32 %v9178_v18 }
 0x5f4   : > { %v3168_v46 = vmul.f32 %v6508_v4, %v8807_v60  ;;  %v3046_v61 = vand.u32 2147483647, %v9178_v18  ;;  %v9304_v39 = vpop.eup %6509  ;;  %v2718_v16 = vsub.f32 1.5, %v9169_v29  ;;  %vm9309_vm12 = vmor %vm3042_vm11, %vm3043_vm10  ;;  %v3262_v41 = vmul.f32 %v9289_v38, %v9245_v27 }
 0x5f5   : > { %v3150_v5 = vmul.f32 %v3142_v28, %v3006_v12  ;;  %v3375_v60 = vsel %vm311_vm0, %v3359_v53, 0.0  ;;  %v3220_v13 = vadd.f32 %v9196_v22, %v3219_v19  ;;  %vm3222_vm15 = vweird.f32 %v9196_v22 }
 0x5f6   : > { %v3260_v32 = vmul.f32 %v3259_v59, %v3168_v46  ;;  %v3045_v29 = vsel %vm9309_vm12, %v9221_v52, %v3041_v11  ;;  %3376 = vadd.xlane.f32.xlu1 %v3375_v60  ;;  %vm3328_vm13 = vcmp.eq.f32.partialorder %v3316_v17, 0.0  ;;  %v3227_v18 = vand.u32 2147483648, %v9143_v31 }
 0x5f7   : > { %6515 = vtanh.f32 %v3150_v5  ;;  %v3049_v20 = vor.u32 1.1754944e-38, %v3048_v58  ;;  %vm3221_vm1 = vweird.f32 %v9143_v31  ;;  %v3225_v9 = vand.u32 2147483647, %v9143_v31 }
 0x5f8   : > { %v6512_v57 = vpop.eup %6511  ;;  %v9322_v62 = vsel %vm3328_vm13, 0.0, %v3260_v32  ;;  %vm3047_vm14 = vcmp.eq.f32.partialorder %v3046_v61, 8.507059e+37  ;;  %vm9326_vm2 = vmor %vm3221_vm1, %vm3222_vm15  ;;  %v3263_v3 = vsub.f32 1.0, %v3262_v41  ;;  %v2719_v30 = vmul.f32 %v9100_v40, %v2718_v16  ;;  %v3319_v16 = vpop.xlane.xlu2 %3318 }
 0x5f9   : > { %v6514_v55 = vpop.eup %6513  ;;  %v3050_v52 = vsel %vm3047_vm14, %v3049_v20, %v3045_v29  ;;  %v3104_v10 = vmul.f32 0.6931472, %v6512_v57  ;;  %v3360_v35 = vmul.f32 %v9322_v62, %v9322_v62  ;;  %v3224_v56 = vsel %vm9326_vm2, %v9196_v22, %v3220_v13 }
 0x5fa   : > { %v3128_v24 = vmul.f32 0.6931472, %v6514_v55  ;;  %v2928_v31 = vmul.f32 %v9304_v39, %v9271_v34  ;;  %v3228_v43 = vor.u32 1.1754944e-38, %v3227_v18  ;;  %vm3226_vm3 = vcmp.eq.f32.partialorder %v3225_v9, 8.507059e+37 }
 0x5fb   : > { %v3378_v2 = vsel %vm311_vm0, %v3360_v35, 0.0  ;;  %v3051_v15 = vmul.f32 %v3050_v52, %v9245_v27  ;;  %v3264_v40 = vmul.f32 %v9289_v38, %v3263_v3  ;;  %v2720_v54 = vmul.f32 %v2719_v30, %v9023_v21 }
 0x5fc   : > { %v3137_v7 = vsub.f32 %v3104_v10, %v3128_v24  ;;  %3379 = vadd.xlane.f32.xlu2 %v3378_v2  ;;  %v3229_v14 = vsel %vm3226_vm3, %v3228_v43, %v3224_v56  ;;  %v2929_v47 = vmul.f32 %v9304_v39, %v2928_v31  ;;  %vm2721_vm4 = vcmp.eq.f32.partialorder %v9023_v21, inf }
 0x5fd   : > { %v6516_v44 = vpop.eup %6515  ;;  %v2724_v6 = vand.u32 2147483648, %v9023_v21  ;;  %vm3326_vm5 = vcmp.eq.f32.partialorder %v3310_v51, 0.0  ;;  %v3265_v63 = vadd.f32 %v9289_v38, %v3264_v40  ;;  %vm3267_vm7 = vweird.f32 %v9289_v38 }
 0x5fe   : > { %v3166_v22 = vmul.f32 %v6516_v44, %v8792_v49  ;;  %v3145_v50 = vmul.f32 0.5, %v3137_v7  ;;  %v2722_v37 = vsel %vm2721_vm4, %v9023_v21, %v2720_v54  ;;  %v3272_v49 = vand.u32 2147483648, %v9245_v27 }
 0x5ff   : > { %v2930_v26 = vmul.f32 0.5, %v2929_v47  ;;  %vm3266_vm8 = vweird.f32 %v9245_v27  ;;  %v3270_v19 = vand.u32 2147483647, %v9245_v27  ;;  %vm2723_vm9 = vcmp.eq.f32.partialorder %v9023_v21, 0.0 }
 0x600   : > { %v3230_v48 = vmul.f32 %v3229_v14, %v3166_v22  ;;  %v3153_v23 = vmul.f32 %v3145_v50, %v3051_v15  ;;  %vm3268_vm10 = vmor %vm3266_vm8, %vm3267_vm7  ;;  %v2725_v53 = vsel %vm2723_vm9, %v2724_v6, %v2722_v37  ;;  %v3273_v28 = vor.u32 1.1754944e-38, %v3272_v49 }
 0x601   : > { %v3269_v4 = vsel %vm3268_vm10, %v9289_v38, %v3265_v63  ;;  %v2931_v58 = vsub.f32 1.5, %v2930_v26  ;;  %vm3271_vm11 = vcmp.eq.f32.partialorder %v3270_v19, 8.507059e+37  ;;  %v2733_v46 = vmax.f32 %v2725_v53, 1e-05 }
 0x602   : > { %v9349_v12 = vsel %vm3326_vm5, 0.0, %v3230_v48  ;;  %6517 = vtanh.f32 %v3153_v23  ;;  %v3274_v61 = vsel %vm3271_vm11, %v3273_v28, %v3269_v4  ;;  %vm3329_vm12 = vcmp.eq.f32.partialorder %v3319_v16, 0.0 }
 0x603   : > { %v3358_v11 = vmul.f32 %v9349_v12, %v9349_v12  ;;  %v2932_v5 = vmul.f32 %v9304_v39, %v2931_v58  ;;  %6519 = vrcp.f32 %v2733_v46  ;;  %v6084_v32 = vclamps-f32 %v2733_v46, 0.99999 }
 0x604   : > { %vm2934_vm15 = vcmp.eq.f32.partialorder %v9271_v34, inf  ;;  %v2937_v39 = vand.u32 2147483648, %v9271_v34  ;;  %vm2936_vm13 = vcmp.eq.f32.partialorder %v9271_v34, 0.0  ;;  %v3063_v35 = vand.u32 2147483648, %v2733_v46 }
 0x605   : > { %v3372_v59 = vsel %vm311_vm0, %v3358_v11, 0.0  ;;  %v2933_v41 = vmul.f32 %v2932_v5, %v9271_v34  ;;  %v3090_v18 = vadd.f32 1.0, %v6084_v32  ;;  %v3114_v57 = vsub.f32 1.0, %v6084_v32 }
 0x606   : > { %3373 = vadd.xlane.f32.xlu0 %v3372_v59  ;;  %vm3057_vm14 = vweird.f32 %v2733_v46  ;;  %v3061_v56 = vand.u32 2147483647, %v2733_v46  ;;  %v3064_v43 = vor.u32 1.1754944e-38, %v3063_v35 }
 0x607   : > { %6521 = vlog2.f32 %v3090_v18 }
 0x608   : > { %v6518_v17 = vpop.eup %6517  ;;  %6523 = vlog2.f32 %v3114_v57  ;;  %vm3062_vm3 = vcmp.eq.f32.partialorder %v3061_v56, 8.507059e+37 }
 0x609   : > { %v3169_v27 = vmul.f32 %v6518_v17, %v8811_v33  ;;  %v6520_v13 = vpop.eup %6519  ;;  %v2935_v33 = vsel %vm2934_vm15, %v9271_v34, %v2933_v41 }
 0x60a   : > { %v3053_v29 = vmul.f32 %v6520_v13, %v2733_v46  ;;  %v2938_v20 = vsel %vm2936_vm13, %v2937_v39, %v2935_v33  ;;  %vm3058_vm1 = vweird.f32 %v6520_v13 }
 0x60b   : > { %v3275_v1 = vmul.f32 %v3274_v61, %v3169_v27  ;;  %v2946_v9 = vmax.f32 %v2938_v20, 1e-05  ;;  %vm3059_vm2 = vmor %vm3057_vm14, %vm3058_vm1 }
 0x60c   : > { %v3054_v55 = vsub.f32 1.0, %v3053_v29 }
 0x60d   : > { %v9361_v21 = vsel %vm3329_vm12, 0.0, %v3275_v1  ;;  %6525 = vrcp.f32 %v2946_v9  ;;  %v6522_v52 = vpop.eup %6521  ;;  %v3287_v47 = vand.u32 2147483648, %v2946_v9  ;;  %vm3281_vm5 = vweird.f32 %v2946_v9 }
 0x60e   : > { %v3361_v38 = vmul.f32 %v9361_v21, %v9361_v21  ;;  %v3055_v8 = vmul.f32 %v6520_v13, %v3054_v55  ;;  %v6524_v10 = vpop.eup %6523  ;;  %v3106_v24 = vmul.f32 0.6931472, %v6522_v52  ;;  %v3285_v23 = vand.u32 2147483647, %v2946_v9 }
 0x60f   : > { %v3130_v34 = vmul.f32 0.6931472, %v6524_v10  ;;  %v3288_v37 = vor.u32 1.1754944e-38, %v3287_v47 }
 0x610   : > { %v3381_v60 = vsel %vm311_vm0, %v3361_v38, 0.0  ;;  %v3056_v3 = vadd.f32 %v6520_v13, %v3055_v8  ;;  %vm3286_vm8 = vcmp.eq.f32.partialorder %v3285_v23, 8.507059e+37 }
 0x611   : > { %3382 = vadd.xlane.f32.xlu0 %v3381_v60  ;;  %v3138_v15 = vsub.f32 %v3106_v24, %v3130_v34 }
 0x612   : > { %v3060_v31 = vsel %vm3059_vm2, %v6520_v13, %v3056_v3 }
 0x613   : > { %v6526_v30 = vpop.eup %6525  ;;  %v3065_v7 = vsel %vm3062_vm3, %v3064_v43, %v3060_v31  ;;  %v3146_v40 = vmul.f32 0.5, %v3138_v15 }
 0x614   : > { %v3277_v2 = vmul.f32 %v6526_v30, %v2946_v9  ;;  %v3066_v44 = vmul.f32 %v3065_v7, %v2946_v9  ;;  %vm3282_vm4 = vweird.f32 %v6526_v30 }
 0x615   : > { %vm3283_vm7 = vmor %vm3281_vm5, %vm3282_vm4 }
 0x616   : > { %v3278_v14 = vsub.f32 1.0, %v3277_v2  ;;  %v3154_v54 = vmul.f32 %v3146_v40, %v3066_v44 }
 0x617   : > { %v3654_v51 = vpop.xlane.xlu1 %3653 }
 0x618   : > { %v3279_v22 = vmul.f32 %v6526_v30, %v3278_v14  ;;  %6527 = vtanh.f32 %v3154_v54  ;;  %vm3662_vm10 = vcmp.eq.f32.partialorder %v3654_v51, inf  ;;  %v3665_v57 = vand.u32 2147483648, %v3654_v51 }
 0x619   : > { %6529 = vrsqrt.f32 %v3654_v51  ;;  %vm3664_vm12 = vcmp.eq.f32.partialorder %v3654_v51, 0.0 }
 0x61a   : > { %v3280_v50 = vadd.f32 %v6526_v30, %v3279_v22 }
 0x61c   : > { %v3284_v6 = vsel %vm3283_vm7, %v6526_v30, %v3280_v50 }
 0x61d   : > { %v3289_v26 = vsel %vm3286_vm8, %v3288_v37, %v3284_v6 }
 0x61e   : > { %v6528_v63 = vpop.eup %6527 }
 0x61f   : > { %v6530_v49 = vpop.eup %6529  ;;  %v3170_v19 = vmul.f32 %v6528_v63, %v8821_v36 }
 0x620   : > { %v3656_v53 = vmul.f32 %v6530_v49, %v3654_v51 }
 0x621   : > { %v3290_v59 = vmul.f32 %v3289_v26, %v3170_v19 }
 0x622   : > { %v3657_v46 = vmul.f32 %v6530_v49, %v3656_v53 }
 0x624   : > { %v3658_v36 = vmul.f32 0.5, %v3657_v46 }
 0x626   : > { %v3659_v38 = vsub.f32 1.5, %v3658_v36 }
 0x628   : > { %v3660_v13 = vmul.f32 %v6530_v49, %v3659_v38 }
 0x62a   : > { %v3661_v18 = vmul.f32 %v3660_v13, %v3654_v51 }
 0x62c   : > { %v3663_v8 = vsel %vm3662_vm10, %v3654_v51, %v3661_v18 }
 0x62d   : > { %v3666_v3 = vsel %vm3664_vm12, %v3665_v57, %v3663_v8 }
 0x62e   : > { %v3667_v56 = vmax.f32 %v3666_v3, 1e-05 }
 0x630   : > { %v3681_v26 = vand.u32 2147483648, %v3667_v56  ;;  %vm3675_vm5 = vweird.f32 %v3667_v56 }
 0x632   : > { %v3682_v46 = vor.u32 1.1754944e-38, %v3681_v26 }
 0x633   : > { %v3365_v48 = vpop.xlane.xlu0 %3364 }
 0x634   : > { %6531 = vrsqrt.f32 %v3365_v48  ;;  %vm3394_vm11 = vcmp.eq.f32.partialorder %v3365_v48, inf  ;;  %v3397_v52 = vand.u32 2147483648, %v3365_v48  ;;  %vm3396_vm15 = vcmp.eq.f32.partialorder %v3365_v48, 0.0 }
 0x63a   : > { %v6532_v11 = vpop.eup %6531 }
 0x63b   : > { %v3388_v4 = vmul.f32 %v6532_v11, %v3365_v48  ;;  %v3322_v28 = vpop.xlane.xlu0 %3321 }
 0x63c   : > { %vm3330_vm9 = vcmp.eq.f32.partialorder %v3322_v28, 0.0 }
 0x63d   : > { %v3389_v58 = vmul.f32 %v6532_v11, %v3388_v4  ;;  %v9372_v17 = vsel %vm3330_vm9, 0.0, %v3290_v59  ;;  %v3368_v27 = vpop.xlane.xlu1 %3367  ;;  %v3679_v4 = vand.u32 2147483647, %v3667_v56 }
 0x63e   : > { %v3362_v61 = vmul.f32 %v9372_v17, %v9372_v17  ;;  %6533 = vrsqrt.f32 %v3368_v27  ;;  %vm3406_vm13 = vcmp.eq.f32.partialorder %v3368_v27, inf  ;;  %v3409_v34 = vand.u32 2147483648, %v3368_v27 }
 0x63f   : > { %v3390_v5 = vmul.f32 0.5, %v3389_v58  ;;  %vm3408_vm1 = vcmp.eq.f32.partialorder %v3368_v27, 0.0  ;;  %vm3680_vm10 = vcmp.eq.f32.partialorder %v3679_v4, 8.507059e+37 }
 0x640   : > { %v3384_v16 = vsel %vm311_vm0, %v3362_v61, 0.0 }
 0x641   : > { %3385 = vadd.xlane.f32.xlu1 %v3384_v16  ;;  %v3391_v1 = vsub.f32 1.5, %v3390_v5  ;;  %v6830_v5 = vld [vmem:[%s11188_s4] sm:$0x1] }
 0x643   : > { %v3392_v32 = vmul.f32 %v6532_v11, %v3391_v1 }
 0x644   : > { %v6534_v41 = vpop.eup %6533 }
 0x645   : > { %v3400_v60 = vmul.f32 %v6534_v41, %v3368_v27  ;;  %v3393_v29 = vmul.f32 %v3392_v32, %v3365_v48 }
 0x647   : > { %v3401_v33 = vmul.f32 %v6534_v41, %v3400_v60  ;;  %v3395_v9 = vsel %vm3394_vm11, %v3365_v48, %v3393_v29 }
 0x648   : > { %v3398_v10 = vsel %vm3396_vm15, %v3397_v52, %v3395_v9 }
 0x649   : > { %v3402_v39 = vmul.f32 0.5, %v3401_v33  ;;  %v9377_v30 = vmax.f32 %v3398_v10, 1e-05 }
 0x64b   : > { %v3403_v20 = vsub.f32 1.5, %v3402_v39  ;;  %6535 = vrcp.f32 %v9377_v30  ;;  %v3500_v40 = vand.u32 2147483647, %v9377_v30  ;;  %v3502_v51 = vand.u32 2147483648, %v9377_v30 }
 0x64c   : > { %6537 = vrcp.f32 %v3667_v56  ;;  %vm3496_vm14 = vweird.f32 %v9377_v30  ;;  %vm3619_vm4 = vcmp.gt.f32.partialorder %v9377_v30, 0.999 }
 0x64d   : > { %v3404_v55 = vmul.f32 %v6534_v41, %v3403_v20  ;;  %vm9396_vm3 = vcmp.eq.f32.partialorder %v3500_v40, 8.507059e+37  ;;  %v3503_v11 = vor.u32 1.1754944e-38, %v3502_v51 }
 0x64f   : > { %v3405_v35 = vmul.f32 %v3404_v55, %v3368_v27 }
 0x651   : > { %v3407_v24 = vsel %vm3406_vm13, %v3368_v27, %v3405_v35  ;;  %v6536_v15 = vpop.eup %6535 }
 0x652   : > { %v3410_v31 = vsel %vm3408_vm1, %v3409_v34, %v3407_v24  ;;  %v6538_v7 = vpop.eup %6537  ;;  %v3492_v44 = vmul.f32 %v6536_v15, %v9377_v30  ;;  %vm3497_vm2 = vweird.f32 %v6536_v15 }
 0x653   : > { %v9380_v43 = vmax.f32 %v3410_v31, 1e-05  ;;  %v3671_v14 = vmul.f32 %v6538_v7, %v3667_v56  ;;  %vm3676_vm7 = vweird.f32 %v6538_v7  ;;  %vm3498_vm8 = vmor %vm3496_vm14, %vm3497_vm2 }
 0x654   : > { %v3493_v22 = vsub.f32 1.0, %v3492_v44  ;;  %vm9403_vm9 = vmor %vm3675_vm5, %vm3676_vm7 }
 0x655   : > { %v3672_v47 = vsub.f32 1.0, %v3671_v14  ;;  %v3517_v57 = vand.u32 2147483648, %v9380_v43  ;;  %vm3511_vm15 = vweird.f32 %v9380_v43  ;;  %v3515_v3 = vand.u32 2147483647, %v9380_v43 }
 0x656   : > { %v3494_v23 = vmul.f32 %v6536_v15, %v3493_v22  ;;  %vm3620_vm2 = vcmp.gt.f32.partialorder %v9380_v43, 0.999 }
 0x657   : > { %v3673_v49 = vmul.f32 %v6538_v7, %v3672_v47  ;;  %vm3516_vm14 = vcmp.eq.f32.partialorder %v3515_v3, 8.507059e+37 }
 0x658   : > { %v3495_v19 = vadd.f32 %v6536_v15, %v3494_v23 }
 0x659   : > { %v3674_v28 = vadd.f32 %v6538_v7, %v3673_v49 }
 0x65a   : > { %v3499_v61 = vsel %vm3498_vm8, %v6536_v15, %v3495_v19  ;;  %v3518_v15 = vor.u32 1.1754944e-38, %v3517_v57 }
 0x65b   : > { %v3504_v1 = vsel %vm9396_vm3, %v3503_v11, %v3499_v61  ;;  %v3678_v41 = vsel %vm9403_vm9, %v6538_v7, %v3674_v28 }
 0x65c   : > { %v3505_v60 = vmul.f32 %v3504_v1, %v9041_v25  ;;  %v3683_v18 = vsel %vm3680_vm10, %v3682_v46, %v3678_v41 }
 0x65e   : > { %v3611_v20 = vmul.f32 0.999, %v3505_v60 }
 0x660   : > { %v9382_v2 = vpop.xlane.xlu2 %3370  ;;  %v9431_v10 = vsel %vm3619_vm4, %v3611_v20, %v9041_v25 }
 0x661   : > { %6539 = vrsqrt.f32 %v9382_v2  ;;  %vm3418_vm11 = vcmp.eq.f32.partialorder %v9382_v2, inf  ;;  %vm3420_vm12 = vcmp.eq.f32.partialorder %v9382_v2, 0.0  ;;  %v3421_v39 = vand.u32 2147483648, %v9382_v2 }
 0x662   : > { %6541 = vrcp.f32 %v9380_v43  ;;  %v3685_v34 = vmul.f32 %v9431_v10, %v9431_v10 }
 0x663   : > { %6543 = vtanh.f32 %v3667_v56 }
 0x667   : > { %v6540_v54 = vpop.eup %6539 }
 0x668   : > { %v3412_v50 = vmul.f32 %v6540_v54, %v9382_v2  ;;  %v9393_v6 = vpop.eup %6541 }
 0x669   : > { %v9390_v48 = vpop.xlane.xlu1 %3376  ;;  %v6544_v59 = vpop.eup %6543  ;;  %v3507_v27 = vmul.f32 %v9393_v6, %v9380_v43  ;;  %vm3512_vm13 = vweird.f32 %v9393_v6 }
 0x66a   : > { %v3413_v63 = vmul.f32 %v6540_v54, %v3412_v50  ;;  %6545 = vrsqrt.f32 %v9390_v48  ;;  %v3669_v36 = vmul.f32 %v6830_v5, %v6544_v59  ;;  %vm3513_vm1 = vmor %vm3511_vm15, %vm3512_vm13  ;;  %vm3444_vm3 = vcmp.eq.f32.partialorder %v9390_v48, 0.0 }
 0x66b   : > { %v3508_v32 = vsub.f32 1.0, %v3507_v27 }
 0x66c   : > { %v3414_v53 = vmul.f32 0.5, %v3413_v63  ;;  %v3684_v55 = vmul.f32 %v3683_v18, %v3669_v36 }
 0x66d   : > { %v3509_v8 = vmul.f32 %v9393_v6, %v3508_v32 }
 0x66e   : > { %v3415_v16 = vsub.f32 1.5, %v3414_v53  ;;  %v3717_v56 = vmul.f32 %v3684_v55, %v3684_v55  ;;  %v9438_v24 = vperm.slane %v3684_v55, 0 }
 0x66f   : > { %v9415_v38 = vpop.xlane.xlu2 %3379  ;;  %v3510_v25 = vadd.f32 %v9393_v6, %v3509_v8 }
 0x670   : > { %v6546_v13 = vpop.eup %6545  ;;  %v3416_v33 = vmul.f32 %v6540_v54, %v3415_v16  ;;  %6547 = vrsqrt.f32 %v9415_v38  ;;  %v3718_v14 = vsel %vm1926_vm6, %v3717_v56, 0.0  ;;  %v3722_v40 = vmul.f32 %v9438_v24, %v9431_v10 }
 0x671   : > { %v3436_v29 = vmul.f32 %v6546_v13, %v9390_v48  ;;  %v3693_v54 = vsel %vm311_vm0, %v3685_v34, 0.0  ;;  %3719 = vadd.xlane.f32.xlu2 %v3718_v14  ;;  %v3514_v51 = vsel %vm3513_vm1, %v9393_v6, %v3510_v25  ;;  %vm3442_vm6 = vcmp.eq.f32.partialorder %v9390_v48, inf }
 0x672   : > { %v3417_v9 = vmul.f32 %v3416_v33, %v9382_v2  ;;  %3694 = vadd.xlane.f32.xlu1 %v3693_v54  ;;  %v3730_v50 = vsel %vm311_vm0, %v3722_v40, 0.0  ;;  %v3519_v47 = vsel %vm3516_vm14, %v3518_v15, %v3514_v51  ;;  %v3445_v6 = vand.u32 2147483648, %v9390_v48 }
 0x673   : > { %v3437_v52 = vmul.f32 %v6546_v13, %v3436_v29  ;;  %3731 = vadd.xlane.f32.xlu0 %v3730_v50  ;;  %v3520_v49 = vmul.f32 %v3519_v47, %v9112_v42  ;;  %vm3454_vm4 = vcmp.eq.f32.partialorder %v9415_v38, inf  ;;  %vm3456_vm5 = vcmp.eq.f32.partialorder %v9415_v38, 0.0 }
 0x674   : > { %v3419_v35 = vsel %vm3418_vm11, %v9382_v2, %v3417_v9  ;;  %v3457_v60 = vand.u32 2147483648, %v9415_v38 }
 0x675   : > { %v3422_v31 = vsel %vm3420_vm12, %v3421_v39, %v3419_v35  ;;  %v3438_v30 = vmul.f32 0.5, %v3437_v52  ;;  %v3612_v11 = vmul.f32 0.999, %v3520_v49 }
 0x676   : > { %v6548_v7 = vpop.eup %6547  ;;  %v9445_v44 = vmax.f32 %v3422_v31, 1e-05 }
 0x677   : > { %v3439_v2 = vsub.f32 1.5, %v3438_v30  ;;  %v3448_v22 = vmul.f32 %v6548_v7, %v9415_v38  ;;  %v9470_v59 = vsel %vm3620_vm2, %v3612_v11, %v9112_v42 }
 0x678   : > { %6549 = vrcp.f32 %v9445_v44  ;;  %v3723_v46 = vmul.f32 %v9438_v24, %v9470_v59  ;;  %v3686_v61 = vmul.f32 %v9470_v59, %v9470_v59  ;;  %v3532_v39 = vand.u32 2147483648, %v9445_v44 }
 0x679   : > { %v9459_v23 = vpop.xlane.xlu0 %3373  ;;  %v3440_v63 = vmul.f32 %v6546_v13, %v3439_v2  ;;  %v3449_v37 = vmul.f32 %v6548_v7, %v3448_v22  ;;  %v3530_v20 = vand.u32 2147483647, %v9445_v44  ;;  %vm3526_vm8 = vweird.f32 %v9445_v44 }
 0x67a   : > { %6551 = vrsqrt.f32 %v9459_v23  ;;  %v3696_v36 = vsel %vm311_vm0, %v3686_v61, 0.0  ;;  %vm3430_vm11 = vcmp.eq.f32.partialorder %v9459_v23, inf  ;;  %vm3432_vm12 = vcmp.eq.f32.partialorder %v9459_v23, 0.0 }
 0x67b   : > { %v3441_v26 = vmul.f32 %v3440_v63, %v9390_v48  ;;  %v3450_v19 = vmul.f32 0.5, %v3449_v37  ;;  %3697 = vadd.xlane.f32.xlu0 %v3696_v36  ;;  %vm3531_vm10 = vcmp.eq.f32.partialorder %v3530_v20, 8.507059e+37  ;;  %vm3621_vm15 = vcmp.gt.f32.partialorder %v9445_v44, 0.999 }
 0x67d   : > { %v3443_v53 = vsel %vm3442_vm6, %v9390_v48, %v3441_v26  ;;  %v3451_v4 = vsub.f32 1.5, %v3450_v19  ;;  %v3733_v48 = vsel %vm311_vm0, %v3723_v46, 0.0 }
 0x67e   : > { %v6550_v28 = vpop.eup %6549  ;;  %v3446_v58 = vsel %vm3444_vm3, %v3445_v6, %v3443_v53  ;;  %3734 = vadd.xlane.f32.xlu2 %v3733_v48 }
 0x67f   : > { %v9476_v27 = vmax.f32 %v3446_v58, 1e-05  ;;  %v3452_v16 = vmul.f32 %v6548_v7, %v3451_v4  ;;  %v3522_v43 = vmul.f32 %v6550_v28, %v9445_v44  ;;  %vm3527_vm7 = vweird.f32 %v6550_v28 }
 0x680   : > { %v6552_v5 = vpop.eup %6551  ;;  %vm3528_vm9 = vmor %vm3526_vm8, %vm3527_vm7  ;;  %v3433_v7 = vand.u32 2147483648, %v9459_v23 }
 0x681   : > { %v3424_v42 = vmul.f32 %v6552_v5, %v9459_v23  ;;  %6553 = vrcp.f32 %v9476_v27  ;;  %v3453_v1 = vmul.f32 %v3452_v16, %v9415_v38  ;;  %v3523_v41 = vsub.f32 1.0, %v3522_v43 }
 0x682   : > { %vm3556_vm1 = vweird.f32 %v9476_v27  ;;  %v3560_v51 = vand.u32 2147483647, %v9476_v27  ;;  %v3562_v50 = vand.u32 2147483648, %v9476_v27 }
 0x683   : > { %v3425_v32 = vmul.f32 %v6552_v5, %v3424_v42  ;;  %v3455_v13 = vsel %vm3454_vm4, %v9415_v38, %v3453_v1  ;;  %v3524_v33 = vmul.f32 %v6550_v28, %v3523_v41  ;;  %v3533_v38 = vor.u32 1.1754944e-38, %v3532_v39 }
 0x684   : > { %v3458_v29 = vsel %vm3456_vm5, %v3457_v60, %v3455_v13  ;;  %v9489_v18 = vpop.xlane.xlu0 %3382  ;;  %v3563_v4 = vor.u32 1.1754944e-38, %v3562_v50  ;;  %vm3561_vm6 = vcmp.eq.f32.partialorder %v3560_v51, 8.507059e+37  ;;  %vm3623_vm4 = vcmp.gt.f32.partialorder %v9476_v27, 0.999 }
 0x685   : > { %v3426_v57 = vmul.f32 0.5, %v3425_v32  ;;  %v9492_v9 = vmax.f32 %v3458_v29, 1e-05  ;;  %6555 = vrsqrt.f32 %v9489_v18  ;;  %v3525_v55 = vadd.f32 %v6550_v28, %v3524_v33 }
 0x686   : > { %vm3466_vm3 = vcmp.eq.f32.partialorder %v9489_v18, inf  ;;  %vm3468_vm5 = vcmp.eq.f32.partialorder %v9489_v18, 0.0  ;;  %v3469_v41 = vand.u32 2147483648, %v9489_v18 }
 0x687   : > { %v6554_v8 = vpop.eup %6553  ;;  %v3427_v52 = vsub.f32 1.5, %v3426_v57  ;;  %6557 = vrcp.f32 %v9492_v9  ;;  %v3529_v3 = vsel %vm3528_vm9, %v6550_v28, %v3525_v55  ;;  %v3577_v43 = vand.u32 2147483648, %v9492_v9 }
 0x688   : > { %v3552_v35 = vmul.f32 %v6554_v8, %v9476_v27  ;;  %v3534_v34 = vsel %vm3531_vm10, %v3533_v38, %v3529_v3  ;;  %vm3557_vm13 = vweird.f32 %v6554_v8  ;;  %v3575_v48 = vand.u32 2147483647, %v9492_v9 }
 0x689   : > { %v3428_v56 = vmul.f32 %v6552_v5, %v3427_v52  ;;  %v3535_v31 = vmul.f32 %v3534_v34, %v9232_v0  ;;  %vm3558_vm14 = vmor %vm3556_vm1, %vm3557_vm13  ;;  %vm3571_vm7 = vweird.f32 %v9492_v9  ;;  %v3578_v39 = vor.u32 1.1754944e-38, %v3577_v43 }
 0x68a   : > { %v3553_v30 = vsub.f32 1.0, %v3552_v35  ;;  %vm3576_vm9 = vcmp.eq.f32.partialorder %v3575_v48, 8.507059e+37 }
 0x68b   : > { %v6556_v25 = vpop.eup %6555  ;;  %v3429_v15 = vmul.f32 %v3428_v56, %v9459_v23  ;;  %v3613_v40 = vmul.f32 0.999, %v3535_v31 }
 0x68c   : > { %v3460_v14 = vmul.f32 %v6556_v25, %v9489_v18  ;;  %v3554_v54 = vmul.f32 %v6554_v8, %v3553_v30 }
 0x68d   : > { %v6558_v2 = vpop.eup %6557  ;;  %v3431_v22 = vsel %vm3430_vm11, %v9459_v23, %v3429_v15  ;;  %v9510_v37 = vsel %vm3621_vm15, %v3613_v40, %v9232_v0 }
 0x68e   : > { %v3434_v47 = vsel %vm3432_vm12, %v3433_v7, %v3431_v22  ;;  %v3461_v63 = vmul.f32 %v6556_v25, %v3460_v14  ;;  %v3555_v44 = vadd.f32 %v6554_v8, %v3554_v54  ;;  %v3687_v26 = vmul.f32 %v9510_v37, %v9510_v37 }
 0x68f   : > { %v9512_v49 = vmax.f32 %v3434_v47, 1e-05  ;;  %v3724_v23 = vmul.f32 %v9438_v24, %v9510_v37  ;;  %v3567_v19 = vmul.f32 %v6558_v2, %v9492_v9  ;;  %vm3572_vm2 = vweird.f32 %v6558_v2 }
 0x690   : > { %v3462_v11 = vmul.f32 0.5, %v3461_v63  ;;  %v3559_v6 = vsel %vm3558_vm14, %v6554_v8, %v3555_v44  ;;  %v3699_v53 = vsel %vm311_vm0, %v3687_v26, 0.0  ;;  %vm3573_vm8 = vmor %vm3571_vm7, %vm3572_vm2  ;;  %vm3624_vm12 = vcmp.gt.f32.partialorder %v9492_v9, 0.999 }
 0x691   : > { %6559 = vrcp.f32 %v9512_v49  ;;  %v3736_v0 = vsel %vm311_vm0, %v3724_v23, 0.0  ;;  %3700 = vadd.xlane.f32.xlu2 %v3699_v53  ;;  %v3564_v58 = vsel %vm3561_vm6, %v3563_v4, %v3559_v6  ;;  %v3568_v46 = vsub.f32 1.0, %v3567_v19 }
 0x692   : > { %v3463_v28 = vsub.f32 1.5, %v3462_v11  ;;  %3737 = vadd.xlane.f32.xlu1 %v3736_v0  ;;  %v3565_v16 = vmul.f32 %v3564_v58, %v9280_v45  ;;  %v3547_v52 = vand.u32 2147483648, %v9512_v49  ;;  %v3545_v3 = vand.u32 2147483647, %v9512_v49 }
 0x693   : > { %v3569_v5 = vmul.f32 %v6558_v2, %v3568_v46  ;;  %vm3541_vm11 = vweird.f32 %v9512_v49  ;;  %vm3622_vm1 = vcmp.gt.f32.partialorder %v9512_v49, 0.999 }
 0x694   : > { %v3464_v61 = vmul.f32 %v6556_v25, %v3463_v28  ;;  %v3615_v42 = vmul.f32 0.999, %v3565_v16  ;;  %v3548_v34 = vor.u32 1.1754944e-38, %v3547_v52  ;;  %vm3546_vm13 = vcmp.eq.f32.partialorder %v3545_v3, 8.507059e+37 }
 0x695   : > { %v3570_v60 = vadd.f32 %v6558_v2, %v3569_v5 }
 0x696   : > { %v3465_v36 = vmul.f32 %v3464_v61, %v9489_v18  ;;  %v9534_v33 = vsel %vm3623_vm4, %v3615_v42, %v9280_v45 }
 0x697   : > { %v6560_v1 = vpop.eup %6559  ;;  %v3726_v27 = vmul.f32 %v9438_v24, %v9534_v33  ;;  %v3574_v20 = vsel %vm3573_vm8, %v6558_v2, %v3570_v60 }
 0x698   : > { %v3467_v32 = vsel %vm3466_vm3, %v9489_v18, %v3465_v36  ;;  %v3537_v13 = vmul.f32 %v6560_v1, %v9512_v49  ;;  %v3579_v8 = vsel %vm3576_vm9, %v3578_v39, %v3574_v20  ;;  %vm3542_vm10 = vweird.f32 %v6560_v1 }
 0x699   : > { %v3470_v29 = vsel %vm3468_vm5, %v3469_v41, %v3467_v32  ;;  %v3742_v18 = vsel %vm311_vm0, %v3726_v27, 0.0  ;;  %v3580_v38 = vmul.f32 %v3579_v8, %v9322_v62  ;;  %vm3543_vm15 = vmor %vm3541_vm11, %vm3542_vm10  ;;  %v3689_v49 = vmul.f32 %v9534_v33, %v9534_v33 }
 0x69a   : > { %v3489_v57 = vmax.f32 %v3470_v29, 1e-05  ;;  %v3538_v55 = vsub.f32 1.0, %v3537_v13  ;;  %3743 = vadd.xlane.f32.xlu2 %v3742_v18 }
 0x69b   : > { %v3616_v35 = vmul.f32 0.999, %v3580_v38  ;;  %v3705_v0 = vsel %vm311_vm0, %v3689_v49, 0.0 }
 0x69c   : > { %6561 = vrcp.f32 %v3489_v57  ;;  %v3539_v45 = vmul.f32 %v6560_v1, %v3538_v55  ;;  %v3590_v22 = vand.u32 2147483647, %v3489_v57  ;;  %v3592_v51 = vand.u32 2147483648, %v3489_v57 }
 0x69d   : > { %v9545_v31 = vsel %vm3624_vm12, %v3616_v35, %v9322_v62  ;;  %vm3586_vm6 = vweird.f32 %v3489_v57  ;;  %vm3625_vm4 = vcmp.gt.f32.partialorder %v3489_v57, 0.999 }
 0x69e   : > { %v3540_v56 = vadd.f32 %v6560_v1, %v3539_v45  ;;  %v3690_v25 = vmul.f32 %v9545_v31, %v9545_v31  ;;  %v3727_v19 = vmul.f32 %v9438_v24, %v9545_v31  ;;  %vm3591_vm3 = vcmp.eq.f32.partialorder %v3590_v22, 8.507059e+37 }
 0x6a0   : > { %v3544_v30 = vsel %vm3543_vm15, %v6560_v1, %v3540_v56  ;;  %v3708_v40 = vsel %vm311_vm0, %v3690_v25, 0.0  ;;  %v3745_v4 = vsel %vm311_vm0, %v3727_v19, 0.0 }
 0x6a1   : > { %v3549_v15 = vsel %vm3546_vm13, %v3548_v34, %v3544_v30 }
 0x6a2   : > { %v6562_v7 = vpop.eup %6561  ;;  %v3550_v14 = vmul.f32 %v3549_v15, %v9349_v12  ;;  %3709 = vadd.xlane.f32.xlu2 %v3708_v40 }
 0x6a3   : > { %v3582_v54 = vmul.f32 %v6562_v7, %v3489_v57  ;;  %vm3587_vm14 = vweird.f32 %v6562_v7 }
 0x6a4   : > { %v3614_v2 = vmul.f32 0.999, %v3550_v14  ;;  %vm3588_vm2 = vmor %vm3586_vm6, %vm3587_vm14 }
 0x6a5   : > { %v3583_v9 = vsub.f32 1.0, %v3582_v54 }
 0x6a6   : > { %v9553_v62 = vsel %vm3622_vm1, %v3614_v2, %v9349_v12  ;;  %v3593_v12 = vor.u32 1.1754944e-38, %v3592_v51 }
 0x6a7   : > { %v3725_v50 = vmul.f32 %v9438_v24, %v9553_v62  ;;  %v3688_v47 = vmul.f32 %v9553_v62, %v9553_v62  ;;  %v3584_v63 = vmul.f32 %v6562_v7, %v3583_v9 }
 0x6a9   : > { %v3739_v44 = vsel %vm311_vm0, %v3725_v50, 0.0  ;;  %v3702_v26 = vsel %vm311_vm0, %v3688_v47, 0.0  ;;  %v3585_v23 = vadd.f32 %v6562_v7, %v3584_v63 }
 0x6aa   : > { %3740 = vadd.xlane.f32.xlu0 %v3739_v44  ;;  %3703 = vadd.xlane.f32.xlu1 %v3702_v26 }
 0x6ab   : > { %v3589_v11 = vsel %vm3588_vm2, %v6562_v7, %v3585_v23 }
 0x6ac   : > { %v3594_v6 = vsel %vm3591_vm3, %v3593_v12, %v3589_v11 }
 0x6ad   : > { %v3595_v53 = vmul.f32 %v3594_v6, %v9361_v21 }
 0x6af   : > { %v3617_v28 = vmul.f32 0.999, %v3595_v53 }
 0x6b1   : > { %v9569_v58 = vsel %vm3625_vm4, %v3617_v28, %v9361_v21 }
 0x6b2   : > { %3706 = vadd.xlane.f32.xlu0 %v3705_v0  ;;  %3746 = vadd.xlane.f32.xlu1 %v3745_v4  ;;  %v3691_v46 = vmul.f32 %v9569_v58, %v9569_v58  ;;  %v3728_v61 = vmul.f32 %v9438_v24, %v9569_v58 }
 0x6b4   : > { %v3711_v16 = vsel %vm311_vm0, %v3691_v46, 0.0  ;;  %v3386_v43 = vpop.xlane.xlu1 %3385  ;;  %v3748_v5 = vsel %vm311_vm0, %v3728_v61, 0.0 }
 0x6b5   : > { %3712 = vadd.xlane.f32.xlu2 %v3711_v16  ;;  %6563 = vrsqrt.f32 %v3386_v43  ;;  %vm3478_vm5 = vcmp.eq.f32.partialorder %v3386_v43, inf  ;;  %v3481_v13 = vand.u32 2147483648, %v3386_v43  ;;  %vm3480_vm7 = vcmp.eq.f32.partialorder %v3386_v43, 0.0 }
 0x6ba   : > { %3749 = vadd.xlane.f32.xlu0 %v3748_v5 }
 0x6bb   : > { %v6564_v48 = vpop.eup %6563 }
 0x6bc   : > { %v3472_v36 = vmul.f32 %v6564_v48, %v3386_v43 }
 0x6be   : > { %v3473_v21 = vmul.f32 %v6564_v48, %v3472_v36 }
 0x6c0   : > { %v3474_v42 = vmul.f32 0.5, %v3473_v21 }
 0x6c2   : > { %v3475_v1 = vsub.f32 1.5, %v3474_v42 }
 0x6c4   : > { %v3476_v41 = vmul.f32 %v6564_v48, %v3475_v1 }
 0x6c6   : > { %v3477_v60 = vmul.f32 %v3476_v41, %v3386_v43 }
 0x6c8   : > { %v3479_v32 = vsel %vm3478_vm5, %v3386_v43, %v3477_v60 }
 0x6c9   : > { %v3482_v39 = vsel %vm3480_vm7, %v3481_v13, %v3479_v32 }
 0x6ca   : > { %v3490_v29 = vmax.f32 %v3482_v39, 1e-05 }
 0x6cc   : > { %6565 = vrcp.f32 %v3490_v29  ;;  %v3607_v55 = vand.u32 2147483648, %v3490_v29  ;;  %v3605_v18 = vand.u32 2147483647, %v3490_v29  ;;  %vm3601_vm9 = vweird.f32 %v3490_v29 }
 0x6cd   : > { %vm3626_vm12 = vcmp.gt.f32.partialorder %v3490_v29, 0.999 }
 0x6ce   : > { %v3608_v34 = vor.u32 1.1754944e-38, %v3607_v55  ;;  %vm3606_vm11 = vcmp.eq.f32.partialorder %v3605_v18, 8.507059e+37 }
 0x6d2   : > { %v6566_v27 = vpop.eup %6565 }
 0x6d3   : > { %v3597_v20 = vmul.f32 %v6566_v27, %v3490_v29  ;;  %vm3602_vm8 = vweird.f32 %v6566_v27 }
 0x6d4   : > { %vm3603_vm10 = vmor %vm3601_vm9, %vm3602_vm8 }
 0x6d5   : > { %v3598_v57 = vsub.f32 1.0, %v3597_v20 }
 0x6d7   : > { %v3599_v52 = vmul.f32 %v6566_v27, %v3598_v57 }
 0x6d9   : > { %v3600_v35 = vadd.f32 %v6566_v27, %v3599_v52 }
 0x6db   : > { %v3604_v30 = vsel %vm3603_vm10, %v6566_v27, %v3600_v35 }
 0x6dc   : > { %v3609_v7 = vsel %vm3606_vm11, %v3608_v34, %v3604_v30 }
 0x6dd   : > { %v3610_v14 = vmul.f32 %v3609_v7, %v9372_v17 }
 0x6df   : > { %v3618_v54 = vmul.f32 0.999, %v3610_v14 }
 0x6e1   : > { %v9582_v51 = vsel %vm3626_vm12, %v3618_v54, %v9372_v17 }
 0x6e2   : > { %v3729_v47 = vmul.f32 %v9438_v24, %v9582_v51  ;;  %v3692_v63 = vmul.f32 %v9582_v51, %v9582_v51 }
 0x6e4   : > { %v3720_v8 = vpop.xlane.xlu2 %3719  ;;  %v3751_v23 = vsel %vm311_vm0, %v3729_v47, 0.0  ;;  %v3714_v12 = vsel %vm311_vm0, %v3692_v63, 0.0 }
 0x6e5   : > { %v9577_v38 = vperm.slane %v3720_v8, 0  ;;  %v3695_v45 = vpop.xlane.xlu1 %3694  ;;  %3752 = vadd.xlane.f32.xlu1 %v3751_v23  ;;  %3715 = vadd.xlane.f32.xlu0 %v3714_v12 }
 0x6e6   : > { %v3732_v3 = vpop.xlane.xlu0 %3731  ;;  %v3787_v0 = vsub.f32 1.0, %v3695_v45 }
 0x6e7   : > { %v3754_v56 = vmul.f32 2.0, %v3732_v3  ;;  %v3811_v25 = vmul.f32 %v9577_v38, %v3695_v45 }
 0x6e8   : > { %v3795_v5 = vmul.f32 %v3787_v0, %v9438_v24 }
 0x6e9   : > { %v3762_v15 = vadd.f32 1.0, %v3754_v56 }
 0x6eb   : > { %v3819_v40 = vadd.f32 %v3811_v25, %v3762_v15  ;;  %v3771_v6 = vadd.f32 %v9577_v38, %v3762_v15 }
 0x6ed   : > { %v3827_v2 = vadd.f32 1e-05, %v3819_v40  ;;  %v3779_v61 = vmul.f32 %v3771_v6, %v9431_v10 }
 0x6ee   : > { %v3698_v22 = vpop.xlane.xlu0 %3697 }
 0x6ef   : > { %6567 = vrcp.f32 %v3827_v2  ;;  %v3812_v26 = vmul.f32 %v9577_v38, %v3698_v22  ;;  %v3846_v4 = vand.u32 2147483648, %v3827_v2  ;;  %v3844_v46 = vand.u32 2147483647, %v3827_v2 }
 0x6f0   : > { %vm3840_vm13 = vweird.f32 %v3827_v2  ;;  %v3803_v1 = vadd.f32 %v3795_v5, %v3779_v61  ;;  %v3788_v13 = vsub.f32 1.0, %v3698_v22 }
 0x6f1   : > { %v3735_v9 = vpop.xlane.xlu2 %3734  ;;  %v3847_v36 = vor.u32 1.1754944e-38, %v3846_v4  ;;  %vm3845_vm14 = vcmp.eq.f32.partialorder %v3844_v46, 8.507059e+37 }
 0x6f2   : > { %v3755_v50 = vmul.f32 2.0, %v3735_v9  ;;  %v3796_v45 = vmul.f32 %v3788_v13, %v9438_v24 }
 0x6f4   : > { %v3763_v44 = vadd.f32 1.0, %v3755_v50 }
 0x6f5   : > { %v6568_v17 = vpop.eup %6567 }
 0x6f6   : > { %v3820_v49 = vadd.f32 %v3812_v26, %v3763_v44  ;;  %v3836_v11 = vmul.f32 %v6568_v17, %v3827_v2  ;;  %vm3841_vm15 = vweird.f32 %v6568_v17  ;;  %v3772_v48 = vadd.f32 %v9577_v38, %v3763_v44 }
 0x6f7   : > { %vm3842_vm1 = vmor %vm3840_vm13, %vm3841_vm15 }
 0x6f8   : > { %v3828_v19 = vadd.f32 1e-05, %v3820_v49  ;;  %v3837_v53 = vsub.f32 1.0, %v3836_v11  ;;  %v3780_v10 = vmul.f32 %v3772_v48, %v9470_v59 }
 0x6fa   : > { %6569 = vrcp.f32 %v3828_v19  ;;  %v3838_v28 = vmul.f32 %v6568_v17, %v3837_v53  ;;  %v3859_v20 = vand.u32 2147483647, %v3828_v19  ;;  %v3861_v57 = vand.u32 2147483648, %v3828_v19 }
 0x6fb   : > { %vm3855_vm2 = vweird.f32 %v3828_v19  ;;  %v3804_v34 = vadd.f32 %v3796_v45, %v3780_v10 }
 0x6fc   : > { %v3839_v16 = vadd.f32 %v6568_v17, %v3838_v28  ;;  %v3862_v59 = vor.u32 1.1754944e-38, %v3861_v57  ;;  %vm3860_vm4 = vcmp.eq.f32.partialorder %v3859_v20, 8.507059e+37 }
 0x6fe   : > { %v3843_v42 = vsel %vm3842_vm1, %v6568_v17, %v3839_v16 }
 0x6ff   : > { %v3848_v32 = vsel %vm3845_vm14, %v3847_v36, %v3843_v42 }
 0x700   : > { %v6570_v43 = vpop.eup %6569  ;;  %v9596_v27 = vmul.f32 %v3848_v32, %v3803_v1 }
 0x701   : > { %v3851_v21 = vmul.f32 %v6570_v43, %v3828_v19  ;;  %vm3856_vm6 = vweird.f32 %v6570_v43 }
 0x702   : > { %v3955_v18 = vmul.f32 %v9596_v27, %v9596_v27  ;;  %vm3857_vm3 = vmor %vm3855_vm2, %vm3856_vm6 }
 0x703   : > { %v3852_v39 = vsub.f32 1.0, %v3851_v21 }
 0x704   : > { %v3701_v41 = vpop.xlane.xlu2 %3700  ;;  %v3963_v56 = vsel %vm311_vm0, %v3955_v18, 0.0 }
 0x705   : > { %v3738_v60 = vpop.xlane.xlu1 %3737  ;;  %v3813_v55 = vmul.f32 %v9577_v38, %v3701_v41  ;;  %v3853_v52 = vmul.f32 %v6570_v43, %v3852_v39  ;;  %3964 = vadd.xlane.f32.xlu1 %v3963_v56  ;;  %v3789_v22 = vsub.f32 1.0, %v3701_v41 }
 0x706   : > { %v3756_v29 = vmul.f32 2.0, %v3738_v60 }
 0x707   : > { %v3854_v35 = vadd.f32 %v6570_v43, %v3853_v52  ;;  %v3797_v12 = vmul.f32 %v3789_v22, %v9438_v24 }
 0x708   : > { %v3764_v8 = vadd.f32 1.0, %v3756_v29 }
 0x709   : > { %v3858_v25 = vsel %vm3857_vm3, %v6570_v43, %v3854_v35 }
 0x70a   : > { %v3821_v3 = vadd.f32 %v3813_v55, %v3764_v8  ;;  %v3863_v15 = vsel %vm3860_vm4, %v3862_v59, %v3858_v25  ;;  %v3773_v2 = vadd.f32 %v9577_v38, %v3764_v8 }
 0x70b   : > { %v9603_v7 = vmul.f32 %v3863_v15, %v3804_v34 }
 0x70c   : > { %v3829_v30 = vadd.f32 1e-05, %v3821_v3  ;;  %v3781_v44 = vmul.f32 %v3773_v2, %v9510_v37 }
 0x70d   : > { %v3956_v14 = vmul.f32 %v9603_v7, %v9603_v7  ;;  %v3744_v47 = vpop.xlane.xlu2 %3743 }
 0x70e   : > { %6571 = vrcp.f32 %v3829_v30  ;;  %v3876_v63 = vand.u32 2147483648, %v3829_v30  ;;  %v3874_v23 = vand.u32 2147483647, %v3829_v30  ;;  %vm3870_vm7 = vweird.f32 %v3829_v30 }
 0x70f   : > { %v3966_v40 = vsel %vm311_vm0, %v3956_v14, 0.0  ;;  %v3805_v19 = vadd.f32 %v3797_v12, %v3781_v44  ;;  %v3758_v61 = vmul.f32 2.0, %v3744_v47 }
 0x710   : > { %3967 = vadd.xlane.f32.xlu2 %v3966_v40  ;;  %v3877_v17 = vor.u32 1.1754944e-38, %v3876_v63  ;;  %vm3875_vm9 = vcmp.eq.f32.partialorder %v3874_v23, 8.507059e+37 }
 0x711   : > { %v3766_v21 = vadd.f32 1.0, %v3758_v61 }
 0x713   : > { %v3775_v3 = vadd.f32 %v9577_v38, %v3766_v21 }
 0x714   : > { %v6572_v54 = vpop.eup %6571 }
 0x715   : > { %v3866_v9 = vmul.f32 %v6572_v54, %v3829_v30  ;;  %vm3871_vm5 = vweird.f32 %v6572_v54  ;;  %v3710_v16 = vpop.xlane.xlu2 %3709 }
 0x716   : > { %vm3872_vm8 = vmor %vm3870_vm7, %vm3871_vm5  ;;  %v3816_v13 = vmul.f32 %v9577_v38, %v3710_v16  ;;  %v3792_v34 = vsub.f32 1.0, %v3710_v16 }
 0x717   : > { %v3867_v50 = vsub.f32 1.0, %v3866_v9  ;;  %v3783_v9 = vmul.f32 %v3775_v3, %v9534_v33 }
 0x718   : > { %v3800_v47 = vmul.f32 %v3792_v34, %v9438_v24 }
 0x719   : > { %v3868_v26 = vmul.f32 %v6572_v54, %v3867_v50 }
 0x71b   : > { %v3869_v49 = vadd.f32 %v6572_v54, %v3868_v26 }
 0x71d   : > { %v3704_v11 = vpop.xlane.xlu1 %3703  ;;  %v3741_v6 = vpop.xlane.xlu0 %3740  ;;  %v3873_v53 = vsel %vm3872_vm8, %v6572_v54, %v3869_v49 }
 0x71e   : > { %v3757_v0 = vmul.f32 2.0, %v3741_v6  ;;  %v3878_v4 = vsel %vm3875_vm9, %v3877_v17, %v3873_v53  ;;  %v3814_v37 = vmul.f32 %v9577_v38, %v3704_v11  ;;  %v3790_v45 = vsub.f32 1.0, %v3704_v11 }
 0x71f   : > { %v9611_v28 = vmul.f32 %v3878_v4, %v3805_v19 }
 0x720   : > { %v3765_v46 = vadd.f32 1.0, %v3757_v0  ;;  %v3798_v2 = vmul.f32 %v3790_v45, %v9438_v24 }
 0x721   : > { %v3957_v43 = vmul.f32 %v9611_v28, %v9611_v28 }
 0x722   : > { %v3822_v5 = vadd.f32 %v3814_v37, %v3765_v46  ;;  %v3774_v55 = vadd.f32 %v9577_v38, %v3765_v46 }
 0x723   : > { %v3969_v48 = vsel %vm311_vm0, %v3957_v43, 0.0 }
 0x724   : > { %v3830_v36 = vadd.f32 1e-05, %v3822_v5  ;;  %3970 = vadd.xlane.f32.xlu0 %v3969_v48  ;;  %v3782_v30 = vmul.f32 %v3774_v55, %v9553_v62 }
 0x725   : > { %v3707_v42 = vpop.xlane.xlu0 %3706  ;;  %v3747_v1 = vpop.xlane.xlu1 %3746 }
 0x726   : > { %6573 = vrcp.f32 %v3830_v36  ;;  %v3815_v41 = vmul.f32 %v9577_v38, %v3707_v42  ;;  %v3759_v60 = vmul.f32 2.0, %v3747_v1  ;;  %v3891_v15 = vand.u32 2147483648, %v3830_v36 }
 0x727   : > { %v3889_v40 = vand.u32 2147483647, %v3830_v36  ;;  %vm3885_vm11 = vweird.f32 %v3830_v36  ;;  %v3806_v44 = vadd.f32 %v3798_v2, %v3782_v30  ;;  %v3791_v26 = vsub.f32 1.0, %v3707_v42 }
 0x728   : > { %v3823_v32 = vadd.f32 %v3815_v41, %v3766_v21  ;;  %v3767_v39 = vadd.f32 1.0, %v3759_v60  ;;  %v9621_v20 = vpop.xlane.xlu2 %3712  ;;  %v3892_v23 = vor.u32 1.1754944e-38, %v3891_v15 }
 0x729   : > { %v3817_v56 = vmul.f32 %v9577_v38, %v9621_v20  ;;  %vm3890_vm15 = vcmp.eq.f32.partialorder %v3889_v40, 8.507059e+37  ;;  %v3799_v37 = vmul.f32 %v3791_v26, %v9438_v24  ;;  %v3793_v61 = vsub.f32 1.0, %v9621_v20 }
 0x72a   : > { %v9619_v29 = vadd.f32 1e-05, %v3823_v32  ;;  %v3824_v10 = vadd.f32 %v3816_v13, %v3767_v39  ;;  %v3776_v17 = vadd.f32 %v9577_v38, %v3767_v39 }
 0x72b   : > { %v3807_v1 = vadd.f32 %v3799_v37, %v3783_v9 }
 0x72c   : > { %v6574_v57 = vpop.eup %6573  ;;  %6575 = vrcp.f32 %v9619_v29  ;;  %v9625_v52 = vadd.f32 1e-05, %v3824_v10  ;;  %v3906_v6 = vand.u32 2147483648, %v9619_v29  ;;  %v3904_v4 = vand.u32 2147483647, %v9619_v29 }
 0x72d   : > { %v3881_v8 = vmul.f32 %v6574_v57, %v3830_v36  ;;  %v3750_v18 = vpop.xlane.xlu0 %3749  ;;  %vm3886_vm10 = vweird.f32 %v6574_v57  ;;  %vm3900_vm1 = vweird.f32 %v9619_v29  ;;  %v3784_v16 = vmul.f32 %v3776_v17, %v9545_v31 }
 0x72e   : > { %v3760_v35 = vmul.f32 2.0, %v3750_v18  ;;  %6577 = vrcp.f32 %v9625_v52  ;;  %vm3887_vm12 = vmor %vm3885_vm11, %vm3886_vm10  ;;  %v3921_v48 = vand.u32 2147483648, %v9625_v52  ;;  %v3907_v36 = vor.u32 1.1754944e-38, %v3906_v6 }
 0x72f   : > { %v3882_v59 = vsub.f32 1.0, %v3881_v8  ;;  %v3919_v42 = vand.u32 2147483647, %v9625_v52  ;;  %vm3905_vm2 = vcmp.eq.f32.partialorder %v3904_v4, 8.507059e+37  ;;  %vm3915_vm3 = vweird.f32 %v9625_v52 }
 0x730   : > { %v3768_v25 = vadd.f32 1.0, %v3760_v35  ;;  %v3922_v20 = vor.u32 1.1754944e-38, %v3921_v48  ;;  %v3801_v35 = vmul.f32 %v3793_v61, %v9438_v24 }
 0x731   : > { %v3883_v14 = vmul.f32 %v6574_v57, %v3882_v59  ;;  %vm3920_vm5 = vcmp.eq.f32.partialorder %v3919_v42, 8.507059e+37 }
 0x732   : > { %v6576_v54 = vpop.eup %6575  ;;  %v3825_v22 = vadd.f32 %v3817_v56, %v3768_v25  ;;  %v3777_v31 = vadd.f32 %v9577_v38, %v3768_v25 }
 0x733   : > { %v3896_v50 = vmul.f32 %v6576_v54, %v9619_v29  ;;  %v3884_v63 = vadd.f32 %v6574_v57, %v3883_v14  ;;  %vm3901_vm13 = vweird.f32 %v6576_v54 }
 0x734   : > { %v9636_v62 = vadd.f32 1e-05, %v3825_v22  ;;  %v6578_v12 = vpop.eup %6577  ;;  %vm3902_vm14 = vmor %vm3900_vm1, %vm3901_vm13  ;;  %v3785_v3 = vmul.f32 %v3777_v31, %v9569_v58 }
 0x735   : > { %v3897_v49 = vsub.f32 1.0, %v3896_v50  ;;  %v3888_v19 = vsel %vm3887_vm12, %v6574_v57, %v3884_v63  ;;  %v3911_v33 = vmul.f32 %v6578_v12, %v9625_v52  ;;  %vm3916_vm6 = vweird.f32 %v6578_v12 }
 0x736   : > { %6579 = vrcp.f32 %v9636_v62  ;;  %v3893_v11 = vsel %vm3890_vm15, %v3892_v23, %v3888_v19  ;;  %vm3917_vm4 = vmor %vm3915_vm3, %vm3916_vm6  ;;  %v3808_v57 = vadd.f32 %v3800_v47, %v3784_v16  ;;  %v3936_v52 = vand.u32 2147483648, %v9636_v62 }
 0x737   : > { %v9642_v53 = vmul.f32 %v3893_v11, %v3806_v44  ;;  %v3898_v0 = vmul.f32 %v6576_v54, %v3897_v49  ;;  %v3912_v46 = vsub.f32 1.0, %v3911_v33  ;;  %v3934_v30 = vand.u32 2147483647, %v9636_v62 }
 0x738   : > { %vm3930_vm8 = vweird.f32 %v9636_v62  ;;  %v3937_v14 = vor.u32 1.1754944e-38, %v3936_v52  ;;  %v3809_v40 = vadd.f32 %v3801_v35, %v3785_v3 }
 0x739   : > { %v3958_v43 = vmul.f32 %v9642_v53, %v9642_v53  ;;  %v3899_v5 = vadd.f32 %v6576_v54, %v3898_v0  ;;  %v3913_v21 = vmul.f32 %v6578_v12, %v3912_v46  ;;  %vm3935_vm10 = vcmp.eq.f32.partialorder %v3934_v30, 8.507059e+37 }
 0x73b   : > { %v3972_v41 = vsel %vm311_vm0, %v3958_v43, 0.0  ;;  %v3903_v60 = vsel %vm3902_vm14, %v6576_v54, %v3899_v5  ;;  %v3914_v39 = vadd.f32 %v6578_v12, %v3913_v21 }
 0x73c   : > { %v6580_v32 = vpop.eup %6579  ;;  %3973 = vadd.xlane.f32.xlu1 %v3972_v41  ;;  %v3908_v13 = vsel %vm3905_vm2, %v3907_v36, %v3903_v60 }
 0x73d   : > { %v3926_v29 = vmul.f32 %v6580_v32, %v9636_v62  ;;  %v9657_v10 = vmul.f32 %v3908_v13, %v3807_v1  ;;  %v3918_v55 = vsel %vm3917_vm4, %v6578_v12, %v3914_v39  ;;  %vm3931_vm7 = vweird.f32 %v6580_v32 }
 0x73e   : > { %v3923_v45 = vsel %vm3920_vm5, %v3922_v20, %v3918_v55  ;;  %vm3932_vm9 = vmor %vm3930_vm8, %vm3931_vm7 }
 0x73f   : > { %v3927_v8 = vsub.f32 1.0, %v3926_v29  ;;  %v3959_v18 = vmul.f32 %v9657_v10, %v9657_v10  ;;  %v9663_v56 = vmul.f32 %v3923_v45, %v3808_v57 }
 0x741   : > { %v3975_v59 = vsel %vm311_vm0, %v3959_v18, 0.0  ;;  %v3928_v34 = vmul.f32 %v6580_v32, %v3927_v8  ;;  %v3960_v25 = vmul.f32 %v9663_v56, %v9663_v56 }
 0x742   : > { %3976 = vadd.xlane.f32.xlu2 %v3975_v59 }
 0x743   : > { %v3929_v15 = vadd.f32 %v6580_v32, %v3928_v34  ;;  %v3978_v58 = vsel %vm311_vm0, %v3960_v25, 0.0 }
 0x744   : > { %3979 = vadd.xlane.f32.xlu0 %v3978_v58 }
 0x745   : > { %v3933_v54 = vsel %vm3932_vm9, %v6580_v32, %v3929_v15 }
 0x746   : > { %v3938_v2 = vsel %vm3935_vm10, %v3937_v14, %v3933_v54 }
 0x747   : > { %v9672_v9 = vmul.f32 %v3938_v2, %v3809_v40 }
 0x749   : > { %v3961_v22 = vmul.f32 %v9672_v9, %v9672_v9 }
 0x74b   : > { %v3981_v50 = vsel %vm311_vm0, %v3961_v22, 0.0 }
 0x74c   : > { %3982 = vadd.xlane.f32.xlu1 %v3981_v50 }
 0x758   : > { %v3753_v47 = vpop.xlane.xlu1 %3752  ;;  %v3716_v63 = vpop.xlane.xlu0 %3715 }
 0x759   : > { %v3761_v44 = vmul.f32 2.0, %v3753_v47  ;;  %v3818_v62 = vmul.f32 %v9577_v38, %v3716_v63  ;;  %v3794_v6 = vsub.f32 1.0, %v3716_v63 }
 0x75b   : > { %v3769_v26 = vadd.f32 1.0, %v3761_v44  ;;  %v3802_v16 = vmul.f32 %v3794_v6, %v9438_v24 }
 0x75d   : > { %v3826_v23 = vadd.f32 %v3818_v62, %v3769_v26  ;;  %v3778_v19 = vadd.f32 %v9577_v38, %v3769_v26 }
 0x75f   : > { %v3834_v12 = vadd.f32 1e-05, %v3826_v23  ;;  %v3786_v46 = vmul.f32 %v3778_v19, %v9582_v51 }
 0x761   : > { %6581 = vrcp.f32 %v3834_v12  ;;  %v3951_v0 = vand.u32 2147483648, %v3834_v12  ;;  %v3949_v37 = vand.u32 2147483647, %v3834_v12  ;;  %vm3945_vm12 = vweird.f32 %v3834_v12 }
 0x762   : > { %v3810_v38 = vadd.f32 %v3802_v16, %v3786_v46 }
 0x763   : > { %v3952_v43 = vor.u32 1.1754944e-38, %v3951_v0  ;;  %vm3950_vm13 = vcmp.eq.f32.partialorder %v3949_v37, 8.507059e+37 }
 0x767   : > { %v6582_v49 = vpop.eup %6581 }
 0x768   : > { %v3941_v17 = vmul.f32 %v6582_v49, %v3834_v12  ;;  %vm3946_vm11 = vweird.f32 %v6582_v49 }
 0x769   : > { %vm3947_vm15 = vmor %vm3945_vm12, %vm3946_vm11 }
 0x76a   : > { %v3942_v33 = vsub.f32 1.0, %v3941_v17 }
 0x76c   : > { %v3943_v4 = vmul.f32 %v6582_v49, %v3942_v33 }
 0x76e   : > { %v3944_v61 = vadd.f32 %v6582_v49, %v3943_v4 }
 0x770   : > { %v3948_v5 = vsel %vm3947_vm15, %v6582_v49, %v3944_v61 }
 0x771   : > { %v3953_v21 = vsel %vm3950_vm13, %v3952_v43, %v3948_v5 }
 0x772   : > { %v9681_v1 = vmul.f32 %v3953_v21, %v3810_v38 }
 0x774   : > { %v3962_v51 = vmul.f32 %v9681_v1, %v9681_v1 }
 0x776   : > { %v3984_v32 = vsel %vm311_vm0, %v3962_v51, 0.0 }
 0x777   : > { %3985 = vadd.xlane.f32.xlu2 %v3984_v32 }
 0x778   : > { %v3965_v11 = vpop.xlane.xlu1 %3964 }
 0x779   : > { %6583 = vrsqrt.f32 %v3965_v11  ;;  %vm3994_vm1 = vcmp.eq.f32.partialorder %v3965_v11, inf  ;;  %v3997_v57 = vand.u32 2147483648, %v3965_v11  ;;  %vm3996_vm14 = vcmp.eq.f32.partialorder %v3965_v11, 0.0 }
 0x77f   : > { %v6584_v48 = vpop.eup %6583 }
 0x780   : > { %v3988_v42 = vmul.f32 %v6584_v48, %v3965_v11 }
 0x782   : > { %v3989_v41 = vmul.f32 %v6584_v48, %v3988_v42 }
 0x783   : > { %v3968_v36 = vpop.xlane.xlu2 %3967 }
 0x784   : > { %6585 = vrsqrt.f32 %v3968_v36  ;;  %v3990_v60 = vmul.f32 0.5, %v3989_v41  ;;  %vm4006_vm6 = vcmp.eq.f32.partialorder %v3968_v36, inf  ;;  %v4009_v34 = vand.u32 2147483648, %v3968_v36 }
 0x785   : > { %vm4008_vm2 = vcmp.eq.f32.partialorder %v3968_v36, 0.0 }
 0x786   : > { %v3991_v31 = vsub.f32 1.5, %v3990_v60 }
 0x788   : > { %v3992_v39 = vmul.f32 %v6584_v48, %v3991_v31 }
 0x78a   : > { %v6586_v24 = vpop.eup %6585  ;;  %v3993_v20 = vmul.f32 %v3992_v39, %v3965_v11 }
 0x78b   : > { %v4000_v13 = vmul.f32 %v6586_v24, %v3968_v36 }
 0x78c   : > { %v3995_v8 = vsel %vm3994_vm1, %v3965_v11, %v3993_v20 }
 0x78d   : > { %v4001_v29 = vmul.f32 %v6586_v24, %v4000_v13  ;;  %v3998_v18 = vsel %vm3996_vm14, %v3997_v57, %v3995_v8 }
 0x78e   : > { %v4083_v3 = vmax.f32 %v3998_v18, 1e-05 }
 0x78f   : > { %v4002_v55 = vmul.f32 0.5, %v4001_v29 }
 0x790   : > { %6587 = vrcp.f32 %v4083_v3  ;;  %v4102_v50 = vand.u32 2147483648, %v4083_v3  ;;  %v4100_v63 = vand.u32 2147483647, %v4083_v3  ;;  %vm4096_vm4 = vweird.f32 %v4083_v3 }
 0x791   : > { %v4003_v45 = vsub.f32 1.5, %v4002_v55  ;;  %vm4219_vm11 = vcmp.gt.f32.partialorder %v4083_v3, 0.999 }
 0x792   : > { %v4103_v12 = vor.u32 1.1754944e-38, %v4102_v50  ;;  %vm4101_vm7 = vcmp.eq.f32.partialorder %v4100_v63, 8.507059e+37 }
 0x793   : > { %v4004_v35 = vmul.f32 %v6586_v24, %v4003_v45  ;;  %v301_v45 = vld [vmem:[%s11189_s5 + $0x8] sm:$0xff] }
 0x794   : > { %6085 = vmatpush.xpose.msk.msra.mxu2 %vm311_vm0, %v301_v45  ;;  %6113 = vmatpush.xpose.msk.msra.mxu3 %vm311_vm0, %v301_v45 }
 0x795   : > { %v4005_v59 = vmul.f32 %v4004_v35, %v3968_v36 }
 0x796   : > { %v6588_v58 = vpop.eup %6587 }
 0x797   : > { %v3971_v52 = vpop.xlane.xlu0 %3970  ;;  %v4007_v30 = vsel %vm4006_vm6, %v3968_v36, %v4005_v59  ;;  %v4092_v40 = vmul.f32 %v6588_v58, %v4083_v3  ;;  %vm4097_vm3 = vweird.f32 %v6588_v58  ;;  %v300_v59 = vld [vmem:[%s11189_s5] sm:$0xff] }
 0x798   : > { %6589 = vrsqrt.f32 %v3971_v52  ;;  %v4010_v25 = vsel %vm4008_vm2, %v4009_v34, %v4007_v30  ;;  %vm4098_vm5 = vmor %vm4096_vm4, %vm4097_vm3  ;;  %vm4018_vm9 = vcmp.eq.f32.partialorder %v3971_v52, inf  ;;  %vm4020_vm10 = vcmp.eq.f32.partialorder %v3971_v52, 0.0  ;;  %6086 = vmatpush.xpose.msk.msra.mxu2 %vm311_vm0, %v300_v59  ;;  %6114 = vmatpush.xpose.msk.msra.mxu3 %vm311_vm0, %v300_v59 }
 0x799   : > { %v4084_v15 = vmax.f32 %v4010_v25, 1e-05  ;;  %v4093_v2 = vsub.f32 1.0, %v4092_v40  ;;  %v4021_v61 = vand.u32 2147483648, %v3971_v52 }
 0x79b   : > { %6591 = vrcp.f32 %v4084_v15  ;;  %v4094_v47 = vmul.f32 %v6588_v58, %v4093_v2  ;;  %v4117_v0 = vand.u32 2147483648, %v4084_v15  ;;  %v4115_v46 = vand.u32 2147483647, %v4084_v15 }
 0x79c   : > { %vm4111_vm12 = vweird.f32 %v4084_v15  ;;  %vm4220_vm1 = vcmp.gt.f32.partialorder %v4084_v15, 0.999 }
 0x79d   : > { %v4095_v62 = vadd.f32 %v6588_v58, %v4094_v47  ;;  %v4118_v36 = vor.u32 1.1754944e-38, %v4117_v0  ;;  %vm4116_vm13 = vcmp.eq.f32.partialorder %v4115_v46, 8.507059e+37 }
 0x79e   : > { %v6590_v14 = vpop.eup %6589 }
 0x79f   : > { %v4012_v54 = vmul.f32 %v6590_v14, %v3971_v52  ;;  %v4099_v17 = vsel %vm4098_vm5, %v6588_v58, %v4095_v62 }
 0x7a0   : > { %v4104_v33 = vsel %vm4101_vm7, %v4103_v12, %v4099_v17 }
 0x7a1   : > { %v4013_v22 = vmul.f32 %v6590_v14, %v4012_v54  ;;  %v6592_v26 = vpop.eup %6591  ;;  %v4105_v6 = vmul.f32 %v4104_v33, %v9596_v27 }
 0x7a2   : > { %v4107_v49 = vmul.f32 %v6592_v26, %v4084_v15  ;;  %vm4112_vm8 = vweird.f32 %v6592_v26 }
 0x7a3   : > { %v4014_v44 = vmul.f32 0.5, %v4013_v22  ;;  %v4211_v16 = vmul.f32 0.999, %v4105_v6  ;;  %vm4113_vm15 = vmor %vm4111_vm12, %vm4112_vm8 }
 0x7a4   : > { %v4108_v11 = vsub.f32 1.0, %v4107_v49 }
 0x7a5   : > { %v4015_v23 = vsub.f32 1.5, %v4014_v44  ;;  %v4243_v38 = vsel %vm4219_vm11, %v4211_v16, %v9596_v27 }
 0x7a6   : > { %v4109_v37 = vmul.f32 %v6592_v26, %v4108_v11  ;;  %v4259_v42 = vmul.f32 0.044715, %v4243_v38  ;;  %v4251_v58 = vmul.f32 0.5, %v4243_v38 }
 0x7a7   : > { %v4016_v19 = vmul.f32 %v6590_v14, %v4015_v23 }
 0x7a8   : > { %v4110_v5 = vadd.f32 %v6592_v26, %v4109_v37  ;;  %v4267_v32 = vmul.f32 %v4259_v42, %v4243_v38 }
 0x7a9   : > { %v4017_v4 = vmul.f32 %v4016_v19, %v3971_v52 }
 0x7aa   : > { %v4114_v41 = vsel %vm4113_vm15, %v6592_v26, %v4110_v5  ;;  %v4275_v31 = vmul.f32 %v4267_v32, %v4243_v38 }
 0x7ab   : > { %v4019_v43 = vsel %vm4018_vm9, %v3971_v52, %v4017_v4  ;;  %v4119_v51 = vsel %vm4116_vm13, %v4118_v36, %v4114_v41 }
 0x7ac   : > { %v4022_v48 = vsel %vm4020_vm10, %v4021_v61, %v4019_v43  ;;  %v4120_v24 = vmul.f32 %v4119_v51, %v9603_v7  ;;  %v4283_v27 = vadd.f32 %v4275_v31, %v4243_v38 }
 0x7ad   : > { %v9688_v21 = vmax.f32 %v4022_v48, 1e-05 }
 0x7ae   : > { %v4212_v13 = vmul.f32 0.999, %v4120_v24  ;;  %v4291_v55 = vmul.f32 0.7978846, %v4283_v27 }
 0x7af   : > { %6593 = vrcp.f32 %v9688_v21  ;;  %v9691_v60 = vpop.xlane.xlu1 %3973  ;;  %v4130_v50 = vand.u32 2147483647, %v9688_v21  ;;  %v4132_v47 = vand.u32 2147483648, %v9688_v21  ;;  %vm4126_vm2 = vweird.f32 %v9688_v21 }
 0x7b0   : > { %6595 = vrsqrt.f32 %v9691_v60  ;;  %v9696_v39 = vsel %vm4220_vm1, %v4212_v13, %v9603_v7  ;;  %vm4030_vm6 = vcmp.eq.f32.partialorder %v9691_v60, inf  ;;  %vm4032_vm3 = vcmp.eq.f32.partialorder %v9691_v60, 0.0 }
 0x7b1   : > { %v4260_v29 = vmul.f32 0.044715, %v9696_v39  ;;  %v4033_v17 = vand.u32 2147483648, %v9691_v60  ;;  %v4133_v0 = vor.u32 1.1754944e-38, %v4132_v47  ;;  %vm4131_vm5 = vcmp.eq.f32.partialorder %v4130_v50, 8.507059e+37 }
 0x7b2   : > { %vm4221_vm7 = vcmp.gt.f32.partialorder %v9688_v21, 0.999  ;;  %v4252_v13 = vmul.f32 0.5, %v9696_v39 }
 0x7b3   : > { %v4268_v3 = vmul.f32 %v4260_v29, %v9696_v39 }
 0x7b5   : > { %v6594_v20 = vpop.eup %6593  ;;  %v9699_v57 = vpop.xlane.xlu2 %3976  ;;  %v4276_v34 = vmul.f32 %v4268_v3, %v9696_v39 }
 0x7b6   : > { %v6596_v8 = vpop.eup %6595  ;;  %6597 = vrsqrt.f32 %v9699_v57  ;;  %v4122_v7 = vmul.f32 %v6594_v20, %v9688_v21  ;;  %vm4127_vm14 = vweird.f32 %v6594_v20  ;;  %vm4042_vm8 = vcmp.eq.f32.partialorder %v9699_v57, inf }
 0x7b7   : > { %v4024_v18 = vmul.f32 %v6596_v8, %v9691_v60  ;;  %6599 = vtanh.f32 %v4291_v55  ;;  %v9708_v35 = vpop.xlane.xlu0 %3979  ;;  %v4284_v14 = vadd.f32 %v4276_v34, %v9696_v39  ;;  %vm4128_vm4 = vmor %vm4126_vm2, %vm4127_vm14  ;;  %v4045_v29 = vand.u32 2147483648, %v9699_v57 }
 0x7b8   : > { %6601 = vrsqrt.f32 %v9708_v35  ;;  %v4123_v30 = vsub.f32 1.0, %v4122_v7  ;;  %vm4044_vm9 = vcmp.eq.f32.partialorder %v9699_v57, 0.0  ;;  %vm4054_vm10 = vcmp.eq.f32.partialorder %v9708_v35, inf }
 0x7b9   : > { %v4025_v52 = vmul.f32 %v6596_v8, %v4024_v18  ;;  %v4292_v44 = vmul.f32 0.7978846, %v4284_v14  ;;  %vm4056_vm11 = vcmp.eq.f32.partialorder %v9708_v35, 0.0 }
 0x7ba   : > { %v4124_v40 = vmul.f32 %v6594_v20, %v4123_v30 }
 0x7bb   : > { %v4026_v25 = vmul.f32 0.5, %v4025_v52  ;;  %v4057_v52 = vand.u32 2147483648, %v9708_v35 }
 0x7bc   : > { %v6598_v15 = vpop.eup %6597  ;;  %v4125_v26 = vadd.f32 %v6594_v20, %v4124_v40 }
 0x7bd   : > { %v6600_v54 = vpop.eup %6599  ;;  %v4027_v2 = vsub.f32 1.5, %v4026_v25  ;;  %v4036_v22 = vmul.f32 %v6598_v15, %v9699_v57 }
 0x7be   : > { %v4307_v63 = vadd.f32 1.0, %v6600_v54  ;;  %v6602_v62 = vpop.eup %6601  ;;  %v4129_v37 = vsel %vm4128_vm4, %v6594_v20, %v4125_v26 }
 0x7bf   : > { %v4028_v23 = vmul.f32 %v6596_v8, %v4027_v2  ;;  %v4037_v12 = vmul.f32 %v6598_v15, %v4036_v22  ;;  %v9724_v49 = vpop.xlane.xlu1 %3982  ;;  %v4048_v19 = vmul.f32 %v6602_v62, %v9708_v35  ;;  %v4134_v43 = vsel %vm4131_vm5, %v4133_v0, %v4129_v37 }
 0x7c0   : > { %6603 = vrsqrt.f32 %v9724_v49  ;;  %v4315_v6 = vmul.f32 %v4307_v63, %v4251_v58  ;;  %v4135_v38 = vmul.f32 %v4134_v43, %v9611_v28  ;;  %vm4066_vm12 = vcmp.eq.f32.partialorder %v9724_v49, inf }
 0x7c1   : > { %v4029_v33 = vmul.f32 %v4028_v23, %v9691_v60  ;;  %v4038_v11 = vmul.f32 0.5, %v4037_v12  ;;  %v4049_v4 = vmul.f32 %v6602_v62, %v4048_v19  ;;  %6605 = vtanh.f32 %v4292_v44 }
 0x7c2   : > { %6087 = vmatmul.msk.f32.vlgmr.msra.gmra.mxu2 %vm311_vm0, %v4315_v6  ;;  %v4323_v16 = vmul.f32 %v4315_v6, %v4315_v6  ;;  %v4213_v24 = vmul.f32 0.999, %v4135_v38  ;;  %v4069_v63 = vand.u32 2147483648, %v9724_v49  ;;  %vm4068_vm13 = vcmp.eq.f32.partialorder %v9724_v49, 0.0 }
 0x7c3   : > { %v4031_v46 = vsel %vm4030_vm6, %v9691_v60, %v4029_v33  ;;  %v4039_v61 = vsub.f32 1.5, %v4038_v11  ;;  %v4050_v48 = vmul.f32 0.5, %v4049_v4 }
 0x7c4   : > { %v4034_v5 = vsel %vm4032_vm3, %v4033_v17, %v4031_v46  ;;  %v4331_v41 = vsel %vm311_vm0, %v4323_v16, 0.0  ;;  %v4245_v55 = vsel %vm4221_vm7, %v4213_v24, %v9611_v28 }
 0x7c5   : > { %v9739_v36 = vmax.f32 %v4034_v5, 1e-05  ;;  %v4040_v42 = vmul.f32 %v6598_v15, %v4039_v61  ;;  %v4051_v32 = vsub.f32 1.5, %v4050_v48  ;;  %4332 = vadd.xlane.f32.xlu0 %v4331_v41  ;;  %v4261_v39 = vmul.f32 0.044715, %v4245_v55 }
 0x7c6   : > { %v6604_v51 = vpop.eup %6603  ;;  %v4253_v38 = vmul.f32 0.5, %v4245_v55 }
 0x7c7   : > { %6607 = vrcp.f32 %v9739_v36  ;;  %v4041_v31 = vmul.f32 %v4040_v42, %v9699_v57  ;;  %v4060_v60 = vmul.f32 %v6604_v51, %v9724_v49  ;;  %v6606_v27 = vpop.eup %6605  ;;  %v4052_v20 = vmul.f32 %v6602_v62, %v4051_v32 }
 0x7c8   : > { %v4308_v18 = vadd.f32 1.0, %v6606_v27  ;;  %v4269_v30 = vmul.f32 %v4261_v39, %v4245_v55  ;;  %v4147_v44 = vand.u32 2147483648, %v9739_v36  ;;  %v4145_v23 = vand.u32 2147483647, %v9739_v36 }
 0x7c9   : > { %v4043_v8 = vsel %vm4042_vm8, %v9699_v57, %v4041_v31  ;;  %v4061_v21 = vmul.f32 %v6604_v51, %v4060_v60  ;;  %v4053_v3 = vmul.f32 %v4052_v20, %v9708_v35  ;;  %vm4141_vm1 = vweird.f32 %v9739_v36 }
 0x7ca   : > { %v4046_v45 = vsel %vm4044_vm9, %v4045_v29, %v4043_v8  ;;  %v4316_v34 = vmul.f32 %v4308_v18, %v4252_v13  ;;  %v4277_v40 = vmul.f32 %v4269_v30, %v4245_v55  ;;  %v4148_v0 = vor.u32 1.1754944e-38, %v4147_v44 }
 0x7cb   : > { %v9754_v7 = vmax.f32 %v4046_v45, 1e-05  ;;  %v4062_v59 = vmul.f32 0.5, %v4061_v21  ;;  %v4055_v28 = vsel %vm4054_vm10, %v9708_v35, %v4053_v3  ;;  %vm4146_vm6 = vcmp.eq.f32.partialorder %v4145_v23, 8.507059e+37 }
 0x7cc   : > { %v4058_v25 = vsel %vm4056_vm11, %v4057_v52, %v4055_v28  ;;  %6088 = vmatmul.msk.f32.gmra.mxu2 %vm311_vm0, %v4316_v34  ;;  %v4324_v58 = vmul.f32 %v4316_v34, %v4316_v34  ;;  %v4285_v35 = vadd.f32 %v4277_v40, %v4245_v55  ;;  %vm4222_vm3 = vcmp.gt.f32.partialorder %v9739_v36, 0.999 }
 0x7cd   : > { %v6608_v57 = vpop.eup %6607  ;;  %6609 = vrcp.f32 %v9754_v7  ;;  %v4063_v15 = vsub.f32 1.5, %v4062_v59  ;;  %v9761_v14 = vmax.f32 %v4058_v25, 1e-05  ;;  %v4160_v61 = vand.u32 2147483647, %v9754_v7 }
 0x7ce   : > { %v4137_v54 = vmul.f32 %v6608_v57, %v9739_v36  ;;  %v4334_v22 = vsel %vm311_vm0, %v4324_v58, 0.0  ;;  %v4293_v26 = vmul.f32 0.7978846, %v4285_v35  ;;  %vm4142_vm15 = vweird.f32 %v6608_v57 }
 0x7cf   : > { %v4064_v2 = vmul.f32 %v6604_v51, %v4063_v15  ;;  %6611 = vrcp.f32 %v9761_v14  ;;  %4335 = vadd.xlane.f32.xlu1 %v4334_v22  ;;  %vm4143_vm14 = vmor %vm4141_vm1, %vm4142_vm15  ;;  %v4162_v16 = vand.u32 2147483648, %v9754_v7  ;;  %vm4156_vm4 = vweird.f32 %v9754_v7 }
 0x7d0   : > { %v4138_v50 = vsub.f32 1.0, %v4137_v54  ;;  %6613 = vtanh.f32 %v4293_v26  ;;  %vm4161_vm5 = vcmp.eq.f32.partialorder %v4160_v61, 8.507059e+37  ;;  %v4177_v13 = vand.u32 2147483648, %v9761_v14 }
 0x7d1   : > { %v4065_v47 = vmul.f32 %v4064_v2, %v9724_v49  ;;  %v4163_v31 = vor.u32 1.1754944e-38, %v4162_v16  ;;  %v4175_v20 = vand.u32 2147483647, %v9761_v14  ;;  %vm4171_vm9 = vweird.f32 %v9761_v14 }
 0x7d2   : > { %v4139_v62 = vmul.f32 %v6608_v57, %v4138_v50  ;;  %vm4223_vm10 = vcmp.gt.f32.partialorder %v9754_v7, 0.999  ;;  %vm4224_vm1 = vcmp.gt.f32.partialorder %v9761_v14, 0.999 }
 0x7d3   : > { %v6610_v12 = vpop.eup %6609  ;;  %v4067_v17 = vsel %vm4066_vm12, %v9724_v49, %v4065_v47  ;;  %vm4176_vm12 = vcmp.eq.f32.partialorder %v4175_v20, 8.507059e+37 }
 0x7d4   : > { %v4070_v19 = vsel %vm4068_vm13, %v4069_v63, %v4067_v17  ;;  %v4140_v33 = vadd.f32 %v6608_v57, %v4139_v62  ;;  %v4152_v11 = vmul.f32 %v6610_v12, %v9754_v7  ;;  %vm4157_vm2 = vweird.f32 %v6610_v12 }
 0x7d5   : > { %v9775_v6 = vmax.f32 %v4070_v19, 1e-05  ;;  %v6612_v4 = vpop.eup %6611  ;;  %vm4158_vm7 = vmor %vm4156_vm4, %vm4157_vm2 }
 0x7d6   : > { %v4144_v37 = vsel %vm4143_vm14, %v6608_v57, %v4140_v33  ;;  %v4153_v46 = vsub.f32 1.0, %v4152_v11  ;;  %v4167_v43 = vmul.f32 %v6612_v4, %v9761_v14  ;;  %v6614_v41 = vpop.eup %6613  ;;  %vm4172_vm8 = vweird.f32 %v6612_v4 }
 0x7d7   : > { %6615 = vrcp.f32 %v9775_v6  ;;  %v4149_v49 = vsel %vm4146_vm6, %v4148_v0, %v4144_v37  ;;  %v4309_v24 = vadd.f32 1.0, %v6614_v41  ;;  %vm4173_vm11 = vmor %vm4171_vm9, %vm4172_vm8  ;;  %v4192_v15 = vand.u32 2147483648, %v9775_v6 }
 0x7d8   : > { %v4150_v5 = vmul.f32 %v4149_v49, %v9642_v53  ;;  %v4154_v48 = vmul.f32 %v6610_v12, %v4153_v46  ;;  %v4168_v42 = vsub.f32 1.0, %v4167_v43  ;;  %v4190_v22 = vand.u32 2147483647, %v9775_v6 }
 0x7d9   : > { %v4317_v55 = vmul.f32 %v4309_v24, %v4253_v38  ;;  %vm4186_vm13 = vweird.f32 %v9775_v6  ;;  %v4193_v26 = vor.u32 1.1754944e-38, %v4192_v15  ;;  %vm4225_vm2 = vcmp.gt.f32.partialorder %v9775_v6, 0.999 }
 0x7da   : > { %v4214_v51 = vmul.f32 0.999, %v4150_v5  ;;  %v4155_v32 = vadd.f32 %v6610_v12, %v4154_v48  ;;  %v4169_v60 = vmul.f32 %v6612_v4, %v4168_v42  ;;  %vm4191_vm6 = vcmp.eq.f32.partialorder %v4190_v22, 8.507059e+37 }
 0x7db   : > { %6089 = vmatmul.msk.f32.gmra.mxu2 %vm311_vm0, %v4317_v55  ;;  %v4325_v39 = vmul.f32 %v4317_v55, %v4317_v55 }
 0x7dc   : > { %v4246_v27 = vsel %vm4222_vm3, %v4214_v51, %v9642_v53  ;;  %v4159_v29 = vsel %vm4158_vm7, %v6610_v12, %v4155_v32  ;;  %v4170_v45 = vadd.f32 %v6612_v4, %v4169_v60  ;;  %v4178_v53 = vor.u32 1.1754944e-38, %v4177_v13 }
 0x7dd   : > { %v6616_v36 = vpop.eup %6615  ;;  %v4262_v8 = vmul.f32 0.044715, %v4246_v27  ;;  %v4164_v21 = vsel %vm4161_vm5, %v4163_v31, %v4159_v29  ;;  %v4337_v30 = vsel %vm311_vm0, %v4325_v39, 0.0  ;;  %v4254_v46 = vmul.f32 0.5, %v4246_v27 }
 0x7de   : > { %v4165_v18 = vmul.f32 %v4164_v21, %v9657_v10  ;;  %v4182_v3 = vmul.f32 %v6616_v36, %v9775_v6  ;;  %v4174_v34 = vsel %vm4173_vm11, %v6612_v4, %v4170_v45  ;;  %4338 = vadd.xlane.f32.xlu2 %v4337_v30  ;;  %vm4187_vm15 = vweird.f32 %v6616_v36 }
 0x7df   : > { %v4270_v52 = vmul.f32 %v4262_v8, %v4246_v27  ;;  %v4179_v25 = vsel %vm4176_vm12, %v4178_v53, %v4174_v34  ;;  %vm4188_vm14 = vmor %vm4186_vm13, %vm4187_vm15  ;;  %vm4538_vm11 = vcmask 130048  }
 0x7e0   : > { %v4215_v59 = vmul.f32 0.999, %v4165_v18  ;;  %v4183_v28 = vsub.f32 1.0, %v4182_v3  ;;  %v4180_v40 = vmul.f32 %v4179_v25, %v9663_v56 }
 0x7e1   : > { %v4278_v57 = vmul.f32 %v4270_v52, %v4246_v27 }
 0x7e2   : > { %v4247_v58 = vsel %vm4223_vm10, %v4215_v59, %v9657_v10  ;;  %v4184_v54 = vmul.f32 %v6616_v36, %v4183_v28  ;;  %v4216_v35 = vmul.f32 0.999, %v4180_v40 }
 0x7e3   : > { %v4286_v7 = vadd.f32 %v4278_v57, %v4246_v27  ;;  %v4263_v2 = vmul.f32 0.044715, %v4247_v58  ;;  %v4255_v42 = vmul.f32 0.5, %v4247_v58 }
 0x7e4   : > { %v4185_v50 = vadd.f32 %v6616_v36, %v4184_v54  ;;  %v4248_v44 = vsel %vm4224_vm1, %v4216_v35, %v9663_v56 }
 0x7e5   : > { %v4294_v47 = vmul.f32 0.7978846, %v4286_v7  ;;  %v4271_v63 = vmul.f32 %v4263_v2, %v4247_v58  ;;  %v4264_v23 = vmul.f32 0.044715, %v4248_v44  ;;  %v4256_v31 = vmul.f32 0.5, %v4248_v44 }
 0x7e6   : > { %v4189_v10 = vsel %vm4188_vm14, %v6616_v36, %v4185_v50 }
 0x7e7   : > { %6617 = vtanh.f32 %v4294_v47  ;;  %v4279_v62 = vmul.f32 %v4271_v63, %v4247_v58  ;;  %v4194_v12 = vsel %vm4191_vm6, %v4193_v26, %v4189_v10  ;;  %v4272_v19 = vmul.f32 %v4264_v23, %v4248_v44 }
 0x7e8   : > { %v4195_v33 = vmul.f32 %v4194_v12, %v9672_v9 }
 0x7e9   : > { %v4287_v17 = vadd.f32 %v4279_v62, %v4247_v58  ;;  %v4280_v0 = vmul.f32 %v4272_v19, %v4248_v44 }
 0x7ea   : > { %v4217_v4 = vmul.f32 0.999, %v4195_v33  ;;  %v3986_v55 = vpop.xlane.xlu2 %3985 }
 0x7eb   : > { %v4295_v11 = vmul.f32 0.7978846, %v4287_v17  ;;  %v4288_v37 = vadd.f32 %v4280_v0, %v4248_v44  ;;  %vm4078_vm3 = vcmp.eq.f32.partialorder %v3986_v55, inf  ;;  %v4081_v57 = vand.u32 2147483648, %v3986_v55 }
 0x7ec   : > { %v4249_v56 = vsel %vm4225_vm2, %v4217_v4, %v9672_v9  ;;  %vm4080_vm4 = vcmp.eq.f32.partialorder %v3986_v55, 0.0 }
 0x7ed   : > { %v6618_v14 = vpop.eup %6617  ;;  %6619 = vtanh.f32 %v4295_v11  ;;  %v4265_v49 = vmul.f32 0.044715, %v4249_v56  ;;  %v4296_v16 = vmul.f32 0.7978846, %v4288_v37  ;;  %v4257_v20 = vmul.f32 0.5, %v4249_v56 }
 0x7ee   : > { %v4310_v61 = vadd.f32 1.0, %v6618_v14 }
 0x7ef   : > { %v4273_v5 = vmul.f32 %v4265_v49, %v4249_v56  ;;  %6621 = vtanh.f32 %v4296_v16 }
 0x7f0   : > { %v4318_v43 = vmul.f32 %v4310_v61, %v4254_v46 }
 0x7f1   : > { %v4281_v48 = vmul.f32 %v4273_v5, %v4249_v56 }
 0x7f2   : > { %6090 = vmatmul.msk.f32.gmra.mxu2 %vm311_vm0, %v4318_v43  ;;  %v4326_v39 = vmul.f32 %v4318_v43, %v4318_v43 }
 0x7f3   : > { %v6620_v38 = vpop.eup %6619  ;;  %v4289_v51 = vadd.f32 %v4281_v48, %v4249_v56 }
 0x7f4   : > { %v4311_v41 = vadd.f32 1.0, %v6620_v38  ;;  %v4340_v59 = vsel %vm311_vm0, %v4326_v39, 0.0 }
 0x7f5   : > { %v4297_v32 = vmul.f32 0.7978846, %v4289_v51  ;;  %v6622_v24 = vpop.eup %6621 }
 0x7f6   : > { %v9804_v6 = vmul.f32 %v4311_v41, %v4255_v42  ;;  %v4312_v9 = vadd.f32 1.0, %v6622_v24 }
 0x7f7   : > { %6623 = vtanh.f32 %v4297_v32 }
 0x7f8   : > { %v4320_v60 = vmul.f32 %v4312_v9, %v4256_v31  ;;  %6625 = vrsqrt.f32 %v3986_v55  ;;  %v4327_v49 = vmul.f32 %v9804_v6, %v9804_v6 }
 0x7fa   : > { %6091 = vmatmul.msk.f32.gmra.mxu2 %vm311_vm0, %v9804_v6  ;;  %v4328_v13 = vmul.f32 %v4320_v60, %v4320_v60  ;;  %v4343_v16 = vsel %vm311_vm0, %v4327_v49, 0.0 }
 0x7fc   : > { %v4346_v29 = vsel %vm311_vm0, %v4328_v13, 0.0 }
 0x7fd   : > { %v6624_v27 = vpop.eup %6623  ;;  %4347 = vadd.xlane.f32.xlu2 %v4346_v29 }
 0x7fe   : > { %v4313_v36 = vadd.f32 1.0, %v6624_v27  ;;  %v6626_v45 = vpop.eup %6625 }
 0x7ff   : > { %v4072_v3 = vmul.f32 %v6626_v45, %v3986_v55 }
 0x800   : > { %v4321_v8 = vmul.f32 %v4313_v36, %v4257_v20 }
 0x801   : > { %v4073_v52 = vmul.f32 %v6626_v45, %v4072_v3 }
 0x802   : > { %6092 = vmatmul.msk.f32.gmra.mxu2 %vm311_vm0, %v4320_v60  ;;  %v4329_v21 = vmul.f32 %v4321_v8, %v4321_v8 }
 0x803   : > { %v4074_v53 = vmul.f32 0.5, %v4073_v52 }
 0x804   : > { %v4349_v18 = vsel %vm311_vm0, %v4329_v21, 0.0 }
 0x805   : > { %4350 = vadd.xlane.f32.xlu0 %v4349_v18  ;;  %v4075_v34 = vsub.f32 1.5, %v4074_v53 }
 0x807   : > { %v4076_v28 = vmul.f32 %v6626_v45, %v4075_v34 }
 0x809   : > { %v4077_v30 = vmul.f32 %v4076_v28, %v3986_v55 }
 0x80a   : > { %6093 = vmatmul.msk.f32.gmra.mxu2 %vm311_vm0, %v4321_v8 }
 0x80b   : > { %v4079_v25 = vsel %vm4078_vm3, %v3986_v55, %v4077_v30 }
 0x80c   : > { %v4082_v15 = vsel %vm4080_vm4, %v4081_v57, %v4079_v25 }
 0x80d   : > { %4341 = vadd.xlane.f32.xlu0 %v4340_v59  ;;  %v4090_v58 = vmax.f32 %v4082_v15, 1e-05 }
 0x80f   : > { %6627 = vrcp.f32 %v4090_v58  ;;  %v4207_v2 = vand.u32 2147483648, %v4090_v58  ;;  %v4205_v35 = vand.u32 2147483647, %v4090_v58  ;;  %vm4201_vm7 = vweird.f32 %v4090_v58 }
 0x810   : > { %vm4226_vm10 = vcmp.gt.f32.partialorder %v4090_v58, 0.999 }
 0x811   : > { %v4208_v47 = vor.u32 1.1754944e-38, %v4207_v2  ;;  %vm4206_vm9 = vcmp.eq.f32.partialorder %v4205_v35, 8.507059e+37 }
 0x815   : > { %v6628_v40 = vpop.eup %6627 }
 0x816   : > { %v4197_v54 = vmul.f32 %v6628_v40, %v4090_v58  ;;  %vm4202_vm5 = vweird.f32 %v6628_v40 }
 0x817   : > { %vm4203_vm8 = vmor %vm4201_vm7, %vm4202_vm5 }
 0x818   : > { %v4198_v7 = vsub.f32 1.0, %v4197_v54 }
 0x81a   : > { %v4199_v22 = vmul.f32 %v6628_v40, %v4198_v7 }
 0x81c   : > { %v4200_v50 = vadd.f32 %v6628_v40, %v4199_v22 }
 0x81e   : > { %v4204_v63 = vsel %vm4203_vm8, %v6628_v40, %v4200_v50 }
 0x81f   : > { %v4209_v44 = vsel %vm4206_vm9, %v4208_v47, %v4204_v63 }
 0x820   : > { %v4210_v10 = vmul.f32 %v4209_v44, %v9681_v1 }
 0x822   : > { %v4218_v26 = vmul.f32 0.999, %v4210_v10 }
 0x824   : > { %v4250_v62 = vsel %vm4226_vm10, %v4218_v26, %v9681_v1 }
 0x825   : > { %v4266_v23 = vmul.f32 0.044715, %v4250_v62  ;;  %v4258_v0 = vmul.f32 0.5, %v4250_v62 }
 0x827   : > { %v4274_v12 = vmul.f32 %v4266_v23, %v4250_v62 }
 0x829   : > { %v4282_v17 = vmul.f32 %v4274_v12, %v4250_v62 }
 0x82b   : > { %v4290_v19 = vadd.f32 %v4282_v17, %v4250_v62 }
 0x82d   : > { %v4298_v33 = vmul.f32 0.7978846, %v4290_v19 }
 0x82f   : > { %6629 = vtanh.f32 %v4298_v33 }
 0x835   : > { %v6630_v11 = vpop.eup %6629 }
 0x836   : > { %v4314_v4 = vadd.f32 1.0, %v6630_v11 }
 0x838   : > { %v4322_v14 = vmul.f32 %v4314_v4, %v4258_v0  ;;  %v4333_v39 = vpop.xlane.xlu0 %4332 }
 0x839   : > { %6631 = vrsqrt.f32 %v4333_v39  ;;  %vm4364_vm12 = vcmp.eq.f32.partialorder %v4333_v39, 0.0 }
 0x83a   : > { %6094 = vmatmul.msk.f32.vlgmr.msra.gmra.mxu3 %vm311_vm0, %v4322_v14  ;;  %v4330_v37 = vmul.f32 %v4322_v14, %v4322_v14  ;;  %v4365_v14 = vand.u32 2147483648, %v4333_v39 }
 0x83c   : > { %v4352_v56 = vsel %vm311_vm0, %v4330_v37, 0.0  ;;  %vm4362_vm0 = vcmp.eq.f32.partialorder %v4333_v39, inf }
 0x83d   : > { %4353 = vadd.xlane.f32.xlu1 %v4352_v56 }
 0x83f   : > { %v6632_v57 = vpop.eup %6631 }
 0x840   : > { %v4356_v25 = vmul.f32 %v6632_v57, %v4333_v39 }
 0x842   : > { %v4336_v28 = vpop.xlane.xlu1 %4335  ;;  %v4357_v58 = vmul.f32 %v6632_v57, %v4356_v25 }
 0x843   : > { %6633 = vrsqrt.f32 %v4336_v28  ;;  %vm4374_vm15 = vcmp.eq.f32.partialorder %v4336_v28, inf  ;;  %vm4376_vm13 = vcmp.eq.f32.partialorder %v4336_v28, 0.0 }
 0x844   : > { %v4358_v2 = vmul.f32 0.5, %v4357_v58 }
 0x845   : > { %v9817_v46 = vpop.f32.mrf.mxu2  ;;  %4344 = vadd.xlane.f32.xlu1 %v4343_v16 }
 0x846   : > { %v4530_v1 = vmul.f32 %v9817_v46, %v9817_v46  ;;  %v5011_v29 = vand.u32 2147483647, %v9817_v46  ;;  %v4359_v35 = vsub.f32 1.5, %v4358_v2 }
 0x848   : > { %v4539_v61 = vsel %vm4538_vm11, %v4530_v1, 0.0  ;;  %v5019_v55 = vsel %vm4538_vm11, %v5011_v29, 0.0  ;;  %v4360_v44 = vmul.f32 %v6632_v57, %v4359_v35 }
 0x849   : > { %4540 = vadd.xlane.f32.xlu2 %v4539_v61  ;;  %v6634_v15 = vpop.eup %6633 }
 0x84a   : > { %v4368_v40 = vmul.f32 %v6634_v15, %v4336_v28  ;;  %v4361_v12 = vmul.f32 %v4360_v44, %v4333_v39 }
 0x84c   : > { %v4369_v22 = vmul.f32 %v6634_v15, %v4368_v40  ;;  %v4363_v4 = vsel %vm4362_vm0, %v4333_v39, %v4361_v12 }
 0x84d   : > { %v4366_v49 = vsel %vm4364_vm12, %v4365_v14, %v4363_v4 }
 0x84e   : > { %v4370_v50 = vmul.f32 0.5, %v4369_v22 }
 0x84f   : > { %v9825_v43 = vpop.f32.mrf.mxu2 }
 0x850   : > { %v4531_v5 = vmul.f32 %v9825_v43, %v9825_v43  ;;  %v5012_v21 = vand.u32 2147483647, %v9825_v43  ;;  %v4371_v10 = vsub.f32 1.5, %v4370_v50 }
 0x851   : > { %v9867_v54 = vpop.xlane.xlu2 %4338 }
 0x852   : > { %v4542_v48 = vsel %vm4538_vm11, %v4531_v5, 0.0  ;;  %v5022_v3 = vsel %vm4538_vm11, %v5012_v21, 0.0  ;;  %v4372_v17 = vmul.f32 %v6634_v15, %v4371_v10  ;;  %vm4386_vm14 = vcmp.eq.f32.partialorder %v9867_v54, inf }
 0x853   : > { %4543 = vadd.xlane.f32.xlu0 %v4542_v48  ;;  %vm4388_vm7 = vcmp.eq.f32.partialorder %v9867_v54, 0.0 }
 0x854   : > { %v4373_v37 = vmul.f32 %v4372_v17, %v4336_v28 }
 0x856   : > { %v4375_v48 = vsel %vm4374_vm15, %v4336_v28, %v4373_v37 }
 0x85e   : > { %v9830_v38 = vpop.f32.mrf.mxu2 }
 0x85f   : > { %v4532_v42 = vmul.f32 %v9830_v38, %v9830_v38 }
 0x861   : > { %v4545_v41 = vsel %vm4538_vm11, %v4532_v42, 0.0 }
 0x862   : > { %4546 = vadd.xlane.f32.xlu1 %v4545_v41 }
 0x870   : > { %v9873_v47 = vpop.xlane.xlu2 %4347 }
 0x875   : > { %v9835_v51 = vpop.f32.mrf.mxu2 }
 0x876   : > { %v4533_v6 = vmul.f32 %v9835_v51, %v9835_v51  ;;  %v5014_v18 = vand.u32 2147483647, %v9835_v51 }
 0x878   : > { %v4548_v32 = vsel %vm4538_vm11, %v4533_v6, 0.0  ;;  %v5028_v45 = vsel %vm4538_vm11, %v5014_v18, 0.0  ;;  %v9865_v30 = vpop.xlane.xlu0 %4350  ;;  %v9891_v6 = vmax.f32 %v4366_v49, 1e-05 }
 0x879   : > { %4549 = vadd.xlane.f32.xlu2 %v4548_v32  ;;  %v4377_v32 = vand.u32 2147483648, %v4336_v28  ;;  %v5013_v28 = vand.u32 2147483647, %v9830_v38  ;;  %vm4434_vm6 = vcmp.eq.f32.partialorder %v9865_v30, inf  ;;  %vm4436_vm3 = vcmp.eq.f32.partialorder %v9865_v30, 0.0 }
 0x87a   : > { %v4678_v44 = vand.u32 2147483648, %v9891_v6  ;;  %vm4672_vm8 = vweird.f32 %v9891_v6 }
 0x87d   : > { %v9840_v24 = vpop.f32.mrf.mxu2 }
 0x87e   : > { %v4534_v31 = vmul.f32 %v9840_v24, %v9840_v24  ;;  %v5015_v52 = vand.u32 2147483647, %v9840_v24 }
 0x880   : > { %v4551_v9 = vsel %vm4538_vm11, %v4534_v31, 0.0  ;;  %v5031_v34 = vsel %vm4538_vm11, %v5015_v52, 0.0  ;;  %v9869_v7 = vpop.xlane.xlu0 %4341 }
 0x881   : > { %4552 = vadd.xlane.f32.xlu0 %v4551_v9  ;;  %6635 = vrsqrt.f32 %v9869_v7  ;;  %vm4398_vm1 = vcmp.eq.f32.partialorder %v9869_v7, inf  ;;  %vm4400_vm2 = vcmp.eq.f32.partialorder %v9869_v7, 0.0 }
 0x882   : > { %6637 = vrsqrt.f32 %v9865_v30 }
 0x883   : > { %6639 = vrsqrt.f32 %v9867_v54 }
 0x885   : > { %v9845_v60 = vpop.f32.mrf.mxu2 }
 0x886   : > { %v4535_v13 = vmul.f32 %v9845_v60, %v9845_v60 }
 0x887   : > { %v6636_v63 = vpop.eup %6635 }
 0x888   : > { %v4554_v27 = vsel %vm4538_vm11, %v4535_v13, 0.0  ;;  %v6638_v62 = vpop.eup %6637  ;;  %v4392_v23 = vmul.f32 %v6636_v63, %v9869_v7 }
 0x889   : > { %4555 = vadd.xlane.f32.xlu1 %v4554_v27  ;;  %v4428_v19 = vmul.f32 %v6638_v62, %v9865_v30  ;;  %v9883_v0 = vpop.eup %6639 }
 0x88a   : > { %v4393_v11 = vmul.f32 %v6636_v63, %v4392_v23  ;;  %v4380_v16 = vmul.f32 %v9883_v0, %v9867_v54  ;;  %v5025_v23 = vsel %vm4538_vm11, %v5013_v28, 0.0 }
 0x88b   : > { %v4429_v56 = vmul.f32 %v6638_v62, %v4428_v19 }
 0x88c   : > { %v4394_v61 = vmul.f32 0.5, %v4393_v11  ;;  %v4381_v13 = vmul.f32 %v9883_v0, %v4380_v16 }
 0x88d   : > { %v9851_v20 = vpop.f32.mrf.mxu2  ;;  %v4430_v42 = vmul.f32 0.5, %v4429_v56 }
 0x88e   : > { %v4536_v36 = vmul.f32 %v9851_v20, %v9851_v20  ;;  %v5017_v53 = vand.u32 2147483647, %v9851_v20  ;;  %v4395_v31 = vsub.f32 1.5, %v4394_v61  ;;  %v4401_v61 = vand.u32 2147483648, %v9869_v7 }
 0x88f   : > { %v4431_v18 = vsub.f32 1.5, %v4430_v42  ;;  %v5016_v42 = vand.u32 2147483647, %v9845_v60 }
 0x890   : > { %v4557_v8 = vsel %vm4538_vm11, %v4536_v36, 0.0  ;;  %v5037_v59 = vsel %vm4538_vm11, %v5017_v53, 0.0  ;;  %v4396_v39 = vmul.f32 %v6636_v63, %v4395_v31  ;;  %v6095_v53 = vclamps-f32 %v9891_v6, 0.99999 }
 0x891   : > { %5020 = vadd.xlane.f32.xlu1 %v5019_v55  ;;  %4558 = vadd.xlane.f32.xlu2 %v4557_v8  ;;  %v4378_v8 = vsel %vm4376_vm13, %v4377_v32, %v4375_v48  ;;  %v4432_v25 = vmul.f32 %v6638_v62, %v4431_v18  ;;  %v4676_v63 = vand.u32 2147483647, %v9891_v6 }
 0x892   : > { %v4397_v40 = vmul.f32 %v4396_v39, %v9869_v7  ;;  %v4803_v2 = vadd.f32 1.0, %v6095_v53  ;;  %v4827_v12 = vsub.f32 1.0, %v6095_v53  ;;  %v5034_v53 = vsel %vm4538_vm11, %v5016_v42, 0.0 }
 0x893   : > { %v4433_v17 = vmul.f32 %v4432_v25, %v9865_v30  ;;  %vm9995_vm15 = vcmp.eq.f32.partialorder %v4676_v63, 8.507059e+37 }
 0x894   : > { %v4399_v14 = vsel %vm4398_vm1, %v9869_v7, %v4397_v40 }
 0x895   : > { %v4435_v48 = vsel %vm4434_vm6, %v9865_v30, %v4433_v17 }
 0x899   : > { %5029 = vadd.xlane.f32.xlu1 %v5028_v45  ;;  %5023 = vadd.xlane.f32.xlu2 %v5022_v3 }
 0x8a1   : > { %5038 = vadd.xlane.f32.xlu1 %v5037_v59  ;;  %5032 = vadd.xlane.f32.xlu2 %v5031_v34  ;;  %v4382_v59 = vmul.f32 0.5, %v4381_v13  ;;  %v9909_v34 = vmax.f32 %v4378_v8, 1e-05  ;;  %v4437_v13 = vand.u32 2147483648, %v9865_v30 }
 0x8a3   : > { %v4383_v35 = vsub.f32 1.5, %v4382_v59  ;;  %v6096_v37 = vclamps-f32 %v9909_v34, 0.99999  ;;  %v4693_v28 = vand.u32 2147483648, %v9909_v34  ;;  %vm4687_vm0 = vweird.f32 %v9909_v34 }
 0x8a5   : > { %v4384_v56 = vmul.f32 %v9883_v0, %v4383_v35  ;;  %v4828_v8 = vsub.f32 1.0, %v6096_v37 }
 0x8b0   : > { %v9875_v26 = vpop.xlane.xlu1 %4353 }
 0x8b8   : > { %v9885_v1 = vpop.xlane.xlu1 %4344 }
 0x8b9   : > { %vm4410_vm13 = vcmp.eq.f32.partialorder %v9885_v1, inf  ;;  %v4413_v63 = vand.u32 2147483648, %v9885_v1  ;;  %vm4412_vm6 = vcmp.eq.f32.partialorder %v9885_v1, 0.0 }
 0x8bc   : > { %v9880_v33 = vpop.xlane.xlu2 %4540 }
 0x8bd   : > { %6641 = vrsqrt.f32 %v9880_v33  ;;  %v9893_v9 = vpop.f32.mrf.mxu3  ;;  %vm4570_vm4 = vcmp.eq.f32.partialorder %v9880_v33, inf  ;;  %v4573_v25 = vand.u32 2147483648, %v9880_v33  ;;  %vm4572_vm5 = vcmp.eq.f32.partialorder %v9880_v33, 0.0 }
 0x8be   : > { %6643 = vrsqrt.f32 %v9885_v1  ;;  %v4537_v36 = vmul.f32 %v9893_v9, %v9893_v9  ;;  %v5018_v55 = vand.u32 2147483647, %v9893_v9 }
 0x8c0   : > { %v4560_v3 = vsel %vm4538_vm11, %v4537_v36, 0.0  ;;  %v5040_v52 = vsel %vm4538_vm11, %v5018_v55, 0.0  ;;  %v4804_v36 = vadd.f32 1.0, %v6096_v37  ;;  %v4385_v55 = vmul.f32 %v4384_v56, %v9867_v54 }
 0x8c1   : > { %4561 = vadd.xlane.f32.xlu0 %v4560_v3  ;;  %5041 = vadd.xlane.f32.xlu2 %v5040_v52  ;;  %v9981_v56 = vor.u32 1.1754944e-38, %v4693_v28 }
 0x8c2   : > { %v4387_v35 = vsel %vm4386_vm14, %v9867_v54, %v4385_v55 }
 0x8c3   : > { %v6642_v5 = vpop.eup %6641 }
 0x8c4   : > { %v4564_v41 = vmul.f32 %v6642_v5, %v9880_v33  ;;  %v9902_v21 = vpop.eup %6643 }
 0x8c5   : > { %v4404_v57 = vmul.f32 %v9902_v21, %v9885_v1 }
 0x8c6   : > { %v4565_v27 = vmul.f32 %v6642_v5, %v4564_v41  ;;  %v9896_v29 = vpop.xlane.xlu0 %4543  ;;  %v4402_v41 = vsel %vm4400_vm2, %v4401_v61, %v4399_v14 }
 0x8c7   : > { %6645 = vrsqrt.f32 %v9896_v29  ;;  %v4405_v62 = vmul.f32 %v9902_v21, %v4404_v57  ;;  %v9947_v3 = vmax.f32 %v4402_v41, 1e-05  ;;  %vm4582_vm10 = vcmp.eq.f32.partialorder %v9896_v29, inf }
 0x8c8   : > { %6647 = vrsqrt.f32 %v9873_v47  ;;  %v4566_v45 = vmul.f32 0.5, %v4565_v27  ;;  %vm4584_vm1 = vcmp.eq.f32.partialorder %v9896_v29, 0.0 }
 0x8c9   : > { %6649 = vrcp.f32 %v9891_v6  ;;  %5026 = vadd.xlane.f32.xlu0 %v5025_v23  ;;  %v9967_v23 = vor.u32 1.1754944e-38, %v4678_v44 }
 0x8ca   : > { %v4567_v15 = vsub.f32 1.5, %v4566_v45  ;;  %6651 = vrcp.f32 %v9909_v34  ;;  %v4438_v45 = vsel %vm4436_vm3, %v4437_v13, %v4435_v48  ;;  %v4585_v13 = vand.u32 2147483648, %v9896_v29 }
 0x8cb   : > { %6653 = vlog2.f32 %v4803_v2  ;;  %v9956_v40 = vmax.f32 %v4438_v45, 1e-05  ;;  %vm4422_vm3 = vcmp.eq.f32.partialorder %v9873_v47, inf }
 0x8cc   : > { %v4568_v19 = vmul.f32 %v6642_v5, %v4567_v15  ;;  %v4406_v5 = vmul.f32 0.5, %v4405_v62  ;;  %6655 = vlog2.f32 %v4827_v12 }
 0x8cd   : > { %v6646_v58 = vpop.eup %6645  ;;  %6657 = vlog2.f32 %v4804_v36  ;;  %v4766_v45 = vand.u32 2147483647, %v9956_v40 }
 0x8ce   : > { %v9915_v22 = vpop.eup %6647  ;;  %v4576_v50 = vmul.f32 %v6646_v58, %v9896_v29  ;;  %v4569_v0 = vmul.f32 %v4568_v19, %v9880_v33  ;;  %v4407_v39 = vsub.f32 1.5, %v4406_v5  ;;  %6659 = vlog2.f32 %v4828_v8 }
 0x8cf   : > { %v9920_v10 = vpop.eup %6649  ;;  %v4416_v4 = vmul.f32 %v9915_v22, %v9873_v47  ;;  %6661 = vrcp.f32 %v9947_v3  ;;  %v4691_v19 = vand.u32 2147483647, %v9909_v34 }
 0x8d0   : > { %v4577_v11 = vmul.f32 %v6646_v58, %v4576_v50  ;;  %v4668_v16 = vmul.f32 %v9920_v10, %v9891_v6  ;;  %v9941_v32 = vpop.eup %6651  ;;  %v4571_v52 = vsel %vm4570_vm4, %v9880_v33, %v4569_v0  ;;  %v4408_v62 = vmul.f32 %v9902_v21, %v4407_v39 }
 0x8d1   : > { %v4417_v31 = vmul.f32 %v9915_v22, %v4416_v4  ;;  %v6654_v18 = vpop.eup %6653  ;;  %v4683_v59 = vmul.f32 %v9941_v32, %v9909_v34  ;;  %5035 = vadd.xlane.f32.xlu0 %v5034_v53  ;;  %v4574_v50 = vsel %vm4572_vm5, %v4573_v25, %v4571_v52  ;;  %vm4673_vm9 = vweird.f32 %v9920_v10 }
 0x8d2   : > { %v4578_v49 = vmul.f32 0.5, %v4577_v11  ;;  %v4669_v7 = vsub.f32 1.0, %v4668_v16  ;;  %v6656_v57 = vpop.eup %6655  ;;  %6663 = vrcp.f32 %v9956_v40  ;;  %v9974_v21 = vmax.f32 %v4574_v50, 1e-05  ;;  %vm10021_vm2 = vmor %vm4672_vm8, %vm4673_vm9 }
 0x8d3   : > { %v4418_v30 = vmul.f32 0.5, %v4417_v31  ;;  %v4684_v12 = vsub.f32 1.0, %v4683_v59  ;;  %v6098_v4 = vclamps-f32 %v9947_v3, 0.99999  ;;  %v4409_v44 = vmul.f32 %v4408_v62, %v9885_v1 }
 0x8d4   : > { %v4579_v27 = vsub.f32 1.5, %v4578_v49  ;;  %v4670_v2 = vmul.f32 %v9920_v10, %v4669_v7  ;;  %v9979_v37 = vmul.f32 0.6931472, %v6654_v18  ;;  %v4836_v49 = vmul.f32 0.6931472, %v6656_v57 }
 0x8d5   : > { %v4419_v33 = vsub.f32 1.5, %v4418_v30  ;;  %v4685_v16 = vmul.f32 %v9941_v32, %v4684_v12  ;;  %vm4688_vm12 = vweird.f32 %v9941_v32  ;;  %v6101_v31 = vclamps-f32 %v9956_v40, 0.99999 }
 0x8d6   : > { %v4580_v15 = vmul.f32 %v6646_v58, %v4579_v27  ;;  %v4389_v58 = vand.u32 2147483648, %v9867_v54  ;;  %v6658_v54 = vpop.eup %6657  ;;  %v4671_v14 = vadd.f32 %v9920_v10, %v4670_v2  ;;  %6665 = vrcp.f32 %v9974_v21  ;;  %vm10044_vm4 = vmor %vm4687_vm0, %vm4688_vm12 }
 0x8d7   : > { %v6660_v61 = vpop.eup %6659  ;;  %v4420_v42 = vmul.f32 %v9915_v22, %v4419_v33  ;;  %v4806_v27 = vadd.f32 1.0, %v6098_v4  ;;  %v4411_v36 = vsel %vm4410_vm13, %v9885_v1, %v4409_v44  ;;  %v4830_v22 = vsub.f32 1.0, %v6098_v4 }
 0x8d8   : > { %v4581_v17 = vmul.f32 %v4580_v15, %v9896_v29  ;;  %v4390_v11 = vsel %vm4388_vm7, %v4389_v58, %v4387_v35  ;;  %v9987_v5 = vpop.eup %6661  ;;  %v4814_v55 = vmul.f32 0.6931472, %v6658_v54  ;;  %vm10010_vm14 = vcmp.eq.f32.partialorder %v4691_v19, 8.507059e+37 }
 0x8d9   : > { %v9989_v48 = vmax.f32 %v4390_v11, 1e-05  ;;  %v10005_v7 = vpop.eup %6663  ;;  %v4713_v18 = vmul.f32 %v9987_v5, %v9947_v3  ;;  %v4838_v39 = vmul.f32 0.6931472, %v6660_v61  ;;  %v4421_v52 = vmul.f32 %v4420_v42, %v9873_v47 }
 0x8da   : > { %v4583_v41 = vsel %vm4582_vm10, %v9896_v29, %v4581_v17  ;;  %v4809_v29 = vadd.f32 1.0, %v6101_v31  ;;  %v4414_v53 = vsel %vm4412_vm6, %v4413_v63, %v4411_v36  ;;  %v4686_v28 = vadd.f32 %v9941_v32, %v4685_v16 }
 0x8db   : > { %v4586_v8 = vsel %vm4584_vm1, %v4585_v13, %v4583_v41  ;;  %6667 = vrcp.f32 %v9989_v48  ;;  %v4833_v57 = vsub.f32 1.0, %v6101_v31  ;;  %v4675_v1 = vsel %vm10021_vm2, %v9920_v10, %v4671_v14 }
 0x8dc   : > { %6669 = vlog2.f32 %v4806_v27  ;;  %v10026_v30 = vmax.f32 %v4586_v8, 1e-05  ;;  %v4758_v25 = vmul.f32 %v10005_v7, %v9956_v40  ;;  %v10033_v15 = vpop.eup %6665  ;;  %v4851_v6 = vsub.f32 %v9979_v37, %v4836_v49 }
 0x8dd   : > { %6671 = vlog2.f32 %v4830_v22  ;;  %v4714_v2 = vsub.f32 1.0, %v4713_v18  ;;  %v4852_v35 = vsub.f32 %v4814_v55, %v4838_v39  ;;  %v4423_v50 = vsel %vm4422_vm3, %v9873_v47, %v4421_v52  ;;  %v10086_v22 = vpop.xlane.xlu1 %4546 }
 0x8de   : > { %v10038_v62 = vmax.f32 %v4414_v53, 1e-05  ;;  %6673 = vlog2.f32 %v4809_v29  ;;  %v6097_v58 = vclamps-f32 %v9989_v48, 0.99999  ;;  %v4425_v12 = vand.u32 2147483648, %v9873_v47 }
 0x8df   : > { %v4680_v33 = vsel %vm9995_vm15, %v9967_v23, %v4675_v1  ;;  %v4690_v17 = vsel %vm10044_vm4, %v9941_v32, %v4686_v28  ;;  %6675 = vlog2.f32 %v4833_v57  ;;  %vm4424_vm5 = vcmp.eq.f32.partialorder %v9873_v47, 0.0 }
 0x8e0   : > { %6677 = vrcp.f32 %v10026_v30  ;;  %v4892_v11 = vmul.f32 %v10033_v15, %v9974_v21  ;;  %v4759_v4 = vsub.f32 1.0, %v4758_v25  ;;  %v4426_v44 = vsel %vm4424_vm5, %v4425_v12, %v4423_v50 }
 0x8e1   : > { %v10056_v19 = vpop.eup %6667  ;;  %v4859_v23 = vmul.f32 0.5, %v4851_v6  ;;  %v4715_v32 = vmul.f32 %v9987_v5, %v4714_v2  ;;  %v4695_v47 = vsel %vm10010_vm14, %v9981_v56, %v4690_v17  ;;  %v10070_v37 = vmul.f32 0.5, %v4852_v35 }
 0x8e2   : > { %v6670_v54 = vpop.eup %6669  ;;  %v10072_v61 = vadd.f32 1.0, %v6097_v58  ;;  %v4681_v49 = vmul.f32 %v4680_v33, %v9974_v21  ;;  %v4721_v16 = vand.u32 2147483647, %v9947_v3  ;;  %v4723_v42 = vand.u32 2147483648, %v9947_v3 }
 0x8e3   : > { %v6672_v14 = vpop.eup %6671  ;;  %v10077_v41 = vsub.f32 1.0, %v6097_v58  ;;  %v10079_v31 = vmax.f32 %v4426_v44, 1e-05  ;;  %v4893_v13 = vsub.f32 1.0, %v4892_v11  ;;  %v4760_v27 = vmul.f32 %v10005_v7, %v4759_v4 }
 0x8e4   : > { %v6674_v0 = vpop.eup %6673  ;;  %v10084_v56 = vmul.f32 %v10056_v19, %v9989_v48  ;;  %v4716_v55 = vadd.f32 %v9987_v5, %v4715_v32  ;;  %vm4718_vm7 = vweird.f32 %v9987_v5  ;;  %v4818_v63 = vmul.f32 0.6931472, %v6670_v54 }
 0x8e5   : > { %v6676_v36 = vpop.eup %6675  ;;  %v4842_v8 = vmul.f32 0.6931472, %v6672_v14  ;;  %vm4717_vm8 = vweird.f32 %v9947_v3  ;;  %v4768_v39 = vand.u32 2147483648, %v9956_v40  ;;  %v6099_v52 = vclamps-f32 %v10038_v62, 0.99999 }
 0x8e6   : > { %v10090_v18 = vpop.eup %6677  ;;  %v4867_v53 = vmul.f32 %v4859_v23, %v4681_v49  ;;  %vm10096_vm9 = vcmp.eq.f32.partialorder %v4721_v16, 8.507059e+37  ;;  %v4724_v28 = vor.u32 1.1754944e-38, %v4723_v42  ;;  %v10100_v57 = vmul.f32 0.6931472, %v6674_v0  ;;  %vm10111_vm10 = vmor %vm4717_vm8, %vm4718_vm7 }
 0x8e7   : > { %v4894_v6 = vmul.f32 %v10033_v15, %v4893_v13  ;;  %v10116_v35 = vadd.f32 %v10005_v7, %v4760_v27  ;;  %v4720_v50 = vsel %vm10111_vm10, %v9987_v5, %v4716_v55  ;;  %v4854_v10 = vsub.f32 %v4818_v63, %v4842_v8 }
 0x8e8   : > { %v10122_v58 = vmul.f32 0.6931472, %v6676_v36  ;;  %v4900_v33 = vand.u32 2147483647, %v9974_v21  ;;  %v4907_v17 = vmul.f32 %v10090_v18, %v10026_v30  ;;  %v4807_v11 = vadd.f32 1.0, %v6099_v52 }
 0x8e9   : > { %v4902_v4 = vand.u32 2147483648, %v9974_v21  ;;  %v4831_v44 = vsub.f32 1.0, %v6099_v52  ;;  %v4895_v5 = vadd.f32 %v10033_v15, %v4894_v6  ;;  %vm4897_vm0 = vweird.f32 %v10033_v15 }
 0x8ea   : > { %v4738_v32 = vand.u32 2147483648, %v10038_v62  ;;  %vm4896_vm12 = vweird.f32 %v9974_v21  ;;  %v4725_v14 = vsel %vm10096_vm9, %v4724_v28, %v4720_v50  ;;  %v10136_v49 = vmul.f32 0.5, %v4854_v10 }
 0x8eb   : > { %v4696_v16 = vmul.f32 %v4695_v47, %v10026_v30  ;;  %vm10141_vm15 = vcmp.eq.f32.partialorder %v4900_v33, 8.507059e+37  ;;  %v4908_v27 = vsub.f32 1.0, %v4907_v17  ;;  %vm10145_vm13 = vmor %vm4896_vm12, %vm4897_vm0  ;;  %v4903_v21 = vor.u32 1.1754944e-38, %v4902_v4 }
 0x8ec   : > { %v10060_v34 = vpop.xlane.xlu2 %4549  ;;  %v4736_v8 = vand.u32 2147483647, %v10038_v62  ;;  %v4899_v59 = vsel %vm10145_vm13, %v10033_v15, %v4895_v5  ;;  %v10156_v28 = vor.u32 1.1754944e-38, %v4738_v32  ;;  %vm4911_vm1 = vweird.f32 %v10026_v30 }
 0x8ed   : > { %6679 = vrsqrt.f32 %v10060_v34  ;;  %v4868_v2 = vmul.f32 %v10070_v37, %v4696_v16  ;;  %v4917_v33 = vand.u32 2147483648, %v10026_v30  ;;  %vm4732_vm14 = vweird.f32 %v10038_v62 }
 0x8ee   : > { %6681 = vrcp.f32 %v10038_v62  ;;  %vm4606_vm6 = vcmp.eq.f32.partialorder %v10060_v34, inf  ;;  %v4609_v15 = vand.u32 2147483648, %v10060_v34  ;;  %v4904_v37 = vsel %vm10141_vm15, %v4903_v21, %v4899_v59 }
 0x8ef   : > { %6683 = vrsqrt.f32 %v10086_v22  ;;  %vm4608_vm2 = vcmp.eq.f32.partialorder %v10060_v34, 0.0  ;;  %vm4912_vm3 = vweird.f32 %v10090_v18  ;;  %vm4763_vm5 = vweird.f32 %v10005_v7 }
 0x8f0   : > { %vm10191_vm8 = vmor %vm4911_vm1, %vm4912_vm3  ;;  %vm4762_vm10 = vweird.f32 %v9956_v40  ;;  %vm4737_vm13 = vcmp.eq.f32.partialorder %v4736_v8, 8.507059e+37  ;;  %vm10240_vm1 = vcmp.eq.f32.partialorder %v4766_v45, 8.507059e+37 }
 0x8f3   : > { %v6680_v29 = vpop.eup %6679 }
 0x8f4   : > { %v10102_v1 = vpop.eup %6681  ;;  %v4600_v3 = vmul.f32 %v6680_v29, %v10060_v34  ;;  %v10106_v25 = vpop.xlane.xlu0 %4552 }
 0x8f5   : > { %6685 = vrsqrt.f32 %v10106_v25  ;;  %v4728_v54 = vmul.f32 %v10102_v1, %v10038_v62  ;;  %v10139_v42 = vpop.eup %6683  ;;  %vm4733_vm4 = vweird.f32 %v10102_v1  ;;  %vm4618_vm0 = vcmp.eq.f32.partialorder %v10106_v25, inf }
 0x8f6   : > { %v4601_v12 = vmul.f32 %v6680_v29, %v4600_v3  ;;  %6687 = vtanh.f32 %v4867_v53  ;;  %v4588_v6 = vmul.f32 %v10139_v42, %v10086_v22  ;;  %vm10217_vm12 = vmor %vm4732_vm14, %vm4733_vm4  ;;  %vm4620_vm15 = vcmp.eq.f32.partialorder %v10106_v25, 0.0 }
 0x8f7   : > { %6689 = vlog2.f32 %v4807_v11  ;;  %v4729_v63 = vsub.f32 1.0, %v4728_v54 }
 0x8f8   : > { %v4602_v23 = vmul.f32 0.5, %v4601_v12  ;;  %6691 = vlog2.f32 %v4831_v44  ;;  %v4909_v12 = vmul.f32 %v10090_v18, %v4908_v27 }
 0x8f9   : > { %v4730_v17 = vmul.f32 %v10102_v1, %v4729_v63 }
 0x8fa   : > { %v4603_v0 = vsub.f32 1.5, %v4602_v23  ;;  %v4589_v23 = vmul.f32 %v10139_v42, %v4588_v6  ;;  %v4910_v13 = vadd.f32 %v10090_v18, %v4909_v12 }
 0x8fb   : > { %v6686_v36 = vpop.eup %6685 }
 0x8fc   : > { %v4604_v47 = vmul.f32 %v6680_v29, %v4603_v0  ;;  %v4612_v52 = vmul.f32 %v6686_v36, %v10106_v25  ;;  %v10151_v53 = vpop.xlane.xlu1 %4555  ;;  %v6688_v3 = vpop.eup %6687  ;;  %v4915_v29 = vand.u32 2147483647, %v10026_v30  ;;  %v4914_v30 = vsel %vm10191_vm8, %v10090_v18, %v4910_v13 }
 0x8fd   : > { %v6690_v11 = vpop.eup %6689  ;;  %6693 = vrsqrt.f32 %v10151_v53  ;;  %v4883_v32 = vmul.f32 %v6688_v3, %v9817_v46 }
 0x8fe   : > { %v4605_v50 = vmul.f32 %v4604_v47, %v10060_v34  ;;  %v4613_v10 = vmul.f32 %v6686_v36, %v4612_v52  ;;  %v6692_v44 = vpop.eup %6691  ;;  %6695 = vtanh.f32 %v4868_v2  ;;  %v4820_v55 = vmul.f32 0.6931472, %v6690_v11 }
 0x8ff   : > { %v4905_v27 = vmul.f32 %v4904_v37, %v4883_v32  ;;  %v4844_v52 = vmul.f32 0.6931472, %v6692_v44  ;;  %vm10195_vm9 = vcmp.eq.f32.partialorder %v4915_v29, 8.507059e+37  ;;  %v4621_v29 = vand.u32 2147483648, %v10106_v25 }
 0x900   : > { %v4607_v4 = vsel %vm4606_vm6, %v10060_v34, %v4605_v50  ;;  %v4614_v54 = vmul.f32 0.5, %v4613_v10  ;;  %v4731_v34 = vadd.f32 %v10102_v1, %v4730_v17 }
 0x901   : > { %v4610_v5 = vsel %vm4608_vm2, %v4609_v15, %v4607_v4  ;;  %v4855_v17 = vsub.f32 %v4820_v55, %v4844_v52  ;;  %vm10259_vm2 = vmor %vm4762_vm10, %vm4763_vm5 }
 0x902   : > { %v10177_v16 = vmax.f32 %v4610_v5, 1e-05  ;;  %v4615_v0 = vsub.f32 1.5, %v4614_v54  ;;  %v4735_v37 = vsel %vm10217_vm12, %v10102_v1, %v4731_v34  ;;  %vm4594_vm12 = vcmp.eq.f32.partialorder %v10086_v22, inf }
 0x903   : > { %v10199_v6 = vpop.eup %6693  ;;  %v4740_v13 = vsel %vm4737_vm13, %v10156_v28, %v4735_v37 }
 0x904   : > { %6697 = vrcp.f32 %v10177_v16  ;;  %v4616_v21 = vmul.f32 %v6686_v36, %v4615_v0  ;;  %v5021_v63 = vpop.xlane.xlu1 %5020  ;;  %v10184_v47 = vpop.xlane.xlu2 %4558  ;;  %v4726_v46 = vmul.f32 %v4725_v14, %v10177_v16  ;;  %v4918_v36 = vor.u32 1.1754944e-38, %v4917_v33 }
 0x905   : > { %vm5043_vm7 = vcmp.eq.f32.partialorder %v5021_v63, 0.0  ;;  %6699 = vrsqrt.f32 %v10184_v47  ;;  %v4590_v14 = vmul.f32 0.5, %v4589_v23  ;;  %v6696_v10 = vpop.eup %6695  ;;  %v4945_v45 = vand.u32 2147483647, %v10177_v16 }
 0x906   : > { %v4617_v2 = vmul.f32 %v4616_v21, %v10106_v25  ;;  %v10202_v50 = vsel %vm5043_vm7, 0.0, %v4905_v27  ;;  %v4870_v33 = vmul.f32 %v10136_v49, %v4726_v46  ;;  %v4624_v49 = vmul.f32 %v10199_v6, %v10151_v53 }
 0x907   : > { %v5075_v12 = vmul.f32 %v10202_v50, %v10202_v50  ;;  %v4919_v54 = vsel %vm10195_vm9, %v4918_v36, %v4914_v30  ;;  %v4591_v5 = vsub.f32 1.5, %v4590_v14  ;;  %v4863_v21 = vmul.f32 0.5, %v4855_v17 }
 0x908   : > { %v4619_v18 = vsel %vm4618_vm0, %v10106_v25, %v4617_v2  ;;  %6701 = vtanh.f32 %v4870_v33  ;;  %v4884_v25 = vmul.f32 %v6696_v10, %v9825_v43  ;;  %v4625_v34 = vmul.f32 %v10199_v6, %v4624_v49 }
 0x909   : > { %v4622_v11 = vsel %vm4620_vm15, %v4621_v29, %v4619_v18  ;;  %v5083_v4 = vsel %vm4538_vm11, %v5075_v12, 0.0  ;;  %6703 = vrsqrt.f32 %v9875_v26  ;;  %v4947_v46 = vand.u32 2147483648, %v10177_v16 }
 0x90a   : > { %v6698_v44 = vpop.eup %6697  ;;  %v10231_v23 = vmax.f32 %v4622_v11, 1e-05  ;;  %5084 = vadd.xlane.f32.xlu0 %v5083_v4  ;;  %v4920_v8 = vmul.f32 %v4919_v54, %v4884_v25  ;;  %v4765_v30 = vsel %vm10259_vm2, %v10005_v7, %v10116_v35  ;;  %v4769_v10 = vor.u32 1.1754944e-38, %v4768_v39 }
 0x90b   : > { %v6700_v1 = vpop.eup %6699  ;;  %v4937_v32 = vmul.f32 %v6698_v44, %v10177_v16  ;;  %vm4942_vm6 = vweird.f32 %v6698_v44  ;;  %v4857_v29 = vsub.f32 %v10100_v57, %v10122_v58  ;;  %v4592_v33 = vmul.f32 %v10139_v42, %v4591_v5 }
 0x90c   : > { %6705 = vrcp.f32 %v10231_v23  ;;  %v4636_v43 = vmul.f32 %v6700_v1, %v10184_v47  ;;  %v5024_v62 = vpop.xlane.xlu2 %5023  ;;  %v4741_v27 = vmul.f32 %v4740_v13, %v10231_v23  ;;  %vm4941_vm3 = vweird.f32 %v10177_v16  ;;  %v5030_v7 = vpop.xlane.xlu1 %5029 }
 0x90d   : > { %v4938_v55 = vsub.f32 1.0, %v4937_v32  ;;  %vm5044_vm14 = vcmp.eq.f32.partialorder %v5024_v62, 0.0  ;;  %v4626_v17 = vmul.f32 0.5, %v4625_v34  ;;  %vm4943_vm4 = vmor %vm4941_vm3, %vm4942_vm6  ;;  %vm4946_vm5 = vcmp.eq.f32.partialorder %v4945_v45, 8.507059e+37 }
 0x90e   : > { %v4637_v63 = vmul.f32 %v6700_v1, %v4636_v43  ;;  %v10251_v52 = vsel %vm5044_vm14, 0.0, %v4920_v8  ;;  %v4871_v36 = vmul.f32 %v4863_v21, %v4741_v27  ;;  %v6702_v14 = vpop.eup %6701  ;;  %v4948_v40 = vor.u32 1.1754944e-38, %v4947_v46 }
 0x90f   : > { %v4939_v28 = vmul.f32 %v6698_v44, %v4938_v55  ;;  %v5076_v59 = vmul.f32 %v10251_v52, %v10251_v52  ;;  %v10271_v12 = vpop.eup %6703  ;;  %v4886_v39 = vmul.f32 %v6702_v14, %v9835_v51  ;;  %v4770_v49 = vsel %vm10240_vm1, %v4769_v10, %v4765_v30 }
 0x910   : > { %v4638_v2 = vmul.f32 0.5, %v4637_v63  ;;  %6707 = vtanh.f32 %v4871_v36  ;;  %v4440_v58 = vmul.f32 %v10271_v12, %v9875_v26  ;;  %v4593_v4 = vmul.f32 %v4592_v33, %v10086_v22 }
 0x911   : > { %v4940_v15 = vadd.f32 %v6698_v44, %v4939_v28  ;;  %v5086_v18 = vsel %vm4538_vm11, %v5076_v59, 0.0  ;;  %vm4642_vm7 = vcmp.eq.f32.partialorder %v10184_v47, inf  ;;  %v4627_v5 = vsub.f32 1.5, %v4626_v17 }
 0x912   : > { %v6706_v37 = vpop.eup %6705  ;;  %v4639_v11 = vsub.f32 1.5, %v4638_v2  ;;  %5087 = vadd.xlane.f32.xlu1 %v5086_v18  ;;  %vm5046_vm8 = vcmp.eq.f32.partialorder %v5030_v7, 0.0  ;;  %vm4644_vm10 = vcmp.eq.f32.partialorder %v10184_v47, 0.0  ;;  %v4960_v43 = vand.u32 2147483647, %v10231_v23 }
 0x913   : > { %v4944_v57 = vsel %vm4943_vm4, %v6698_v44, %v4940_v15  ;;  %v4952_v35 = vmul.f32 %v6706_v37, %v10231_v23  ;;  %v4645_v44 = vand.u32 2147483648, %v10184_v47  ;;  %vm4957_vm9 = vweird.f32 %v6706_v37 }
 0x914   : > { %v4640_v42 = vmul.f32 %v6700_v1, %v4639_v11  ;;  %v4949_v16 = vsel %vm4946_vm5, %v4948_v40, %v4944_v57  ;;  %v4962_v1 = vand.u32 2147483648, %v10231_v23  ;;  %v4441_v27 = vmul.f32 %v10271_v12, %v4440_v58  ;;  %v5033_v36 = vpop.xlane.xlu2 %5032 }
 0x915   : > { %v4950_v54 = vmul.f32 %v4949_v16, %v4886_v39  ;;  %v4953_v25 = vsub.f32 1.0, %v4952_v35  ;;  %vm4956_vm0 = vweird.f32 %v10231_v23  ;;  %v4865_v63 = vmul.f32 0.5, %v4857_v29 }
 0x916   : > { %v4641_v51 = vmul.f32 %v4640_v42, %v10184_v47  ;;  %v6708_v8 = vpop.eup %6707  ;;  %vm10300_vm15 = vmor %vm4956_vm0, %vm4957_vm9  ;;  %v4595_v46 = vsel %vm4594_vm12, %v10086_v22, %v4593_v4  ;;  %v4628_v28 = vmul.f32 %v10199_v6, %v4627_v5  ;;  %v4963_v3 = vor.u32 1.1754944e-38, %v4962_v1 }
 0x917   : > { %v10287_v32 = vsel %vm5046_vm8, 0.0, %v4950_v54  ;;  %v4954_v13 = vmul.f32 %v6706_v37, %v4953_v25  ;;  %v4887_v14 = vmul.f32 %v6708_v8, %v9840_v24  ;;  %vm4961_vm13 = vcmp.eq.f32.partialorder %v4960_v43, 8.507059e+37 }
 0x918   : > { %v4643_v0 = vsel %vm4642_vm7, %v10184_v47, %v4641_v51  ;;  %v5078_v62 = vmul.f32 %v10287_v32, %v10287_v32  ;;  %v4442_v2 = vmul.f32 0.5, %v4441_v27  ;;  %v4597_v30 = vand.u32 2147483648, %v10086_v22 }
 0x919   : > { %v4646_v34 = vsel %vm4644_vm10, %v4645_v44, %v4643_v0  ;;  %v4955_v55 = vadd.f32 %v6706_v37, %v4954_v13  ;;  %vm4596_vm1 = vcmp.eq.f32.partialorder %v10086_v22, 0.0  ;;  %vm5047_vm14 = vcmp.eq.f32.partialorder %v5033_v36, 0.0 }
 0x91a   : > { %v10298_v21 = vmax.f32 %v4646_v34, 1e-05  ;;  %v5092_v47 = vsel %vm4538_vm11, %v5078_v62, 0.0  ;;  %v4598_v33 = vsel %vm4596_vm1, %v4597_v30, %v4595_v46  ;;  %v4629_v15 = vmul.f32 %v4628_v28, %v10151_v53 }
 0x91b   : > { %v4959_v59 = vsel %vm10300_vm15, %v6706_v37, %v4955_v55  ;;  %5093 = vadd.xlane.f32.xlu0 %v5092_v47  ;;  %v4699_v18 = vsub.f32 1.0, %v10084_v56  ;;  %v6100_v37 = vclamps-f32 %v10079_v31, 0.99999  ;;  %v4443_v17 = vsub.f32 1.5, %v4442_v2  ;;  %v5039_v55 = vpop.xlane.xlu1 %5038 }
 0x91c   : > { %6709 = vrcp.f32 %v10298_v21  ;;  %v4771_v23 = vmul.f32 %v4770_v49, %v10298_v21  ;;  %v4964_v10 = vsel %vm4961_vm13, %v4963_v3, %v4959_v59  ;;  %v10324_v40 = vmax.f32 %v4598_v33, 1e-05 }
 0x91d   : > { %6711 = vrcp.f32 %v10079_v31  ;;  %v4965_v29 = vmul.f32 %v4964_v10, %v4887_v14  ;;  %vm4630_vm6 = vcmp.eq.f32.partialorder %v10151_v53, inf  ;;  %v4700_v57 = vmul.f32 %v10056_v19, %v4699_v18 }
 0x91e   : > { %v4873_v6 = vmul.f32 %v4865_v63, %v4771_v23  ;;  %6713 = vlog2.f32 %v10072_v61  ;;  %v4631_v56 = vsel %vm4630_vm6, %v10151_v53, %v4629_v15  ;;  %vm4702_vm2 = vweird.f32 %v9989_v48 }
 0x91f   : > { %6715 = vlog2.f32 %v10077_v41  ;;  %v10318_v24 = vsel %vm5047_vm14, 0.0, %v4965_v29  ;;  %v4808_v35 = vadd.f32 1.0, %v6100_v37  ;;  %v4444_v42 = vmul.f32 %v10271_v12, %v4443_v17 }
 0x920   : > { %v5079_v22 = vmul.f32 %v10318_v24, %v10318_v24  ;;  %6717 = vtanh.f32 %v4873_v6  ;;  %v4633_v16 = vand.u32 2147483648, %v10151_v53  ;;  %v4832_v4 = vsub.f32 1.0, %v6100_v37 }
 0x921   : > { %6719 = vrcp.f32 %v10324_v40  ;;  %vm4632_vm3 = vcmp.eq.f32.partialorder %v10151_v53, 0.0  ;;  %v4992_v54 = vand.u32 2147483648, %v10298_v21  ;;  %v4990_v44 = vand.u32 2147483647, %v10298_v21 }
 0x922   : > { %v6710_v11 = vpop.eup %6709  ;;  %v5095_v7 = vsel %vm4538_vm11, %v5079_v22, 0.0  ;;  %v4634_v5 = vsel %vm4632_vm3, %v4633_v16, %v4631_v56  ;;  %v4701_v12 = vadd.f32 %v10056_v19, %v4700_v57  ;;  %vm4703_vm5 = vweird.f32 %v10056_v19 }
 0x923   : > { %v10326_v61 = vpop.eup %6711  ;;  %v4982_v41 = vmul.f32 %v6710_v11, %v10298_v21  ;;  %5096 = vadd.xlane.f32.xlu1 %v5095_v7  ;;  %vm4987_vm4 = vweird.f32 %v6710_v11  ;;  %v4708_v1 = vand.u32 2147483648, %v9989_v48  ;;  %v4445_v53 = vmul.f32 %v4444_v42, %v9875_v26  ;;  %vm10357_vm0 = vmor %vm4702_vm2, %vm4703_vm5 }
 0x924   : > { %v6714_v39 = vpop.eup %6713  ;;  %v4743_v25 = vmul.f32 %v10326_v61, %v10079_v31  ;;  %vm4986_vm7 = vweird.f32 %v10298_v21  ;;  %v10347_v8 = vmax.f32 %v4634_v5, 1e-05  ;;  %v4993_v27 = vor.u32 1.1754944e-38, %v4992_v54 }
 0x925   : > { %v6716_v58 = vpop.eup %6715  ;;  %v4983_v49 = vsub.f32 1.0, %v4982_v41  ;;  %v4816_v0 = vmul.f32 0.6931472, %v6714_v39  ;;  %vm4988_vm8 = vmor %vm4986_vm7, %vm4987_vm4  ;;  %6721 = vlog2.f32 %v4808_v35  ;;  %vm4991_vm9 = vcmp.eq.f32.partialorder %v4990_v44, 8.507059e+37 }
 0x926   : > { %v6718_v13 = vpop.eup %6717  ;;  %v4840_v62 = vmul.f32 0.6931472, %v6716_v58  ;;  %v4744_v34 = vsub.f32 1.0, %v4743_v25  ;;  %6723 = vlog2.f32 %v4832_v4  ;;  %vm4446_vm10 = vcmp.eq.f32.partialorder %v9875_v26, inf }
 0x927   : > { %v4984_v51 = vmul.f32 %v6710_v11, %v4983_v49  ;;  %v4889_v63 = vmul.f32 %v6718_v13, %v9851_v20  ;;  %v10350_v47 = vpop.eup %6719  ;;  %v4706_v28 = vand.u32 2147483647, %v9989_v48  ;;  %v4447_v20 = vsel %vm4446_vm10, %v9875_v26, %v4445_v53 }
 0x928   : > { %v4705_v3 = vsel %vm10357_vm0, %v10056_v19, %v4701_v12  ;;  %v4709_v23 = vor.u32 1.1754944e-38, %v4708_v1  ;;  %v4449_v36 = vand.u32 2147483648, %v9875_v26  ;;  %6725 = vrcp.f32 %v10347_v8 }
 0x929   : > { %v4985_v43 = vadd.f32 %v6710_v11, %v4984_v51  ;;  %vm5049_vm12 = vcmp.eq.f32.partialorder %v5039_v55, 0.0  ;;  %v4745_v14 = vmul.f32 %v10326_v61, %v4744_v34  ;;  %vm4448_vm15 = vcmp.eq.f32.partialorder %v9875_v26, 0.0 }
 0x92a   : > { %v4853_v48 = vsub.f32 %v4816_v0, %v4840_v62  ;;  %v4922_v30 = vmul.f32 %v10350_v47, %v10324_v40  ;;  %v4450_v6 = vsel %vm4448_vm15, %v4449_v36, %v4447_v20  ;;  %vm4707_vm13 = vcmp.eq.f32.partialorder %v4706_v28, 8.507059e+37 }
 0x92b   : > { %v4989_v45 = vsel %vm4988_vm8, %v6710_v11, %v4985_v43  ;;  %v6722_v10 = vpop.eup %6721  ;;  %v4710_v33 = vsel %vm4707_vm13, %v4709_v23, %v4705_v3  ;;  %v4746_v26 = vadd.f32 %v10326_v61, %v4745_v14  ;;  %vm4748_vm1 = vweird.f32 %v10326_v61 }
 0x92c   : > { %v4994_v46 = vsel %vm4991_vm9, %v4993_v27, %v4989_v45  ;;  %v6724_v29 = vpop.eup %6723  ;;  %v4711_v18 = vmul.f32 %v4710_v33, %v10324_v40  ;;  %v10380_v37 = vmax.f32 %v4450_v6, 1e-05  ;;  %v4861_v17 = vmul.f32 0.5, %v4853_v48 }
 0x92d   : > { %v4995_v59 = vmul.f32 %v4994_v46, %v4889_v63  ;;  %v4923_v22 = vsub.f32 1.0, %v4922_v30  ;;  %v4753_v11 = vand.u32 2147483648, %v10079_v31  ;;  %vm4747_vm14 = vweird.f32 %v10079_v31 }
 0x92e   : > { %v10383_v41 = vpop.eup %6725  ;;  %v4751_v7 = vand.u32 2147483647, %v10079_v31  ;;  %v4822_v39 = vmul.f32 0.6931472, %v6722_v10  ;;  %v4846_v56 = vmul.f32 0.6931472, %v6724_v29  ;;  %vm4749_vm6 = vmor %vm4747_vm14, %vm4748_vm1  ;;  %v4869_v57 = vmul.f32 %v4861_v17, %v4711_v18 }
 0x92f   : > { %v10370_v2 = vsel %vm5049_vm12, 0.0, %v4995_v59  ;;  %v4750_v35 = vsel %vm4749_vm6, %v10326_v61, %v4746_v26  ;;  %6727 = vrcp.f32 %v10380_v37  ;;  %v4924_v58 = vmul.f32 %v10350_v47, %v4923_v22 }
 0x930   : > { %v5081_v19 = vmul.f32 %v10370_v2, %v10370_v2  ;;  %v4754_v42 = vor.u32 1.1754944e-38, %v4753_v11  ;;  %v4967_v16 = vmul.f32 %v10383_v41, %v10347_v8  ;;  %vm4752_vm2 = vcmp.eq.f32.partialorder %v4751_v7, 8.507059e+37 }
 0x931   : > { %v4856_v49 = vsub.f32 %v4822_v39, %v4846_v56  ;;  %6729 = vtanh.f32 %v4869_v57  ;;  %v4925_v54 = vadd.f32 %v10350_v47, %v4924_v58  ;;  %vm4927_vm3 = vweird.f32 %v10350_v47 }
 0x932   : > { %v5101_v15 = vsel %vm4538_vm11, %v5081_v19, 0.0  ;;  %v4755_v4 = vsel %vm4752_vm2, %v4754_v42, %v4750_v35  ;;  %v4968_v25 = vsub.f32 1.0, %v4967_v16  ;;  %v6102_v61 = vclamps-f32 %v10380_v37, 0.99999  ;;  %v10442_v16 = vld [vmem:[%s11190_s6] sm:$0x1] }
 0x933   : > { %5102 = vadd.xlane.f32.xlu0 %v5101_v15  ;;  %v4756_v31 = vmul.f32 %v4755_v4, %v10347_v8  ;;  %v4932_v5 = vand.u32 2147483648, %v10324_v40  ;;  %v4864_v51 = vmul.f32 0.5, %v4856_v49  ;;  %vm4926_vm4 = vweird.f32 %v10324_v40 }
 0x934   : > { %v10399_v13 = vpop.xlane.xlu0 %4561  ;;  %v4930_v12 = vand.u32 2147483647, %v10324_v40  ;;  %vm4928_vm5 = vmor %vm4926_vm4, %vm4927_vm3  ;;  %v4969_v53 = vmul.f32 %v10383_v41, %v4968_v25  ;;  %v4810_v43 = vadd.f32 1.0, %v6102_v61  ;;  %v4834_v55 = vsub.f32 1.0, %v6102_v61 }
 0x935   : > { %v10397_v44 = vpop.eup %6727  ;;  %6731 = vrsqrt.f32 %v10399_v13  ;;  %v4872_v1 = vmul.f32 %v4864_v51, %v4756_v31  ;;  %v4929_v0 = vsel %vm4928_vm5, %v10350_v47, %v4925_v54  ;;  %v4933_v27 = vor.u32 1.1754944e-38, %v4932_v5 }
 0x936   : > { %v4773_v34 = vmul.f32 %v10397_v44, %v10380_v37  ;;  %vm4931_vm7 = vcmp.eq.f32.partialorder %v4930_v12, 8.507059e+37  ;;  %v4970_v45 = vadd.f32 %v10383_v41, %v4969_v53  ;;  %vm4972_vm8 = vweird.f32 %v10383_v41 }
 0x937   : > { %v6730_v62 = vpop.eup %6729  ;;  %v4934_v63 = vsel %vm4931_vm7, %v4933_v27, %v4929_v0  ;;  %6733 = vtanh.f32 %v4872_v1  ;;  %v4977_v46 = vand.u32 2147483648, %v10347_v8  ;;  %vm4971_vm9 = vweird.f32 %v10347_v8 }
 0x938   : > { %v4885_v40 = vmul.f32 %v6730_v62, %v9830_v38  ;;  %6735 = vlog2.f32 %v4810_v43  ;;  %v4774_v21 = vsub.f32 1.0, %v4773_v34  ;;  %v4975_v3 = vand.u32 2147483647, %v10347_v8  ;;  %vm4973_vm0 = vmor %vm4971_vm9, %vm4972_vm8 }
 0x939   : > { %6737 = vlog2.f32 %v4834_v55  ;;  %v4974_v36 = vsel %vm4973_vm0, %v10383_v41, %v4970_v45  ;;  %v4978_v30 = vor.u32 1.1754944e-38, %v4977_v46  ;;  %vm4778_vm15 = vweird.f32 %v10397_v44 }
 0x93a   : > { %v4935_v20 = vmul.f32 %v4934_v63, %v4885_v40  ;;  %vm4976_vm12 = vcmp.eq.f32.partialorder %v4975_v3, 8.507059e+37  ;;  %v4775_v19 = vmul.f32 %v10397_v44, %v4774_v21  ;;  %v4783_v39 = vand.u32 2147483648, %v10380_v37  ;;  %v5042_v40 = vpop.xlane.xlu2 %5041 }
 0x93b   : > { %v6732_v47 = vpop.eup %6731  ;;  %v4979_v33 = vsel %vm4976_vm12, %v4978_v30, %v4974_v36  ;;  %vm4777_vm1 = vweird.f32 %v10380_v37  ;;  %vm4654_vm14 = vcmp.eq.f32.partialorder %v10399_v13, inf  ;;  %v4657_v35 = vand.u32 2147483648, %v10399_v13 }
 0x93c   : > { %v4648_v28 = vmul.f32 %v6732_v47, %v10399_v13  ;;  %v5027_v59 = vpop.xlane.xlu0 %5026  ;;  %v4776_v41 = vadd.f32 %v10397_v44, %v4775_v19  ;;  %vm4779_vm6 = vmor %vm4777_vm1, %vm4778_vm15  ;;  %vm4656_vm2 = vcmp.eq.f32.partialorder %v10399_v13, 0.0  ;;  %v4784_v54 = vor.u32 1.1754944e-38, %v4783_v39 }
 0x93d   : > { %vm5045_vm10 = vcmp.eq.f32.partialorder %v5027_v59, 0.0  ;;  %v6734_v14 = vpop.eup %6733  ;;  %v5371_v61 = vmul.f32 %v10442_v16, %v10442_v16  ;;  %vm5372_vm4 = vcmask 122880  }
 0x93e   : > { %v4649_v38 = vmul.f32 %v6732_v47, %v4648_v28  ;;  %v10415_v23 = vsel %vm5045_vm10, 0.0, %v4935_v20  ;;  %v6736_v10 = vpop.eup %6735  ;;  %v4888_v18 = vmul.f32 %v6734_v14, %v9845_v60  ;;  %v4781_v60 = vand.u32 2147483647, %v10380_v37 }
 0x93f   : > { %v5077_v48 = vmul.f32 %v10415_v23, %v10415_v23  ;;  %v6738_v29 = vpop.eup %6737  ;;  %v4826_v26 = vmul.f32 0.6931472, %v6736_v10  ;;  %v4780_v37 = vsel %vm4779_vm6, %v10397_v44, %v4776_v41  ;;  %v5373_v1 = vsel %vm5372_vm4, %v5371_v61, 0.0 }
 0x940   : > { %v4650_v6 = vmul.f32 0.5, %v4649_v38  ;;  %v4980_v22 = vmul.f32 %v4979_v33, %v4888_v18  ;;  %v4850_v7 = vmul.f32 0.6931472, %v6738_v29  ;;  %vm4782_vm3 = vcmp.eq.f32.partialorder %v4781_v60, 8.507059e+37 }
 0x941   : > { %v5089_v8 = vsel %vm4538_vm11, %v5077_v48, 0.0  ;;  %v4785_v5 = vsel %vm4782_vm3, %v4784_v54, %v4780_v37  ;;  %vm5050_vm10 = vcmp.eq.f32.partialorder %v5042_v40, 0.0 }
 0x942   : > { %v4651_v15 = vsub.f32 1.5, %v4650_v6  ;;  %5090 = vadd.xlane.f32.xlu2 %v5089_v8  ;;  %v4858_v49 = vsub.f32 %v4826_v26, %v4850_v7 }
 0x944   : > { %v4652_v17 = vmul.f32 %v6732_v47, %v4651_v15  ;;  %v5036_v11 = vpop.xlane.xlu0 %5035 }
 0x945   : > { %vm5048_vm13 = vcmp.eq.f32.partialorder %v5036_v11, 0.0 }
 0x946   : > { %v4653_v56 = vmul.f32 %v4652_v17, %v10399_v13  ;;  %v10427_v57 = vsel %vm5048_vm13, 0.0, %v4980_v22 }
 0x947   : > { %v5080_v58 = vmul.f32 %v10427_v57, %v10427_v57 }
 0x948   : > { %v4655_v42 = vsel %vm4654_vm14, %v10399_v13, %v4653_v56  ;;  %v4866_v13 = vmul.f32 0.5, %v4858_v49 }
 0x949   : > { %v4658_v4 = vsel %vm4656_vm2, %v4657_v35, %v4655_v42  ;;  %v5098_v31 = vsel %vm4538_vm11, %v5080_v58, 0.0 }
 0x94a   : > { %v4666_v25 = vmax.f32 %v4658_v4, 1e-05  ;;  %5099 = vadd.xlane.f32.xlu2 %v5098_v31 }
 0x94c   : > { %6739 = vrcp.f32 %v4666_v25  ;;  %v4786_v51 = vmul.f32 %v4785_v5, %v4666_v25  ;;  %v5007_v43 = vand.u32 2147483648, %v4666_v25  ;;  %v5005_v27 = vand.u32 2147483647, %v4666_v25 }
 0x94d   : > { %vm5001_vm7 = vweird.f32 %v4666_v25 }
 0x94e   : > { %v4874_v12 = vmul.f32 %v4866_v13, %v4786_v51  ;;  %v5008_v63 = vor.u32 1.1754944e-38, %v5007_v43  ;;  %vm5006_vm9 = vcmp.eq.f32.partialorder %v5005_v27, 8.507059e+37 }
 0x950   : > { %6741 = vtanh.f32 %v4874_v12 }
 0x952   : > { %v6740_v44 = vpop.eup %6739  ;;  %5374 = vadd.xlane.f32.xlu2 %v5373_v1 }
 0x953   : > { %v4997_v0 = vmul.f32 %v6740_v44, %v4666_v25  ;;  %vm5002_vm5 = vweird.f32 %v6740_v44 }
 0x954   : > { %vm5003_vm8 = vmor %vm5001_vm7, %vm5002_vm5 }
 0x955   : > { %v4998_v53 = vsub.f32 1.0, %v4997_v0 }
 0x956   : > { %v6742_v34 = vpop.eup %6741 }
 0x957   : > { %v4999_v62 = vmul.f32 %v6740_v44, %v4998_v53  ;;  %v4890_v45 = vmul.f32 %v6742_v34, %v9893_v9 }
 0x959   : > { %v5000_v55 = vadd.f32 %v6740_v44, %v4999_v62 }
 0x95b   : > { %v5004_v47 = vsel %vm5003_vm8, %v6740_v44, %v5000_v55 }
 0x95c   : > { %v5009_v46 = vsel %vm5006_vm9, %v5008_v63, %v5004_v47 }
 0x95d   : > { %v5010_v21 = vmul.f32 %v5009_v46, %v4890_v45 }
 0x95f   : > { %v10450_v28 = vsel %vm5050_vm10, 0.0, %v5010_v21 }
 0x960   : > { %v5082_v20 = vmul.f32 %v10450_v28, %v10450_v28 }
 0x962   : > { %v5104_v59 = vsel %vm4538_vm11, %v5082_v20, 0.0 }
 0x963   : > { %5105 = vadd.xlane.f32.xlu1 %v5104_v59 }
 0x97d   : > { %v5085_v3 = vpop.xlane.xlu0 %5084 }
 0x97e   : > { %6743 = vrsqrt.f32 %v5085_v3  ;;  %vm5114_vm0 = vcmp.eq.f32.partialorder %v5085_v3, inf  ;;  %v5117_v39 = vand.u32 2147483648, %v5085_v3  ;;  %vm5116_vm12 = vcmp.eq.f32.partialorder %v5085_v3, 0.0 }
 0x984   : > { %v6744_v36 = vpop.eup %6743 }
 0x985   : > { %v5088_v38 = vpop.xlane.xlu1 %5087  ;;  %v5108_v14 = vmul.f32 %v6744_v36, %v5085_v3 }
 0x986   : > { %6745 = vrsqrt.f32 %v5088_v38  ;;  %vm5126_vm15 = vcmp.eq.f32.partialorder %v5088_v38, inf  ;;  %v5129_v61 = vand.u32 2147483648, %v5088_v38  ;;  %vm5128_vm13 = vcmp.eq.f32.partialorder %v5088_v38, 0.0 }
 0x987   : > { %v5109_v9 = vmul.f32 %v6744_v36, %v5108_v14 }
 0x989   : > { %v5110_v30 = vmul.f32 0.5, %v5109_v9 }
 0x98b   : > { %v5111_v19 = vsub.f32 1.5, %v5110_v30 }
 0x98c   : > { %v6746_v48 = vpop.eup %6745 }
 0x98d   : > { %v5120_v10 = vmul.f32 %v6746_v48, %v5088_v38  ;;  %v5112_v8 = vmul.f32 %v6744_v36, %v5111_v19 }
 0x98e   : > { %v10455_v6 = vpop.xlane.xlu0 %5093 }
 0x98f   : > { %v5121_v29 = vmul.f32 %v6746_v48, %v5120_v10  ;;  %6747 = vrsqrt.f32 %v10455_v6  ;;  %v5113_v26 = vmul.f32 %v5112_v8, %v5085_v3  ;;  %vm5150_vm14 = vcmp.eq.f32.partialorder %v10455_v6, inf }
 0x990   : > { %vm5152_vm2 = vcmp.eq.f32.partialorder %v10455_v6, 0.0 }
 0x991   : > { %v5122_v33 = vmul.f32 0.5, %v5121_v29  ;;  %v5115_v11 = vsel %vm5114_vm0, %v5085_v3, %v5113_v26  ;;  %v5153_v29 = vand.u32 2147483648, %v10455_v6 }
 0x992   : > { %v5118_v60 = vsel %vm5116_vm12, %v5117_v39, %v5115_v11 }
 0x993   : > { %v5123_v17 = vsub.f32 1.5, %v5122_v33  ;;  %v10465_v49 = vmax.f32 %v5118_v60, 1e-05 }
 0x995   : > { %v6748_v18 = vpop.eup %6747  ;;  %v5124_v41 = vmul.f32 %v6746_v48, %v5123_v17  ;;  %vm5216_vm8 = vweird.f32 %v10465_v49 }
 0x996   : > { %v10458_v15 = vpop.xlane.xlu1 %5096  ;;  %v5144_v22 = vmul.f32 %v6748_v18, %v10455_v6 }
 0x997   : > { %6749 = vrsqrt.f32 %v10458_v15  ;;  %v5125_v58 = vmul.f32 %v5124_v41, %v5088_v38  ;;  %vm5162_vm3 = vcmp.eq.f32.partialorder %v10458_v15, inf  ;;  %vm5164_vm5 = vcmp.eq.f32.partialorder %v10458_v15, 0.0 }
 0x998   : > { %v5145_v35 = vmul.f32 %v6748_v18, %v5144_v22 }
 0x999   : > { %v5127_v31 = vsel %vm5126_vm15, %v5088_v38, %v5125_v58 }
 0x99a   : > { %v5146_v4 = vmul.f32 0.5, %v5145_v35  ;;  %v5130_v13 = vsel %vm5128_vm13, %v5129_v61, %v5127_v31  ;;  %v5222_v31 = vand.u32 2147483648, %v10465_v49 }
 0x99b   : > { %v10472_v53 = vmax.f32 %v5130_v13, 1e-05 }
 0x99c   : > { %v5147_v12 = vsub.f32 1.5, %v5146_v4  ;;  %v5220_v4 = vand.u32 2147483647, %v10465_v49 }
 0x99d   : > { %v6750_v7 = vpop.eup %6749  ;;  %vm5231_vm0 = vweird.f32 %v10472_v53 }
 0x99e   : > { %v5156_v42 = vmul.f32 %v6750_v7, %v10458_v15  ;;  %v5148_v62 = vmul.f32 %v6748_v18, %v5147_v12  ;;  %vm5221_vm10 = vcmp.eq.f32.partialorder %v5220_v4, 8.507059e+37 }
 0x9a0   : > { %v5157_v54 = vmul.f32 %v6750_v7, %v5156_v42  ;;  %v5149_v21 = vmul.f32 %v5148_v62, %v10455_v6 }
 0x9a2   : > { %v5158_v1 = vmul.f32 0.5, %v5157_v54  ;;  %v5151_v48 = vsel %vm5150_vm14, %v10455_v6, %v5149_v21  ;;  %v5165_v6 = vand.u32 2147483648, %v10458_v15 }
 0x9a3   : > { %v5154_v22 = vsel %vm5152_vm2, %v5153_v29, %v5151_v48 }
 0x9a4   : > { %v5159_v34 = vsub.f32 1.5, %v5158_v1  ;;  %v10501_v60 = vmax.f32 %v5154_v22, 1e-05 }
 0x9a6   : > { %v10463_v37 = vpop.xlane.xlu0 %5102  ;;  %v5160_v59 = vmul.f32 %v6750_v7, %v5159_v34 }
 0x9a7   : > { %vm5188_vm2 = vcmp.eq.f32.partialorder %v10463_v37, 0.0 }
 0x9a8   : > { %v5161_v8 = vmul.f32 %v5160_v59, %v10458_v15 }
 0x9aa   : > { %v5163_v39 = vsel %vm5162_vm3, %v10458_v15, %v5161_v8  ;;  %v5189_v8 = vand.u32 2147483648, %v10463_v37 }
 0x9ab   : > { %v5166_v54 = vsel %vm5164_vm5, %v5165_v6, %v5163_v39 }
 0x9ac   : > { %v10513_v15 = vmax.f32 %v5166_v54, 1e-05 }
 0x9b5   : > { %v5091_v56 = vpop.xlane.xlu2 %5090 }
 0x9b6   : > { %6751 = vrsqrt.f32 %v5091_v56  ;;  %vm5138_vm1 = vcmp.eq.f32.partialorder %v5091_v56, inf  ;;  %v5141_v36 = vand.u32 2147483648, %v5091_v56  ;;  %vm5140_vm6 = vcmp.eq.f32.partialorder %v5091_v56, 0.0 }
 0x9b7   : > { %6753 = vrsqrt.f32 %v10463_v37 }
 0x9b8   : > { %6755 = vrcp.f32 %v10465_v49 }
 0x9bc   : > { %v6752_v25 = vpop.eup %6751 }
 0x9bd   : > { %v5132_v5 = vmul.f32 %v6752_v25, %v5091_v56  ;;  %v10469_v51 = vpop.xlane.xlu2 %5099  ;;  %v6754_v0 = vpop.eup %6753 }
 0x9be   : > { %6757 = vrsqrt.f32 %v10469_v51  ;;  %v10474_v27 = vpop.eup %6755  ;;  %v5180_v40 = vmul.f32 %v6754_v0, %v10463_v37  ;;  %vm5174_vm14 = vcmp.eq.f32.partialorder %v10469_v51, inf  ;;  %vm5176_vm3 = vcmp.eq.f32.partialorder %v10469_v51, 0.0 }
 0x9bf   : > { %v5133_v44 = vmul.f32 %v6752_v25, %v5132_v5  ;;  %6759 = vrcp.f32 %v10472_v53  ;;  %v5212_v20 = vmul.f32 %v10474_v27, %v10465_v49  ;;  %vm5217_vm7 = vweird.f32 %v10474_v27 }
 0x9c0   : > { %v5181_v38 = vmul.f32 %v6754_v0, %v5180_v40  ;;  %vm10515_vm9 = vmor %vm5216_vm8, %vm5217_vm7  ;;  %vm5339_vm8 = vcmp.gt.f32.partialorder %v10465_v49, 0.999 }
 0x9c1   : > { %v5134_v43 = vmul.f32 0.5, %v5133_v44  ;;  %v5213_v10 = vsub.f32 1.0, %v5212_v20 }
 0x9c2   : > { %v5182_v26 = vmul.f32 0.5, %v5181_v38 }
 0x9c3   : > { %v5135_v55 = vsub.f32 1.5, %v5134_v43  ;;  %v5214_v7 = vmul.f32 %v10474_v27, %v5213_v10 }
 0x9c4   : > { %v6758_v63 = vpop.eup %6757  ;;  %v5183_v35 = vsub.f32 1.5, %v5182_v26 }
 0x9c5   : > { %v5136_v45 = vmul.f32 %v6752_v25, %v5135_v55  ;;  %v5168_v47 = vmul.f32 %v6758_v63, %v10469_v51  ;;  %v10479_v46 = vpop.xlane.xlu2 %5374  ;;  %v10487_v19 = vpop.eup %6759  ;;  %v5215_v61 = vadd.f32 %v10474_v27, %v5214_v7 }
 0x9c6   : > { %6761 = vrsqrt.f32 %v10479_v46  ;;  %v5227_v41 = vmul.f32 %v10487_v19, %v10472_v53  ;;  %v5184_v12 = vmul.f32 %v6754_v0, %v5183_v35  ;;  %v5223_v0 = vor.u32 1.1754944e-38, %v5222_v31 }
 0x9c7   : > { %v5137_v3 = vmul.f32 %v5136_v45, %v5091_v56  ;;  %v5169_v14 = vmul.f32 %v6758_v63, %v5168_v47  ;;  %v5219_v55 = vsel %vm10515_vm9, %v10474_v27, %v5215_v61  ;;  %vm5383_vm12 = vcmp.eq.f32.partialorder %v10479_v46, inf }
 0x9c8   : > { %v5228_v25 = vsub.f32 1.0, %v5227_v41  ;;  %v5185_v45 = vmul.f32 %v5184_v12, %v10463_v37  ;;  %v5386_v21 = vand.u32 2147483648, %v10479_v46  ;;  %vm5385_vm15 = vcmp.eq.f32.partialorder %v10479_v46, 0.0 }
 0x9c9   : > { %v5139_v9 = vsel %vm5138_vm1, %v5091_v56, %v5137_v3  ;;  %v5170_v17 = vmul.f32 0.5, %v5169_v14  ;;  %v5224_v20 = vsel %vm5221_vm10, %v5223_v0, %v5219_v55  ;;  %vm5232_vm13 = vweird.f32 %v10487_v19 }
 0x9ca   : > { %v5142_v30 = vsel %vm5140_vm6, %v5141_v36, %v5139_v9  ;;  %v5229_v34 = vmul.f32 %v10487_v19, %v5228_v25  ;;  %v5237_v36 = vand.u32 2147483648, %v10472_v53  ;;  %vm5186_vm1 = vcmp.eq.f32.partialorder %v10463_v37, inf  ;;  %vm5233_vm6 = vmor %vm5231_vm0, %vm5232_vm13 }
 0x9cb   : > { %v10491_v33 = vmax.f32 %v5142_v30, 1e-05  ;;  %v5171_v58 = vsub.f32 1.5, %v5170_v17  ;;  %v5187_v48 = vsel %vm5186_vm1, %v10463_v37, %v5185_v45  ;;  %v5235_v30 = vand.u32 2147483647, %v10472_v53 }
 0x9cc   : > { %v6762_v18 = vpop.eup %6761  ;;  %v5230_v38 = vadd.f32 %v10487_v19, %v5229_v34  ;;  %v5225_v10 = vmul.f32 %v5224_v20, %v10202_v50  ;;  %v5190_v41 = vsel %vm5188_vm2, %v5189_v8, %v5187_v48  ;;  %v5238_v39 = vor.u32 1.1754944e-38, %v5237_v36 }
 0x9cd   : > { %v5377_v11 = vmul.f32 %v6762_v18, %v10479_v46  ;;  %6763 = vrcp.f32 %v10491_v33  ;;  %v5172_v1 = vmul.f32 %v6758_v63, %v5171_v58  ;;  %vm5236_vm5 = vcmp.eq.f32.partialorder %v5235_v30, 8.507059e+37 }
 0x9ce   : > { %6765 = vrcp.f32 %v10501_v60  ;;  %v5234_v22 = vsel %vm5233_vm6, %v10487_v19, %v5230_v38  ;;  %v5331_v58 = vmul.f32 0.999, %v5225_v10  ;;  %v5265_v37 = vand.u32 2147483647, %v10501_v60 }
 0x9cf   : > { %v5378_v56 = vmul.f32 %v6762_v18, %v5377_v11  ;;  %v5173_v47 = vmul.f32 %v5172_v1, %v10469_v51  ;;  %v5239_v35 = vsel %vm5236_vm5, %v5238_v39, %v5234_v22  ;;  %v10565_v4 = vmax.f32 %v5190_v41, 1e-05 }
 0x9d0   : > { %v5252_v61 = vand.u32 2147483648, %v10491_v33  ;;  %v5240_v1 = vmul.f32 %v5239_v35, %v10251_v52  ;;  %vm5246_vm9 = vweird.f32 %v10491_v33  ;;  %v5250_v43 = vand.u32 2147483647, %v10491_v33 }
 0x9d1   : > { %v5379_v42 = vmul.f32 0.5, %v5378_v56  ;;  %vm5261_vm5 = vweird.f32 %v10501_v60  ;;  %v10616_v39 = vsel %vm5339_vm8, %v5331_v58, %v10202_v50  ;;  %vm5276_vm8 = vweird.f32 %v10513_v15 }
 0x9d3   : > { %v5380_v5 = vsub.f32 1.5, %v5379_v42  ;;  %v10509_v13 = vpop.eup %6763 }
 0x9d4   : > { %v5242_v40 = vmul.f32 %v10509_v13, %v10491_v33  ;;  %v10537_v59 = vpop.eup %6765  ;;  %vm5247_vm7 = vweird.f32 %v10509_v13 }
 0x9d5   : > { %v5381_v44 = vmul.f32 %v6762_v18, %v5380_v5  ;;  %v5177_v18 = vand.u32 2147483648, %v10469_v51  ;;  %v5257_v26 = vmul.f32 %v10537_v59, %v10501_v60  ;;  %vm5262_vm10 = vweird.f32 %v10537_v59  ;;  %vm10584_vm0 = vmor %vm5246_vm9, %vm5247_vm7 }
 0x9d6   : > { %v10519_v62 = vpop.xlane.xlu1 %5105  ;;  %v5243_v9 = vsub.f32 1.0, %v5242_v40  ;;  %vm10618_vm7 = vcmp.eq.f32.partialorder %v5265_v37, 8.507059e+37  ;;  %vm10624_vm9 = vmor %vm5261_vm5, %vm5262_vm10 }
 0x9d7   : > { %v5382_v63 = vmul.f32 %v5381_v44, %v10479_v46  ;;  %6767 = vrsqrt.f32 %v10519_v62  ;;  %v5258_v42 = vsub.f32 1.0, %v5257_v26  ;;  %v5267_v44 = vand.u32 2147483648, %v10501_v60 }
 0x9d8   : > { %6769 = vrcp.f32 %v10513_v15  ;;  %v5244_v56 = vmul.f32 %v10509_v13, %v5243_v9  ;;  %vm5198_vm13 = vcmp.eq.f32.partialorder %v10519_v62, inf  ;;  %vm5200_vm1 = vcmp.eq.f32.partialorder %v10519_v62, 0.0 }
 0x9d9   : > { %v5384_v27 = vsel %vm5383_vm12, %v10479_v46, %v5382_v63  ;;  %v5175_v46 = vsel %vm5174_vm14, %v10469_v51, %v5173_v47  ;;  %v5259_v34 = vmul.f32 %v10537_v59, %v5258_v42  ;;  %v5201_v36 = vand.u32 2147483648, %v10519_v62 }
 0x9da   : > { %v5387_v3 = vsel %vm5385_vm15, %v5386_v21, %v5384_v27  ;;  %v5178_v7 = vsel %vm5176_vm3, %v5177_v18, %v5175_v46  ;;  %v5245_v25 = vadd.f32 %v10509_v13, %v5244_v56  ;;  %v5253_v21 = vor.u32 1.1754944e-38, %v5252_v61 }
 0x9db   : > { %v10544_v14 = vmax.f32 %v5387_v3, 1e-05  ;;  %v10567_v51 = vmax.f32 %v5178_v7, 1e-05  ;;  %vm5340_vm15 = vcmp.gt.f32.partialorder %v10472_v53, 0.999  ;;  %v5260_v10 = vadd.f32 %v10537_v59, %v5259_v34 }
 0x9dc   : > { %v5249_v47 = vsel %vm10584_vm0, %v10509_v13, %v5245_v25  ;;  %vm5251_vm14 = vcmp.eq.f32.partialorder %v5250_v43, 8.507059e+37 }
 0x9dd   : > { %v6768_v29 = vpop.eup %6767  ;;  %6771 = vrcp.f32 %v10544_v14  ;;  %v5402_v45 = vand.u32 2147483648, %v10544_v14  ;;  %v5400_v3 = vand.u32 2147483647, %v10544_v14  ;;  %vm5396_vm6 = vweird.f32 %v10544_v14 }
 0x9de   : > { %v5192_v17 = vmul.f32 %v6768_v29, %v10519_v62  ;;  %v10561_v11 = vpop.eup %6769  ;;  %6773 = vtanh.f32 %v10544_v14  ;;  %v5254_v48 = vsel %vm5251_vm14, %v5253_v21, %v5249_v47  ;;  %v5264_v42 = vsel %vm10624_vm9, %v10537_v59, %v5260_v10 }
 0x9df   : > { %v5272_v19 = vmul.f32 %v10561_v11, %v10513_v15  ;;  %6775 = vrcp.f32 %v10567_v51  ;;  %v5403_v30 = vor.u32 1.1754944e-38, %v5402_v45  ;;  %vm5401_vm3 = vcmp.eq.f32.partialorder %v5400_v3, 8.507059e+37 }
 0x9e0   : > { %v5193_v6 = vmul.f32 %v6768_v29, %v5192_v17  ;;  %6777 = vrcp.f32 %v10565_v4  ;;  %v5255_v41 = vmul.f32 %v5254_v48, %v10415_v23  ;;  %vm5277_vm0 = vweird.f32 %v10561_v11 }
 0x9e1   : > { %v5273_v40 = vsub.f32 1.0, %v5272_v19  ;;  %vm10651_vm10 = vmor %vm5276_vm8, %vm5277_vm0  ;;  %vm5291_vm5 = vweird.f32 %v10567_v51  ;;  %vm5306_vm9 = vweird.f32 %v10565_v4 }
 0x9e2   : > { %v5194_v31 = vmul.f32 0.5, %v5193_v6  ;;  %v5268_v6 = vor.u32 1.1754944e-38, %v5267_v44  ;;  %v5333_v19 = vmul.f32 0.999, %v5255_v41  ;;  %v5295_v41 = vand.u32 2147483647, %v10567_v51 }
 0x9e3   : > { %v6772_v54 = vpop.eup %6771 }
 0x9e4   : > { %v5195_v5 = vsub.f32 1.5, %v5194_v31  ;;  %v5392_v12 = vmul.f32 %v6772_v54, %v10544_v14  ;;  %vm5397_vm12 = vweird.f32 %v6772_v54  ;;  %v6774_v38 = vpop.eup %6773  ;;  %v5332_v14 = vmul.f32 0.999, %v5240_v1 }
 0x9e5   : > { %vm5398_vm2 = vmor %vm5396_vm6, %vm5397_vm12  ;;  %v10603_v8 = vpop.eup %6775  ;;  %v5390_v26 = vmul.f32 %v6774_v38, %v10442_v16  ;;  %v5269_v53 = vsel %vm10618_vm7, %v5268_v6, %v5264_v42  ;;  %vm5296_vm8 = vcmp.eq.f32.partialorder %v5295_v41, 8.507059e+37 }
 0x9e6   : > { %v5196_v55 = vmul.f32 %v6768_v29, %v5195_v5  ;;  %v5393_v0 = vsub.f32 1.0, %v5392_v12  ;;  %v5274_v29 = vmul.f32 %v10561_v11, %v5273_v40  ;;  %v5287_v49 = vmul.f32 %v10603_v8, %v10567_v51 }
 0x9e7   : > { %v10642_v31 = vsel %vm5340_vm15, %v5332_v14, %v10251_v52  ;;  %v5280_v52 = vand.u32 2147483647, %v10513_v15  ;;  %v5270_v47 = vmul.f32 %v5269_v53, %v10287_v32  ;;  %vm5342_vm15 = vcmp.gt.f32.partialorder %v10501_v60, 0.999 }
 0x9e8   : > { %v5197_v27 = vmul.f32 %v5196_v55, %v10519_v62  ;;  %v5394_v20 = vmul.f32 %v6772_v54, %v5393_v0  ;;  %v5275_v35 = vadd.f32 %v10561_v11, %v5274_v29  ;;  %v5288_v1 = vsub.f32 1.0, %v5287_v49 }
 0x9e9   : > { %v5406_v0 = vmul.f32 %v10616_v39, %v10616_v39  ;;  %v5407_v45 = vmul.f32 %v10642_v31, %v10642_v31  ;;  %vm5281_vm12 = vcmp.eq.f32.partialorder %v5280_v52, 8.507059e+37  ;;  %v5334_v48 = vmul.f32 0.999, %v5270_v47 }
 0x9ea   : > { %v5199_v9 = vsel %vm5198_vm13, %v10519_v62, %v5197_v27  ;;  %v5395_v13 = vadd.f32 %v6772_v54, %v5394_v20  ;;  %v10608_v62 = vpop.eup %6777  ;;  %v5279_v12 = vsel %vm10651_vm10, %v10561_v11, %v5275_v35  ;;  %v5289_v27 = vmul.f32 %v10603_v8, %v5288_v1 }
 0x9eb   : > { %v5202_v46 = vsel %vm5200_vm1, %v5201_v36, %v5199_v9  ;;  %v5302_v37 = vmul.f32 %v10608_v62, %v10565_v4  ;;  %v5414_v38 = vsel %vm4538_vm11, %v5406_v0, 0.0  ;;  %vm5307_vm1 = vweird.f32 %v10608_v62 }
 0x9ec   : > { %v10605_v18 = vmax.f32 %v5202_v46, 1e-05  ;;  %v5399_v17 = vsel %vm5398_vm2, %v6772_v54, %v5395_v13  ;;  %v5282_v54 = vand.u32 2147483648, %v10513_v15  ;;  %v5417_v13 = vsel %vm4538_vm11, %v5407_v45, 0.0  ;;  %vm10716_vm0 = vmor %vm5306_vm9, %vm5307_vm1 }
 0x9ed   : > { %v5404_v22 = vsel %vm5401_vm3, %v5403_v30, %v5399_v17  ;;  %v5303_v55 = vsub.f32 1.0, %v5302_v37  ;;  %v5290_v10 = vadd.f32 %v10603_v8, %v5289_v27  ;;  %vm5292_vm6 = vweird.f32 %v10603_v8 }
 0x9ee   : > { %6779 = vrcp.f32 %v10605_v18  ;;  %v5405_v7 = vmul.f32 %v5404_v22, %v5390_v26  ;;  %v5283_v11 = vor.u32 1.1754944e-38, %v5282_v54  ;;  %v5325_v9 = vand.u32 2147483647, %v10605_v18  ;;  %vm10701_vm7 = vmor %vm5291_vm5, %vm5292_vm6 }
 0x9ef   : > { %v5304_v3 = vmul.f32 %v10608_v62, %v5303_v55  ;;  %vm5321_vm14 = vweird.f32 %v10605_v18  ;;  %v5297_v17 = vand.u32 2147483648, %v10567_v51  ;;  %v10697_v16 = vsel %vm5342_vm15, %v5334_v48, %v10287_v32 }
 0x9f0   : > { %v5438_v50 = vmul.f32 %v5405_v7, %v5405_v7  ;;  %v10632_v58 = vperm.slane %v5405_v7, 0  ;;  %vm5326_vm3 = vcmp.eq.f32.partialorder %v5325_v9, 8.507059e+37  ;;  %v5312_v35 = vand.u32 2147483648, %v10565_v4 }
 0x9f1   : > { %v5305_v22 = vadd.f32 %v10608_v62, %v5304_v3  ;;  %v5310_v32 = vand.u32 2147483647, %v10565_v4  ;;  %v5298_v42 = vor.u32 1.1754944e-38, %v5297_v17  ;;  %vm5346_vm10 = vcmp.gt.f32.partialorder %v10605_v18, 0.999 }
 0x9f2   : > { %v5439_v25 = vsel %vm5372_vm4, %v5438_v50, 0.0  ;;  %v5444_v61 = vmul.f32 %v10632_v58, %v10642_v31  ;;  %v5443_v59 = vmul.f32 %v10632_v58, %v10616_v39  ;;  %vm5341_vm4 = vcmp.gt.f32.partialorder %v10491_v33, 0.999 }
 0x9f3   : > { %5440 = vadd.xlane.f32.xlu0 %v5439_v25  ;;  %v10667_v63 = vsel %vm5341_vm4, %v5333_v19, %v10415_v23  ;;  %v5284_v33 = vsel %vm5281_vm12, %v5283_v11, %v5279_v12  ;;  %v5327_v23 = vand.u32 2147483648, %v10605_v18  ;;  %v5294_v50 = vsel %vm10701_vm7, %v10603_v8, %v5290_v10 }
 0x9f4   : > { %v6780_v44 = vpop.eup %6779  ;;  %v5454_v43 = vsel %vm4538_vm11, %v5444_v61, 0.0  ;;  %v5451_v34 = vsel %vm4538_vm11, %v5443_v59, 0.0  ;;  %v5408_v20 = vmul.f32 %v10667_v63, %v10667_v63  ;;  %v5285_v46 = vmul.f32 %v5284_v33, %v10318_v24 }
 0x9f5   : > { %5455 = vadd.xlane.f32.xlu2 %v5454_v43  ;;  %5452 = vadd.xlane.f32.xlu1 %v5451_v34  ;;  %v5317_v40 = vmul.f32 %v6780_v44, %v10605_v18  ;;  %vm5322_vm13 = vweird.f32 %v6780_v44  ;;  %v5328_v26 = vor.u32 1.1754944e-38, %v5327_v23  ;;  %v5445_v7 = vmul.f32 %v10632_v58, %v10667_v63 }
 0x9f6   : > { %v5420_v29 = vsel %vm4538_vm11, %v5408_v20, 0.0  ;;  %vm5323_vm2 = vmor %vm5321_vm14, %vm5322_vm13  ;;  %v5446_v60 = vmul.f32 %v10632_v58, %v10697_v16  ;;  %v5335_v54 = vmul.f32 0.999, %v5285_v46  ;;  %v5309_v8 = vsel %vm10716_vm0, %v10608_v62, %v5305_v22 }
 0x9f7   : > { %v5318_v21 = vsub.f32 1.0, %v5317_v40  ;;  %v5457_v25 = vsel %vm4538_vm11, %v5445_v7, 0.0  ;;  %v5299_v61 = vsel %vm5296_vm8, %v5298_v42, %v5294_v50  ;;  %v5313_v59 = vor.u32 1.1754944e-38, %v5312_v35 }
 0x9f8   : > { %vm5311_vm4 = vcmp.eq.f32.partialorder %v5310_v32, 8.507059e+37  ;;  %v5460_v52 = vsel %vm4538_vm11, %v5446_v60, 0.0  ;;  %vm5343_vm12 = vcmp.gt.f32.partialorder %v10513_v15, 0.999  ;;  %v5300_v18 = vmul.f32 %v5299_v61, %v10427_v57 }
 0x9f9   : > { %v5319_v36 = vmul.f32 %v6780_v44, %v5318_v21  ;;  %v5314_v12 = vsel %vm5311_vm4, %v5313_v59, %v5309_v8  ;;  %v10733_v62 = vsel %vm5343_vm12, %v5335_v54, %v10318_v24  ;;  %vm5344_vm15 = vcmp.gt.f32.partialorder %v10567_v51, 0.999 }
 0x9fa   : > { %v5410_v43 = vmul.f32 %v10733_v62, %v10733_v62  ;;  %v5336_v34 = vmul.f32 0.999, %v5300_v18  ;;  %v5447_v24 = vmul.f32 %v10632_v58, %v10733_v62  ;;  %vm5345_vm13 = vcmp.gt.f32.partialorder %v10565_v4, 0.999 }
 0x9fb   : > { %5415 = vadd.xlane.f32.xlu0 %v5414_v38  ;;  %v5320_v30 = vadd.f32 %v6780_v44, %v5319_v36 }
 0x9fc   : > { %v5426_v0 = vsel %vm4538_vm11, %v5410_v43, 0.0  ;;  %v10748_v40 = vsel %vm5344_vm15, %v5336_v34, %v10427_v57  ;;  %v5463_v11 = vsel %vm4538_vm11, %v5447_v24, 0.0 }
 0x9fd   : > { %5421 = vadd.xlane.f32.xlu2 %v5420_v29  ;;  %5418 = vadd.xlane.f32.xlu1 %v5417_v13  ;;  %v5324_v14 = vsel %vm5323_vm2, %v6780_v44, %v5320_v30  ;;  %v5315_v44 = vmul.f32 %v5314_v12, %v10370_v2  ;;  %v5448_v45 = vmul.f32 %v10632_v58, %v10748_v40 }
 0x9fe   : > { %v5329_v56 = vsel %vm5326_vm3, %v5328_v26, %v5324_v14  ;;  %v5411_v57 = vmul.f32 %v10748_v40, %v10748_v40 }
 0x9ff   : > { %v5330_v49 = vmul.f32 %v5329_v56, %v10450_v28  ;;  %v5337_v55 = vmul.f32 0.999, %v5315_v44  ;;  %v5466_v51 = vsel %vm4538_vm11, %v5448_v45, 0.0 }
 0xa00   : > { %v5429_v27 = vsel %vm4538_vm11, %v5411_v57, 0.0 }
 0xa01   : > { %v5338_v19 = vmul.f32 0.999, %v5330_v49  ;;  %v10755_v47 = vsel %vm5345_vm13, %v5337_v55, %v10370_v2 }
 0xa02   : > { %v5449_v21 = vmul.f32 %v10632_v58, %v10755_v47  ;;  %v5412_v4 = vmul.f32 %v10755_v47, %v10755_v47 }
 0xa03   : > { %5458 = vadd.xlane.f32.xlu0 %v5457_v25  ;;  %v10726_v5 = vsel %vm5346_vm10, %v5338_v19, %v10450_v28  ;;  %v5409_v28 = vmul.f32 %v10697_v16, %v10697_v16 }
 0xa04   : > { %v5450_v53 = vmul.f32 %v10632_v58, %v10726_v5  ;;  %v5469_v33 = vsel %vm4538_vm11, %v5449_v21, 0.0  ;;  %v5413_v2 = vmul.f32 %v10726_v5, %v10726_v5  ;;  %v5432_v20 = vsel %vm4538_vm11, %v5412_v4, 0.0 }
 0xa05   : > { %5461 = vadd.xlane.f32.xlu1 %v5460_v52  ;;  %v5423_v15 = vsel %vm4538_vm11, %v5409_v28, 0.0 }
 0xa06   : > { %v5472_v1 = vsel %vm4538_vm11, %v5450_v53, 0.0  ;;  %v5435_v23 = vsel %vm4538_vm11, %v5413_v2, 0.0 }
 0xa07   : > { %5473 = vadd.xlane.f32.xlu2 %v5472_v1 }
 0xa0b   : > { %5424 = vadd.xlane.f32.xlu0 %v5423_v15 }
 0xa0d   : > { %5427 = vadd.xlane.f32.xlu1 %v5426_v0 }
 0xa0f   : > { %5464 = vadd.xlane.f32.xlu2 %v5463_v11 }
 0xa13   : > { %5467 = vadd.xlane.f32.xlu0 %v5466_v51 }
 0xa15   : > { %5470 = vadd.xlane.f32.xlu1 %v5469_v33 }
 0xa17   : > { %5430 = vadd.xlane.f32.xlu2 %v5429_v27 }
 0xa1b   : > { %5433 = vadd.xlane.f32.xlu0 %v5432_v20 }
 0xa1d   : > { %5436 = vadd.xlane.f32.xlu1 %v5435_v23 }
 0xa66   : > { %v5441_v3 = vpop.xlane.xlu0 %5440 }
 0xa67   : > { %v10770_v13 = vperm.slane %v5441_v3, 0 }
 0xa68   : > { %v5456_v38 = vpop.xlane.xlu2 %5455  ;;  %v5453_v36 = vpop.xlane.xlu1 %5452 }
 0xa69   : > { %v5475_v9 = vmul.f32 2.0, %v5453_v36  ;;  %v5476_v48 = vmul.f32 2.0, %v5456_v38 }
 0xa6b   : > { %v5483_v30 = vadd.f32 1.0, %v5475_v9  ;;  %v5484_v17 = vadd.f32 1.0, %v5476_v48 }
 0xa6d   : > { %v5492_v50 = vadd.f32 %v10770_v13, %v5483_v30  ;;  %v5493_v60 = vadd.f32 %v10770_v13, %v5484_v17 }
 0xa6e   : > { %v5416_v46 = vpop.xlane.xlu0 %5415 }
 0xa6f   : > { %v5532_v10 = vmul.f32 %v10770_v13, %v5416_v46  ;;  %v5508_v56 = vsub.f32 1.0, %v5416_v46  ;;  %v5500_v59 = vmul.f32 %v5492_v50, %v10616_v39  ;;  %v5501_v12 = vmul.f32 %v5493_v60, %v10642_v31 }
 0xa70   : > { %v5419_v29 = vpop.xlane.xlu1 %5418  ;;  %v10773_v22 = vpop.xlane.xlu2 %5421 }
 0xa71   : > { %v5540_v26 = vadd.f32 %v5532_v10, %v5483_v30  ;;  %v5533_v14 = vmul.f32 %v10770_v13, %v5419_v29  ;;  %v5534_v42 = vmul.f32 %v10770_v13, %v10773_v22  ;;  %v5509_v37 = vsub.f32 1.0, %v5419_v29 }
 0xa72   : > { %v5516_v54 = vmul.f32 %v5508_v56, %v10632_v58  ;;  %v5510_v24 = vsub.f32 1.0, %v10773_v22 }
 0xa73   : > { %v5548_v41 = vadd.f32 1e-05, %v5540_v26  ;;  %v5541_v7 = vadd.f32 %v5533_v14, %v5484_v17  ;;  %v5517_v1 = vmul.f32 %v5509_v37, %v10632_v58 }
 0xa74   : > { %v5524_v43 = vadd.f32 %v5516_v54, %v5500_v59  ;;  %v10814_v60 = vmul.f32 %v5510_v24, %v10632_v58 }
 0xa75   : > { %6781 = vrcp.f32 %v5548_v41  ;;  %v5549_v6 = vadd.f32 1e-05, %v5541_v7  ;;  %v5565_v18 = vand.u32 2147483647, %v5548_v41  ;;  %v5567_v15 = vand.u32 2147483648, %v5548_v41 }
 0xa76   : > { %v5459_v35 = vpop.xlane.xlu0 %5458  ;;  %vm5561_vm1 = vweird.f32 %v5548_v41  ;;  %v5525_v57 = vadd.f32 %v5517_v1, %v5501_v12 }
 0xa77   : > { %v5477_v49 = vmul.f32 2.0, %v5459_v35  ;;  %6783 = vrcp.f32 %v5549_v6  ;;  %v5580_v11 = vand.u32 2147483647, %v5549_v6  ;;  %v5582_v31 = vand.u32 2147483648, %v5549_v6 }
 0xa78   : > { %v5462_v32 = vpop.xlane.xlu1 %5461  ;;  %vm10788_vm6 = vcmp.eq.f32.partialorder %v5565_v18, 8.507059e+37  ;;  %v5568_v2 = vor.u32 1.1754944e-38, %v5567_v15  ;;  %vm5576_vm2 = vweird.f32 %v5549_v6 }
 0xa79   : > { %v5485_v19 = vadd.f32 1.0, %v5477_v49  ;;  %v5478_v53 = vmul.f32 2.0, %v5462_v32  ;;  %vm10794_vm7 = vcmp.eq.f32.partialorder %v5580_v11, 8.507059e+37  ;;  %v5583_v46 = vor.u32 1.1754944e-38, %v5582_v31 }
 0xa7a   : > { %v5474_v8 = vpop.xlane.xlu2 %5473 }
 0xa7b   : > { %v6782_v25 = vpop.eup %6781  ;;  %v5542_v61 = vadd.f32 %v5534_v42, %v5485_v19  ;;  %v5486_v45 = vadd.f32 1.0, %v5478_v53  ;;  %v5482_v7 = vmul.f32 2.0, %v5474_v8 }
 0xa7c   : > { %v5557_v52 = vmul.f32 %v6782_v25, %v5548_v41  ;;  %vm5562_vm14 = vweird.f32 %v6782_v25  ;;  %v5494_v41 = vadd.f32 %v10770_v13, %v5485_v19 }
 0xa7d   : > { %v10784_v28 = vadd.f32 1e-05, %v5542_v61  ;;  %v6784_v44 = vpop.eup %6783  ;;  %vm5563_vm5 = vmor %vm5561_vm1, %vm5562_vm14  ;;  %v5495_v30 = vadd.f32 %v10770_v13, %v5486_v45  ;;  %v10826_v59 = vadd.f32 1.0, %v5482_v7 }
 0xa7e   : > { %v5558_v34 = vsub.f32 1.0, %v5557_v52  ;;  %v5425_v55 = vpop.xlane.xlu0 %5424  ;;  %v5572_v0 = vmul.f32 %v6784_v44, %v5549_v6  ;;  %vm5577_vm3 = vweird.f32 %v6784_v44  ;;  %v10824_v61 = vmul.f32 %v5494_v41, %v10667_v63 }
 0xa7f   : > { %6785 = vrcp.f32 %v10784_v28  ;;  %v5535_v27 = vmul.f32 %v10770_v13, %v5425_v55  ;;  %v5511_v3 = vsub.f32 1.0, %v5425_v55  ;;  %vm5578_vm9 = vmor %vm5576_vm2, %vm5577_vm3  ;;  %v5503_v54 = vmul.f32 %v5495_v30, %v10697_v16 }
 0xa80   : > { %v5559_v39 = vmul.f32 %v6782_v25, %v5558_v34  ;;  %v5428_v21 = vpop.xlane.xlu1 %5427  ;;  %v5573_v33 = vsub.f32 1.0, %v5572_v0  ;;  %vm5591_vm0 = vweird.f32 %v10784_v28  ;;  %v5595_v11 = vand.u32 2147483647, %v10784_v28 }
 0xa81   : > { %v5543_v38 = vadd.f32 %v5535_v27, %v5486_v45  ;;  %v5512_v56 = vsub.f32 1.0, %v5428_v21  ;;  %v5519_v50 = vmul.f32 %v5511_v3, %v10632_v58  ;;  %v5536_v32 = vmul.f32 %v10770_v13, %v5428_v21 }
 0xa82   : > { %v5560_v4 = vadd.f32 %v6782_v25, %v5559_v39  ;;  %v5465_v20 = vpop.xlane.xlu2 %5464  ;;  %v5574_v23 = vmul.f32 %v6784_v44, %v5573_v33  ;;  %v5597_v21 = vand.u32 2147483648, %v10784_v28  ;;  %vm10863_vm12 = vcmp.eq.f32.partialorder %v5595_v11, 8.507059e+37 }
 0xa83   : > { %v5479_v36 = vmul.f32 2.0, %v5465_v20  ;;  %v10803_v17 = vadd.f32 1e-05, %v5543_v38  ;;  %v10829_v52 = vmul.f32 %v5512_v56, %v10632_v58  ;;  %v10833_v18 = vadd.f32 %v5519_v50, %v5503_v54 }
 0xa84   : > { %v5564_v9 = vsel %vm5563_vm5, %v6782_v25, %v5560_v4  ;;  %v5575_v26 = vadd.f32 %v6784_v44, %v5574_v23 }
 0xa85   : > { %v10799_v10 = vpop.eup %6785  ;;  %v5569_v29 = vsel %vm10788_vm6, %v5568_v2, %v5564_v9  ;;  %v5487_v22 = vadd.f32 1.0, %v5479_v36  ;;  %6787 = vrcp.f32 %v10803_v17  ;;  %v5610_v55 = vand.u32 2147483647, %v10803_v17 }
 0xa86   : > { %v10805_v14 = vmul.f32 %v5569_v29, %v5524_v43  ;;  %v5468_v35 = vpop.xlane.xlu0 %5467  ;;  %v5579_v49 = vsel %vm5578_vm9, %v6784_v44, %v5575_v26  ;;  %v5587_v6 = vmul.f32 %v10799_v10, %v10784_v28  ;;  %vm5592_vm8 = vweird.f32 %v10799_v10 }
 0xa87   : > { %v5584_v42 = vsel %vm10794_vm7, %v5583_v46, %v5579_v49  ;;  %v5544_v8 = vadd.f32 %v5536_v32, %v5487_v22  ;;  %v5480_v25 = vmul.f32 2.0, %v5468_v35  ;;  %v5612_v51 = vand.u32 2147483648, %v10803_v17  ;;  %vm5593_vm13 = vmor %vm5591_vm0, %vm5592_vm8 }
 0xa88   : > { %v5471_v37 = vpop.xlane.xlu1 %5470  ;;  %v10820_v19 = vmul.f32 %v5584_v42, %v5525_v57  ;;  %v5676_v12 = vmul.f32 %v10805_v14, %v10805_v14  ;;  %v5588_v63 = vsub.f32 1.0, %v5587_v6  ;;  %v5496_v57 = vadd.f32 %v10770_v13, %v5487_v22 }
 0xa89   : > { %v10835_v1 = vadd.f32 1e-05, %v5544_v8  ;;  %v5488_v44 = vadd.f32 1.0, %v5480_v25  ;;  %v5481_v43 = vmul.f32 2.0, %v5471_v37  ;;  %vm5606_vm10 = vweird.f32 %v10803_v17 }
 0xa8a   : > { %v5431_v53 = vpop.xlane.xlu2 %5430  ;;  %v5684_v34 = vsel %vm4538_vm11, %v5676_v12, 0.0  ;;  %v5677_v15 = vmul.f32 %v10820_v19, %v10820_v19  ;;  %v5589_v3 = vmul.f32 %v10799_v10, %v5588_v63  ;;  %vm10858_vm4 = vcmp.eq.f32.partialorder %v5610_v55, 8.507059e+37 }
 0xa8b   : > { %v5537_v16 = vmul.f32 %v10770_v13, %v5431_v53  ;;  %v6788_v24 = vpop.eup %6787  ;;  %6789 = vrcp.f32 %v10835_v1  ;;  %5685 = vadd.xlane.f32.xlu2 %v5684_v34  ;;  %v5489_v2 = vadd.f32 1.0, %v5481_v43  ;;  %v5513_v20 = vsub.f32 1.0, %v5431_v53 }
 0xa8c   : > { %v5602_v39 = vmul.f32 %v6788_v24, %v10803_v17  ;;  %v5687_v31 = vsel %vm4538_vm11, %v5677_v15, 0.0  ;;  %vm5607_vm15 = vweird.f32 %v6788_v24  ;;  %v5497_v48 = vadd.f32 %v10770_v13, %v5488_v44 }
 0xa8d   : > { %v5545_v0 = vadd.f32 %v5537_v16, %v5488_v44  ;;  %5688 = vadd.xlane.f32.xlu0 %v5687_v31  ;;  %v5613_v29 = vor.u32 1.1754944e-38, %v5612_v51  ;;  %v5504_v26 = vmul.f32 %v5496_v57, %v10733_v62  ;;  %v5590_v41 = vadd.f32 %v10799_v10, %v5589_v3  ;;  %vm5608_vm1 = vmor %vm5606_vm10, %vm5607_vm15 }
 0xa8e   : > { %v5434_v45 = vpop.xlane.xlu0 %5433  ;;  %v5603_v4 = vsub.f32 1.0, %v5602_v39  ;;  %v5521_v35 = vmul.f32 %v5513_v20, %v10632_v58  ;;  %v5598_v49 = vor.u32 1.1754944e-38, %v5597_v21  ;;  %v5498_v62 = vadd.f32 %v10770_v13, %v5489_v2 }
 0xa8f   : > { %v10851_v33 = vadd.f32 1e-05, %v5545_v0  ;;  %v5538_v27 = vmul.f32 %v10770_v13, %v5434_v45  ;;  %v5594_v42 = vsel %vm5593_vm13, %v10799_v10, %v5590_v41  ;;  %v5505_v54 = vmul.f32 %v5497_v48, %v10748_v40 }
 0xa90   : > { %v10854_v23 = vpop.xlane.xlu1 %5436  ;;  %v5604_v9 = vmul.f32 %v6788_v24, %v5603_v4  ;;  %v5599_v28 = vsel %vm10863_vm12, %v5598_v49, %v5594_v42  ;;  %v5526_v17 = vadd.f32 %v10814_v60, %v10824_v61  ;;  %v5514_v53 = vsub.f32 1.0, %v5434_v45 }
 0xa91   : > { %6791 = vrcp.f32 %v10851_v33  ;;  %v5546_v46 = vadd.f32 %v5538_v27, %v5489_v2  ;;  %v10868_v30 = vpop.eup %6789  ;;  %v5539_v22 = vmul.f32 %v10770_v13, %v10854_v23  ;;  %v10898_v10 = vadd.f32 %v10770_v13, %v10826_v59 }
 0xa92   : > { %v5605_v7 = vadd.f32 %v6788_v24, %v5604_v9  ;;  %v5617_v56 = vmul.f32 %v10868_v30, %v10835_v1  ;;  %v5528_v40 = vadd.f32 %v10829_v52, %v5504_v26  ;;  %v5506_v16 = vmul.f32 %v5498_v62, %v10755_v47 }
 0xa93   : > { %v10884_v50 = vadd.f32 1e-05, %v5546_v46  ;;  %v5547_v32 = vadd.f32 %v5539_v22, %v10826_v59  ;;  %v5640_v60 = vand.u32 2147483647, %v10851_v33  ;;  %v10909_v63 = vmul.f32 %v5599_v28, %v5526_v17 }
 0xa94   : > { %v5609_v6 = vsel %vm5608_vm1, %v6788_v24, %v5605_v7  ;;  %v5618_v37 = vsub.f32 1.0, %v5617_v56  ;;  %v5529_v43 = vadd.f32 %v5521_v35, %v5505_v54  ;;  %v5642_v52 = vand.u32 2147483648, %v10851_v33 }
 0xa95   : > { %v5614_v25 = vsel %vm10858_vm4, %v5613_v29, %v5609_v6  ;;  %6793 = vrcp.f32 %v10884_v50  ;;  %v10907_v61 = vadd.f32 1e-05, %v5547_v32  ;;  %v5678_v15 = vmul.f32 %v10909_v63, %v10909_v63 }
 0xa96   : > { %v10901_v12 = vmul.f32 %v5614_v25, %v10833_v18  ;;  %v5619_v59 = vmul.f32 %v10868_v30, %v5618_v37  ;;  %v5522_v18 = vmul.f32 %v5514_v53, %v10632_v58  ;;  %vm5636_vm6 = vweird.f32 %v10851_v33 }
 0xa97   : > { %v6792_v8 = vpop.eup %6791  ;;  %6795 = vrcp.f32 %v10907_v61  ;;  %vm10922_vm2 = vcmp.eq.f32.partialorder %v5640_v60, 8.507059e+37  ;;  %vm5621_vm3 = vweird.f32 %v10835_v1  ;;  %vm5622_vm5 = vweird.f32 %v10868_v30 }
 0xa98   : > { %v5632_v44 = vmul.f32 %v6792_v8, %v10851_v33  ;;  %v5679_v13 = vmul.f32 %v10901_v12, %v10901_v12  ;;  %vm5637_vm14 = vweird.f32 %v6792_v8  ;;  %v5620_v55 = vadd.f32 %v10868_v30, %v5619_v59  ;;  %vm10938_vm9 = vmor %vm5621_vm3, %vm5622_vm5 }
 0xa99   : > { %vm10929_vm7 = vmor %vm5636_vm6, %vm5637_vm14  ;;  %v5690_v21 = vsel %vm4538_vm11, %v5678_v15, 0.0  ;;  %v5625_v51 = vand.u32 2147483647, %v10835_v1  ;;  %v5643_v57 = vor.u32 1.1754944e-38, %v5642_v52  ;;  %v5655_v33 = vand.u32 2147483647, %v10884_v50 }
 0xa9a   : > { %v5633_v34 = vsub.f32 1.0, %v5632_v44  ;;  %v5693_v24 = vsel %vm4538_vm11, %v5679_v13, 0.0  ;;  %v5515_v27 = vsub.f32 1.0, %v10854_v23  ;;  %5691 = vadd.xlane.f32.xlu1 %v5690_v21  ;;  %v5627_v2 = vand.u32 2147483648, %v10835_v1 }
 0xa9b   : > { %v6794_v0 = vpop.eup %6793  ;;  %5694 = vadd.xlane.f32.xlu2 %v5693_v24  ;;  %v5530_v3 = vadd.f32 %v5522_v18, %v5506_v16  ;;  %v5624_v36 = vsel %vm10938_vm9, %v10868_v30, %v5620_v55  ;;  %v5657_v48 = vand.u32 2147483648, %v10884_v50  ;;  %vm5626_vm8 = vcmp.eq.f32.partialorder %v5625_v51, 8.507059e+37 }
 0xa9c   : > { %v5634_v47 = vmul.f32 %v6792_v8, %v5633_v34  ;;  %v5647_v45 = vmul.f32 %v6794_v0, %v10884_v50  ;;  %vm5652_vm0 = vweird.f32 %v6794_v0  ;;  %v5628_v46 = vor.u32 1.1754944e-38, %v5627_v2 }
 0xa9d   : > { %v6796_v9 = vpop.eup %6795  ;;  %vm5651_vm10 = vweird.f32 %v10884_v50  ;;  %vm10955_vm4 = vcmp.eq.f32.partialorder %v5655_v33, 8.507059e+37  ;;  %v5523_v30 = vmul.f32 %v5515_v27, %v10632_v58  ;;  %v5658_v62 = vor.u32 1.1754944e-38, %v5657_v48 }
 0xa9e   : > { %v5635_v39 = vadd.f32 %v6792_v8, %v5634_v47  ;;  %v5648_v38 = vsub.f32 1.0, %v5647_v45  ;;  %v5662_v26 = vmul.f32 %v6796_v9, %v10907_v61  ;;  %v5629_v41 = vsel %vm5626_vm8, %v5628_v46, %v5624_v36  ;;  %vm5653_vm12 = vmor %vm5651_vm10, %vm5652_vm0 }
 0xa9f   : > { %v10960_v35 = vmul.f32 %v5629_v41, %v5528_v40  ;;  %vm5667_vm15 = vweird.f32 %v6796_v9  ;;  %v5670_v50 = vand.u32 2147483647, %v10907_v61  ;;  %v5672_v32 = vand.u32 2147483648, %v10907_v61 }
 0xaa0   : > { %v5639_v20 = vsel %vm10929_vm7, %v6792_v8, %v5635_v39  ;;  %v5649_v1 = vmul.f32 %v6794_v0, %v5648_v38  ;;  %v5663_v56 = vsub.f32 1.0, %v5662_v26  ;;  %v5507_v54 = vmul.f32 %v10898_v10, %v10726_v5 }
 0xaa1   : > { %v5644_v23 = vsel %vm10922_vm2, %v5643_v57, %v5639_v20  ;;  %v5680_v58 = vmul.f32 %v10960_v35, %v10960_v35  ;;  %vm5666_vm13 = vweird.f32 %v10907_v61  ;;  %v5673_v53 = vor.u32 1.1754944e-38, %v5672_v32 }
 0xaa2   : > { %v10951_v29 = vmul.f32 %v5644_v23, %v5529_v43  ;;  %v5650_v7 = vadd.f32 %v6794_v0, %v5649_v1  ;;  %v5664_v6 = vmul.f32 %v6796_v9, %v5663_v56  ;;  %vm5668_vm1 = vmor %vm5666_vm13, %vm5667_vm15  ;;  %v5531_v40 = vadd.f32 %v5523_v30, %v5507_v54 }
 0xaa3   : > { %v5696_v25 = vsel %vm4538_vm11, %v5680_v58, 0.0  ;;  %vm5671_vm14 = vcmp.eq.f32.partialorder %v5670_v50, 8.507059e+37 }
 0xaa4   : > { %v5681_v49 = vmul.f32 %v10951_v29, %v10951_v29  ;;  %v5654_v42 = vsel %vm5653_vm12, %v6794_v0, %v5650_v7  ;;  %v5665_v17 = vadd.f32 %v6796_v9, %v5664_v6  ;;  %5697 = vadd.xlane.f32.xlu0 %v5696_v25 }
 0xaa5   : > { %v5659_v28 = vsel %vm10955_vm4, %v5658_v62, %v5654_v42 }
 0xaa6   : > { %v5699_v37 = vsel %vm4538_vm11, %v5681_v49, 0.0  ;;  %v10974_v8 = vmul.f32 %v5659_v28, %v5530_v3  ;;  %v5669_v44 = vsel %vm5668_vm1, %v6796_v9, %v5665_v17 }
 0xaa7   : > { %5700 = vadd.xlane.f32.xlu1 %v5699_v37  ;;  %v5674_v10 = vsel %vm5671_vm14, %v5673_v53, %v5669_v44 }
 0xaa8   : > { %v5682_v5 = vmul.f32 %v10974_v8, %v10974_v8  ;;  %v10980_v16 = vmul.f32 %v5674_v10, %v5531_v40 }
 0xaaa   : > { %v5702_v60 = vsel %vm4538_vm11, %v5682_v5, 0.0  ;;  %v5683_v61 = vmul.f32 %v10980_v16, %v10980_v16 }
 0xaab   : > { %5703 = vadd.xlane.f32.xlu2 %v5702_v60 }
 0xaac   : > { %v5705_v43 = vsel %vm4538_vm11, %v5683_v61, 0.0 }
 0xaad   : > { %5706 = vadd.xlane.f32.xlu0 %v5705_v43 }
 0xafe   : > { %v5686_v34 = vpop.xlane.xlu2 %5685 }
 0xaff   : > { %6797 = vrsqrt.f32 %v5686_v34  ;;  %vm5715_vm6 = vcmp.eq.f32.partialorder %v5686_v34, inf  ;;  %v5718_v33 = vand.u32 2147483648, %v5686_v34  ;;  %vm5717_vm2 = vcmp.eq.f32.partialorder %v5686_v34, 0.0 }
 0xb00   : > { %v5689_v13 = vpop.xlane.xlu0 %5688 }
 0xb01   : > { %6799 = vrsqrt.f32 %v5689_v13  ;;  %vm5727_vm3 = vcmp.eq.f32.partialorder %v5689_v13, inf  ;;  %v5730_v20 = vand.u32 2147483648, %v5689_v13  ;;  %vm5729_vm5 = vcmp.eq.f32.partialorder %v5689_v13, 0.0 }
 0xb05   : > { %v6798_v59 = vpop.eup %6797 }
 0xb06   : > { %v5709_v52 = vmul.f32 %v6798_v59, %v5686_v34 }
 0xb07   : > { %v6800_v18 = vpop.eup %6799 }
 0xb08   : > { %v5710_v47 = vmul.f32 %v6798_v59, %v5709_v52  ;;  %v5721_v15 = vmul.f32 %v6800_v18, %v5689_v13 }
 0xb0a   : > { %v5711_v24 = vmul.f32 0.5, %v5710_v47  ;;  %v5722_v55 = vmul.f32 %v6800_v18, %v5721_v15 }
 0xb0c   : > { %v5712_v0 = vsub.f32 1.5, %v5711_v24  ;;  %v5723_v11 = vmul.f32 0.5, %v5722_v55 }
 0xb0d   : > { %v10989_v57 = vpop.xlane.xlu1 %5691 }
 0xb0e   : > { %v5713_v39 = vmul.f32 %v6798_v59, %v5712_v0  ;;  %v5724_v31 = vsub.f32 1.5, %v5723_v11  ;;  %v10986_v45 = vpop.xlane.xlu2 %5694  ;;  %vm5739_vm0 = vcmp.eq.f32.partialorder %v10989_v57, inf  ;;  %vm5741_vm8 = vcmp.eq.f32.partialorder %v10989_v57, 0.0 }
 0xb0f   : > { %6801 = vrsqrt.f32 %v10986_v45  ;;  %vm5751_vm7 = vcmp.eq.f32.partialorder %v10986_v45, inf  ;;  %vm5753_vm9 = vcmp.eq.f32.partialorder %v10986_v45, 0.0  ;;  %v5754_v32 = vand.u32 2147483648, %v10986_v45 }
 0xb10   : > { %v5714_v21 = vmul.f32 %v5713_v39, %v5686_v34  ;;  %v5725_v51 = vmul.f32 %v6800_v18, %v5724_v31  ;;  %6803 = vrsqrt.f32 %v10989_v57  ;;  %v5742_v6 = vand.u32 2147483648, %v10989_v57 }
 0xb12   : > { %v5716_v27 = vsel %vm5715_vm6, %v5686_v34, %v5714_v21  ;;  %v5726_v4 = vmul.f32 %v5725_v51, %v5689_v13 }
 0xb13   : > { %v5719_v2 = vsel %vm5717_vm2, %v5718_v33, %v5716_v27 }
 0xb14   : > { %v10992_v3 = vmax.f32 %v5719_v2, 1e-05  ;;  %v5728_v38 = vsel %vm5727_vm3, %v5689_v13, %v5726_v4 }
 0xb15   : > { %v6802_v36 = vpop.eup %6801  ;;  %v5731_v9 = vsel %vm5729_vm5, %v5730_v20, %v5728_v38 }
 0xb16   : > { %6805 = vrcp.f32 %v10992_v3  ;;  %v6804_v23 = vpop.eup %6803  ;;  %v10995_v48 = vmax.f32 %v5731_v9, 1e-05  ;;  %v5745_v46 = vmul.f32 %v6802_v36, %v10986_v45  ;;  %v5821_v22 = vand.u32 2147483647, %v10992_v3 }
 0xb17   : > { %v5733_v1 = vmul.f32 %v6804_v23, %v10989_v57  ;;  %v11003_v7 = vpop.xlane.xlu0 %5697  ;;  %v5823_v56 = vand.u32 2147483648, %v10992_v3  ;;  %vm5817_vm10 = vweird.f32 %v10992_v3  ;;  %vm5940_vm2 = vcmp.gt.f32.partialorder %v10992_v3, 0.999 }
 0xb18   : > { %6807 = vrcp.f32 %v10995_v48  ;;  %v5746_v41 = vmul.f32 %v6802_v36, %v5745_v46  ;;  %vm11016_vm4 = vcmp.eq.f32.partialorder %v5821_v22, 8.507059e+37  ;;  %vm5832_vm12 = vweird.f32 %v10995_v48 }
 0xb19   : > { %v5734_v30 = vmul.f32 %v6804_v23, %v5733_v1  ;;  %v5824_v53 = vor.u32 1.1754944e-38, %v5823_v56  ;;  %v5836_v40 = vand.u32 2147483647, %v10995_v48  ;;  %v5838_v34 = vand.u32 2147483648, %v10995_v48 }
 0xb1a   : > { %v10999_v26 = vpop.xlane.xlu1 %5700  ;;  %v5747_v50 = vmul.f32 0.5, %v5746_v41  ;;  %vm5941_vm3 = vcmp.gt.f32.partialorder %v10995_v48, 0.999  ;;  %vm5763_vm5 = vcmp.eq.f32.partialorder %v11003_v7, inf }
 0xb1b   : > { %6809 = vrsqrt.f32 %v10999_v26  ;;  %v5735_v62 = vmul.f32 0.5, %v5734_v30  ;;  %vm5837_vm6 = vcmp.eq.f32.partialorder %v5836_v40, 8.507059e+37 }
 0xb1c   : > { %6811 = vrsqrt.f32 %v11003_v7  ;;  %v6806_v49 = vpop.eup %6805  ;;  %v5748_v54 = vsub.f32 1.5, %v5747_v50 }
 0xb1d   : > { %v5813_v42 = vmul.f32 %v6806_v49, %v10992_v3  ;;  %v5736_v37 = vsub.f32 1.5, %v5735_v62  ;;  %vm5818_vm15 = vweird.f32 %v6806_v49  ;;  %v5766_v3 = vand.u32 2147483648, %v11003_v7 }
 0xb1e   : > { %v11020_v28 = vpop.xlane.xlu2 %5703  ;;  %v6808_v17 = vpop.eup %6807  ;;  %v5749_v60 = vmul.f32 %v6802_v36, %v5748_v54  ;;  %vm5819_vm1 = vmor %vm5817_vm10, %vm5818_vm15 }
 0xb1f   : > { %v5814_v25 = vsub.f32 1.0, %v5813_v42  ;;  %v5828_v5 = vmul.f32 %v6808_v17, %v10995_v48  ;;  %v5737_v10 = vmul.f32 %v6804_v23, %v5736_v37  ;;  %6813 = vrsqrt.f32 %v11020_v28 }
 0xb20   : > { %v5750_v18 = vmul.f32 %v5749_v60, %v10986_v45  ;;  %v11031_v15 = vpop.xlane.xlu0 %5706  ;;  %vm5833_vm13 = vweird.f32 %v6808_v17  ;;  %vm5787_vm15 = vcmp.eq.f32.partialorder %v11020_v28, inf }
 0xb21   : > { %v6810_v44 = vpop.eup %6809  ;;  %v5815_v43 = vmul.f32 %v6806_v49, %v5814_v25  ;;  %v5829_v59 = vsub.f32 1.0, %v5828_v5  ;;  %v5738_v52 = vmul.f32 %v5737_v10, %v10989_v57  ;;  %6815 = vrsqrt.f32 %v11031_v15  ;;  %vm5834_vm14 = vmor %vm5832_vm12, %vm5833_vm13 }
 0xb22   : > { %v6812_v61 = vpop.eup %6811  ;;  %v5769_v13 = vmul.f32 %v6810_v44, %v10999_v26  ;;  %v5752_v39 = vsel %vm5751_vm7, %v10986_v45, %v5750_v18  ;;  %v5839_v45 = vor.u32 1.1754944e-38, %v5838_v34  ;;  %vm5765_vm7 = vcmp.eq.f32.partialorder %v11003_v7, 0.0 }
 0xb23   : > { %v5757_v47 = vmul.f32 %v6812_v61, %v11003_v7  ;;  %v5816_v24 = vadd.f32 %v6806_v49, %v5815_v43  ;;  %v5830_v0 = vmul.f32 %v6808_v17, %v5829_v59  ;;  %v5740_v11 = vsel %vm5739_vm0, %v10989_v57, %v5738_v52 }
 0xb24   : > { %v5770_v55 = vmul.f32 %v6810_v44, %v5769_v13  ;;  %v5743_v51 = vsel %vm5741_vm8, %v5742_v6, %v5740_v11  ;;  %v5755_v33 = vsel %vm5753_vm9, %v5754_v32, %v5752_v39  ;;  %vm5775_vm9 = vcmp.eq.f32.partialorder %v10999_v26, inf }
 0xb25   : > { %v5758_v31 = vmul.f32 %v6812_v61, %v5757_v47  ;;  %v5820_v21 = vsel %vm5819_vm1, %v6806_v49, %v5816_v24  ;;  %v11046_v4 = vpop.eup %6813  ;;  %v5831_v20 = vadd.f32 %v6808_v17, %v5830_v0  ;;  %v11050_v38 = vmax.f32 %v5743_v51, 1e-05 }
 0xb26   : > { %v5771_v27 = vmul.f32 0.5, %v5770_v55  ;;  %v5825_v2 = vsel %vm11016_vm4, %v5824_v53, %v5820_v21  ;;  %v11052_v36 = vmax.f32 %v5755_v33, 1e-05  ;;  %v5781_v41 = vmul.f32 %v11046_v4, %v11020_v28 }
 0xb27   : > { %v5826_v9 = vmul.f32 %v5825_v2, %v10805_v14  ;;  %v5835_v57 = vsel %vm5834_vm14, %v6808_v17, %v5831_v20  ;;  %6817 = vrcp.f32 %v11050_v38  ;;  %v5759_v23 = vmul.f32 0.5, %v5758_v31  ;;  %v11059_v1 = vpop.eup %6815 }
 0xb28   : > { %v5772_v46 = vsub.f32 1.5, %v5771_v27  ;;  %v5840_v30 = vsel %vm5837_vm6, %v5839_v45, %v5835_v57  ;;  %6819 = vrcp.f32 %v11052_v36  ;;  %v5782_v42 = vmul.f32 %v11046_v4, %v5781_v41 }
 0xb29   : > { %v5932_v22 = vmul.f32 0.999, %v5826_v9  ;;  %v5841_v56 = vmul.f32 %v5840_v30, %v10820_v19  ;;  %v5760_v50 = vsub.f32 1.5, %v5759_v23  ;;  %v5793_v6 = vmul.f32 %v11059_v1, %v11031_v15 }
 0xb2a   : > { %v5773_v32 = vmul.f32 %v6810_v44, %v5772_v46  ;;  %vm5847_vm0 = vweird.f32 %v11050_v38  ;;  %vm5777_vm8 = vcmp.eq.f32.partialorder %v10999_v26, 0.0  ;;  %v5778_v17 = vand.u32 2147483648, %v10999_v26 }
 0xb2b   : > { %v5964_v49 = vsel %vm5940_vm2, %v5932_v22, %v10805_v14  ;;  %v5933_v62 = vmul.f32 0.999, %v5841_v56  ;;  %v5761_v48 = vmul.f32 %v6812_v61, %v5760_v50  ;;  %v5851_v53 = vand.u32 2147483647, %v11050_v38 }
 0xb2c   : > { %5972 = vst.msk [vmem:[%s11066_s20] sm:$0xff] %vm4538_vm11, %v5964_v49  ;;  %v5774_v37 = vmul.f32 %v5773_v32, %v10999_v26  ;;  %v5783_v44 = vmul.f32 0.5, %v5782_v42  ;;  %v5794_v61 = vmul.f32 %v11059_v1, %v5793_v6  ;;  %v5853_v43 = vand.u32 2147483648, %v11050_v38 }
 0xb2d   : > { %v6818_v14 = vpop.eup %6817  ;;  %v5965_v58 = vsel %vm5941_vm3, %v5933_v62, %v10820_v19  ;;  %v5762_v19 = vmul.f32 %v5761_v48, %v11003_v7  ;;  %v5866_v34 = vand.u32 2147483647, %v11052_v36  ;;  %v5868_v47 = vand.u32 2147483648, %v11052_v36 }
 0xb2e   : > { %5973 = vst.msk [vmem:[%s11066_s20 + $0x8] sm:$0xff] %vm4538_vm11, %v5965_v58  ;;  %v5843_v54 = vmul.f32 %v6818_v14, %v11050_v38  ;;  %v6820_v25 = vpop.eup %6819  ;;  %v5776_v40 = vsel %vm5775_vm9, %v10999_v26, %v5774_v37  ;;  %vm5848_vm10 = vweird.f32 %v6818_v14  ;;  %v5784_v11 = vsub.f32 1.5, %v5783_v44 }
 0xb2f   : > { %v5858_v10 = vmul.f32 %v6820_v25, %v11052_v36  ;;  %v5779_v60 = vsel %vm5777_vm8, %v5778_v17, %v5776_v40  ;;  %v5764_v13 = vsel %vm5763_vm5, %v11003_v7, %v5762_v19  ;;  %vm5863_vm4 = vweird.f32 %v6820_v25  ;;  %vm5849_vm12 = vmor %vm5847_vm0, %vm5848_vm10 }
 0xb30   : > { %v5844_v5 = vsub.f32 1.0, %v5843_v54  ;;  %v11102_v59 = vmax.f32 %v5779_v60, 1e-05  ;;  %v5767_v18 = vsel %vm5765_vm7, %v5766_v3, %v5764_v13  ;;  %v5795_v39 = vmul.f32 0.5, %v5794_v61 }
 0xb31   : > { %v5859_v26 = vsub.f32 1.0, %v5858_v10  ;;  %v11107_v24 = vmax.f32 %v5767_v18, 1e-05  ;;  %v5854_v31 = vor.u32 1.1754944e-38, %v5853_v43  ;;  %vm5852_vm13 = vcmp.eq.f32.partialorder %v5851_v53, 8.507059e+37 }
 0xb32   : > { %v5845_v52 = vmul.f32 %v6818_v14, %v5844_v5  ;;  %6821 = vrcp.f32 %v11102_v59  ;;  %vm5862_vm1 = vweird.f32 %v11052_v36  ;;  %vm5867_vm6 = vcmp.eq.f32.partialorder %v5866_v34, 8.507059e+37 }
 0xb33   : > { %v5860_v0 = vmul.f32 %v6820_v25, %v5859_v26  ;;  %6823 = vrcp.f32 %v11107_v24  ;;  %vm5864_vm14 = vmor %vm5862_vm1, %vm5863_vm4  ;;  %v5869_v33 = vor.u32 1.1754944e-38, %v5868_v47  ;;  %vm5789_vm2 = vcmp.eq.f32.partialorder %v11020_v28, 0.0 }
 0xb34   : > { %v5846_v55 = vadd.f32 %v6818_v14, %v5845_v52  ;;  %v5785_v20 = vmul.f32 %v11046_v4, %v5784_v11  ;;  %v5796_v9 = vsub.f32 1.5, %v5795_v39  ;;  %vm5942_vm3 = vcmp.gt.f32.partialorder %v11050_v38, 0.999 }
 0xb35   : > { %v5861_v21 = vadd.f32 %v6820_v25, %v5860_v0  ;;  %v5790_v23 = vand.u32 2147483648, %v11020_v28  ;;  %vm5799_vm5 = vcmp.eq.f32.partialorder %v11031_v15, inf  ;;  %vm5943_vm7 = vcmp.gt.f32.partialorder %v11052_v36, 0.999 }
 0xb36   : > { %v5850_v7 = vsel %vm5849_vm12, %v6818_v14, %v5846_v55  ;;  %v5786_v4 = vmul.f32 %v5785_v20, %v11020_v28  ;;  %v5797_v56 = vmul.f32 %v11059_v1, %v5796_v9  ;;  %vm5801_vm9 = vcmp.eq.f32.partialorder %v11031_v15, 0.0 }
 0xb37   : > { %v5855_v51 = vsel %vm5852_vm13, %v5854_v31, %v5850_v7  ;;  %v5865_v2 = vsel %vm5864_vm14, %v6820_v25, %v5861_v21  ;;  %v5802_v38 = vand.u32 2147483648, %v11031_v15  ;;  %v5896_v32 = vand.u32 2147483647, %v11102_v59 }
 0xb38   : > { %v5856_v27 = vmul.f32 %v5855_v51, %v10909_v63  ;;  %v6822_v45 = vpop.eup %6821  ;;  %v5870_v57 = vsel %vm5867_vm6, %v5869_v33, %v5865_v2  ;;  %v5898_v42 = vand.u32 2147483648, %v11102_v59  ;;  %v5788_v1 = vsel %vm5787_vm15, %v11020_v28, %v5786_v4 }
 0xb39   : > { %v5871_v22 = vmul.f32 %v5870_v57, %v10901_v12  ;;  %v5888_v30 = vmul.f32 %v6822_v45, %v11102_v59  ;;  %v6824_v41 = vpop.eup %6823  ;;  %v5798_v6 = vmul.f32 %v5797_v56, %v11031_v15  ;;  %v5883_v58 = vand.u32 2147483648, %v11107_v24 }
 0xb3a   : > { %v5934_v46 = vmul.f32 0.999, %v5856_v27  ;;  %v5873_v50 = vmul.f32 %v6824_v41, %v11107_v24  ;;  %v5791_v48 = vsel %vm5789_vm2, %v5790_v23, %v5788_v1  ;;  %vm5893_vm0 = vweird.f32 %v6822_v45 }
 0xb3b   : > { %v5935_v62 = vmul.f32 0.999, %v5871_v22  ;;  %v5889_v3 = vsub.f32 1.0, %v5888_v30  ;;  %v11147_v54 = vmax.f32 %v5791_v48, 1e-05  ;;  %v5800_v17 = vsel %vm5799_vm5, %v11031_v15, %v5798_v6 }
 0xb3c   : > { %v5966_v49 = vsel %vm5942_vm3, %v5934_v46, %v10909_v63  ;;  %v5874_v14 = vsub.f32 1.0, %v5873_v50  ;;  %vm5878_vm8 = vweird.f32 %v6824_v41  ;;  %v5803_v36 = vsel %vm5801_vm9, %v5802_v38, %v5800_v17 }
 0xb3d   : > { %5974 = vst.msk [vmem:[%s11066_s20 + $0x10] sm:$0xff] %vm4538_vm11, %v5966_v49  ;;  %v5967_v63 = vsel %vm5943_vm7, %v5935_v62, %v10901_v12  ;;  %v5890_v37 = vmul.f32 %v6822_v45, %v5889_v3  ;;  %v5881_v12 = vand.u32 2147483647, %v11107_v24  ;;  %vm5892_vm10 = vweird.f32 %v11102_v59 }
 0xb3e   : > { %5975 = vst.msk [vmem:[%s11066_s20 + $0x18] sm:$0xff] %vm4538_vm11, %v5967_v63  ;;  %v5875_v25 = vmul.f32 %v6824_v41, %v5874_v14  ;;  %6825 = vrcp.f32 %v11147_v54  ;;  %vm5877_vm4 = vweird.f32 %v11107_v24  ;;  %vm5894_vm12 = vmor %vm5892_vm10, %vm5893_vm0  ;;  %v5899_v19 = vor.u32 1.1754944e-38, %v5898_v42 }
 0xb3f   : > { %v5891_v53 = vadd.f32 %v6822_v45, %v5890_v37  ;;  %v5811_v40 = vmax.f32 %v5803_v36, 1e-05  ;;  %vm5879_vm15 = vmor %vm5877_vm4, %vm5878_vm8  ;;  %v5884_v44 = vor.u32 1.1754944e-38, %v5883_v58  ;;  %vm5897_vm13 = vcmp.eq.f32.partialorder %v5896_v32, 8.507059e+37 }
 0xb40   : > { %v5876_v28 = vadd.f32 %v6824_v41, %v5875_v25  ;;  %vm5882_vm1 = vcmp.eq.f32.partialorder %v5881_v12, 8.507059e+37  ;;  %vm5945_vm14 = vcmp.gt.f32.partialorder %v11102_v59, 0.999  ;;  %vm5944_vm6 = vcmp.gt.f32.partialorder %v11107_v24, 0.999 }
 0xb41   : > { %v5895_v5 = vsel %vm5894_vm12, %v6822_v45, %v5891_v53  ;;  %6827 = vrcp.f32 %v5811_v40  ;;  %v5913_v11 = vand.u32 2147483648, %v11147_v54  ;;  %v5911_v59 = vand.u32 2147483647, %v11147_v54 }
 0xb42   : > { %v5880_v10 = vsel %vm5879_vm15, %v6824_v41, %v5876_v28  ;;  %v5900_v15 = vsel %vm5897_vm13, %v5899_v19, %v5895_v5  ;;  %vm5907_vm3 = vweird.f32 %v11147_v54  ;;  %v5926_v51 = vand.u32 2147483647, %v5811_v40 }
 0xb43   : > { %v5885_v60 = vsel %vm5882_vm1, %v5884_v44, %v5880_v10  ;;  %v5901_v61 = vmul.f32 %v5900_v15, %v10951_v29  ;;  %v5914_v24 = vor.u32 1.1754944e-38, %v5913_v11  ;;  %vm5912_vm9 = vcmp.eq.f32.partialorder %v5911_v59, 8.507059e+37 }
 0xb44   : > { %v5886_v43 = vmul.f32 %v5885_v60, %v10960_v35  ;;  %v6826_v34 = vpop.eup %6825  ;;  %vm5922_vm0 = vweird.f32 %v5811_v40  ;;  %vm5927_vm10 = vcmp.eq.f32.partialorder %v5926_v51, 8.507059e+37  ;;  %vm5946_vm4 = vcmp.gt.f32.partialorder %v11147_v54, 0.999 }
 0xb45   : > { %v5937_v13 = vmul.f32 0.999, %v5901_v61  ;;  %v5903_v26 = vmul.f32 %v6826_v34, %v11147_v54  ;;  %vm5908_vm2 = vweird.f32 %v6826_v34  ;;  %vm5947_vm12 = vcmp.gt.f32.partialorder %v5811_v40, 0.999 }
 0xb46   : > { %v5936_v52 = vmul.f32 0.999, %v5886_v43  ;;  %vm5909_vm5 = vmor %vm5907_vm3, %vm5908_vm2 }
 0xb47   : > { %v5969_v18 = vsel %vm5945_vm14, %v5937_v13, %v10951_v29  ;;  %v6828_v47 = vpop.eup %6827  ;;  %v5904_v0 = vsub.f32 1.0, %v5903_v26  ;;  %v5928_v29 = vand.u32 2147483648, %v5811_v40 }
 0xb48   : > { %v5968_v55 = vsel %vm5944_vm6, %v5936_v52, %v10960_v35  ;;  %5977 = vst.msk [vmem:[%s11066_s20 + $0x28] sm:$0xff] %vm4538_vm11, %v5969_v18  ;;  %v5918_v39 = vmul.f32 %v6828_v47, %v5811_v40  ;;  %vm5923_vm7 = vweird.f32 %v6828_v47 }
 0xb49   : > { %5976 = vst.msk [vmem:[%s11066_s20 + $0x20] sm:$0xff] %vm4538_vm11, %v5968_v55  ;;  %v5905_v31 = vmul.f32 %v6826_v34, %v5904_v0  ;;  %vm5924_vm8 = vmor %vm5922_vm0, %vm5923_vm7  ;;  %v5929_v9 = vor.u32 1.1754944e-38, %v5928_v29 }
 0xb4a   : > { %v5919_v7 = vsub.f32 1.0, %v5918_v39 }
 0xb4b   : > { %v5906_v21 = vadd.f32 %v6826_v34, %v5905_v31 }
 0xb4c   : > { %v5920_v35 = vmul.f32 %v6828_v47, %v5919_v7 }
 0xb4d   : > { %v5910_v33 = vsel %vm5909_vm5, %v6826_v34, %v5906_v21 }
 0xb4e   : > { %v5915_v27 = vsel %vm5912_vm9, %v5914_v24, %v5910_v33  ;;  %v5921_v2 = vadd.f32 %v6828_v47, %v5920_v35 }
 0xb4f   : > { %v5916_v20 = vmul.f32 %v5915_v27, %v10974_v8 }
 0xb50   : > { %v5925_v45 = vsel %vm5924_vm8, %v6828_v47, %v5921_v2 }
 0xb51   : > { %v5938_v57 = vmul.f32 0.999, %v5916_v20  ;;  %v5930_v23 = vsel %vm5927_vm10, %v5929_v9, %v5925_v45 }
 0xb52   : > { %v5931_v46 = vmul.f32 %v5930_v23, %v10980_v16 }
 0xb53   : > { %v5970_v22 = vsel %vm5946_vm4, %v5938_v57, %v10974_v8 }
 0xb54   : > { %5978 = vst.msk [vmem:[%s11066_s20 + $0x30] sm:$0xff] %vm4538_vm11, %v5970_v22  ;;  %v5939_v30 = vmul.f32 0.999, %v5931_v46 }
 0xb56   : > { %v5971_v41 = vsel %vm5947_vm12, %v5939_v30, %v10980_v16 }
 0xb57   : > { %5979 = vst.msk [vmem:[%s11066_s20 + $0x38] sm:$0xff] %vm4538_vm11, %v5971_v41 }
 0xb58 PF: > { %s17_s24 = sadd.s32 1, %s6837_s24  }
 0xb59   : > { %p14_p4 = scmp.ge.s32.totalorder %s17_s24, 4  }
 0xb5b   :  { %16 = sbr.rel (!%p14_p4) target bundleno = 1 (0x1), region = 78 }

</bundles_post_ra>
